<compile_context>
chip_gen: v7x
topology: tpu7x:2x2x1
jax: 0.10.0
libtpu: 0.0.40
codegen_flags: <defaults>
</compile_context>

<pallas_src>
import math

import jax
import jax.numpy as jnp
from jax.experimental import pallas as pl
from jax.experimental.pallas import tpu as pltpu

N_GRAPH = 16          # weight.shape[0] in GraphConvolution
N_NODES = 32          # adjacency is (32, 32)
D_IN = 128            # gcn1 in_dim
D_HID = 64            # gcn1 out_dim == gcn2 in_dim
D_OUT = 16            # gcn2 out_dim
FLAT_DIM = N_GRAPH * N_NODES * D_OUT   # 8192
LANE = 128


def _round_up(v, m):
    return (v + m - 1) // m * m


# --------------------------------------------------------------------------- #
# Kernel 1: fused GraphConvolution(128->64) + ReLU + GraphConvolution(64->16)  #
# --------------------------------------------------------------------------- #
def _gcn_stack_kernel(x_ref, adj_ref, w1_ref, b1_ref, w2_ref, b2_ref, o_ref):
    """One batch tile.

    x_ref  : (N_GRAPH, TB*32, 128)  per-g feature slabs, rows ordered (batch, node)
    adj_ref: (TB*32, TB*32)         block-diagonal kron(I_TB, adj)
    w1_ref : (16, 128, 64)   b1_ref: (1, 64)
    w2_ref : (16,  64, 16)   b2_ref: (1, 16)
    o_ref  : (TB*32, 256)           lanes ordered (g, out_feature) -> lane dense
    """
    adjm = adj_ref[...]
    b1 = b1_ref[...]
    b2 = b2_ref[...]
    for g in range(N_GRAPH):
        xg = x_ref[g]                                               # (TB*32, 128)
        s1 = jnp.dot(xg, w1_ref[g], preferred_element_type=jnp.float32)
        h1 = jnp.dot(adjm, s1, preferred_element_type=jnp.float32) + b1
        h1 = jnp.maximum(h1, 0.0)                                   # ReLU (dropout = id)
        s2 = jnp.dot(h1, w2_ref[g], preferred_element_type=jnp.float32)
        h2 = jnp.dot(adjm, s2, preferred_element_type=jnp.float32) + b2
        o_ref[:, g * D_OUT:(g + 1) * D_OUT] = h2.astype(o_ref.dtype)


# --------------------------------------------------------------------------- #
# Kernel 2: fc1 + ReLU + fc2 (class axis padded to 128 lanes)                  #
# --------------------------------------------------------------------------- #
def _mlp_head_kernel(x_ref, w1_ref, b1_ref, w2_ref, b2_ref, o_ref):
    h = jnp.dot(x_ref[...], w1_ref[...], preferred_element_type=jnp.float32) + b1_ref[...]
    h = jnp.maximum(h, 0.0)                                         # ReLU (dropout = id)
    o_ref[...] = (jnp.dot(h, w2_ref[...], preferred_element_type=jnp.float32)
                  + b2_ref[...]).astype(o_ref.dtype)


# --------------------------------------------------------------------------- #
# Wrapper                                                                      #
# --------------------------------------------------------------------------- #
def gcn_forward(x, adj, params, *, batch_tile=4, row_tile=None):
    """x: (B, 16, 128, 32), adj: (32, 32). Returns (B, nclass) logits."""
    B = x.shape[0]
    assert x.shape == (B, N_GRAPH, D_IN, N_NODES), x.shape
    assert adj.shape == (N_NODES, N_NODES), adj.shape

    tb = batch_tile
    b_pad = _round_up(max(B, tb), tb)

    # PyTorch GraphConvolution does `input.reshape(s1, s2, s4, s3)` (a raw reshape,
    # NOT a transpose); replicate it, pad the batch, then lay the data out as
    # (g, batch*node, feat) so each per-g matmul in the kernel is a plain 2-D GEMM.
    xr = x.reshape(B, N_GRAPH, N_NODES, D_IN)
    xr = jnp.pad(xr, ((0, b_pad - B), (0, 0), (0, 0), (0, 0)))
    xr = xr.transpose(1, 0, 2, 3).reshape(N_GRAPH, b_pad * N_NODES, D_IN)

    # Block-diagonal adjacency so the per-batch `adj @ support` is one 2-D matmul
    # over the whole batch tile.
    adj_bd = jnp.kron(jnp.eye(tb, dtype=adj.dtype), adj)            # (tb*32, tb*32)

    w1 = params["gcn1_w"]
    b1 = params["gcn1_b"].reshape(1, D_HID)
    w2 = params["gcn2_w"]
    b2 = params["gcn2_b"].reshape(1, D_OUT)

    rows_blk = tb * N_NODES
    out_cols = N_GRAPH * D_OUT                                      # 256 (lane dense)

    gcn_out = pl.pallas_call(
        _gcn_stack_kernel,
        out_shape=jax.ShapeDtypeStruct((b_pad * N_NODES, out_cols), jnp.float32),
        grid_spec=pltpu.PrefetchScalarGridSpec(
            num_scalar_prefetch=0,
            grid=(b_pad // tb,),
            in_specs=[
                pl.BlockSpec((N_GRAPH, rows_blk, D_IN), lambda i: (0, i, 0)),
                pl.BlockSpec((rows_blk, rows_blk), lambda i: (0, 0)),
                pl.BlockSpec((N_GRAPH, D_IN, D_HID), lambda i: (0, 0, 0)),
                pl.BlockSpec((1, D_HID), lambda i: (0, 0)),
                pl.BlockSpec((N_GRAPH, D_HID, D_OUT), lambda i: (0, 0, 0)),
                pl.BlockSpec((1, D_OUT), lambda i: (0, 0)),
            ],
            out_specs=pl.BlockSpec((rows_blk, out_cols), lambda i: (i, 0)),
        ),
        compiler_params=pltpu.CompilerParams(
            dimension_semantics=("parallel",)),
    )(xr, adj_bd, w1, b1, w2, b2)

    # (b_pad*32, 256) -> PyTorch flatten order (b, g, n, o).  Pure layout plumbing
    # on a tiny tensor, done in the wrapper (XLA).
    flat = (gcn_out.reshape(b_pad, N_NODES, N_GRAPH, D_OUT)
            .transpose(0, 2, 1, 3)[:B].reshape(B, FLAT_DIM))

    dense = params["fc1_w"].shape[0]
    nclass = params["fc2_w"].shape[0]

    tm = row_tile or min(128, _round_up(B, 8))
    m_pad = _round_up(max(B, tm), tm)
    flat_p = jnp.pad(flat, ((0, m_pad - B), (0, 0)))

    wf1 = params["fc1_w"].T                                         # (8192, dense)
    bf1 = params["fc1_b"].reshape(1, dense)
    # Pad the class axis to a full 128-lane width (zero columns) so the output
    # store is lane dense; no softmax follows, so zero padding is safe and the
    # extra columns are sliced off below.
    wf2 = jnp.pad(params["fc2_w"].T, ((0, 0), (0, LANE - nclass)))
    bf2 = jnp.pad(params["fc2_b"].reshape(1, nclass), ((0, 0), (0, LANE - nclass)))

    logits = pl.pallas_call(
        _mlp_head_kernel,
        out_shape=jax.ShapeDtypeStruct((m_pad, LANE), jnp.float32),
        grid_spec=pltpu.PrefetchScalarGridSpec(
            num_scalar_prefetch=0,
            grid=(m_pad // tm,),
            in_specs=[
                pl.BlockSpec((tm, FLAT_DIM), lambda i: (i, 0)),
                pl.BlockSpec((FLAT_DIM, dense), lambda i: (0, 0)),
                pl.BlockSpec((1, dense), lambda i: (0, 0)),
                pl.BlockSpec((dense, LANE), lambda i: (0, 0)),
                pl.BlockSpec((1, LANE), lambda i: (0, 0)),
            ],
            out_specs=pl.BlockSpec((tm, LANE), lambda i: (i, 0)),
        ),
        compiler_params=pltpu.CompilerParams(
            dimension_semantics=("parallel",)),
    )(flat_p, wf1, bf1, wf2, bf2)

    return logits[:B, :nclass]


# --------------------------------------------------------------------------- #
# Parameters & pure-JAX reference (mirrors the PyTorch module)                 #
# --------------------------------------------------------------------------- #
def init_params(key, dense_size=64, nclass=3):
    ks = jax.random.split(key, 8)
    u = lambda k, shp, s: jax.random.uniform(k, shp, minval=-s, maxval=s,
                                             dtype=jnp.float32)
    s1 = 1.0 / math.sqrt(D_IN)
    s2 = 1.0 / math.sqrt(D_HID)
    sf1 = 1.0 / math.sqrt(FLAT_DIM)
    sf2 = 1.0 / math.sqrt(dense_size)
    return {
        "gcn1_w": u(ks[0], (N_GRAPH, D_IN, D_HID), s1),
        "gcn1_b": u(ks[1], (D_HID,), s1),
        "gcn2_w": u(ks[2], (N_GRAPH, D_HID, D_OUT), s2),
        "gcn2_b": u(ks[3], (D_OUT,), s2),
        "fc1_w": u(ks[4], (dense_size, FLAT_DIM), sf1),
        "fc1_b": u(ks[5], (dense_size,), sf1),
        "fc2_w": u(ks[6], (nclass, dense_size), sf2),
        "fc2_b": u(ks[7], (nclass,), sf2),
    }


def _mm(a, b):
    return jnp.matmul(a, b, precision=jax.lax.Precision.HIGHEST)


def _graph_conv_ref(inp, adj, weight, bias):
    s1, s2, s3, s4 = inp.shape
    new_inp = inp.reshape(s1, s2, s4, s3)          # raw reshape, like torch
    support = _mm(new_inp, weight)                 # (B,16,n,out), weight (16,in,out)
    out = _mm(adj, support) + bias                 # adj broadcast over (B,16)
    a1, a2, a3, a4 = out.shape
    return out.reshape(a1, a2, a4, a3)


def gcn_reference(x, adj, params):
    h = jax.nn.relu(_graph_conv_ref(x, adj, params["gcn1_w"], params["gcn1_b"]))
    h = _graph_conv_ref(h, adj, params["gcn2_w"], params["gcn2_b"])
    flat = h.reshape(h.shape[0], -1)
    f = jax.nn.relu(_mm(flat, params["fc1_w"].T) + params["fc1_b"])
    return _mm(f, params["fc2_w"].T) + params["fc2_b"]


if __name__ == "__main__":
    # Shapes implied by the module: adj 32x32, gcn1 in_dim 128, 16 weight slices,
    # so x is (B, 16, 128, 32).  Small demo: B=6, dense_size=64, nclass=3.
    B, DENSE, NCLASS = 6, 64, 3

    key = jax.random.PRNGKey(0)
    kx, kadj, kp = jax.random.split(key, 3)

    x = jax.random.normal(kx, (B, N_GRAPH, D_IN, N_NODES), dtype=jnp.float32)
    adj = jax.random.normal(kadj, (N_NODES, N_NODES), dtype=jnp.float32)
    params = init_params(kp, DENSE, NCLASS)

    out = jax.block_until_ready(gcn_forward(x, adj, params))
    ref = jax.block_until_ready(gcn_reference(x, adj, params))

    assert out.shape == ref.shape == (B, NCLASS), (out.shape, ref.shape)
    max_diff = float(jnp.max(jnp.abs(out - ref)))
    assert jnp.allclose(out, ref, atol=2e-2, rtol=2e-2), f"mismatch, max diff {max_diff}"

    print("KERNEL_OK")
</pallas_src>

<mosaic_0001>
module attributes {stable_mosaic.version = 11 : i64} {
  func.func @_gcn_stack_kernel(%arg0: i32, %arg1: memref<16x128x128xf32, #tpu.memory_space<vmem>>, %arg2: memref<128x128xf32, #tpu.memory_space<vmem>>, %arg3: memref<16x128x64xf32, #tpu.memory_space<vmem>>, %arg4: memref<1x64xf32, #tpu.memory_space<vmem>>, %arg5: memref<16x64x16xf32, #tpu.memory_space<vmem>>, %arg6: memref<1x16xf32, #tpu.memory_space<vmem>>, %arg7: memref<128x256xf32, #tpu.memory_space<vmem>>) attributes {dimension_semantics = [#tpu.dimension_semantics<parallel>], iteration_bounds = array<i64: 2>, scalar_prefetch = 0 : i64, scratch_operands = 0 : i64, tpu.core_type = #tpu.core_type<tc>, window_params = [{transform_indices = @transform_0, window_bounds = array<i64: 16, 128, 128>}, {pipeline_mode = #tpu.pipeline_mode<synchronous>, transform_indices = @transform_1, window_bounds = array<i64: 128, 128>}, {pipeline_mode = #tpu.pipeline_mode<synchronous>, transform_indices = @transform_2, window_bounds = array<i64: 16, 128, 64>}, {pipeline_mode = #tpu.pipeline_mode<synchronous>, transform_indices = @transform_3, window_bounds = array<i64: 1, 64>}, {pipeline_mode = #tpu.pipeline_mode<synchronous>, transform_indices = @transform_4, window_bounds = array<i64: 16, 64, 16>}, {pipeline_mode = #tpu.pipeline_mode<synchronous>, transform_indices = @transform_5, window_bounds = array<i64: 1, 16>}, {transform_indices = @transform_6, window_bounds = array<i64: 128, 256>}]} {
    %c0 = arith.constant 0 : index
    %c0_0 = arith.constant 0 : index
    %0 = vector.load %arg2[%c0, %c0_0] : memref<128x128xf32, #tpu.memory_space<vmem>>, vector<128x128xf32>
    %c0_1 = arith.constant 0 : index
    %c0_2 = arith.constant 0 : index
    %1 = vector.load %arg4[%c0_1, %c0_2] : memref<1x64xf32, #tpu.memory_space<vmem>>, vector<1x64xf32>
    %c0_3 = arith.constant 0 : index
    %c0_4 = arith.constant 0 : index
    %2 = vector.load %arg6[%c0_3, %c0_4] : memref<1x16xf32, #tpu.memory_space<vmem>>, vector<1x16xf32>
    %c0_5 = arith.constant 0 : index
    %c0_6 = arith.constant 0 : index
    %c0_7 = arith.constant 0 : index
    %3 = vector.load %arg1[%c0_5, %c0_6, %c0_7] : memref<16x128x128xf32, #tpu.memory_space<vmem>>, vector<1x128x128xf32>
    %4 = vector.shape_cast %3 : vector<1x128x128xf32> to vector<128x128xf32>
    %c0_8 = arith.constant 0 : index
    %c0_9 = arith.constant 0 : index
    %c0_10 = arith.constant 0 : index
    %5 = vector.load %arg3[%c0_8, %c0_9, %c0_10] : memref<16x128x64xf32, #tpu.memory_space<vmem>>, vector<1x128x64xf32>
    %6 = vector.shape_cast %5 : vector<1x128x64xf32> to vector<128x64xf32>
    %cst = arith.constant dense<0.000000e+00> : vector<128x64xf32>
    %7 = tpu.matmul %4, %6, %cst {dimension_numbers = #tpu.dot_dimension_numbers<[1], [0], [0], [1], [0, 0, 1, 1], [], []>} : vector<128x128xf32>, vector<128x64xf32>, vector<128x64xf32> -> vector<128x64xf32>
    %cst_11 = arith.constant dense<0.000000e+00> : vector<128x64xf32>
    %8 = tpu.matmul %0, %7, %cst_11 {dimension_numbers = #tpu.dot_dimension_numbers<[1], [0], [0], [1], [0, 0, 1, 1], [], []>} : vector<128x128xf32>, vector<128x64xf32>, vector<128x64xf32> -> vector<128x64xf32>
    %9 = vector.broadcast %1 : vector<1x64xf32> to vector<128x64xf32>
    %10 = arith.addf %8, %9 : vector<128x64xf32>
    %cst_12 = arith.constant 0.000000e+00 : f32
    %11 = vector.broadcast %cst_12 : f32 to vector<128x64xf32>
    %12 = arith.maximumf %10, %11 : vector<128x64xf32>
    %c0_13 = arith.constant 0 : index
    %c0_14 = arith.constant 0 : index
    %c0_15 = arith.constant 0 : index
    %13 = vector.load %arg5[%c0_13, %c0_14, %c0_15] : memref<16x64x16xf32, #tpu.memory_space<vmem>>, vector<1x64x16xf32>
    %14 = vector.shape_cast %13 : vector<1x64x16xf32> to vector<64x16xf32>
    %cst_16 = arith.constant dense<0.000000e+00> : vector<128x16xf32>
    %15 = tpu.matmul %12, %14, %cst_16 {dimension_numbers = #tpu.dot_dimension_numbers<[1], [0], [0], [1], [0, 0, 1, 1], [], []>} : vector<128x64xf32>, vector<64x16xf32>, vector<128x16xf32> -> vector<128x16xf32>
    %cst_17 = arith.constant dense<0.000000e+00> : vector<128x16xf32>
    %16 = tpu.matmul %0, %15, %cst_17 {dimension_numbers = #tpu.dot_dimension_numbers<[1], [0], [0], [1], [0, 0, 1, 1], [], []>} : vector<128x128xf32>, vector<128x16xf32>, vector<128x16xf32> -> vector<128x16xf32>
    %17 = vector.broadcast %2 : vector<1x16xf32> to vector<128x16xf32>
    %18 = arith.addf %16, %17 : vector<128x16xf32>
    %c0_18 = arith.constant 0 : index
    %c0_19 = arith.constant 0 : index
    %19 = vector.load %arg7[%c0_18, %c0_19] : memref<128x256xf32, #tpu.memory_space<vmem>>, vector<128x16xf32>
    tpu.vector_store %arg7[%c0_18, %c0_19], %18 {strides = array<i32>} : memref<128x256xf32, #tpu.memory_space<vmem>>, vector<128x16xf32>,
    %c1 = arith.constant 1 : index
    %c0_20 = arith.constant 0 : index
    %c0_21 = arith.constant 0 : index
    %20 = vector.load %arg1[%c1, %c0_20, %c0_21] : memref<16x128x128xf32, #tpu.memory_space<vmem>>, vector<1x128x128xf32>
    %21 = vector.shape_cast %20 : vector<1x128x128xf32> to vector<128x128xf32>
    %c1_22 = arith.constant 1 : index
    %c0_23 = arith.constant 0 : index
    %c0_24 = arith.constant 0 : index
    %22 = vector.load %arg3[%c1_22, %c0_23, %c0_24] : memref<16x128x64xf32, #tpu.memory_space<vmem>>, vector<1x128x64xf32>
    %23 = vector.shape_cast %22 : vector<1x128x64xf32> to vector<128x64xf32>
    %cst_25 = arith.constant dense<0.000000e+00> : vector<128x64xf32>
    %24 = tpu.matmul %21, %23, %cst_25 {dimension_numbers = #tpu.dot_dimension_numbers<[1], [0], [0], [1], [0, 0, 1, 1], [], []>} : vector<128x128xf32>, vector<128x64xf32>, vector<128x64xf32> -> vector<128x64xf32>
    %cst_26 = arith.constant dense<0.000000e+00> : vector<128x64xf32>
    %25 = tpu.matmul %0, %24, %cst_26 {dimension_numbers = #tpu.dot_dimension_numbers<[1], [0], [0], [1], [0, 0, 1, 1], [], []>} : vector<128x128xf32>, vector<128x64xf32>, vector<128x64xf32> -> vector<128x64xf32>
    %26 = vector.broadcast %1 : vector<1x64xf32> to vector<128x64xf32>
    %27 = arith.addf %25, %26 : vector<128x64xf32>
    %cst_27 = arith.constant 0.000000e+00 : f32
    %28 = vector.broadcast %cst_27 : f32 to vector<128x64xf32>
    %29 = arith.maximumf %27, %28 : vector<128x64xf32>
    %c1_28 = arith.constant 1 : index
    %c0_29 = arith.constant 0 : index
    %c0_30 = arith.constant 0 : index
    %30 = vector.load %arg5[%c1_28, %c0_29, %c0_30] : memref<16x64x16xf32, #tpu.memory_space<vmem>>, vector<1x64x16xf32>
    %31 = vector.shape_cast %30 : vector<1x64x16xf32> to vector<64x16xf32>
    %cst_31 = arith.constant dense<0.000000e+00> : vector<128x16xf32>
    %32 = tpu.matmul %29, %31, %cst_31 {dimension_numbers = #tpu.dot_dimension_numbers<[1], [0], [0], [1], [0, 0, 1, 1], [], []>} : vector<128x64xf32>, vector<64x16xf32>, vector<128x16xf32> -> vector<128x16xf32>
    %cst_32 = arith.constant dense<0.000000e+00> : vector<128x16xf32>
    %33 = tpu.matmul %0, %32, %cst_32 {dimension_numbers = #tpu.dot_dimension_numbers<[1], [0], [0], [1], [0, 0, 1, 1], [], []>} : vector<128x128xf32>, vector<128x16xf32>, vector<128x16xf32> -> vector<128x16xf32>
    %34 = vector.broadcast %2 : vector<1x16xf32> to vector<128x16xf32>
    %35 = arith.addf %33, %34 : vector<128x16xf32>
    %c0_33 = arith.constant 0 : index
    %c16 = arith.constant 16 : index
    %36 = vector.load %arg7[%c0_33, %c16] : memref<128x256xf32, #tpu.memory_space<vmem>>, vector<128x16xf32>
    tpu.vector_store %arg7[%c0_33, %c16], %35 {strides = array<i32>} : memref<128x256xf32, #tpu.memory_space<vmem>>, vector<128x16xf32>,
    %c2 = arith.constant 2 : index
    %c0_34 = arith.constant 0 : index
    %c0_35 = arith.constant 0 : index
    %37 = vector.load %arg1[%c2, %c0_34, %c0_35] : memref<16x128x128xf32, #tpu.memory_space<vmem>>, vector<1x128x128xf32>
    %38 = vector.shape_cast %37 : vector<1x128x128xf32> to vector<128x128xf32>
    %c2_36 = arith.constant 2 : index
    %c0_37 = arith.constant 0 : index
    %c0_38 = arith.constant 0 : index
    %39 = vector.load %arg3[%c2_36, %c0_37, %c0_38] : memref<16x128x64xf32, #tpu.memory_space<vmem>>, vector<1x128x64xf32>
    %40 = vector.shape_cast %39 : vector<1x128x64xf32> to vector<128x64xf32>
    %cst_39 = arith.constant dense<0.000000e+00> : vector<128x64xf32>
    %41 = tpu.matmul %38, %40, %cst_39 {dimension_numbers = #tpu.dot_dimension_numbers<[1], [0], [0], [1], [0, 0, 1, 1], [], []>} : vector<128x128xf32>, vector<128x64xf32>, vector<128x64xf32> -> vector<128x64xf32>
    %cst_40 = arith.constant dense<0.000000e+00> : vector<128x64xf32>
    %42 = tpu.matmul %0, %41, %cst_40 {dimension_numbers = #tpu.dot_dimension_numbers<[1], [0], [0], [1], [0, 0, 1, 1], [], []>} : vector<128x128xf32>, vector<128x64xf32>, vector<128x64xf32> -> vector<128x64xf32>
    %43 = vector.broadcast %1 : vector<1x64xf32> to vector<128x64xf32>
    %44 = arith.addf %42, %43 : vector<128x64xf32>
    %cst_41 = arith.constant 0.000000e+00 : f32
    %45 = vector.broadcast %cst_41 : f32 to vector<128x64xf32>
    %46 = arith.maximumf %44, %45 : vector<128x64xf32>
    %c2_42 = arith.constant 2 : index
    %c0_43 = arith.constant 0 : index
    %c0_44 = arith.constant 0 : index
    %47 = vector.load %arg5[%c2_42, %c0_43, %c0_44] : memref<16x64x16xf32, #tpu.memory_space<vmem>>, vector<1x64x16xf32>
    %48 = vector.shape_cast %47 : vector<1x64x16xf32> to vector<64x16xf32>
    %cst_45 = arith.constant dense<0.000000e+00> : vector<128x16xf32>
    %49 = tpu.matmul %46, %48, %cst_45 {dimension_numbers = #tpu.dot_dimension_numbers<[1], [0], [0], [1], [0, 0, 1, 1], [], []>} : vector<128x64xf32>, vector<64x16xf32>, vector<128x16xf32> -> vector<128x16xf32>
    %cst_46 = arith.constant dense<0.000000e+00> : vector<128x16xf32>
    %50 = tpu.matmul %0, %49, %cst_46 {dimension_numbers = #tpu.dot_dimension_numbers<[1], [0], [0], [1], [0, 0, 1, 1], [], []>} : vector<128x128xf32>, vector<128x16xf32>, vector<128x16xf32> -> vector<128x16xf32>
    %51 = vector.broadcast %2 : vector<1x16xf32> to vector<128x16xf32>
    %52 = arith.addf %50, %51 : vector<128x16xf32>
    %c0_47 = arith.constant 0 : index
    %c32 = arith.constant 32 : index
    %53 = vector.load %arg7[%c0_47, %c32] : memref<128x256xf32, #tpu.memory_space<vmem>>, vector<128x16xf32>
    tpu.vector_store %arg7[%c0_47, %c32], %52 {strides = array<i32>} : memref<128x256xf32, #tpu.memory_space<vmem>>, vector<128x16xf32>,
    %c3 = arith.constant 3 : index
    %c0_48 = arith.constant 0 : index
    %c0_49 = arith.constant 0 : index
    %54 = vector.load %arg1[%c3, %c0_48, %c0_49] : memref<16x128x128xf32, #tpu.memory_space<vmem>>, vector<1x128x128xf32>
    %55 = vector.shape_cast %54 : vector<1x128x128xf32> to vector<128x128xf32>
    %c3_50 = arith.constant 3 : index
    %c0_51 = arith.constant 0 : index
    %c0_52 = arith.constant 0 : index
    %56 = vector.load %arg3[%c3_50, %c0_51, %c0_52] : memref<16x128x64xf32, #tpu.memory_space<vmem>>, vector<1x128x64xf32>
    %57 = vector.shape_cast %56 : vector<1x128x64xf32> to vector<128x64xf32>
    %cst_53 = arith.constant dense<0.000000e+00> : vector<128x64xf32>
    %58 = tpu.matmul %55, %57, %cst_53 {dimension_numbers = #tpu.dot_dimension_numbers<[1], [0], [0], [1], [0, 0, 1, 1], [], []>} : vector<128x128xf32>, vector<128x64xf32>, vector<128x64xf32> -> vector<128x64xf32>
    %cst_54 = arith.constant dense<0.000000e+00> : vector<128x64xf32>
    %59 = tpu.matmul %0, %58, %cst_54 {dimension_numbers = #tpu.dot_dimension_numbers<[1], [0], [0], [1], [0, 0, 1, 1], [], []>} : vector<128x128xf32>, vector<128x64xf32>, vector<128x64xf32> -> vector<128x64xf32>
    %60 = vector.broadcast %1 : vector<1x64xf32> to vector<128x64xf32>
    %61 = arith.addf %59, %60 : vector<128x64xf32>
    %cst_55 = arith.constant 0.000000e+00 : f32
    %62 = vector.broadcast %cst_55 : f32 to vector<128x64xf32>
    %63 = arith.maximumf %61, %62 : vector<128x64xf32>
    %c3_56 = arith.constant 3 : index
    %c0_57 = arith.constant 0 : index
    %c0_58 = arith.constant 0 : index
    %64 = vector.load %arg5[%c3_56, %c0_57, %c0_58] : memref<16x64x16xf32, #tpu.memory_space<vmem>>, vector<1x64x16xf32>
    %65 = vector.shape_cast %64 : vector<1x64x16xf32> to vector<64x16xf32>
    %cst_59 = arith.constant dense<0.000000e+00> : vector<128x16xf32>
    %66 = tpu.matmul %63, %65, %cst_59 {dimension_numbers = #tpu.dot_dimension_numbers<[1], [0], [0], [1], [0, 0, 1, 1], [], []>} : vector<128x64xf32>, vector<64x16xf32>, vector<128x16xf32> -> vector<128x16xf32>
    %cst_60 = arith.constant dense<0.000000e+00> : vector<128x16xf32>
    %67 = tpu.matmul %0, %66, %cst_60 {dimension_numbers = #tpu.dot_dimension_numbers<[1], [0], [0], [1], [0, 0, 1, 1], [], []>} : vector<128x128xf32>, vector<128x16xf32>, vector<128x16xf32> -> vector<128x16xf32>
    %68 = vector.broadcast %2 : vector<1x16xf32> to vector<128x16xf32>
    %69 = arith.addf %67, %68 : vector<128x16xf32>
    %c0_61 = arith.constant 0 : index
    %c48 = arith.constant 48 : index
    %70 = vector.load %arg7[%c0_61, %c48] : memref<128x256xf32, #tpu.memory_space<vmem>>, vector<128x16xf32>
    tpu.vector_store %arg7[%c0_61, %c48], %69 {strides = array<i32>} : memref<128x256xf32, #tpu.memory_space<vmem>>, vector<128x16xf32>,
    %c4 = arith.constant 4 : index
    %c0_62 = arith.constant 0 : index
    %c0_63 = arith.constant 0 : index
    %71 = vector.load %arg1[%c4, %c0_62, %c0_63] : memref<16x128x128xf32, #tpu.memory_space<vmem>>, vector<1x128x128xf32>
    %72 = vector.shape_cast %71 : vector<1x128x128xf32> to vector<128x128xf32>
    %c4_64 = arith.constant 4 : index
    %c0_65 = arith.constant 0 : index
    %c0_66 = arith.constant 0 : index
    %73 = vector.load %arg3[%c4_64, %c0_65, %c0_66] : memref<16x128x64xf32, #tpu.memory_space<vmem>>, vector<1x128x64xf32>
    %74 = vector.shape_cast %73 : vector<1x128x64xf32> to vector<128x64xf32>
    %cst_67 = arith.constant dense<0.000000e+00> : vector<128x64xf32>
    %75 = tpu.matmul %72, %74, %cst_67 {dimension_numbers = #tpu.dot_dimension_numbers<[1], [0], [0], [1], [0, 0, 1, 1], [], []>} : vector<128x128xf32>, vector<128x64xf32>, vector<128x64xf32> -> vector<128x64xf32>
    %cst_68 = arith.constant dense<0.000000e+00> : vector<128x64xf32>
    %76 = tpu.matmul %0, %75, %cst_68 {dimension_numbers = #tpu.dot_dimension_numbers<[1], [0], [0], [1], [0, 0, 1, 1], [], []>} : vector<128x128xf32>, vector<128x64xf32>, vector<128x64xf32> -> vector<128x64xf32>
    %77 = vector.broadcast %1 : vector<1x64xf32> to vector<128x64xf32>
    %78 = arith.addf %76, %77 : vector<128x64xf32>
    %cst_69 = arith.constant 0.000000e+00 : f32
    %79 = vector.broadcast %cst_69 : f32 to vector<128x64xf32>
    %80 = arith.maximumf %78, %79 : vector<128x64xf32>
    %c4_70 = arith.constant 4 : index
    %c0_71 = arith.constant 0 : index
    %c0_72 = arith.constant 0 : index
    %81 = vector.load %arg5[%c4_70, %c0_71, %c0_72] : memref<16x64x16xf32, #tpu.memory_space<vmem>>, vector<1x64x16xf32>
    %82 = vector.shape_cast %81 : vector<1x64x16xf32> to vector<64x16xf32>
    %cst_73 = arith.constant dense<0.000000e+00> : vector<128x16xf32>
    %83 = tpu.matmul %80, %82, %cst_73 {dimension_numbers = #tpu.dot_dimension_numbers<[1], [0], [0], [1], [0, 0, 1, 1], [], []>} : vector<128x64xf32>, vector<64x16xf32>, vector<128x16xf32> -> vector<128x16xf32>
    %cst_74 = arith.constant dense<0.000000e+00> : vector<128x16xf32>
    %84 = tpu.matmul %0, %83, %cst_74 {dimension_numbers = #tpu.dot_dimension_numbers<[1], [0], [0], [1], [0, 0, 1, 1], [], []>} : vector<128x128xf32>, vector<128x16xf32>, vector<128x16xf32> -> vector<128x16xf32>
    %85 = vector.broadcast %2 : vector<1x16xf32> to vector<128x16xf32>
    %86 = arith.addf %84, %85 : vector<128x16xf32>
    %c0_75 = arith.constant 0 : index
    %c64 = arith.constant 64 : index
    %87 = vector.load %arg7[%c0_75, %c64] : memref<128x256xf32, #tpu.memory_space<vmem>>, vector<128x16xf32>
    tpu.vector_store %arg7[%c0_75, %c64], %86 {strides = array<i32>} : memref<128x256xf32, #tpu.memory_space<vmem>>, vector<128x16xf32>,
    %c5 = arith.constant 5 : index
    %c0_76 = arith.constant 0 : index
    %c0_77 = arith.constant 0 : index
    %88 = vector.load %arg1[%c5, %c0_76, %c0_77] : memref<16x128x128xf32, #tpu.memory_space<vmem>>, vector<1x128x128xf32>
    %89 = vector.shape_cast %88 : vector<1x128x128xf32> to vector<128x128xf32>
    %c5_78 = arith.constant 5 : index
    %c0_79 = arith.constant 0 : index
    %c0_80 = arith.constant 0 : index
    %90 = vector.load %arg3[%c5_78, %c0_79, %c0_80] : memref<16x128x64xf32, #tpu.memory_space<vmem>>, vector<1x128x64xf32>
    %91 = vector.shape_cast %90 : vector<1x128x64xf32> to vector<128x64xf32>
    %cst_81 = arith.constant dense<0.000000e+00> : vector<128x64xf32>
    %92 = tpu.matmul %89, %91, %cst_81 {dimension_numbers = #tpu.dot_dimension_numbers<[1], [0], [0], [1], [0, 0, 1, 1], [], []>} : vector<128x128xf32>, vector<128x64xf32>, vector<128x64xf32> -> vector<128x64xf32>
    %cst_82 = arith.constant dense<0.000000e+00> : vector<128x64xf32>
    %93 = tpu.matmul %0, %92, %cst_82 {dimension_numbers = #tpu.dot_dimension_numbers<[1], [0], [0], [1], [0, 0, 1, 1], [], []>} : vector<128x128xf32>, vector<128x64xf32>, vector<128x64xf32> -> vector<128x64xf32>
    %94 = vector.broadcast %1 : vector<1x64xf32> to vector<128x64xf32>
    %95 = arith.addf %93, %94 : vector<128x64xf32>
    %cst_83 = arith.constant 0.000000e+00 : f32
    %96 = vector.broadcast %cst_83 : f32 to vector<128x64xf32>
    %97 = arith.maximumf %95, %96 : vector<128x64xf32>
    %c5_84 = arith.constant 5 : index
    %c0_85 = arith.constant 0 : index
    %c0_86 = arith.constant 0 : index
    %98 = vector.load %arg5[%c5_84, %c0_85, %c0_86] : memref<16x64x16xf32, #tpu.memory_space<vmem>>, vector<1x64x16xf32>
    %99 = vector.shape_cast %98 : vector<1x64x16xf32> to vector<64x16xf32>
    %cst_87 = arith.constant dense<0.000000e+00> : vector<128x16xf32>
    %100 = tpu.matmul %97, %99, %cst_87 {dimension_numbers = #tpu.dot_dimension_numbers<[1], [0], [0], [1], [0, 0, 1, 1], [], []>} : vector<128x64xf32>, vector<64x16xf32>, vector<128x16xf32> -> vector<128x16xf32>
    %cst_88 = arith.constant dense<0.000000e+00> : vector<128x16xf32>
    %101 = tpu.matmul %0, %100, %cst_88 {dimension_numbers = #tpu.dot_dimension_numbers<[1], [0], [0], [1], [0, 0, 1, 1], [], []>} : vector<128x128xf32>, vector<128x16xf32>, vector<128x16xf32> -> vector<128x16xf32>
    %102 = vector.broadcast %2 : vector<1x16xf32> to vector<128x16xf32>
    %103 = arith.addf %101, %102 : vector<128x16xf32>
    %c0_89 = arith.constant 0 : index
    %c80 = arith.constant 80 : index
    %104 = vector.load %arg7[%c0_89, %c80] : memref<128x256xf32, #tpu.memory_space<vmem>>, vector<128x16xf32>
    tpu.vector_store %arg7[%c0_89, %c80], %103 {strides = array<i32>} : memref<128x256xf32, #tpu.memory_space<vmem>>, vector<128x16xf32>,
    %c6 = arith.constant 6 : index
    %c0_90 = arith.constant 0 : index
    %c0_91 = arith.constant 0 : index
    %105 = vector.load %arg1[%c6, %c0_90, %c0_91] : memref<16x128x128xf32, #tpu.memory_space<vmem>>, vector<1x128x128xf32>
    %106 = vector.shape_cast %105 : vector<1x128x128xf32> to vector<128x128xf32>
    %c6_92 = arith.constant 6 : index
    %c0_93 = arith.constant 0 : index
    %c0_94 = arith.constant 0 : index
    %107 = vector.load %arg3[%c6_92, %c0_93, %c0_94] : memref<16x128x64xf32, #tpu.memory_space<vmem>>, vector<1x128x64xf32>
    %108 = vector.shape_cast %107 : vector<1x128x64xf32> to vector<128x64xf32>
    %cst_95 = arith.constant dense<0.000000e+00> : vector<128x64xf32>
    %109 = tpu.matmul %106, %108, %cst_95 {dimension_numbers = #tpu.dot_dimension_numbers<[1], [0], [0], [1], [0, 0, 1, 1], [], []>} : vector<128x128xf32>, vector<128x64xf32>, vector<128x64xf32> -> vector<128x64xf32>
    %cst_96 = arith.constant dense<0.000000e+00> : vector<128x64xf32>
    %110 = tpu.matmul %0, %109, %cst_96 {dimension_numbers = #tpu.dot_dimension_numbers<[1], [0], [0], [1], [0, 0, 1, 1], [], []>} : vector<128x128xf32>, vector<128x64xf32>, vector<128x64xf32> -> vector<128x64xf32>
    %111 = vector.broadcast %1 : vector<1x64xf32> to vector<128x64xf32>
    %112 = arith.addf %110, %111 : vector<128x64xf32>
    %cst_97 = arith.constant 0.000000e+00 : f32
    %113 = vector.broadcast %cst_97 : f32 to vector<128x64xf32>
    %114 = arith.maximumf %112, %113 : vector<128x64xf32>
    %c6_98 = arith.constant 6 : index
    %c0_99 = arith.constant 0 : index
    %c0_100 = arith.constant 0 : index
    %115 = vector.load %arg5[%c6_98, %c0_99, %c0_100] : memref<16x64x16xf32, #tpu.memory_space<vmem>>, vector<1x64x16xf32>
    %116 = vector.shape_cast %115 : vector<1x64x16xf32> to vector<64x16xf32>
    %cst_101 = arith.constant dense<0.000000e+00> : vector<128x16xf32>
    %117 = tpu.matmul %114, %116, %cst_101 {dimension_numbers = #tpu.dot_dimension_numbers<[1], [0], [0], [1], [0, 0, 1, 1], [], []>} : vector<128x64xf32>, vector<64x16xf32>, vector<128x16xf32> -> vector<128x16xf32>
    %cst_102 = arith.constant dense<0.000000e+00> : vector<128x16xf32>
    %118 = tpu.matmul %0, %117, %cst_102 {dimension_numbers = #tpu.dot_dimension_numbers<[1], [0], [0], [1], [0, 0, 1, 1], [], []>} : vector<128x128xf32>, vector<128x16xf32>, vector<128x16xf32> -> vector<128x16xf32>
    %119 = vector.broadcast %2 : vector<1x16xf32> to vector<128x16xf32>
    %120 = arith.addf %118, %119 : vector<128x16xf32>
    %c0_103 = arith.constant 0 : index
    %c96 = arith.constant 96 : index
    %121 = vector.load %arg7[%c0_103, %c96] : memref<128x256xf32, #tpu.memory_space<vmem>>, vector<128x16xf32>
    tpu.vector_store %arg7[%c0_103, %c96], %120 {strides = array<i32>} : memref<128x256xf32, #tpu.memory_space<vmem>>, vector<128x16xf32>,
    %c7 = arith.constant 7 : index
    %c0_104 = arith.constant 0 : index
    %c0_105 = arith.constant 0 : index
    %122 = vector.load %arg1[%c7, %c0_104, %c0_105] : memref<16x128x128xf32, #tpu.memory_space<vmem>>, vector<1x128x128xf32>
    %123 = vector.shape_cast %122 : vector<1x128x128xf32> to vector<128x128xf32>
    %c7_106 = arith.constant 7 : index
    %c0_107 = arith.constant 0 : index
    %c0_108 = arith.constant 0 : index
    %124 = vector.load %arg3[%c7_106, %c0_107, %c0_108] : memref<16x128x64xf32, #tpu.memory_space<vmem>>, vector<1x128x64xf32>
    %125 = vector.shape_cast %124 : vector<1x128x64xf32> to vector<128x64xf32>
    %cst_109 = arith.constant dense<0.000000e+00> : vector<128x64xf32>
    %126 = tpu.matmul %123, %125, %cst_109 {dimension_numbers = #tpu.dot_dimension_numbers<[1], [0], [0], [1], [0, 0, 1, 1], [], []>} : vector<128x128xf32>, vector<128x64xf32>, vector<128x64xf32> -> vector<128x64xf32>
    %cst_110 = arith.constant dense<0.000000e+00> : vector<128x64xf32>
    %127 = tpu.matmul %0, %126, %cst_110 {dimension_numbers = #tpu.dot_dimension_numbers<[1], [0], [0], [1], [0, 0, 1, 1], [], []>} : vector<128x128xf32>, vector<128x64xf32>, vector<128x64xf32> -> vector<128x64xf32>
    %128 = vector.broadcast %1 : vector<1x64xf32> to vector<128x64xf32>
    %129 = arith.addf %127, %128 : vector<128x64xf32>
    %cst_111 = arith.constant 0.000000e+00 : f32
    %130 = vector.broadcast %cst_111 : f32 to vector<128x64xf32>
    %131 = arith.maximumf %129, %130 : vector<128x64xf32>
    %c7_112 = arith.constant 7 : index
    %c0_113 = arith.constant 0 : index
    %c0_114 = arith.constant 0 : index
    %132 = vector.load %arg5[%c7_112, %c0_113, %c0_114] : memref<16x64x16xf32, #tpu.memory_space<vmem>>, vector<1x64x16xf32>
    %133 = vector.shape_cast %132 : vector<1x64x16xf32> to vector<64x16xf32>
    %cst_115 = arith.constant dense<0.000000e+00> : vector<128x16xf32>
    %134 = tpu.matmul %131, %133, %cst_115 {dimension_numbers = #tpu.dot_dimension_numbers<[1], [0], [0], [1], [0, 0, 1, 1], [], []>} : vector<128x64xf32>, vector<64x16xf32>, vector<128x16xf32> -> vector<128x16xf32>
    %cst_116 = arith.constant dense<0.000000e+00> : vector<128x16xf32>
    %135 = tpu.matmul %0, %134, %cst_116 {dimension_numbers = #tpu.dot_dimension_numbers<[1], [0], [0], [1], [0, 0, 1, 1], [], []>} : vector<128x128xf32>, vector<128x16xf32>, vector<128x16xf32> -> vector<128x16xf32>
    %136 = vector.broadcast %2 : vector<1x16xf32> to vector<128x16xf32>
    %137 = arith.addf %135, %136 : vector<128x16xf32>
    %c0_117 = arith.constant 0 : index
    %c112 = arith.constant 112 : index
    %138 = vector.load %arg7[%c0_117, %c112] : memref<128x256xf32, #tpu.memory_space<vmem>>, vector<128x16xf32>
    tpu.vector_store %arg7[%c0_117, %c112], %137 {strides = array<i32>} : memref<128x256xf32, #tpu.memory_space<vmem>>, vector<128x16xf32>,
    %c8 = arith.constant 8 : index
    %c0_118 = arith.constant 0 : index
    %c0_119 = arith.constant 0 : index
    %139 = vector.load %arg1[%c8, %c0_118, %c0_119] : memref<16x128x128xf32, #tpu.memory_space<vmem>>, vector<1x128x128xf32>
    %140 = vector.shape_cast %139 : vector<1x128x128xf32> to vector<128x128xf32>
    %c8_120 = arith.constant 8 : index
    %c0_121 = arith.constant 0 : index
    %c0_122 = arith.constant 0 : index
    %141 = vector.load %arg3[%c8_120, %c0_121, %c0_122] : memref<16x128x64xf32, #tpu.memory_space<vmem>>, vector<1x128x64xf32>
    %142 = vector.shape_cast %141 : vector<1x128x64xf32> to vector<128x64xf32>
    %cst_123 = arith.constant dense<0.000000e+00> : vector<128x64xf32>
    %143 = tpu.matmul %140, %142, %cst_123 {dimension_numbers = #tpu.dot_dimension_numbers<[1], [0], [0], [1], [0, 0, 1, 1], [], []>} : vector<128x128xf32>, vector<128x64xf32>, vector<128x64xf32> -> vector<128x64xf32>
    %cst_124 = arith.constant dense<0.000000e+00> : vector<128x64xf32>
    %144 = tpu.matmul %0, %143, %cst_124 {dimension_numbers = #tpu.dot_dimension_numbers<[1], [0], [0], [1], [0, 0, 1, 1], [], []>} : vector<128x128xf32>, vector<128x64xf32>, vector<128x64xf32> -> vector<128x64xf32>
    %145 = vector.broadcast %1 : vector<1x64xf32> to vector<128x64xf32>
    %146 = arith.addf %144, %145 : vector<128x64xf32>
    %cst_125 = arith.constant 0.000000e+00 : f32
    %147 = vector.broadcast %cst_125 : f32 to vector<128x64xf32>
    %148 = arith.maximumf %146, %147 : vector<128x64xf32>
    %c8_126 = arith.constant 8 : index
    %c0_127 = arith.constant 0 : index
    %c0_128 = arith.constant 0 : index
    %149 = vector.load %arg5[%c8_126, %c0_127, %c0_128] : memref<16x64x16xf32, #tpu.memory_space<vmem>>, vector<1x64x16xf32>
    %150 = vector.shape_cast %149 : vector<1x64x16xf32> to vector<64x16xf32>
    %cst_129 = arith.constant dense<0.000000e+00> : vector<128x16xf32>
    %151 = tpu.matmul %148, %150, %cst_129 {dimension_numbers = #tpu.dot_dimension_numbers<[1], [0], [0], [1], [0, 0, 1, 1], [], []>} : vector<128x64xf32>, vector<64x16xf32>, vector<128x16xf32> -> vector<128x16xf32>
    %cst_130 = arith.constant dense<0.000000e+00> : vector<128x16xf32>
    %152 = tpu.matmul %0, %151, %cst_130 {dimension_numbers = #tpu.dot_dimension_numbers<[1], [0], [0], [1], [0, 0, 1, 1], [], []>} : vector<128x128xf32>, vector<128x16xf32>, vector<128x16xf32> -> vector<128x16xf32>
    %153 = vector.broadcast %2 : vector<1x16xf32> to vector<128x16xf32>
    %154 = arith.addf %152, %153 : vector<128x16xf32>
    %c0_131 = arith.constant 0 : index
    %c128 = arith.constant 128 : index
    %155 = vector.load %arg7[%c0_131, %c128] : memref<128x256xf32, #tpu.memory_space<vmem>>, vector<128x16xf32>
    tpu.vector_store %arg7[%c0_131, %c128], %154 {strides = array<i32>} : memref<128x256xf32, #tpu.memory_space<vmem>>, vector<128x16xf32>,
    %c9 = arith.constant 9 : index
    %c0_132 = arith.constant 0 : index
    %c0_133 = arith.constant 0 : index
    %156 = vector.load %arg1[%c9, %c0_132, %c0_133] : memref<16x128x128xf32, #tpu.memory_space<vmem>>, vector<1x128x128xf32>
    %157 = vector.shape_cast %156 : vector<1x128x128xf32> to vector<128x128xf32>
    %c9_134 = arith.constant 9 : index
    %c0_135 = arith.constant 0 : index
    %c0_136 = arith.constant 0 : index
    %158 = vector.load %arg3[%c9_134, %c0_135, %c0_136] : memref<16x128x64xf32, #tpu.memory_space<vmem>>, vector<1x128x64xf32>
    %159 = vector.shape_cast %158 : vector<1x128x64xf32> to vector<128x64xf32>
    %cst_137 = arith.constant dense<0.000000e+00> : vector<128x64xf32>
    %160 = tpu.matmul %157, %159, %cst_137 {dimension_numbers = #tpu.dot_dimension_numbers<[1], [0], [0], [1], [0, 0, 1, 1], [], []>} : vector<128x128xf32>, vector<128x64xf32>, vector<128x64xf32> -> vector<128x64xf32>
    %cst_138 = arith.constant dense<0.000000e+00> : vector<128x64xf32>
    %161 = tpu.matmul %0, %160, %cst_138 {dimension_numbers = #tpu.dot_dimension_numbers<[1], [0], [0], [1], [0, 0, 1, 1], [], []>} : vector<128x128xf32>, vector<128x64xf32>, vector<128x64xf32> -> vector<128x64xf32>
    %162 = vector.broadcast %1 : vector<1x64xf32> to vector<128x64xf32>
    %163 = arith.addf %161, %162 : vector<128x64xf32>
    %cst_139 = arith.constant 0.000000e+00 : f32
    %164 = vector.broadcast %cst_139 : f32 to vector<128x64xf32>
    %165 = arith.maximumf %163, %164 : vector<128x64xf32>
    %c9_140 = arith.constant 9 : index
    %c0_141 = arith.constant 0 : index
    %c0_142 = arith.constant 0 : index
    %166 = vector.load %arg5[%c9_140, %c0_141, %c0_142] : memref<16x64x16xf32, #tpu.memory_space<vmem>>, vector<1x64x16xf32>
    %167 = vector.shape_cast %166 : vector<1x64x16xf32> to vector<64x16xf32>
    %cst_143 = arith.constant dense<0.000000e+00> : vector<128x16xf32>
    %168 = tpu.matmul %165, %167, %cst_143 {dimension_numbers = #tpu.dot_dimension_numbers<[1], [0], [0], [1], [0, 0, 1, 1], [], []>} : vector<128x64xf32>, vector<64x16xf32>, vector<128x16xf32> -> vector<128x16xf32>
    %cst_144 = arith.constant dense<0.000000e+00> : vector<128x16xf32>
    %169 = tpu.matmul %0, %168, %cst_144 {dimension_numbers = #tpu.dot_dimension_numbers<[1], [0], [0], [1], [0, 0, 1, 1], [], []>} : vector<128x128xf32>, vector<128x16xf32>, vector<128x16xf32> -> vector<128x16xf32>
    %170 = vector.broadcast %2 : vector<1x16xf32> to vector<128x16xf32>
    %171 = arith.addf %169, %170 : vector<128x16xf32>
    %c0_145 = arith.constant 0 : index
    %c144 = arith.constant 144 : index
    %172 = vector.load %arg7[%c0_145, %c144] : memref<128x256xf32, #tpu.memory_space<vmem>>, vector<128x16xf32>
    tpu.vector_store %arg7[%c0_145, %c144], %171 {strides = array<i32>} : memref<128x256xf32, #tpu.memory_space<vmem>>, vector<128x16xf32>,
    %c10 = arith.constant 10 : index
    %c0_146 = arith.constant 0 : index
    %c0_147 = arith.constant 0 : index
    %173 = vector.load %arg1[%c10, %c0_146, %c0_147] : memref<16x128x128xf32, #tpu.memory_space<vmem>>, vector<1x128x128xf32>
    %174 = vector.shape_cast %173 : vector<1x128x128xf32> to vector<128x128xf32>
    %c10_148 = arith.constant 10 : index
    %c0_149 = arith.constant 0 : index
    %c0_150 = arith.constant 0 : index
    %175 = vector.load %arg3[%c10_148, %c0_149, %c0_150] : memref<16x128x64xf32, #tpu.memory_space<vmem>>, vector<1x128x64xf32>
    %176 = vector.shape_cast %175 : vector<1x128x64xf32> to vector<128x64xf32>
    %cst_151 = arith.constant dense<0.000000e+00> : vector<128x64xf32>
    %177 = tpu.matmul %174, %176, %cst_151 {dimension_numbers = #tpu.dot_dimension_numbers<[1], [0], [0], [1], [0, 0, 1, 1], [], []>} : vector<128x128xf32>, vector<128x64xf32>, vector<128x64xf32> -> vector<128x64xf32>
    %cst_152 = arith.constant dense<0.000000e+00> : vector<128x64xf32>
    %178 = tpu.matmul %0, %177, %cst_152 {dimension_numbers = #tpu.dot_dimension_numbers<[1], [0], [0], [1], [0, 0, 1, 1], [], []>} : vector<128x128xf32>, vector<128x64xf32>, vector<128x64xf32> -> vector<128x64xf32>
    %179 = vector.broadcast %1 : vector<1x64xf32> to vector<128x64xf32>
    %180 = arith.addf %178, %179 : vector<128x64xf32>
    %cst_153 = arith.constant 0.000000e+00 : f32
    %181 = vector.broadcast %cst_153 : f32 to vector<128x64xf32>
    %182 = arith.maximumf %180, %181 : vector<128x64xf32>
    %c10_154 = arith.constant 10 : index
    %c0_155 = arith.constant 0 : index
    %c0_156 = arith.constant 0 : index
    %183 = vector.load %arg5[%c10_154, %c0_155, %c0_156] : memref<16x64x16xf32, #tpu.memory_space<vmem>>, vector<1x64x16xf32>
    %184 = vector.shape_cast %183 : vector<1x64x16xf32> to vector<64x16xf32>
    %cst_157 = arith.constant dense<0.000000e+00> : vector<128x16xf32>
    %185 = tpu.matmul %182, %184, %cst_157 {dimension_numbers = #tpu.dot_dimension_numbers<[1], [0], [0], [1], [0, 0, 1, 1], [], []>} : vector<128x64xf32>, vector<64x16xf32>, vector<128x16xf32> -> vector<128x16xf32>
    %cst_158 = arith.constant dense<0.000000e+00> : vector<128x16xf32>
    %186 = tpu.matmul %0, %185, %cst_158 {dimension_numbers = #tpu.dot_dimension_numbers<[1], [0], [0], [1], [0, 0, 1, 1], [], []>} : vector<128x128xf32>, vector<128x16xf32>, vector<128x16xf32> -> vector<128x16xf32>
    %187 = vector.broadcast %2 : vector<1x16xf32> to vector<128x16xf32>
    %188 = arith.addf %186, %187 : vector<128x16xf32>
    %c0_159 = arith.constant 0 : index
    %c160 = arith.constant 160 : index
    %189 = vector.load %arg7[%c0_159, %c160] : memref<128x256xf32, #tpu.memory_space<vmem>>, vector<128x16xf32>
    tpu.vector_store %arg7[%c0_159, %c160], %188 {strides = array<i32>} : memref<128x256xf32, #tpu.memory_space<vmem>>, vector<128x16xf32>,
    %c11 = arith.constant 11 : index
    %c0_160 = arith.constant 0 : index
    %c0_161 = arith.constant 0 : index
    %190 = vector.load %arg1[%c11, %c0_160, %c0_161] : memref<16x128x128xf32, #tpu.memory_space<vmem>>, vector<1x128x128xf32>
    %191 = vector.shape_cast %190 : vector<1x128x128xf32> to vector<128x128xf32>
    %c11_162 = arith.constant 11 : index
    %c0_163 = arith.constant 0 : index
    %c0_164 = arith.constant 0 : index
    %192 = vector.load %arg3[%c11_162, %c0_163, %c0_164] : memref<16x128x64xf32, #tpu.memory_space<vmem>>, vector<1x128x64xf32>
    %193 = vector.shape_cast %192 : vector<1x128x64xf32> to vector<128x64xf32>
    %cst_165 = arith.constant dense<0.000000e+00> : vector<128x64xf32>
    %194 = tpu.matmul %191, %193, %cst_165 {dimension_numbers = #tpu.dot_dimension_numbers<[1], [0], [0], [1], [0, 0, 1, 1], [], []>} : vector<128x128xf32>, vector<128x64xf32>, vector<128x64xf32> -> vector<128x64xf32>
    %cst_166 = arith.constant dense<0.000000e+00> : vector<128x64xf32>
    %195 = tpu.matmul %0, %194, %cst_166 {dimension_numbers = #tpu.dot_dimension_numbers<[1], [0], [0], [1], [0, 0, 1, 1], [], []>} : vector<128x128xf32>, vector<128x64xf32>, vector<128x64xf32> -> vector<128x64xf32>
    %196 = vector.broadcast %1 : vector<1x64xf32> to vector<128x64xf32>
    %197 = arith.addf %195, %196 : vector<128x64xf32>
    %cst_167 = arith.constant 0.000000e+00 : f32
    %198 = vector.broadcast %cst_167 : f32 to vector<128x64xf32>
    %199 = arith.maximumf %197, %198 : vector<128x64xf32>
    %c11_168 = arith.constant 11 : index
    %c0_169 = arith.constant 0 : index
    %c0_170 = arith.constant 0 : index
    %200 = vector.load %arg5[%c11_168, %c0_169, %c0_170] : memref<16x64x16xf32, #tpu.memory_space<vmem>>, vector<1x64x16xf32>
    %201 = vector.shape_cast %200 : vector<1x64x16xf32> to vector<64x16xf32>
    %cst_171 = arith.constant dense<0.000000e+00> : vector<128x16xf32>
    %202 = tpu.matmul %199, %201, %cst_171 {dimension_numbers = #tpu.dot_dimension_numbers<[1], [0], [0], [1], [0, 0, 1, 1], [], []>} : vector<128x64xf32>, vector<64x16xf32>, vector<128x16xf32> -> vector<128x16xf32>
    %cst_172 = arith.constant dense<0.000000e+00> : vector<128x16xf32>
    %203 = tpu.matmul %0, %202, %cst_172 {dimension_numbers = #tpu.dot_dimension_numbers<[1], [0], [0], [1], [0, 0, 1, 1], [], []>} : vector<128x128xf32>, vector<128x16xf32>, vector<128x16xf32> -> vector<128x16xf32>
    %204 = vector.broadcast %2 : vector<1x16xf32> to vector<128x16xf32>
    %205 = arith.addf %203, %204 : vector<128x16xf32>
    %c0_173 = arith.constant 0 : index
    %c176 = arith.constant 176 : index
    %206 = vector.load %arg7[%c0_173, %c176] : memref<128x256xf32, #tpu.memory_space<vmem>>, vector<128x16xf32>
    tpu.vector_store %arg7[%c0_173, %c176], %205 {strides = array<i32>} : memref<128x256xf32, #tpu.memory_space<vmem>>, vector<128x16xf32>,
    %c12 = arith.constant 12 : index
    %c0_174 = arith.constant 0 : index
    %c0_175 = arith.constant 0 : index
    %207 = vector.load %arg1[%c12, %c0_174, %c0_175] : memref<16x128x128xf32, #tpu.memory_space<vmem>>, vector<1x128x128xf32>
    %208 = vector.shape_cast %207 : vector<1x128x128xf32> to vector<128x128xf32>
    %c12_176 = arith.constant 12 : index
    %c0_177 = arith.constant 0 : index
    %c0_178 = arith.constant 0 : index
    %209 = vector.load %arg3[%c12_176, %c0_177, %c0_178] : memref<16x128x64xf32, #tpu.memory_space<vmem>>, vector<1x128x64xf32>
    %210 = vector.shape_cast %209 : vector<1x128x64xf32> to vector<128x64xf32>
    %cst_179 = arith.constant dense<0.000000e+00> : vector<128x64xf32>
    %211 = tpu.matmul %208, %210, %cst_179 {dimension_numbers = #tpu.dot_dimension_numbers<[1], [0], [0], [1], [0, 0, 1, 1], [], []>} : vector<128x128xf32>, vector<128x64xf32>, vector<128x64xf32> -> vector<128x64xf32>
    %cst_180 = arith.constant dense<0.000000e+00> : vector<128x64xf32>
    %212 = tpu.matmul %0, %211, %cst_180 {dimension_numbers = #tpu.dot_dimension_numbers<[1], [0], [0], [1], [0, 0, 1, 1], [], []>} : vector<128x128xf32>, vector<128x64xf32>, vector<128x64xf32> -> vector<128x64xf32>
    %213 = vector.broadcast %1 : vector<1x64xf32> to vector<128x64xf32>
    %214 = arith.addf %212, %213 : vector<128x64xf32>
    %cst_181 = arith.constant 0.000000e+00 : f32
    %215 = vector.broadcast %cst_181 : f32 to vector<128x64xf32>
    %216 = arith.maximumf %214, %215 : vector<128x64xf32>
    %c12_182 = arith.constant 12 : index
    %c0_183 = arith.constant 0 : index
    %c0_184 = arith.constant 0 : index
    %217 = vector.load %arg5[%c12_182, %c0_183, %c0_184] : memref<16x64x16xf32, #tpu.memory_space<vmem>>, vector<1x64x16xf32>
    %218 = vector.shape_cast %217 : vector<1x64x16xf32> to vector<64x16xf32>
    %cst_185 = arith.constant dense<0.000000e+00> : vector<128x16xf32>
    %219 = tpu.matmul %216, %218, %cst_185 {dimension_numbers = #tpu.dot_dimension_numbers<[1], [0], [0], [1], [0, 0, 1, 1], [], []>} : vector<128x64xf32>, vector<64x16xf32>, vector<128x16xf32> -> vector<128x16xf32>
    %cst_186 = arith.constant dense<0.000000e+00> : vector<128x16xf32>
    %220 = tpu.matmul %0, %219, %cst_186 {dimension_numbers = #tpu.dot_dimension_numbers<[1], [0], [0], [1], [0, 0, 1, 1], [], []>} : vector<128x128xf32>, vector<128x16xf32>, vector<128x16xf32> -> vector<128x16xf32>
    %221 = vector.broadcast %2 : vector<1x16xf32> to vector<128x16xf32>
    %222 = arith.addf %220, %221 : vector<128x16xf32>
    %c0_187 = arith.constant 0 : index
    %c192 = arith.constant 192 : index
    %223 = vector.load %arg7[%c0_187, %c192] : memref<128x256xf32, #tpu.memory_space<vmem>>, vector<128x16xf32>
    tpu.vector_store %arg7[%c0_187, %c192], %222 {strides = array<i32>} : memref<128x256xf32, #tpu.memory_space<vmem>>, vector<128x16xf32>,
    %c13 = arith.constant 13 : index
    %c0_188 = arith.constant 0 : index
    %c0_189 = arith.constant 0 : index
    %224 = vector.load %arg1[%c13, %c0_188, %c0_189] : memref<16x128x128xf32, #tpu.memory_space<vmem>>, vector<1x128x128xf32>
    %225 = vector.shape_cast %224 : vector<1x128x128xf32> to vector<128x128xf32>
    %c13_190 = arith.constant 13 : index
    %c0_191 = arith.constant 0 : index
    %c0_192 = arith.constant 0 : index
    %226 = vector.load %arg3[%c13_190, %c0_191, %c0_192] : memref<16x128x64xf32, #tpu.memory_space<vmem>>, vector<1x128x64xf32>
    %227 = vector.shape_cast %226 : vector<1x128x64xf32> to vector<128x64xf32>
    %cst_193 = arith.constant dense<0.000000e+00> : vector<128x64xf32>
    %228 = tpu.matmul %225, %227, %cst_193 {dimension_numbers = #tpu.dot_dimension_numbers<[1], [0], [0], [1], [0, 0, 1, 1], [], []>} : vector<128x128xf32>, vector<128x64xf32>, vector<128x64xf32> -> vector<128x64xf32>
    %cst_194 = arith.constant dense<0.000000e+00> : vector<128x64xf32>
    %229 = tpu.matmul %0, %228, %cst_194 {dimension_numbers = #tpu.dot_dimension_numbers<[1], [0], [0], [1], [0, 0, 1, 1], [], []>} : vector<128x128xf32>, vector<128x64xf32>, vector<128x64xf32> -> vector<128x64xf32>
    %230 = vector.broadcast %1 : vector<1x64xf32> to vector<128x64xf32>
    %231 = arith.addf %229, %230 : vector<128x64xf32>
    %cst_195 = arith.constant 0.000000e+00 : f32
    %232 = vector.broadcast %cst_195 : f32 to vector<128x64xf32>
    %233 = arith.maximumf %231, %232 : vector<128x64xf32>
    %c13_196 = arith.constant 13 : index
    %c0_197 = arith.constant 0 : index
    %c0_198 = arith.constant 0 : index
    %234 = vector.load %arg5[%c13_196, %c0_197, %c0_198] : memref<16x64x16xf32, #tpu.memory_space<vmem>>, vector<1x64x16xf32>
    %235 = vector.shape_cast %234 : vector<1x64x16xf32> to vector<64x16xf32>
    %cst_199 = arith.constant dense<0.000000e+00> : vector<128x16xf32>
    %236 = tpu.matmul %233, %235, %cst_199 {dimension_numbers = #tpu.dot_dimension_numbers<[1], [0], [0], [1], [0, 0, 1, 1], [], []>} : vector<128x64xf32>, vector<64x16xf32>, vector<128x16xf32> -> vector<128x16xf32>
    %cst_200 = arith.constant dense<0.000000e+00> : vector<128x16xf32>
    %237 = tpu.matmul %0, %236, %cst_200 {dimension_numbers = #tpu.dot_dimension_numbers<[1], [0], [0], [1], [0, 0, 1, 1], [], []>} : vector<128x128xf32>, vector<128x16xf32>, vector<128x16xf32> -> vector<128x16xf32>
    %238 = vector.broadcast %2 : vector<1x16xf32> to vector<128x16xf32>
    %239 = arith.addf %237, %238 : vector<128x16xf32>
    %c0_201 = arith.constant 0 : index
    %c208 = arith.constant 208 : index
    %240 = vector.load %arg7[%c0_201, %c208] : memref<128x256xf32, #tpu.memory_space<vmem>>, vector<128x16xf32>
    tpu.vector_store %arg7[%c0_201, %c208], %239 {strides = array<i32>} : memref<128x256xf32, #tpu.memory_space<vmem>>, vector<128x16xf32>,
    %c14 = arith.constant 14 : index
    %c0_202 = arith.constant 0 : index
    %c0_203 = arith.constant 0 : index
    %241 = vector.load %arg1[%c14, %c0_202, %c0_203] : memref<16x128x128xf32, #tpu.memory_space<vmem>>, vector<1x128x128xf32>
    %242 = vector.shape_cast %241 : vector<1x128x128xf32> to vector<128x128xf32>
    %c14_204 = arith.constant 14 : index
    %c0_205 = arith.constant 0 : index
    %c0_206 = arith.constant 0 : index
    %243 = vector.load %arg3[%c14_204, %c0_205, %c0_206] : memref<16x128x64xf32, #tpu.memory_space<vmem>>, vector<1x128x64xf32>
    %244 = vector.shape_cast %243 : vector<1x128x64xf32> to vector<128x64xf32>
    %cst_207 = arith.constant dense<0.000000e+00> : vector<128x64xf32>
    %245 = tpu.matmul %242, %244, %cst_207 {dimension_numbers = #tpu.dot_dimension_numbers<[1], [0], [0], [1], [0, 0, 1, 1], [], []>} : vector<128x128xf32>, vector<128x64xf32>, vector<128x64xf32> -> vector<128x64xf32>
    %cst_208 = arith.constant dense<0.000000e+00> : vector<128x64xf32>
    %246 = tpu.matmul %0, %245, %cst_208 {dimension_numbers = #tpu.dot_dimension_numbers<[1], [0], [0], [1], [0, 0, 1, 1], [], []>} : vector<128x128xf32>, vector<128x64xf32>, vector<128x64xf32> -> vector<128x64xf32>
    %247 = vector.broadcast %1 : vector<1x64xf32> to vector<128x64xf32>
    %248 = arith.addf %246, %247 : vector<128x64xf32>
    %cst_209 = arith.constant 0.000000e+00 : f32
    %249 = vector.broadcast %cst_209 : f32 to vector<128x64xf32>
    %250 = arith.maximumf %248, %249 : vector<128x64xf32>
    %c14_210 = arith.constant 14 : index
    %c0_211 = arith.constant 0 : index
    %c0_212 = arith.constant 0 : index
    %251 = vector.load %arg5[%c14_210, %c0_211, %c0_212] : memref<16x64x16xf32, #tpu.memory_space<vmem>>, vector<1x64x16xf32>
    %252 = vector.shape_cast %251 : vector<1x64x16xf32> to vector<64x16xf32>
    %cst_213 = arith.constant dense<0.000000e+00> : vector<128x16xf32>
    %253 = tpu.matmul %250, %252, %cst_213 {dimension_numbers = #tpu.dot_dimension_numbers<[1], [0], [0], [1], [0, 0, 1, 1], [], []>} : vector<128x64xf32>, vector<64x16xf32>, vector<128x16xf32> -> vector<128x16xf32>
    %cst_214 = arith.constant dense<0.000000e+00> : vector<128x16xf32>
    %254 = tpu.matmul %0, %253, %cst_214 {dimension_numbers = #tpu.dot_dimension_numbers<[1], [0], [0], [1], [0, 0, 1, 1], [], []>} : vector<128x128xf32>, vector<128x16xf32>, vector<128x16xf32> -> vector<128x16xf32>
    %255 = vector.broadcast %2 : vector<1x16xf32> to vector<128x16xf32>
    %256 = arith.addf %254, %255 : vector<128x16xf32>
    %c0_215 = arith.constant 0 : index
    %c224 = arith.constant 224 : index
    %257 = vector.load %arg7[%c0_215, %c224] : memref<128x256xf32, #tpu.memory_space<vmem>>, vector<128x16xf32>
    tpu.vector_store %arg7[%c0_215, %c224], %256 {strides = array<i32>} : memref<128x256xf32, #tpu.memory_space<vmem>>, vector<128x16xf32>,
    %c15 = arith.constant 15 : index
    %c0_216 = arith.constant 0 : index
    %c0_217 = arith.constant 0 : index
    %258 = vector.load %arg1[%c15, %c0_216, %c0_217] : memref<16x128x128xf32, #tpu.memory_space<vmem>>, vector<1x128x128xf32>
    %259 = vector.shape_cast %258 : vector<1x128x128xf32> to vector<128x128xf32>
    %c15_218 = arith.constant 15 : index
    %c0_219 = arith.constant 0 : index
    %c0_220 = arith.constant 0 : index
    %260 = vector.load %arg3[%c15_218, %c0_219, %c0_220] : memref<16x128x64xf32, #tpu.memory_space<vmem>>, vector<1x128x64xf32>
    %261 = vector.shape_cast %260 : vector<1x128x64xf32> to vector<128x64xf32>
    %cst_221 = arith.constant dense<0.000000e+00> : vector<128x64xf32>
    %262 = tpu.matmul %259, %261, %cst_221 {dimension_numbers = #tpu.dot_dimension_numbers<[1], [0], [0], [1], [0, 0, 1, 1], [], []>} : vector<128x128xf32>, vector<128x64xf32>, vector<128x64xf32> -> vector<128x64xf32>
    %cst_222 = arith.constant dense<0.000000e+00> : vector<128x64xf32>
    %263 = tpu.matmul %0, %262, %cst_222 {dimension_numbers = #tpu.dot_dimension_numbers<[1], [0], [0], [1], [0, 0, 1, 1], [], []>} : vector<128x128xf32>, vector<128x64xf32>, vector<128x64xf32> -> vector<128x64xf32>
    %264 = vector.broadcast %1 : vector<1x64xf32> to vector<128x64xf32>
    %265 = arith.addf %263, %264 : vector<128x64xf32>
    %cst_223 = arith.constant 0.000000e+00 : f32
    %266 = vector.broadcast %cst_223 : f32 to vector<128x64xf32>
    %267 = arith.maximumf %265, %266 : vector<128x64xf32>
    %c15_224 = arith.constant 15 : index
    %c0_225 = arith.constant 0 : index
    %c0_226 = arith.constant 0 : index
    %268 = vector.load %arg5[%c15_224, %c0_225, %c0_226] : memref<16x64x16xf32, #tpu.memory_space<vmem>>, vector<1x64x16xf32>
    %269 = vector.shape_cast %268 : vector<1x64x16xf32> to vector<64x16xf32>
    %cst_227 = arith.constant dense<0.000000e+00> : vector<128x16xf32>
    %270 = tpu.matmul %267, %269, %cst_227 {dimension_numbers = #tpu.dot_dimension_numbers<[1], [0], [0], [1], [0, 0, 1, 1], [], []>} : vector<128x64xf32>, vector<64x16xf32>, vector<128x16xf32> -> vector<128x16xf32>
    %cst_228 = arith.constant dense<0.000000e+00> : vector<128x16xf32>
    %271 = tpu.matmul %0, %270, %cst_228 {dimension_numbers = #tpu.dot_dimension_numbers<[1], [0], [0], [1], [0, 0, 1, 1], [], []>} : vector<128x128xf32>, vector<128x16xf32>, vector<128x16xf32> -> vector<128x16xf32>
    %272 = vector.broadcast %2 : vector<1x16xf32> to vector<128x16xf32>
    %273 = arith.addf %271, %272 : vector<128x16xf32>
    %c0_229 = arith.constant 0 : index
    %c240 = arith.constant 240 : index
    %274 = vector.load %arg7[%c0_229, %c240] : memref<128x256xf32, #tpu.memory_space<vmem>>, vector<128x16xf32>
    tpu.vector_store %arg7[%c0_229, %c240], %273 {strides = array<i32>} : memref<128x256xf32, #tpu.memory_space<vmem>>, vector<128x16xf32>,
    return
  }
  func.func @transform_0(%arg0: i32) -> (i32, i32, i32) {
    %c0_i32 = arith.constant 0 : i32
    %c0_i32_0 = arith.constant 0 : i32
    %c0_i32_1 = arith.constant 0 : i32
    return %c0_i32, %arg0, %c0_i32_0 : i32, i32, i32
  }
  func.func @transform_1(%arg0: i32) -> (i32, i32) {
    %c0_i32 = arith.constant 0 : i32
    %c0_i32_0 = arith.constant 0 : i32
    %c0_i32_1 = arith.constant 0 : i32
    return %c0_i32, %c0_i32_0 : i32, i32
  }
  func.func @transform_2(%arg0: i32) -> (i32, i32, i32) {
    %c0_i32 = arith.constant 0 : i32
    %c0_i32_0 = arith.constant 0 : i32
    %c0_i32_1 = arith.constant 0 : i32
    %c0_i32_2 = arith.constant 0 : i32
    return %c0_i32, %c0_i32_0, %c0_i32_1 : i32, i32, i32
  }
  func.func @transform_3(%arg0: i32) -> (i32, i32) {
    %c0_i32 = arith.constant 0 : i32
    %c0_i32_0 = arith.constant 0 : i32
    %c0_i32_1 = arith.constant 0 : i32
    return %c0_i32, %c0_i32_0 : i32, i32
  }
  func.func @transform_4(%arg0: i32) -> (i32, i32, i32) {
    %c0_i32 = arith.constant 0 : i32
    %c0_i32_0 = arith.constant 0 : i32
    %c0_i32_1 = arith.constant 0 : i32
    %c0_i32_2 = arith.constant 0 : i32
    return %c0_i32, %c0_i32_0, %c0_i32_1 : i32, i32, i32
  }
  func.func @transform_5(%arg0: i32) -> (i32, i32) {
    %c0_i32 = arith.constant 0 : i32
    %c0_i32_0 = arith.constant 0 : i32
    %c0_i32_1 = arith.constant 0 : i32
    return %c0_i32, %c0_i32_0 : i32, i32
  }
  func.func @transform_6(%arg0: i32) -> (i32, i32) {
    %c0_i32 = arith.constant 0 : i32
    %c0_i32_0 = arith.constant 0 : i32
    return %arg0, %c0_i32 : i32, i32
  }
}

</mosaic_0001>

<bundles_post_ra>
// kernel: tpu_custom_call.1
= control target key start
LH: loop header
LB: loop body
LE: loop exit
PB: predicated region body
PF: predicated region fallthrough
CT: control target
= control target key end

     0   :  { %11 = vsyncpa [#allocation4], 0  ;;  %s26646_s0 = inlined_call_operand.vmem [shape: f32[16,256,128], index: 0, kind: input, shape index: {}]   ;;  %s26647_s1 = inlined_call_operand.vmem [shape: f32[128,128], index: 1, kind: input, shape index: {}]   ;;  %s26648_s2 = inlined_call_operand.vmem [shape: f32[16,128,64], index: 2, kind: input, shape index: {}]   ;;  %s26649_s3 = inlined_call_operand.vmem [shape: f32[1,64], index: 3, kind: input, shape index: {}]   ;;  %s26650_s4 = inlined_call_operand.vmem [shape: f32[16,64,16], index: 4, kind: input, shape index: {}]   ;;  %s26651_s5 = inlined_call_operand.vmem [shape: f32[1,16], index: 5, kind: input, shape index: {}]   ;;  %s26652_s6 = inlined_call_operand.hbm [shape: f32[256,256], index: 6, kind: output, shape index: {}]  }
   0x1   :  { %13 = vsyncpa [#allocation4 + $0x1], 0  ;;  %s21782_s21 = smov 0   ;;  %s21784_s22 = smov 0  }
   0x2   :  { %s21786_s23 = smov 0   ;;  %s21788_s24 = smov 0  }
   0x3 LB: > { %s26653_s25 = sadd.s32 4294967295, %s21736_s24   ;;  %s13570_s26 = sadd.s32 4294967294, %s21736_s24   ;;  %s21736_s24 = sphi %s21788_s24, %s26666_s24   ;;  %s21732_s23 = sphi %s21786_s23, %s26665_s23   ;;  %s21728_s22 = sphi %s21784_s22, %s26664_s22   ;;  %s21724_s21 = sphi %s21782_s21, %s26663_s21  }
   0x4   : > { %s21805_s27 = sadd.s32 1, %s21736_s24   ;;  %s26_s28 = sadd.s32 1, %s21732_s23 }
   0x5   : > { %s23_s29 = ssub.s32 %s21736_s24, %s21805_s27  ;;  %p33_p0 = scmp.ne.s32.totalorder %s21732_s23, %s21728_s22 }
   0x6   : > { %p24_p1 = scmp.eq.s32.totalorder %s23_s29, 0  ;;  %p34_p2 = scmp.eq.s32.totalorder %s21736_s24, 0 }
   0x7   : > { %p168_p3 = scmp.eq.s32.totalorder %s26653_s25, 1  ;;  %p173_p4 = scmp.ne.s32.totalorder %s21728_s22, %s21724_s21 }
   0x8   : > { %s21818_s30 = scalar_select %p24_p1, %s21732_s23, %s26_s28  }
   0x9   : > { %p35_p5 = por %p34_p2, %p33_p0  ;;  %p21820_p6 = por %p168_p3, %p33_p0 }
   0xa   : > { %p174_p7 = scmp.eq.s32.totalorder %s13570_s26, 1  ;;  %p13572_p9 = scmp.ge.s32.totalorder %s21736_s24, 2 }
   0xc   : > { %p21824_p8 = por %p174_p7, %p173_p4  ;;  %205 = sbr.rel (%p13572_p9) target bundleno = 151 (0x97), region = 36 }
  0x13   : > { %208 = sbr.rel (!%p35_p5) target bundleno = 151 (0x97), region = 40  ;;  %s210_s9 = sand.u32 (%p35_p5), 1, %s21732_s23  }
  0x14   : > { %s14443_s10 = sshll.u32 (%p35_p5), %s21736_s24, 7  ;;  %s13573_s11 = sshll.u32 (%p35_p5), %s210_s9, 11 }
  0x15   : > { %s21836_s14 = scalar_lea.vmem (%p35_p5), %s26646_s0, %s14443_s10  ;;  %s21841_s15 = scalar_lea.vmem (%p35_p5), [#allocation2], %s13573_s11 }
  0x16   : > { %v753_v0 = vld [vmem:[%s21836_s14] sm:$0xff] (%p35_p5)  ;;  %v755_v1 = vld [vmem:[%s21836_s14 + $0x8] sm:$0xff] (%p35_p5)  ;;  %v757_v2 = vld [vmem:[%s21836_s14 + $0x10] sm:$0xff] (%p35_p5) }
  0x17   : > { %754 = vst [vmem:[%s21841_s15] sm:$0xff] (%p35_p5), %v753_v0  ;;  %756 = vst [vmem:[%s21841_s15 + $0x8] sm:$0xff] (%p35_p5), %v755_v1  ;;  %v759_v3 = vld [vmem:[%s21836_s14 + $0x18] sm:$0xff] (%p35_p5)  ;;  %v761_v4 = vld [vmem:[%s21836_s14 + $0x20] sm:$0xff] (%p35_p5) }
  0x18   : > { %758 = vst [vmem:[%s21841_s15 + $0x10] sm:$0xff] (%p35_p5), %v757_v2  ;;  %v763_v5 = vld [vmem:[%s21836_s14 + $0x28] sm:$0xff] (%p35_p5)  ;;  %760 = vst [vmem:[%s21841_s15 + $0x18] sm:$0xff] (%p35_p5), %v759_v3  ;;  %v765_v6 = vld [vmem:[%s21836_s14 + $0x30] sm:$0xff] (%p35_p5) }
  0x19   : > { %762 = vst [vmem:[%s21841_s15 + $0x20] sm:$0xff] (%p35_p5), %v761_v4  ;;  %764 = vst [vmem:[%s21841_s15 + $0x28] sm:$0xff] (%p35_p5), %v763_v5  ;;  %v767_v7 = vld [vmem:[%s21836_s14 + $0x38] sm:$0xff] (%p35_p5)  ;;  %v769_v8 = vld [vmem:[%s21836_s14 + $0x40] sm:$0xff] (%p35_p5) }
  0x1a   : > { %766 = vst [vmem:[%s21841_s15 + $0x30] sm:$0xff] %v765_v6  ;;  %768 = vst [vmem:[%s21841_s15 + $0x38] sm:$0xff] %v767_v7  ;;  %v771_v9 = vld [vmem:[%s21836_s14 + $0x48] sm:$0xff]  ;;  %v773_v10 = vld [vmem:[%s21836_s14 + $0x50] sm:$0xff] }
  0x1b   : > { %770 = vst [vmem:[%s21841_s15 + $0x40] sm:$0xff] %v769_v8  ;;  %v775_v11 = vld [vmem:[%s21836_s14 + $0x58] sm:$0xff]  ;;  %772 = vst [vmem:[%s21841_s15 + $0x48] sm:$0xff] %v771_v9  ;;  %v777_v12 = vld [vmem:[%s21836_s14 + $0x60] sm:$0xff] }
  0x1c   : > { %774 = vst [vmem:[%s21841_s15 + $0x50] sm:$0xff] %v773_v10  ;;  %776 = vst [vmem:[%s21841_s15 + $0x58] sm:$0xff] %v775_v11  ;;  %v779_v13 = vld [vmem:[%s21836_s14 + $0x68] sm:$0xff]  ;;  %v781_v14 = vld [vmem:[%s21836_s14 + $0x70] sm:$0xff] }
  0x1d   : > { %778 = vst [vmem:[%s21841_s15 + $0x60] sm:$0xff] %v777_v12  ;;  %780 = vst [vmem:[%s21841_s15 + $0x68] sm:$0xff] %v779_v13  ;;  %v783_v15 = vld [vmem:[%s21836_s14 + $0x78] sm:$0xff]  ;;  %v785_v16 = vld [vmem:[%s21836_s14 + $0x100] sm:$0xff] }
  0x1e   : > { %782 = vst [vmem:[%s21841_s15 + $0x70] sm:$0xff] %v781_v14  ;;  %v787_v17 = vld [vmem:[%s21836_s14 + $0x108] sm:$0xff]  ;;  %784 = vst [vmem:[%s21841_s15 + $0x78] sm:$0xff] %v783_v15  ;;  %v789_v18 = vld [vmem:[%s21836_s14 + $0x110] sm:$0xff] }
  0x1f   : > { %786 = vst [vmem:[%s21841_s15 + $0x80] sm:$0xff] %v785_v16  ;;  %788 = vst [vmem:[%s21841_s15 + $0x88] sm:$0xff] %v787_v17  ;;  %v791_v19 = vld [vmem:[%s21836_s14 + $0x118] sm:$0xff]  ;;  %v793_v20 = vld [vmem:[%s21836_s14 + $0x120] sm:$0xff] }
  0x20   : > { %790 = vst [vmem:[%s21841_s15 + $0x90] sm:$0xff] %v789_v18  ;;  %792 = vst [vmem:[%s21841_s15 + $0x98] sm:$0xff] %v791_v19  ;;  %v795_v21 = vld [vmem:[%s21836_s14 + $0x128] sm:$0xff]  ;;  %v797_v22 = vld [vmem:[%s21836_s14 + $0x130] sm:$0xff] }
  0x21   : > { %794 = vst [vmem:[%s21841_s15 + $0xa0] sm:$0xff] %v793_v20  ;;  %v799_v23 = vld [vmem:[%s21836_s14 + $0x138] sm:$0xff]  ;;  %796 = vst [vmem:[%s21841_s15 + $0xa8] sm:$0xff] %v795_v21  ;;  %v801_v24 = vld [vmem:[%s21836_s14 + $0x140] sm:$0xff] }
  0x22   : > { %798 = vst [vmem:[%s21841_s15 + $0xb0] sm:$0xff] %v797_v22  ;;  %800 = vst [vmem:[%s21841_s15 + $0xb8] sm:$0xff] %v799_v23  ;;  %v803_v25 = vld [vmem:[%s21836_s14 + $0x148] sm:$0xff]  ;;  %v805_v26 = vld [vmem:[%s21836_s14 + $0x150] sm:$0xff] }
  0x23   : > { %802 = vst [vmem:[%s21841_s15 + $0xc0] sm:$0xff] %v801_v24  ;;  %804 = vst [vmem:[%s21841_s15 + $0xc8] sm:$0xff] %v803_v25  ;;  %v807_v27 = vld [vmem:[%s21836_s14 + $0x158] sm:$0xff]  ;;  %v809_v28 = vld [vmem:[%s21836_s14 + $0x160] sm:$0xff] }
  0x24   : > { %806 = vst [vmem:[%s21841_s15 + $0xd0] sm:$0xff] %v805_v26  ;;  %v811_v29 = vld [vmem:[%s21836_s14 + $0x168] sm:$0xff]  ;;  %808 = vst [vmem:[%s21841_s15 + $0xd8] sm:$0xff] %v807_v27  ;;  %v813_v30 = vld [vmem:[%s21836_s14 + $0x170] sm:$0xff] }
  0x25   : > { %810 = vst [vmem:[%s21841_s15 + $0xe0] sm:$0xff] %v809_v28  ;;  %812 = vst [vmem:[%s21841_s15 + $0xe8] sm:$0xff] %v811_v29  ;;  %v815_v31 = vld [vmem:[%s21836_s14 + $0x178] sm:$0xff]  ;;  %v817_v32 = vld [vmem:[%s21836_s14 + $0x200] sm:$0xff] }
  0x26   : > { %814 = vst [vmem:[%s21841_s15 + $0xf0] sm:$0xff] %v813_v30  ;;  %816 = vst [vmem:[%s21841_s15 + $0xf8] sm:$0xff] %v815_v31  ;;  %v819_v33 = vld [vmem:[%s21836_s14 + $0x208] sm:$0xff]  ;;  %v821_v34 = vld [vmem:[%s21836_s14 + $0x210] sm:$0xff] }
  0x27   : > { %818 = vst [vmem:[%s21841_s15 + $0x100] sm:$0xff] %v817_v32  ;;  %v823_v35 = vld [vmem:[%s21836_s14 + $0x218] sm:$0xff]  ;;  %820 = vst [vmem:[%s21841_s15 + $0x108] sm:$0xff] %v819_v33  ;;  %v825_v36 = vld [vmem:[%s21836_s14 + $0x220] sm:$0xff] }
  0x28   : > { %822 = vst [vmem:[%s21841_s15 + $0x110] sm:$0xff] %v821_v34  ;;  %824 = vst [vmem:[%s21841_s15 + $0x118] sm:$0xff] %v823_v35  ;;  %v827_v37 = vld [vmem:[%s21836_s14 + $0x228] sm:$0xff]  ;;  %v829_v38 = vld [vmem:[%s21836_s14 + $0x230] sm:$0xff] }
  0x29   : > { %826 = vst [vmem:[%s21841_s15 + $0x120] sm:$0xff] %v825_v36  ;;  %828 = vst [vmem:[%s21841_s15 + $0x128] sm:$0xff] %v827_v37  ;;  %v831_v39 = vld [vmem:[%s21836_s14 + $0x238] sm:$0xff]  ;;  %v833_v40 = vld [vmem:[%s21836_s14 + $0x240] sm:$0xff] }
  0x2a   : > { %830 = vst [vmem:[%s21841_s15 + $0x130] sm:$0xff] %v829_v38  ;;  %v835_v41 = vld [vmem:[%s21836_s14 + $0x248] sm:$0xff]  ;;  %832 = vst [vmem:[%s21841_s15 + $0x138] sm:$0xff] %v831_v39  ;;  %v837_v42 = vld [vmem:[%s21836_s14 + $0x250] sm:$0xff] }
  0x2b   : > { %834 = vst [vmem:[%s21841_s15 + $0x140] sm:$0xff] %v833_v40  ;;  %836 = vst [vmem:[%s21841_s15 + $0x148] sm:$0xff] %v835_v41  ;;  %v839_v43 = vld [vmem:[%s21836_s14 + $0x258] sm:$0xff]  ;;  %v841_v44 = vld [vmem:[%s21836_s14 + $0x260] sm:$0xff] }
  0x2c   : > { %838 = vst [vmem:[%s21841_s15 + $0x150] sm:$0xff] %v837_v42  ;;  %840 = vst [vmem:[%s21841_s15 + $0x158] sm:$0xff] %v839_v43  ;;  %v843_v45 = vld [vmem:[%s21836_s14 + $0x268] sm:$0xff]  ;;  %v845_v46 = vld [vmem:[%s21836_s14 + $0x270] sm:$0xff] }
  0x2d   : > { %842 = vst [vmem:[%s21841_s15 + $0x160] sm:$0xff] %v841_v44  ;;  %v847_v47 = vld [vmem:[%s21836_s14 + $0x278] sm:$0xff]  ;;  %844 = vst [vmem:[%s21841_s15 + $0x168] sm:$0xff] %v843_v45  ;;  %v849_v48 = vld [vmem:[%s21836_s14 + $0x300] sm:$0xff] }
  0x2e   : > { %846 = vst [vmem:[%s21841_s15 + $0x170] sm:$0xff] %v845_v46  ;;  %848 = vst [vmem:[%s21841_s15 + $0x178] sm:$0xff] %v847_v47  ;;  %v851_v49 = vld [vmem:[%s21836_s14 + $0x308] sm:$0xff]  ;;  %v853_v50 = vld [vmem:[%s21836_s14 + $0x310] sm:$0xff] }
  0x2f   : > { %850 = vst [vmem:[%s21841_s15 + $0x180] sm:$0xff] %v849_v48  ;;  %852 = vst [vmem:[%s21841_s15 + $0x188] sm:$0xff] %v851_v49  ;;  %v855_v51 = vld [vmem:[%s21836_s14 + $0x318] sm:$0xff]  ;;  %v857_v52 = vld [vmem:[%s21836_s14 + $0x320] sm:$0xff] }
  0x30   : > { %854 = vst [vmem:[%s21841_s15 + $0x190] sm:$0xff] %v853_v50  ;;  %v859_v53 = vld [vmem:[%s21836_s14 + $0x328] sm:$0xff]  ;;  %856 = vst [vmem:[%s21841_s15 + $0x198] sm:$0xff] %v855_v51  ;;  %v861_v54 = vld [vmem:[%s21836_s14 + $0x330] sm:$0xff] }
  0x31   : > { %858 = vst [vmem:[%s21841_s15 + $0x1a0] sm:$0xff] %v857_v52  ;;  %860 = vst [vmem:[%s21841_s15 + $0x1a8] sm:$0xff] %v859_v53  ;;  %v863_v55 = vld [vmem:[%s21836_s14 + $0x338] sm:$0xff]  ;;  %v865_v56 = vld [vmem:[%s21836_s14 + $0x340] sm:$0xff] }
  0x32   : > { %862 = vst [vmem:[%s21841_s15 + $0x1b0] sm:$0xff] %v861_v54  ;;  %864 = vst [vmem:[%s21841_s15 + $0x1b8] sm:$0xff] %v863_v55  ;;  %v867_v57 = vld [vmem:[%s21836_s14 + $0x348] sm:$0xff]  ;;  %v869_v58 = vld [vmem:[%s21836_s14 + $0x350] sm:$0xff] }
  0x33   : > { %866 = vst [vmem:[%s21841_s15 + $0x1c0] sm:$0xff] %v865_v56  ;;  %v871_v59 = vld [vmem:[%s21836_s14 + $0x358] sm:$0xff]  ;;  %868 = vst [vmem:[%s21841_s15 + $0x1c8] sm:$0xff] %v867_v57  ;;  %v873_v60 = vld [vmem:[%s21836_s14 + $0x360] sm:$0xff] }
  0x34   : > { %870 = vst [vmem:[%s21841_s15 + $0x1d0] sm:$0xff] %v869_v58  ;;  %872 = vst [vmem:[%s21841_s15 + $0x1d8] sm:$0xff] %v871_v59  ;;  %v875_v61 = vld [vmem:[%s21836_s14 + $0x368] sm:$0xff]  ;;  %v877_v62 = vld [vmem:[%s21836_s14 + $0x370] sm:$0xff] }
  0x35   : > { %874 = vst [vmem:[%s21841_s15 + $0x1e0] sm:$0xff] %v873_v60  ;;  %876 = vst [vmem:[%s21841_s15 + $0x1e8] sm:$0xff] %v875_v61  ;;  %v879_v63 = vld [vmem:[%s21836_s14 + $0x378] sm:$0xff]  ;;  %v881_v0 = vld [vmem:[%s21836_s14 + $0x400] sm:$0xff] }
  0x36   : > { %878 = vst [vmem:[%s21841_s15 + $0x1f0] sm:$0xff] %v877_v62  ;;  %v883_v1 = vld [vmem:[%s21836_s14 + $0x408] sm:$0xff]  ;;  %880 = vst [vmem:[%s21841_s15 + $0x1f8] sm:$0xff] %v879_v63  ;;  %v885_v2 = vld [vmem:[%s21836_s14 + $0x410] sm:$0xff] }
  0x37   : > { %882 = vst [vmem:[%s21841_s15 + $0x200] sm:$0xff] %v881_v0  ;;  %884 = vst [vmem:[%s21841_s15 + $0x208] sm:$0xff] %v883_v1  ;;  %v887_v3 = vld [vmem:[%s21836_s14 + $0x418] sm:$0xff]  ;;  %v889_v4 = vld [vmem:[%s21836_s14 + $0x420] sm:$0xff] }
  0x38   : > { %886 = vst [vmem:[%s21841_s15 + $0x210] sm:$0xff] %v885_v2  ;;  %888 = vst [vmem:[%s21841_s15 + $0x218] sm:$0xff] %v887_v3  ;;  %v891_v5 = vld [vmem:[%s21836_s14 + $0x428] sm:$0xff]  ;;  %v893_v6 = vld [vmem:[%s21836_s14 + $0x430] sm:$0xff] }
  0x39   : > { %890 = vst [vmem:[%s21841_s15 + $0x220] sm:$0xff] %v889_v4  ;;  %v895_v7 = vld [vmem:[%s21836_s14 + $0x438] sm:$0xff]  ;;  %892 = vst [vmem:[%s21841_s15 + $0x228] sm:$0xff] %v891_v5  ;;  %v897_v8 = vld [vmem:[%s21836_s14 + $0x440] sm:$0xff] }
  0x3a   : > { %894 = vst [vmem:[%s21841_s15 + $0x230] sm:$0xff] %v893_v6  ;;  %896 = vst [vmem:[%s21841_s15 + $0x238] sm:$0xff] %v895_v7  ;;  %v899_v9 = vld [vmem:[%s21836_s14 + $0x448] sm:$0xff]  ;;  %v901_v10 = vld [vmem:[%s21836_s14 + $0x450] sm:$0xff] }
  0x3b   : > { %898 = vst [vmem:[%s21841_s15 + $0x240] sm:$0xff] %v897_v8  ;;  %900 = vst [vmem:[%s21841_s15 + $0x248] sm:$0xff] %v899_v9  ;;  %v903_v11 = vld [vmem:[%s21836_s14 + $0x458] sm:$0xff]  ;;  %v905_v12 = vld [vmem:[%s21836_s14 + $0x460] sm:$0xff] }
  0x3c   : > { %902 = vst [vmem:[%s21841_s15 + $0x250] sm:$0xff] %v901_v10  ;;  %v907_v13 = vld [vmem:[%s21836_s14 + $0x468] sm:$0xff]  ;;  %904 = vst [vmem:[%s21841_s15 + $0x258] sm:$0xff] %v903_v11  ;;  %v909_v14 = vld [vmem:[%s21836_s14 + $0x470] sm:$0xff] }
  0x3d   : > { %906 = vst [vmem:[%s21841_s15 + $0x260] sm:$0xff] %v905_v12  ;;  %908 = vst [vmem:[%s21841_s15 + $0x268] sm:$0xff] %v907_v13  ;;  %v911_v15 = vld [vmem:[%s21836_s14 + $0x478] sm:$0xff]  ;;  %v913_v16 = vld [vmem:[%s21836_s14 + $0x500] sm:$0xff] }
  0x3e   : > { %910 = vst [vmem:[%s21841_s15 + $0x270] sm:$0xff] %v909_v14  ;;  %912 = vst [vmem:[%s21841_s15 + $0x278] sm:$0xff] %v911_v15  ;;  %v915_v17 = vld [vmem:[%s21836_s14 + $0x508] sm:$0xff]  ;;  %v917_v18 = vld [vmem:[%s21836_s14 + $0x510] sm:$0xff] }
  0x3f   : > { %914 = vst [vmem:[%s21841_s15 + $0x280] sm:$0xff] %v913_v16  ;;  %v919_v19 = vld [vmem:[%s21836_s14 + $0x518] sm:$0xff]  ;;  %916 = vst [vmem:[%s21841_s15 + $0x288] sm:$0xff] %v915_v17  ;;  %v921_v20 = vld [vmem:[%s21836_s14 + $0x520] sm:$0xff] }
  0x40   : > { %918 = vst [vmem:[%s21841_s15 + $0x290] sm:$0xff] %v917_v18  ;;  %920 = vst [vmem:[%s21841_s15 + $0x298] sm:$0xff] %v919_v19  ;;  %v923_v21 = vld [vmem:[%s21836_s14 + $0x528] sm:$0xff]  ;;  %v925_v22 = vld [vmem:[%s21836_s14 + $0x530] sm:$0xff] }
  0x41   : > { %922 = vst [vmem:[%s21841_s15 + $0x2a0] sm:$0xff] %v921_v20  ;;  %924 = vst [vmem:[%s21841_s15 + $0x2a8] sm:$0xff] %v923_v21  ;;  %v927_v23 = vld [vmem:[%s21836_s14 + $0x538] sm:$0xff]  ;;  %v929_v24 = vld [vmem:[%s21836_s14 + $0x540] sm:$0xff] }
  0x42   : > { %926 = vst [vmem:[%s21841_s15 + $0x2b0] sm:$0xff] %v925_v22  ;;  %v931_v25 = vld [vmem:[%s21836_s14 + $0x548] sm:$0xff]  ;;  %928 = vst [vmem:[%s21841_s15 + $0x2b8] sm:$0xff] %v927_v23  ;;  %v933_v26 = vld [vmem:[%s21836_s14 + $0x550] sm:$0xff] }
  0x43   : > { %930 = vst [vmem:[%s21841_s15 + $0x2c0] sm:$0xff] %v929_v24  ;;  %932 = vst [vmem:[%s21841_s15 + $0x2c8] sm:$0xff] %v931_v25  ;;  %v935_v27 = vld [vmem:[%s21836_s14 + $0x558] sm:$0xff]  ;;  %v937_v28 = vld [vmem:[%s21836_s14 + $0x560] sm:$0xff] }
  0x44   : > { %934 = vst [vmem:[%s21841_s15 + $0x2d0] sm:$0xff] %v933_v26  ;;  %936 = vst [vmem:[%s21841_s15 + $0x2d8] sm:$0xff] %v935_v27  ;;  %v939_v29 = vld [vmem:[%s21836_s14 + $0x568] sm:$0xff]  ;;  %v941_v30 = vld [vmem:[%s21836_s14 + $0x570] sm:$0xff] }
  0x45   : > { %938 = vst [vmem:[%s21841_s15 + $0x2e0] sm:$0xff] %v937_v28  ;;  %v943_v31 = vld [vmem:[%s21836_s14 + $0x578] sm:$0xff]  ;;  %940 = vst [vmem:[%s21841_s15 + $0x2e8] sm:$0xff] %v939_v29  ;;  %v945_v32 = vld [vmem:[%s21836_s14 + $0x600] sm:$0xff] }
  0x46   : > { %942 = vst [vmem:[%s21841_s15 + $0x2f0] sm:$0xff] %v941_v30  ;;  %944 = vst [vmem:[%s21841_s15 + $0x2f8] sm:$0xff] %v943_v31  ;;  %v947_v33 = vld [vmem:[%s21836_s14 + $0x608] sm:$0xff]  ;;  %v949_v34 = vld [vmem:[%s21836_s14 + $0x610] sm:$0xff] }
  0x47   : > { %946 = vst [vmem:[%s21841_s15 + $0x300] sm:$0xff] %v945_v32  ;;  %948 = vst [vmem:[%s21841_s15 + $0x308] sm:$0xff] %v947_v33  ;;  %v951_v35 = vld [vmem:[%s21836_s14 + $0x618] sm:$0xff]  ;;  %v953_v36 = vld [vmem:[%s21836_s14 + $0x620] sm:$0xff] }
  0x48   : > { %950 = vst [vmem:[%s21841_s15 + $0x310] sm:$0xff] %v949_v34  ;;  %v955_v37 = vld [vmem:[%s21836_s14 + $0x628] sm:$0xff]  ;;  %952 = vst [vmem:[%s21841_s15 + $0x318] sm:$0xff] %v951_v35  ;;  %v957_v38 = vld [vmem:[%s21836_s14 + $0x630] sm:$0xff] }
  0x49   : > { %954 = vst [vmem:[%s21841_s15 + $0x320] sm:$0xff] %v953_v36  ;;  %956 = vst [vmem:[%s21841_s15 + $0x328] sm:$0xff] %v955_v37  ;;  %v959_v39 = vld [vmem:[%s21836_s14 + $0x638] sm:$0xff]  ;;  %v961_v40 = vld [vmem:[%s21836_s14 + $0x640] sm:$0xff] }
  0x4a   : > { %958 = vst [vmem:[%s21841_s15 + $0x330] sm:$0xff] %v957_v38  ;;  %960 = vst [vmem:[%s21841_s15 + $0x338] sm:$0xff] %v959_v39  ;;  %v963_v41 = vld [vmem:[%s21836_s14 + $0x648] sm:$0xff]  ;;  %v965_v42 = vld [vmem:[%s21836_s14 + $0x650] sm:$0xff] }
  0x4b   : > { %962 = vst [vmem:[%s21841_s15 + $0x340] sm:$0xff] %v961_v40  ;;  %v967_v43 = vld [vmem:[%s21836_s14 + $0x658] sm:$0xff]  ;;  %964 = vst [vmem:[%s21841_s15 + $0x348] sm:$0xff] %v963_v41  ;;  %v969_v44 = vld [vmem:[%s21836_s14 + $0x660] sm:$0xff] }
  0x4c   : > { %966 = vst [vmem:[%s21841_s15 + $0x350] sm:$0xff] %v965_v42  ;;  %968 = vst [vmem:[%s21841_s15 + $0x358] sm:$0xff] %v967_v43  ;;  %v971_v45 = vld [vmem:[%s21836_s14 + $0x668] sm:$0xff]  ;;  %v973_v46 = vld [vmem:[%s21836_s14 + $0x670] sm:$0xff] }
  0x4d   : > { %970 = vst [vmem:[%s21841_s15 + $0x360] sm:$0xff] %v969_v44  ;;  %972 = vst [vmem:[%s21841_s15 + $0x368] sm:$0xff] %v971_v45  ;;  %v975_v47 = vld [vmem:[%s21836_s14 + $0x678] sm:$0xff]  ;;  %v977_v48 = vld [vmem:[%s21836_s14 + $0x700] sm:$0xff] }
  0x4e   : > { %974 = vst [vmem:[%s21841_s15 + $0x370] sm:$0xff] %v973_v46  ;;  %v979_v49 = vld [vmem:[%s21836_s14 + $0x708] sm:$0xff]  ;;  %976 = vst [vmem:[%s21841_s15 + $0x378] sm:$0xff] %v975_v47  ;;  %v981_v50 = vld [vmem:[%s21836_s14 + $0x710] sm:$0xff] }
  0x4f   : > { %978 = vst [vmem:[%s21841_s15 + $0x380] sm:$0xff] %v977_v48  ;;  %980 = vst [vmem:[%s21841_s15 + $0x388] sm:$0xff] %v979_v49  ;;  %v983_v51 = vld [vmem:[%s21836_s14 + $0x718] sm:$0xff]  ;;  %v985_v52 = vld [vmem:[%s21836_s14 + $0x720] sm:$0xff] }
  0x50   : > { %982 = vst [vmem:[%s21841_s15 + $0x390] sm:$0xff] %v981_v50  ;;  %984 = vst [vmem:[%s21841_s15 + $0x398] sm:$0xff] %v983_v51  ;;  %v987_v53 = vld [vmem:[%s21836_s14 + $0x728] sm:$0xff]  ;;  %v989_v54 = vld [vmem:[%s21836_s14 + $0x730] sm:$0xff] }
  0x51   : > { %986 = vst [vmem:[%s21841_s15 + $0x3a0] sm:$0xff] %v985_v52  ;;  %v991_v55 = vld [vmem:[%s21836_s14 + $0x738] sm:$0xff]  ;;  %988 = vst [vmem:[%s21841_s15 + $0x3a8] sm:$0xff] %v987_v53  ;;  %v993_v56 = vld [vmem:[%s21836_s14 + $0x740] sm:$0xff] }
  0x52   : > { %990 = vst [vmem:[%s21841_s15 + $0x3b0] sm:$0xff] %v989_v54  ;;  %992 = vst [vmem:[%s21841_s15 + $0x3b8] sm:$0xff] %v991_v55  ;;  %v995_v57 = vld [vmem:[%s21836_s14 + $0x748] sm:$0xff]  ;;  %v997_v58 = vld [vmem:[%s21836_s14 + $0x750] sm:$0xff] }
  0x53   : > { %994 = vst [vmem:[%s21841_s15 + $0x3c0] sm:$0xff] %v993_v56  ;;  %996 = vst [vmem:[%s21841_s15 + $0x3c8] sm:$0xff] %v995_v57  ;;  %v999_v59 = vld [vmem:[%s21836_s14 + $0x758] sm:$0xff]  ;;  %v1001_v60 = vld [vmem:[%s21836_s14 + $0x760] sm:$0xff] }
  0x54   : > { %998 = vst [vmem:[%s21841_s15 + $0x3d0] sm:$0xff] %v997_v58  ;;  %v1003_v61 = vld [vmem:[%s21836_s14 + $0x768] sm:$0xff]  ;;  %1000 = vst [vmem:[%s21841_s15 + $0x3d8] sm:$0xff] %v999_v59  ;;  %v1005_v62 = vld [vmem:[%s21836_s14 + $0x770] sm:$0xff] }
  0x55   : > { %1002 = vst [vmem:[%s21841_s15 + $0x3e0] sm:$0xff] %v1001_v60  ;;  %1004 = vst [vmem:[%s21841_s15 + $0x3e8] sm:$0xff] %v1003_v61  ;;  %v1007_v63 = vld [vmem:[%s21836_s14 + $0x778] sm:$0xff]  ;;  %v1009_v0 = vld [vmem:[%s21836_s14 + $0x800] sm:$0xff] }
  0x56   : > { %1006 = vst [vmem:[%s21841_s15 + $0x3f0] sm:$0xff] %v1005_v62  ;;  %1008 = vst [vmem:[%s21841_s15 + $0x3f8] sm:$0xff] %v1007_v63  ;;  %v1011_v1 = vld [vmem:[%s21836_s14 + $0x808] sm:$0xff]  ;;  %v1013_v2 = vld [vmem:[%s21836_s14 + $0x810] sm:$0xff] }
  0x57   : > { %1010 = vst [vmem:[%s21841_s15 + $0x400] sm:$0xff] %v1009_v0  ;;  %v1015_v3 = vld [vmem:[%s21836_s14 + $0x818] sm:$0xff]  ;;  %1012 = vst [vmem:[%s21841_s15 + $0x408] sm:$0xff] %v1011_v1  ;;  %v1017_v4 = vld [vmem:[%s21836_s14 + $0x820] sm:$0xff] }
  0x58   : > { %1014 = vst [vmem:[%s21841_s15 + $0x410] sm:$0xff] %v1013_v2  ;;  %1016 = vst [vmem:[%s21841_s15 + $0x418] sm:$0xff] %v1015_v3  ;;  %v1019_v5 = vld [vmem:[%s21836_s14 + $0x828] sm:$0xff]  ;;  %v1021_v6 = vld [vmem:[%s21836_s14 + $0x830] sm:$0xff] }
  0x59   : > { %1018 = vst [vmem:[%s21841_s15 + $0x420] sm:$0xff] %v1017_v4  ;;  %1020 = vst [vmem:[%s21841_s15 + $0x428] sm:$0xff] %v1019_v5  ;;  %v1023_v7 = vld [vmem:[%s21836_s14 + $0x838] sm:$0xff]  ;;  %v1025_v8 = vld [vmem:[%s21836_s14 + $0x840] sm:$0xff] }
  0x5a   : > { %1022 = vst [vmem:[%s21841_s15 + $0x430] sm:$0xff] %v1021_v6  ;;  %v1027_v9 = vld [vmem:[%s21836_s14 + $0x848] sm:$0xff]  ;;  %1024 = vst [vmem:[%s21841_s15 + $0x438] sm:$0xff] %v1023_v7  ;;  %v1029_v10 = vld [vmem:[%s21836_s14 + $0x850] sm:$0xff] }
  0x5b   : > { %1026 = vst [vmem:[%s21841_s15 + $0x440] sm:$0xff] %v1025_v8  ;;  %1028 = vst [vmem:[%s21841_s15 + $0x448] sm:$0xff] %v1027_v9  ;;  %v1031_v11 = vld [vmem:[%s21836_s14 + $0x858] sm:$0xff]  ;;  %v1033_v12 = vld [vmem:[%s21836_s14 + $0x860] sm:$0xff] }
  0x5c   : > { %1030 = vst [vmem:[%s21841_s15 + $0x450] sm:$0xff] %v1029_v10  ;;  %1032 = vst [vmem:[%s21841_s15 + $0x458] sm:$0xff] %v1031_v11  ;;  %v1035_v13 = vld [vmem:[%s21836_s14 + $0x868] sm:$0xff]  ;;  %v1037_v14 = vld [vmem:[%s21836_s14 + $0x870] sm:$0xff] }
  0x5d   : > { %1034 = vst [vmem:[%s21841_s15 + $0x460] sm:$0xff] %v1033_v12  ;;  %v1039_v15 = vld [vmem:[%s21836_s14 + $0x878] sm:$0xff]  ;;  %1036 = vst [vmem:[%s21841_s15 + $0x468] sm:$0xff] %v1035_v13  ;;  %v1041_v16 = vld [vmem:[%s21836_s14 + $0x900] sm:$0xff] }
  0x5e   : > { %1038 = vst [vmem:[%s21841_s15 + $0x470] sm:$0xff] %v1037_v14  ;;  %1040 = vst [vmem:[%s21841_s15 + $0x478] sm:$0xff] %v1039_v15  ;;  %v1043_v17 = vld [vmem:[%s21836_s14 + $0x908] sm:$0xff]  ;;  %v1045_v18 = vld [vmem:[%s21836_s14 + $0x910] sm:$0xff] }
  0x5f   : > { %1042 = vst [vmem:[%s21841_s15 + $0x480] sm:$0xff] %v1041_v16  ;;  %1044 = vst [vmem:[%s21841_s15 + $0x488] sm:$0xff] %v1043_v17  ;;  %v1047_v19 = vld [vmem:[%s21836_s14 + $0x918] sm:$0xff]  ;;  %v1049_v20 = vld [vmem:[%s21836_s14 + $0x920] sm:$0xff] }
  0x60   : > { %1046 = vst [vmem:[%s21841_s15 + $0x490] sm:$0xff] %v1045_v18  ;;  %v1051_v21 = vld [vmem:[%s21836_s14 + $0x928] sm:$0xff]  ;;  %1048 = vst [vmem:[%s21841_s15 + $0x498] sm:$0xff] %v1047_v19  ;;  %v1053_v22 = vld [vmem:[%s21836_s14 + $0x930] sm:$0xff] }
  0x61   : > { %1050 = vst [vmem:[%s21841_s15 + $0x4a0] sm:$0xff] %v1049_v20  ;;  %1052 = vst [vmem:[%s21841_s15 + $0x4a8] sm:$0xff] %v1051_v21  ;;  %v1055_v23 = vld [vmem:[%s21836_s14 + $0x938] sm:$0xff]  ;;  %v1057_v24 = vld [vmem:[%s21836_s14 + $0x940] sm:$0xff] }
  0x62   : > { %1054 = vst [vmem:[%s21841_s15 + $0x4b0] sm:$0xff] %v1053_v22  ;;  %1056 = vst [vmem:[%s21841_s15 + $0x4b8] sm:$0xff] %v1055_v23  ;;  %v1059_v25 = vld [vmem:[%s21836_s14 + $0x948] sm:$0xff]  ;;  %v1061_v26 = vld [vmem:[%s21836_s14 + $0x950] sm:$0xff] }
  0x63   : > { %1058 = vst [vmem:[%s21841_s15 + $0x4c0] sm:$0xff] %v1057_v24  ;;  %v1063_v27 = vld [vmem:[%s21836_s14 + $0x958] sm:$0xff]  ;;  %1060 = vst [vmem:[%s21841_s15 + $0x4c8] sm:$0xff] %v1059_v25  ;;  %v1065_v28 = vld [vmem:[%s21836_s14 + $0x960] sm:$0xff] }
  0x64   : > { %1062 = vst [vmem:[%s21841_s15 + $0x4d0] sm:$0xff] %v1061_v26  ;;  %1064 = vst [vmem:[%s21841_s15 + $0x4d8] sm:$0xff] %v1063_v27  ;;  %v1067_v29 = vld [vmem:[%s21836_s14 + $0x968] sm:$0xff]  ;;  %v1069_v30 = vld [vmem:[%s21836_s14 + $0x970] sm:$0xff] }
  0x65   : > { %1066 = vst [vmem:[%s21841_s15 + $0x4e0] sm:$0xff] %v1065_v28  ;;  %1068 = vst [vmem:[%s21841_s15 + $0x4e8] sm:$0xff] %v1067_v29  ;;  %v1071_v31 = vld [vmem:[%s21836_s14 + $0x978] sm:$0xff]  ;;  %v1073_v32 = vld [vmem:[%s21836_s14 + $0xa00] sm:$0xff] }
  0x66   : > { %1070 = vst [vmem:[%s21841_s15 + $0x4f0] sm:$0xff] %v1069_v30  ;;  %v1075_v33 = vld [vmem:[%s21836_s14 + $0xa08] sm:$0xff]  ;;  %1072 = vst [vmem:[%s21841_s15 + $0x4f8] sm:$0xff] %v1071_v31  ;;  %v1077_v34 = vld [vmem:[%s21836_s14 + $0xa10] sm:$0xff] }
  0x67   : > { %1074 = vst [vmem:[%s21841_s15 + $0x500] sm:$0xff] %v1073_v32  ;;  %1076 = vst [vmem:[%s21841_s15 + $0x508] sm:$0xff] %v1075_v33  ;;  %v1079_v35 = vld [vmem:[%s21836_s14 + $0xa18] sm:$0xff]  ;;  %v1081_v36 = vld [vmem:[%s21836_s14 + $0xa20] sm:$0xff] }
  0x68   : > { %1078 = vst [vmem:[%s21841_s15 + $0x510] sm:$0xff] %v1077_v34  ;;  %1080 = vst [vmem:[%s21841_s15 + $0x518] sm:$0xff] %v1079_v35  ;;  %v1083_v37 = vld [vmem:[%s21836_s14 + $0xa28] sm:$0xff]  ;;  %v1085_v38 = vld [vmem:[%s21836_s14 + $0xa30] sm:$0xff] }
  0x69   : > { %1082 = vst [vmem:[%s21841_s15 + $0x520] sm:$0xff] %v1081_v36  ;;  %v1087_v39 = vld [vmem:[%s21836_s14 + $0xa38] sm:$0xff]  ;;  %1084 = vst [vmem:[%s21841_s15 + $0x528] sm:$0xff] %v1083_v37  ;;  %v1089_v40 = vld [vmem:[%s21836_s14 + $0xa40] sm:$0xff] }
  0x6a   : > { %1086 = vst [vmem:[%s21841_s15 + $0x530] sm:$0xff] %v1085_v38  ;;  %1088 = vst [vmem:[%s21841_s15 + $0x538] sm:$0xff] %v1087_v39  ;;  %v1091_v41 = vld [vmem:[%s21836_s14 + $0xa48] sm:$0xff]  ;;  %v1093_v42 = vld [vmem:[%s21836_s14 + $0xa50] sm:$0xff] }
  0x6b   : > { %1090 = vst [vmem:[%s21841_s15 + $0x540] sm:$0xff] %v1089_v40  ;;  %1092 = vst [vmem:[%s21841_s15 + $0x548] sm:$0xff] %v1091_v41  ;;  %v1095_v43 = vld [vmem:[%s21836_s14 + $0xa58] sm:$0xff]  ;;  %v1097_v44 = vld [vmem:[%s21836_s14 + $0xa60] sm:$0xff] }
  0x6c   : > { %1094 = vst [vmem:[%s21841_s15 + $0x550] sm:$0xff] %v1093_v42  ;;  %v1099_v45 = vld [vmem:[%s21836_s14 + $0xa68] sm:$0xff]  ;;  %1096 = vst [vmem:[%s21841_s15 + $0x558] sm:$0xff] %v1095_v43  ;;  %v1101_v46 = vld [vmem:[%s21836_s14 + $0xa70] sm:$0xff] }
  0x6d   : > { %1098 = vst [vmem:[%s21841_s15 + $0x560] sm:$0xff] %v1097_v44  ;;  %1100 = vst [vmem:[%s21841_s15 + $0x568] sm:$0xff] %v1099_v45  ;;  %v1103_v47 = vld [vmem:[%s21836_s14 + $0xa78] sm:$0xff]  ;;  %v1105_v48 = vld [vmem:[%s21836_s14 + $0xb00] sm:$0xff] }
  0x6e   : > { %1102 = vst [vmem:[%s21841_s15 + $0x570] sm:$0xff] %v1101_v46  ;;  %1104 = vst [vmem:[%s21841_s15 + $0x578] sm:$0xff] %v1103_v47  ;;  %v1107_v49 = vld [vmem:[%s21836_s14 + $0xb08] sm:$0xff]  ;;  %v1109_v50 = vld [vmem:[%s21836_s14 + $0xb10] sm:$0xff] }
  0x6f   : > { %1106 = vst [vmem:[%s21841_s15 + $0x580] sm:$0xff] %v1105_v48  ;;  %v1111_v51 = vld [vmem:[%s21836_s14 + $0xb18] sm:$0xff]  ;;  %1108 = vst [vmem:[%s21841_s15 + $0x588] sm:$0xff] %v1107_v49  ;;  %v1113_v52 = vld [vmem:[%s21836_s14 + $0xb20] sm:$0xff] }
  0x70   : > { %1110 = vst [vmem:[%s21841_s15 + $0x590] sm:$0xff] %v1109_v50  ;;  %1112 = vst [vmem:[%s21841_s15 + $0x598] sm:$0xff] %v1111_v51  ;;  %v1115_v53 = vld [vmem:[%s21836_s14 + $0xb28] sm:$0xff]  ;;  %v1117_v54 = vld [vmem:[%s21836_s14 + $0xb30] sm:$0xff] }
  0x71   : > { %1114 = vst [vmem:[%s21841_s15 + $0x5a0] sm:$0xff] %v1113_v52  ;;  %1116 = vst [vmem:[%s21841_s15 + $0x5a8] sm:$0xff] %v1115_v53  ;;  %v1119_v55 = vld [vmem:[%s21836_s14 + $0xb38] sm:$0xff]  ;;  %v1121_v56 = vld [vmem:[%s21836_s14 + $0xb40] sm:$0xff] }
  0x72   : > { %1118 = vst [vmem:[%s21841_s15 + $0x5b0] sm:$0xff] %v1117_v54  ;;  %v1123_v57 = vld [vmem:[%s21836_s14 + $0xb48] sm:$0xff]  ;;  %1120 = vst [vmem:[%s21841_s15 + $0x5b8] sm:$0xff] %v1119_v55  ;;  %v1125_v58 = vld [vmem:[%s21836_s14 + $0xb50] sm:$0xff] }
  0x73   : > { %1122 = vst [vmem:[%s21841_s15 + $0x5c0] sm:$0xff] %v1121_v56  ;;  %1124 = vst [vmem:[%s21841_s15 + $0x5c8] sm:$0xff] %v1123_v57  ;;  %v1127_v59 = vld [vmem:[%s21836_s14 + $0xb58] sm:$0xff]  ;;  %v1129_v60 = vld [vmem:[%s21836_s14 + $0xb60] sm:$0xff] }
  0x74   : > { %1126 = vst [vmem:[%s21841_s15 + $0x5d0] sm:$0xff] %v1125_v58  ;;  %1128 = vst [vmem:[%s21841_s15 + $0x5d8] sm:$0xff] %v1127_v59  ;;  %v1131_v61 = vld [vmem:[%s21836_s14 + $0xb68] sm:$0xff]  ;;  %v1133_v62 = vld [vmem:[%s21836_s14 + $0xb70] sm:$0xff] }
  0x75   : > { %1130 = vst [vmem:[%s21841_s15 + $0x5e0] sm:$0xff] %v1129_v60  ;;  %v1135_v63 = vld [vmem:[%s21836_s14 + $0xb78] sm:$0xff]  ;;  %1132 = vst [vmem:[%s21841_s15 + $0x5e8] sm:$0xff] %v1131_v61  ;;  %v1137_v0 = vld [vmem:[%s21836_s14 + $0xc00] sm:$0xff] }
  0x76   : > { %1134 = vst [vmem:[%s21841_s15 + $0x5f0] sm:$0xff] %v1133_v62  ;;  %1136 = vst [vmem:[%s21841_s15 + $0x5f8] sm:$0xff] %v1135_v63  ;;  %v1139_v1 = vld [vmem:[%s21836_s14 + $0xc08] sm:$0xff]  ;;  %v1141_v2 = vld [vmem:[%s21836_s14 + $0xc10] sm:$0xff] }
  0x77   : > { %1138 = vst [vmem:[%s21841_s15 + $0x600] sm:$0xff] %v1137_v0  ;;  %1140 = vst [vmem:[%s21841_s15 + $0x608] sm:$0xff] %v1139_v1  ;;  %v1143_v3 = vld [vmem:[%s21836_s14 + $0xc18] sm:$0xff]  ;;  %v1145_v4 = vld [vmem:[%s21836_s14 + $0xc20] sm:$0xff] }
  0x78   : > { %1142 = vst [vmem:[%s21841_s15 + $0x610] sm:$0xff] %v1141_v2  ;;  %v1147_v5 = vld [vmem:[%s21836_s14 + $0xc28] sm:$0xff]  ;;  %1144 = vst [vmem:[%s21841_s15 + $0x618] sm:$0xff] %v1143_v3  ;;  %v1149_v6 = vld [vmem:[%s21836_s14 + $0xc30] sm:$0xff] }
  0x79   : > { %1146 = vst [vmem:[%s21841_s15 + $0x620] sm:$0xff] %v1145_v4  ;;  %1148 = vst [vmem:[%s21841_s15 + $0x628] sm:$0xff] %v1147_v5  ;;  %v1151_v7 = vld [vmem:[%s21836_s14 + $0xc38] sm:$0xff]  ;;  %v1153_v8 = vld [vmem:[%s21836_s14 + $0xc40] sm:$0xff] }
  0x7a   : > { %1150 = vst [vmem:[%s21841_s15 + $0x630] sm:$0xff] %v1149_v6  ;;  %1152 = vst [vmem:[%s21841_s15 + $0x638] sm:$0xff] %v1151_v7  ;;  %v1155_v9 = vld [vmem:[%s21836_s14 + $0xc48] sm:$0xff]  ;;  %v1157_v10 = vld [vmem:[%s21836_s14 + $0xc50] sm:$0xff] }
  0x7b   : > { %1154 = vst [vmem:[%s21841_s15 + $0x640] sm:$0xff] %v1153_v8  ;;  %v1159_v11 = vld [vmem:[%s21836_s14 + $0xc58] sm:$0xff]  ;;  %1156 = vst [vmem:[%s21841_s15 + $0x648] sm:$0xff] %v1155_v9  ;;  %v1161_v12 = vld [vmem:[%s21836_s14 + $0xc60] sm:$0xff] }
  0x7c   : > { %1158 = vst [vmem:[%s21841_s15 + $0x650] sm:$0xff] %v1157_v10  ;;  %1160 = vst [vmem:[%s21841_s15 + $0x658] sm:$0xff] %v1159_v11  ;;  %v1163_v13 = vld [vmem:[%s21836_s14 + $0xc68] sm:$0xff]  ;;  %v1165_v14 = vld [vmem:[%s21836_s14 + $0xc70] sm:$0xff] }
  0x7d   : > { %1162 = vst [vmem:[%s21841_s15 + $0x660] sm:$0xff] %v1161_v12  ;;  %1164 = vst [vmem:[%s21841_s15 + $0x668] sm:$0xff] %v1163_v13  ;;  %v1167_v15 = vld [vmem:[%s21836_s14 + $0xc78] sm:$0xff]  ;;  %v1169_v16 = vld [vmem:[%s21836_s14 + $0xd00] sm:$0xff] }
  0x7e   : > { %1166 = vst [vmem:[%s21841_s15 + $0x670] sm:$0xff] %v1165_v14  ;;  %v1171_v17 = vld [vmem:[%s21836_s14 + $0xd08] sm:$0xff]  ;;  %1168 = vst [vmem:[%s21841_s15 + $0x678] sm:$0xff] %v1167_v15  ;;  %v1173_v18 = vld [vmem:[%s21836_s14 + $0xd10] sm:$0xff] }
  0x7f   : > { %1170 = vst [vmem:[%s21841_s15 + $0x680] sm:$0xff] %v1169_v16  ;;  %1172 = vst [vmem:[%s21841_s15 + $0x688] sm:$0xff] %v1171_v17  ;;  %v1175_v19 = vld [vmem:[%s21836_s14 + $0xd18] sm:$0xff]  ;;  %v1177_v20 = vld [vmem:[%s21836_s14 + $0xd20] sm:$0xff] }
  0x80   : > { %1174 = vst [vmem:[%s21841_s15 + $0x690] sm:$0xff] %v1173_v18  ;;  %1176 = vst [vmem:[%s21841_s15 + $0x698] sm:$0xff] %v1175_v19  ;;  %v1179_v21 = vld [vmem:[%s21836_s14 + $0xd28] sm:$0xff]  ;;  %v1181_v22 = vld [vmem:[%s21836_s14 + $0xd30] sm:$0xff] }
  0x81   : > { %1178 = vst [vmem:[%s21841_s15 + $0x6a0] sm:$0xff] %v1177_v20  ;;  %v1183_v23 = vld [vmem:[%s21836_s14 + $0xd38] sm:$0xff]  ;;  %1180 = vst [vmem:[%s21841_s15 + $0x6a8] sm:$0xff] %v1179_v21  ;;  %v1185_v24 = vld [vmem:[%s21836_s14 + $0xd40] sm:$0xff] }
  0x82   : > { %1182 = vst [vmem:[%s21841_s15 + $0x6b0] sm:$0xff] %v1181_v22  ;;  %1184 = vst [vmem:[%s21841_s15 + $0x6b8] sm:$0xff] %v1183_v23  ;;  %v1187_v25 = vld [vmem:[%s21836_s14 + $0xd48] sm:$0xff]  ;;  %v1189_v26 = vld [vmem:[%s21836_s14 + $0xd50] sm:$0xff] }
  0x83   : > { %1186 = vst [vmem:[%s21841_s15 + $0x6c0] sm:$0xff] %v1185_v24  ;;  %1188 = vst [vmem:[%s21841_s15 + $0x6c8] sm:$0xff] %v1187_v25  ;;  %v1191_v27 = vld [vmem:[%s21836_s14 + $0xd58] sm:$0xff]  ;;  %v1193_v28 = vld [vmem:[%s21836_s14 + $0xd60] sm:$0xff] }
  0x84   : > { %1190 = vst [vmem:[%s21841_s15 + $0x6d0] sm:$0xff] %v1189_v26  ;;  %v1195_v29 = vld [vmem:[%s21836_s14 + $0xd68] sm:$0xff]  ;;  %1192 = vst [vmem:[%s21841_s15 + $0x6d8] sm:$0xff] %v1191_v27  ;;  %v1197_v30 = vld [vmem:[%s21836_s14 + $0xd70] sm:$0xff] }
  0x85   : > { %1194 = vst [vmem:[%s21841_s15 + $0x6e0] sm:$0xff] %v1193_v28  ;;  %1196 = vst [vmem:[%s21841_s15 + $0x6e8] sm:$0xff] %v1195_v29  ;;  %v1199_v31 = vld [vmem:[%s21836_s14 + $0xd78] sm:$0xff]  ;;  %v1201_v32 = vld [vmem:[%s21836_s14 + $0xe00] sm:$0xff] }
  0x86   : > { %1198 = vst [vmem:[%s21841_s15 + $0x6f0] sm:$0xff] %v1197_v30  ;;  %1200 = vst [vmem:[%s21841_s15 + $0x6f8] sm:$0xff] %v1199_v31  ;;  %v1203_v33 = vld [vmem:[%s21836_s14 + $0xe08] sm:$0xff]  ;;  %v1205_v34 = vld [vmem:[%s21836_s14 + $0xe10] sm:$0xff] }
  0x87   : > { %1202 = vst [vmem:[%s21841_s15 + $0x700] sm:$0xff] %v1201_v32  ;;  %v1207_v35 = vld [vmem:[%s21836_s14 + $0xe18] sm:$0xff]  ;;  %1204 = vst [vmem:[%s21841_s15 + $0x708] sm:$0xff] %v1203_v33  ;;  %v1209_v36 = vld [vmem:[%s21836_s14 + $0xe20] sm:$0xff] }
  0x88   : > { %1206 = vst [vmem:[%s21841_s15 + $0x710] sm:$0xff] %v1205_v34  ;;  %1208 = vst [vmem:[%s21841_s15 + $0x718] sm:$0xff] %v1207_v35  ;;  %v1211_v37 = vld [vmem:[%s21836_s14 + $0xe28] sm:$0xff]  ;;  %v1213_v38 = vld [vmem:[%s21836_s14 + $0xe30] sm:$0xff] }
  0x89   : > { %1210 = vst [vmem:[%s21841_s15 + $0x720] sm:$0xff] %v1209_v36  ;;  %1212 = vst [vmem:[%s21841_s15 + $0x728] sm:$0xff] %v1211_v37  ;;  %v1215_v39 = vld [vmem:[%s21836_s14 + $0xe38] sm:$0xff]  ;;  %v1217_v40 = vld [vmem:[%s21836_s14 + $0xe40] sm:$0xff] }
  0x8a   : > { %1214 = vst [vmem:[%s21841_s15 + $0x730] sm:$0xff] %v1213_v38  ;;  %v1219_v41 = vld [vmem:[%s21836_s14 + $0xe48] sm:$0xff]  ;;  %1216 = vst [vmem:[%s21841_s15 + $0x738] sm:$0xff] %v1215_v39  ;;  %v1221_v42 = vld [vmem:[%s21836_s14 + $0xe50] sm:$0xff] }
  0x8b   : > { %1218 = vst [vmem:[%s21841_s15 + $0x740] sm:$0xff] %v1217_v40  ;;  %1220 = vst [vmem:[%s21841_s15 + $0x748] sm:$0xff] %v1219_v41  ;;  %v1223_v43 = vld [vmem:[%s21836_s14 + $0xe58] sm:$0xff]  ;;  %v1225_v44 = vld [vmem:[%s21836_s14 + $0xe60] sm:$0xff] }
  0x8c   : > { %1222 = vst [vmem:[%s21841_s15 + $0x750] sm:$0xff] %v1221_v42  ;;  %1224 = vst [vmem:[%s21841_s15 + $0x758] sm:$0xff] %v1223_v43  ;;  %v1227_v45 = vld [vmem:[%s21836_s14 + $0xe68] sm:$0xff]  ;;  %v1229_v46 = vld [vmem:[%s21836_s14 + $0xe70] sm:$0xff] }
  0x8d   : > { %1226 = vst [vmem:[%s21841_s15 + $0x760] sm:$0xff] %v1225_v44  ;;  %v1231_v47 = vld [vmem:[%s21836_s14 + $0xe78] sm:$0xff]  ;;  %1228 = vst [vmem:[%s21841_s15 + $0x768] sm:$0xff] %v1227_v45  ;;  %v1233_v48 = vld [vmem:[%s21836_s14 + $0xf00] sm:$0xff] }
  0x8e   : > { %1230 = vst [vmem:[%s21841_s15 + $0x770] sm:$0xff] %v1229_v46  ;;  %1232 = vst [vmem:[%s21841_s15 + $0x778] sm:$0xff] %v1231_v47  ;;  %v1235_v49 = vld [vmem:[%s21836_s14 + $0xf08] sm:$0xff]  ;;  %v1237_v50 = vld [vmem:[%s21836_s14 + $0xf10] sm:$0xff] }
  0x8f   : > { %1234 = vst [vmem:[%s21841_s15 + $0x780] sm:$0xff] %v1233_v48  ;;  %1236 = vst [vmem:[%s21841_s15 + $0x788] sm:$0xff] %v1235_v49  ;;  %v1239_v51 = vld [vmem:[%s21836_s14 + $0xf18] sm:$0xff]  ;;  %v1241_v52 = vld [vmem:[%s21836_s14 + $0xf20] sm:$0xff] }
  0x90   : > { %1238 = vst [vmem:[%s21841_s15 + $0x790] sm:$0xff] %v1237_v50  ;;  %v1243_v53 = vld [vmem:[%s21836_s14 + $0xf28] sm:$0xff]  ;;  %1240 = vst [vmem:[%s21841_s15 + $0x798] sm:$0xff] %v1239_v51  ;;  %v1245_v54 = vld [vmem:[%s21836_s14 + $0xf30] sm:$0xff] }
  0x91   : > { %1242 = vst [vmem:[%s21841_s15 + $0x7a0] sm:$0xff] %v1241_v52  ;;  %1244 = vst [vmem:[%s21841_s15 + $0x7a8] sm:$0xff] %v1243_v53  ;;  %v1247_v55 = vld [vmem:[%s21836_s14 + $0xf38] sm:$0xff]  ;;  %v1249_v56 = vld [vmem:[%s21836_s14 + $0xf40] sm:$0xff] }
  0x92   : > { %1246 = vst [vmem:[%s21841_s15 + $0x7b0] sm:$0xff] %v1245_v54  ;;  %1248 = vst [vmem:[%s21841_s15 + $0x7b8] sm:$0xff] %v1247_v55  ;;  %v1251_v57 = vld [vmem:[%s21836_s14 + $0xf48] sm:$0xff]  ;;  %v1253_v58 = vld [vmem:[%s21836_s14 + $0xf50] sm:$0xff] }
  0x93   : > { %1250 = vst [vmem:[%s21841_s15 + $0x7c0] sm:$0xff] %v1249_v56  ;;  %v1255_v59 = vld [vmem:[%s21836_s14 + $0xf58] sm:$0xff]  ;;  %1252 = vst [vmem:[%s21841_s15 + $0x7c8] sm:$0xff] %v1251_v57  ;;  %v1257_v60 = vld [vmem:[%s21836_s14 + $0xf60] sm:$0xff] }
  0x94   : > { %1254 = vst [vmem:[%s21841_s15 + $0x7d0] sm:$0xff] %v1253_v58  ;;  %1256 = vst [vmem:[%s21841_s15 + $0x7d8] sm:$0xff] %v1255_v59  ;;  %v1259_v61 = vld [vmem:[%s21836_s14 + $0xf68] sm:$0xff]  ;;  %v1261_v62 = vld [vmem:[%s21836_s14 + $0xf70] sm:$0xff] }
  0x95   : > { %1258 = vst [vmem:[%s21841_s15 + $0x7e0] sm:$0xff] %v1257_v60  ;;  %1260 = vst [vmem:[%s21841_s15 + $0x7e8] sm:$0xff] %v1259_v61  ;;  %v1263_v63 = vld [vmem:[%s21836_s14 + $0xf78] sm:$0xff] }
  0x96   : > { %1262 = vst [vmem:[%s21841_s15 + $0x7f0] sm:$0xff] %v1261_v62  ;;  %1264 = vst [vmem:[%s21841_s15 + $0x7f8] sm:$0xff] %v1263_v63 }
  0x97 PF: > { %p13576_p10 = scmp.ge.s32.totalorder %s21736_s24, 1  ;;  %p1269_p11 = scmp.lt.s32.totalorder %s21736_s24, 3 }
  0x99   : > { %p1270_p12 = pnand %p13576_p10, %p1269_p11 }
  0x9a   : > { %v1341_v0 = vld [vmem:[%s26648_s2] sm:$0xff] (!%p1270_p12)  ;;  %v1342_v1 = vld [vmem:[%s26648_s2 + $0x8] sm:$0xff] (!%p1270_p12)  ;;  %v1343_v2 = vld [vmem:[%s26648_s2 + $0x10] sm:$0xff] (!%p1270_p12)  ;;  %s22364_s28 = sand.u32 (!%p1270_p12), 1, %s21728_s22   ;;  %vm1677_vm0 = vcmask (!%p1270_p12), 523264   ;;  %vm2022_vm1 = vcmask (!%p1270_p12), 130048  }
  0x9b   : > { %1273 = sbr.rel (%p1270_p12) target bundleno = 8729 (0x2219), region = 78  ;;  %v19694_v3 = vpack.c.bf16 (!%p1270_p12), %v1342_v1, %v1341_v0  ;;  %v1344_v4 = vld [vmem:[%s26648_s2 + $0x18] sm:$0xff] (!%p1270_p12)  ;;  %s13577_s10 = sshll.u32 (!%p1270_p12), %s22364_s28, 11  ;;  %v1345_v6 = vld [vmem:[%s26648_s2 + $0x20] sm:$0xff] (!%p1270_p12)  ;;  %v1346_v7 = vld [vmem:[%s26648_s2 + $0x28] sm:$0xff] (!%p1270_p12)  ;;  %vm2790_vm2 = vcmask (!%p1270_p12), 261248  }
  0x9c   : > { %v19698_v5 = vpack.c.bf16 (!%p1270_p12), %v1344_v4, %v1343_v2  ;;  %v19702_v8 = vpack.c.bf16 (!%p1270_p12), %v1346_v7, %v1345_v6  ;;  %s22376_s15 = scalar_lea.vmem (!%p1270_p12), [#allocation2], %s13577_s10  ;;  %v1347_v10 = vld [vmem:[%s26648_s2 + $0x30] sm:$0xff] (!%p1270_p12)  ;;  %v1348_v11 = vld [vmem:[%s26648_s2 + $0x38] sm:$0xff] (!%p1270_p12)  ;;  %v1349_v13 = vld [vmem:[%s26648_s2 + $0x40] sm:$0xff] (!%p1270_p12)  ;;  %s13578_s26 = sshll.u32 (!%p1270_p12), %s22364_s28, 8  ;;  %vm3558_vm3 = vcmask (!%p1270_p12), 392448  }
  0x9d   : > { %19695 = vmatprep.subr.bf16.mxu0 (!%p1270_p12), %v19694_v3  ;;  %v1325_v9 = vld [vmem:[%s22376_s15] sm:$0xff] (!%p1270_p12)  ;;  %v19706_v12 = vpack.c.bf16 (!%p1270_p12), %v1348_v11, %v1347_v10  ;;  %v1350_v14 = vld [vmem:[%s26648_s2 + $0x48] sm:$0xff] (!%p1270_p12)  ;;  %v1351_v16 = vld [vmem:[%s26648_s2 + $0x50] sm:$0xff] (!%p1270_p12)  ;;  %s22719_s10 = scalar_lea.vmem (!%p1270_p12), [#allocation3], %s13578_s26  ;;  %s21738_s20 = smov (!%p1270_p12), 16   ;;  %vm4326_vm4 = vcmask (!%p1270_p12), 523648  }
  0x9e   : > { %19697 = vmatpush3.bf16.msra.mxu0 (!%p1270_p12), %v19694_v3  ;;  %16398 = vmatprep.mubr.f32.mxu0 (!%p1270_p12), %v1325_v9  ;;  %v19710_v15 = vpack.c.bf16 (!%p1270_p12), %v1350_v14, %v1349_v13  ;;  %v1352_v17 = vld [vmem:[%s26648_s2 + $0x58] sm:$0xff] (!%p1270_p12)  ;;  %v1353_v19 = vld [vmem:[%s26648_s2 + $0x60] sm:$0xff] (!%p1270_p12)  ;;  %v1354_v20 = vld [vmem:[%s26648_s2 + $0x68] sm:$0xff] (!%p1270_p12)  ;;  %s21739_s17 = smov (!%p1270_p12), 32   ;;  %s21740_s18 = smov (!%p1270_p12), 48   ;;  %vm5094_vm5 = vcmask (!%p1270_p12), 654848  }
  0x9f   : > { %19699 = vmatprep.subr.bf16.mxu0 (!%p1270_p12), %v19698_v5  ;;  %v19714_v18 = vpack.c.bf16 (!%p1270_p12), %v1352_v17, %v1351_v16  ;;  %v19718_v21 = vpack.c.bf16 (!%p1270_p12), %v1354_v20, %v1353_v19  ;;  %v1355_v22 = vld [vmem:[%s26648_s2 + $0x70] sm:$0xff] (!%p1270_p12)  ;;  %v1356_v23 = vld [vmem:[%s26648_s2 + $0x78] sm:$0xff] (!%p1270_p12)  ;;  %v1326_v25 = vld [vmem:[%s22376_s15 + $0x8] sm:$0xff] (!%p1270_p12)  ;;  %s21741_s14 = smov (!%p1270_p12), 64   ;;  %s21742_s16 = smov (!%p1270_p12), 80   ;;  %vm5862_vm6 = vcmask (!%p1270_p12), 786048  }
  0xa0   : > { %v19722_v24 = vpack.c.bf16 (!%p1270_p12), %v1356_v23, %v1355_v22  ;;  %v1327_v26 = vld [vmem:[%s22376_s15 + $0x10] sm:$0xff] (!%p1270_p12)  ;;  %v1328_v27 = vld [vmem:[%s22376_s15 + $0x18] sm:$0xff] (!%p1270_p12)  ;;  %v1329_v28 = vld [vmem:[%s22376_s15 + $0x20] sm:$0xff] (!%p1270_p12)  ;;  %s26654_s25 = smov (!%p1270_p12), 96   ;;  %vm6630_vm7 = vcmask (!%p1270_p12), 917248   ;;  %s26656_s29 = smov (!%p1270_p12), 112  }
  0xa1   : > { %v1330_v29 = vld [vmem:[%s22376_s15 + $0x28] sm:$0xff] (!%p1270_p12)  ;;  %v1331_v30 = vld [vmem:[%s22376_s15 + $0x30] sm:$0xff] (!%p1270_p12)  ;;  %v1332_v31 = vld [vmem:[%s22376_s15 + $0x38] sm:$0xff] (!%p1270_p12)  ;;  %vm7398_vm8 = vcmask (!%p1270_p12), 1048448   ;;  %s26660_s26 = smov (!%p1270_p12), 96   ;;  %s13488_s19 = scalar_lea.sflag (!%p1270_p12), [#allocation4], %s22364_s28 }
  0xa2   : > { %19701 = vmatpush3.bf16.msra.mxu0 %v19698_v5  ;;  %v1333_v32 = vld [vmem:[%s22376_s15 + $0x40] sm:$0xff]  ;;  %v1334_v33 = vld [vmem:[%s22376_s15 + $0x48] sm:$0xff]  ;;  %v1335_v34 = vld [vmem:[%s22376_s15 + $0x50] sm:$0xff]  ;;  %s21745_s9 = smov [#allocation3]  }
  0xa3   : > { %19703 = vmatprep.subr.bf16.mxu0 %v19702_v8  ;;  %v1336_v35 = vld [vmem:[%s22376_s15 + $0x58] sm:$0xff]  ;;  %v1337_v36 = vld [vmem:[%s22376_s15 + $0x60] sm:$0xff]  ;;  %v1338_v37 = vld [vmem:[%s22376_s15 + $0x68] sm:$0xff] }
  0xa4   : > { %v1339_v38 = vld [vmem:[%s22376_s15 + $0x70] sm:$0xff]  ;;  %v1340_v39 = vld [vmem:[%s22376_s15 + $0x78] sm:$0xff]  ;;  %v22427_v40 = vld [vmem:[%s26647_s1] sm:$0xff] }
  0xa5   : > { %16454 = vmatprep.mubr.f32.mxu1 %v22427_v40  ;;  %v1669_v41 = vld [vmem:[%s26650_s4] sm:$0xff]  ;;  %v1670_v42 = vld [vmem:[%s26650_s4 + $0x8] sm:$0xff]  ;;  %v1671_v43 = vld [vmem:[%s26650_s4 + $0x10] sm:$0xff] }
  0xa6   : > { %19705 = vmatpush3.bf16.msra.mxu0 %v19702_v8  ;;  %v19758_v44 = vpack.c.bf16 %v1670_v42, %v1669_v41  ;;  %v1672_v45 = vld [vmem:[%s26650_s4 + $0x18] sm:$0xff]  ;;  %v1673_v47 = vld [vmem:[%s26650_s4 + $0x20] sm:$0xff]  ;;  %v1674_v48 = vld [vmem:[%s26650_s4 + $0x28] sm:$0xff] }
  0xa7   : > { %19707 = vmatprep.subr.bf16.mxu0 %v19706_v12  ;;  %v19762_v46 = vpack.c.bf16 %v1672_v45, %v1671_v43  ;;  %v19766_v49 = vpack.c.bf16 %v1674_v48, %v1673_v47  ;;  %v1675_v50 = vld [vmem:[%s26650_s4 + $0x30] sm:$0xff]  ;;  %v1676_v51 = vld [vmem:[%s26650_s4 + $0x38] sm:$0xff]  ;;  %v22457_v13 = vld [vmem:[%s26647_s1 + $0x8] sm:$0xff] }
  0xa8   : > { %v19770_v52 = vpack.c.bf16 %v1676_v51, %v1675_v50  ;;  %v22462_v14 = vld [vmem:[%s26647_s1 + $0x10] sm:$0xff]  ;;  %v22474_v16 = vld [vmem:[%s26647_s1 + $0x20] sm:$0xff]  ;;  %v22481_v17 = vld [vmem:[%s26647_s1 + $0x28] sm:$0xff] }
  0xa9   : > { %v22493_v19 = vld [vmem:[%s26647_s1 + $0x38] sm:$0xff]  ;;  %v22498_v20 = vld [vmem:[%s26647_s1 + $0x40] sm:$0xff]  ;;  %v22510_v22 = vld [vmem:[%s26647_s1 + $0x50] sm:$0xff] }
  0xaa   : > { %19709 = vmatpush3.bf16.msra.mxu0 %v19706_v12  ;;  %v22517_v23 = vld [vmem:[%s26647_s1 + $0x58] sm:$0xff]  ;;  %v13618_v47 = vld [vmem:[%s26648_s2 + $0xa8] sm:$0xff] }
  0xab   : > { %19711 = vmatprep.subr.bf16.mxu0 %v19710_v15 }
  0xae   : > { %19713 = vmatpush3.bf16.msra.mxu0 %v19710_v15  ;;  %v22469_v15 = vld [vmem:[%s26647_s1 + $0x18] sm:$0xff] }
  0xaf   : > { %19715 = vmatprep.subr.bf16.mxu0 %v19714_v18 }
  0xb2   : > { %19717 = vmatpush3.bf16.msra.mxu0 %v19714_v18  ;;  %v22486_v18 = vld [vmem:[%s26647_s1 + $0x30] sm:$0xff] }
  0xb3   : > { %19719 = vmatprep.subr.bf16.mxu0 %v19718_v21 }
  0xb6   : > { %19721 = vmatpush3.bf16.msra.mxu0 %v19718_v21  ;;  %v22505_v21 = vld [vmem:[%s26647_s1 + $0x48] sm:$0xff] }
  0xb7   : > { %19723 = vmatprep.subr.bf16.mxu0 %v19722_v24 }
  0xba   : > { %19725 = vmatpush3.bf16.msra.mxu0 %v19722_v24  ;;  %v22522_v24 = vld [vmem:[%s26647_s1 + $0x60] sm:$0xff] }
  0xbb   : > { %19759 = vmatprep.subr.bf16.mxu0 %v19758_v44 }
  0xbd   : > { %16399 = vmatmul.mubr.f32.vlgmr.msra.gmra.mrb[0].mxu0 %v1326_v25  ;;  %v22529_v25 = vld [vmem:[%s26647_s1 + $0x68] sm:$0xff] }
  0xbe   : > { %16401 = vmatprep.mubr.f32.mxu0 %v1327_v26  ;;  %19761 = vmatpush3.bf16.msra.mxu0 %v19758_v44  ;;  %v22534_v26 = vld [vmem:[%s26647_s1 + $0x70] sm:$0xff] }
  0xbf   : > { %19763 = vmatprep.subr.bf16.mxu0 %v19762_v46 }
  0xc1   : > { %16402 = vmatmul.mubr.f32.gmra.mrb[2].mxu0 %v1328_v27  ;;  %v22541_v27 = vld [vmem:[%s26647_s1 + $0x78] sm:$0xff] }
  0xc2   : > { %16404 = vmatprep.mubr.f32.mxu0 %v1329_v28  ;;  %19765 = vmatpush3.bf16.msra.mxu0 %v19762_v46  ;;  %v13613_v28 = vld [vmem:[%s26648_s2 + $0x80] sm:$0xff] }
  0xc3   : > { %19767 = vmatprep.subr.bf16.mxu0 %v19766_v49  ;;  %v13617_v46 = vld [vmem:[%s26648_s2 + $0xa0] sm:$0xff] }
  0xc5   : > { %16405 = vmatmul.mubr.f32.gmra.mrb[4].mxu0 %v1330_v29  ;;  %v13614_v29 = vld [vmem:[%s26648_s2 + $0x88] sm:$0xff] }
  0xc6   : > { %16407 = vmatprep.mubr.f32.mxu0 %v1331_v30  ;;  %19769 = vmatpush3.bf16.msra.mxu0 %v19766_v49  ;;  %v19806_v30 = vpack.c.bf16 %v13614_v29, %v13613_v28 }
  0xc7   : > { %19771 = vmatprep.subr.bf16.mxu0 %v19770_v52 }
  0xc9   : > { %16408 = vmatmul.mubr.f32.gmra.mrb[6].mxu0 %v1332_v31  ;;  %v22554_v31 = vld [vmem:[%s26649_s3] ss:$0 sm:$0xff] }
  0xca   : > { %16410 = vmatprep.mubr.f32.mxu0 %v1333_v32  ;;  %19773 = vmatpush3.bf16.msra.mxu0 %v19770_v52 }
  0xcb   : > { %19807 = vmatprep.subr.bf16.mxu0 %v19806_v30 }
  0xcd   : > { %16411 = vmatmul.mubr.f32.gmra.mrb[8].mxu0 %v1334_v33 }
  0xce   : > { %16413 = vmatprep.mubr.f32.mxu0 %v1335_v34 }
  0xd1   : > { %16414 = vmatmul.mubr.f32.gmra.mrb[10].mxu0 %v1336_v35 }
  0xd2   : > { %16416 = vmatprep.mubr.f32.mxu0 %v1337_v36  ;;  %v13615_v36 = vld [vmem:[%s26648_s2 + $0x90] sm:$0xff] }
  0xd5   : > { %16417 = vmatmul.mubr.f32.gmra.mrb[12].mxu0 %v1338_v37  ;;  %v13616_v37 = vld [vmem:[%s26648_s2 + $0x98] sm:$0xff] }
  0xd6   : > { %16419 = vmatprep.mubr.f32.mxu0 %v1339_v38  ;;  %v19810_v44 = vpack.c.bf16 %v13616_v37, %v13615_v36 }
  0xd9   : > { %16420 = vmatmul.mubr.f32.gmra.mrb[14].mxu0 %v1340_v39 }
 0x190   : > { %v16400_v53 = vpop.f32.mrb[0].mxu0 }
 0x191   : > { %v1423_v54 = vpop.f32.mrb[1].mxu0 }
 0x192   : > { %v19726_v55 = vpack.c.bf16 %v16400_v53, %v1423_v54  ;;  %v19814_v53 = vpack.c.bf16 %v13618_v47, %v13617_v46 }
 0x194   : > { %v16403_v56 = vpop.f32.mrb[2].mxu0  ;;  %19727 = vmatprep.subr.bf16.mxu1 %v19726_v55 }
 0x195   : > { %v1433_v57 = vpop.f32.mrb[3].mxu0  ;;  %19729 = vmatpush3.bf16.msra.mxu1 %v19726_v55  ;;  %v13619_v55 = vld [vmem:[%s26648_s2 + $0xb0] sm:$0xff] }
 0x196   : > { %v19730_v58 = vpack.c.bf16 %v16403_v56, %v1433_v57  ;;  %v13620_v56 = vld [vmem:[%s26648_s2 + $0xb8] sm:$0xff] }
 0x198   : > { %v16406_v59 = vpop.f32.mrb[4].mxu0  ;;  %19731 = vmatprep.subr.bf16.mxu1 %v19730_v58 }
 0x199   : > { %v1443_v60 = vpop.f32.mrb[5].mxu0  ;;  %19733 = vmatpush3.bf16.msra.mxu1 %v19730_v58 }
 0x19a   : > { %v19734_v61 = vpack.c.bf16 %v16406_v59, %v1443_v60 }
 0x19c   : > { %v16409_v62 = vpop.f32.mrb[6].mxu0  ;;  %19735 = vmatprep.subr.bf16.mxu1 %v19734_v61 }
 0x19d   : > { %v1453_v63 = vpop.f32.mrb[7].mxu0  ;;  %19737 = vmatpush3.bf16.msra.mxu1 %v19734_v61 }
 0x19e   : > { %v19738_v0 = vpack.c.bf16 %v16409_v62, %v1453_v63  ;;  %v19818_v62 = vpack.c.bf16 %v13620_v56, %v13619_v55  ;;  %v13597_v55 = vld [vmem:[%s22376_s15 + $0x80] sm:$0xff]  ;;  %v13598_v56 = vld [vmem:[%s22376_s15 + $0x88] sm:$0xff] }
 0x1a0   : > { %v16412_v1 = vpop.f32.mrb[8].mxu0  ;;  %19739 = vmatprep.subr.bf16.mxu1 %v19738_v0 }
 0x1a1   : > { %v1463_v2 = vpop.f32.mrb[9].mxu0  ;;  %19741 = vmatpush3.bf16.msra.mxu1 %v19738_v0  ;;  %v13621_v0 = vld [vmem:[%s26648_s2 + $0xc0] sm:$0xff] }
 0x1a2   : > { %v19742_v3 = vpack.c.bf16 %v16412_v1, %v1463_v2  ;;  %v13622_v1 = vld [vmem:[%s26648_s2 + $0xc8] sm:$0xff] }
 0x1a4   : > { %v16415_v4 = vpop.f32.mrb[10].mxu0  ;;  %19743 = vmatprep.subr.bf16.mxu1 %v19742_v3 }
 0x1a5   : > { %v1473_v5 = vpop.f32.mrb[11].mxu0  ;;  %19745 = vmatpush3.bf16.msra.mxu1 %v19742_v3 }
 0x1a6   : > { %v19746_v6 = vpack.c.bf16 %v16415_v4, %v1473_v5 }
 0x1a8   : > { %v16418_v7 = vpop.f32.mrb[12].mxu0  ;;  %19747 = vmatprep.subr.bf16.mxu1 %v19746_v6 }
 0x1a9   : > { %v1483_v8 = vpop.f32.mrb[13].mxu0  ;;  %19749 = vmatpush3.bf16.msra.mxu1 %v19746_v6 }
 0x1aa   : > { %v19750_v9 = vpack.c.bf16 %v16418_v7, %v1483_v8  ;;  %v19822_v7 = vpack.c.bf16 %v13622_v1, %v13621_v0  ;;  %v13606_v0 = vld [vmem:[%s22376_s15 + $0xc8] sm:$0xff]  ;;  %v13607_v1 = vld [vmem:[%s22376_s15 + $0xd0] sm:$0xff] }
 0x1ac   : > { %v16421_v10 = vpop.f32.mrb[14].mxu0  ;;  %19751 = vmatprep.subr.bf16.mxu1 %v19750_v9 }
 0x1ad   : > { %v1493_v11 = vpop.f32.mrb[15].mxu0  ;;  %19753 = vmatpush3.bf16.msra.mxu1 %v19750_v9  ;;  %v13623_v9 = vld [vmem:[%s26648_s2 + $0xd0] sm:$0xff] }
 0x1ae   : > { %v19754_v12 = vpack.c.bf16 %v16421_v10, %v1493_v11  ;;  %v13624_v10 = vld [vmem:[%s26648_s2 + $0xd8] sm:$0xff] }
 0x1b0   : > { %19755 = vmatprep.subr.bf16.mxu1 %v19754_v12 }
 0x1b1   : > { %19757 = vmatpush3.bf16.msra.mxu1 %v19754_v12 }
 0x1b4   : > { %16455 = vmatmul.mubr.f32.vlgmr.msra.gmra.mrb[0].mxu1 %v22457_v13 }
 0x1b5   : > { %16457 = vmatprep.mubr.f32.mxu1 %v22462_v14 }
 0x1b8   : > { %16458 = vmatmul.mubr.f32.gmra.mrb[2].mxu1 %v22469_v15 }
 0x1b9   : > { %16460 = vmatprep.mubr.f32.mxu1 %v22474_v16 }
 0x1bc   : > { %16461 = vmatmul.mubr.f32.gmra.mrb[4].mxu1 %v22481_v17 }
 0x1bd   : > { %16463 = vmatprep.mubr.f32.mxu1 %v22486_v18 }
 0x1c0   : > { %16464 = vmatmul.mubr.f32.gmra.mrb[6].mxu1 %v22493_v19 }
 0x1c1   : > { %16466 = vmatprep.mubr.f32.mxu1 %v22498_v20 }
 0x1c4   : > { %16467 = vmatmul.mubr.f32.gmra.mrb[8].mxu1 %v22505_v21 }
 0x1c5   : > { %16469 = vmatprep.mubr.f32.mxu1 %v22510_v22 }
 0x1c8   : > { %16470 = vmatmul.mubr.f32.gmra.mrb[10].mxu1 %v22517_v23 }
 0x1c9   : > { %16472 = vmatprep.mubr.f32.mxu1 %v22522_v24 }
 0x1cc   : > { %16473 = vmatmul.mubr.f32.gmra.mrb[12].mxu1 %v22529_v25 }
 0x1cd   : > { %16475 = vmatprep.mubr.f32.mxu1 %v22534_v26 }
 0x1d0   : > { %16476 = vmatmul.mubr.f32.gmra.mrb[14].mxu1 %v22541_v27 }
 0x1d1   : > { %16550 = vmatprep.mubr.f32.mxu1 %v22427_v40 }
 0x287   : > { %v16456_v32 = vpop.f32.mrb[0].mxu1 }
 0x288   : > { %v1580_v33 = vadd.f32 %v16456_v32, %v22554_v31  ;;  %v1574_v34 = vpop.f32.mrb[1].mxu1  ;;  %v19826_v32 = vpack.c.bf16 %v13624_v10, %v13623_v9 }
 0x289   : > { %v1575_v35 = vadd.f32 %v22554_v31, %v1574_v34  ;;  %v13625_v34 = vld [vmem:[%s26648_s2 + $0xe0] sm:$0xff] }
 0x28a   : > { %v1654_v41 = vmax.f32 %v1580_v33, 0.0 }
 0x28b   : > { %v1653_v38 = vmax.f32 %v1575_v35, 0.0  ;;  %v16459_v39 = vpop.f32.mrb[2].mxu1  ;;  %v13626_v35 = vld [vmem:[%s26648_s2 + $0xe8] sm:$0xff] }
 0x28c   : > { %v1590_v42 = vadd.f32 %v16459_v39, %v22554_v31  ;;  %v1584_v43 = vpop.f32.mrb[3].mxu1 }
 0x28d   : > { %v1585_v45 = vadd.f32 %v22554_v31, %v1584_v43  ;;  %16494 = vmatprep.mubr.msk.f32.mxu0 %vm1677_vm0, %v1653_v38 }
 0x28e   : > { %16495 = vmatmul.mubr.msk.f32.vlgmr.msra.gmra.mrb[16].mxu0 %vm1677_vm0, %v1654_v41  ;;  %v1656_v50 = vmax.f32 %v1590_v42, 0.0  ;;  %v19830_v42 = vpack.c.bf16 %v13626_v35, %v13625_v34 }
 0x28f   : > { %v1655_v48 = vmax.f32 %v1585_v45, 0.0  ;;  %v16462_v49 = vpop.f32.mrb[4].mxu1  ;;  %19809 = vmatpush3.bf16.msra.mxu0 %v19806_v30  ;;  %v13628_v45 = vld [vmem:[%s26648_s2 + $0xf8] sm:$0xff] }
 0x290   : > { %v1600_v51 = vadd.f32 %v16462_v49, %v22554_v31  ;;  %v1594_v52 = vpop.f32.mrb[5].mxu1  ;;  %19811 = vmatprep.subr.bf16.mxu0 %v19810_v44 }
 0x291   : > { %v1595_v54 = vadd.f32 %v22554_v31, %v1594_v52  ;;  %16497 = vmatprep.mubr.msk.f32.mxu0 %vm1677_vm0, %v1655_v48 }
 0x292   : > { %16498 = vmatmul.mubr.msk.f32.gmra.mrb[18].mxu0 %vm1677_vm0, %v1656_v50  ;;  %v1658_v59 = vmax.f32 %v1600_v51, 0.0 }
 0x293   : > { %v1657_v57 = vmax.f32 %v1595_v54, 0.0  ;;  %v16465_v58 = vpop.f32.mrb[6].mxu1  ;;  %19813 = vmatpush3.bf16.msra.mxu0 %v19810_v44  ;;  %v13627_v44 = vld [vmem:[%s26648_s2 + $0xf0] sm:$0xff] }
 0x294   : > { %v1610_v60 = vadd.f32 %v16465_v58, %v22554_v31  ;;  %v1604_v61 = vpop.f32.mrb[7].mxu1  ;;  %19815 = vmatprep.subr.bf16.mxu0 %v19814_v53  ;;  %v19834_v51 = vpack.c.bf16 %v13628_v45, %v13627_v44  ;;  %v13600_v58 = vld [vmem:[%s22376_s15 + $0x98] sm:$0xff] }
 0x295   : > { %v1605_v63 = vadd.f32 %v22554_v31, %v1604_v61  ;;  %16500 = vmatprep.mubr.msk.f32.mxu0 %vm1677_vm0, %v1657_v57  ;;  %v13599_v57 = vld [vmem:[%s22376_s15 + $0x90] sm:$0xff] }
 0x296   : > { %16501 = vmatmul.mubr.msk.f32.gmra.mrb[20].mxu0 %vm1677_vm0, %v1658_v59  ;;  %v1660_v4 = vmax.f32 %v1610_v60, 0.0  ;;  %v13601_v59 = vld [vmem:[%s22376_s15 + $0xa0] sm:$0xff]  ;;  %v13602_v60 = vld [vmem:[%s22376_s15 + $0xa8] sm:$0xff]  ;;  %v13603_v61 = vld [vmem:[%s22376_s15 + $0xb0] sm:$0xff] }
 0x297   : > { %v1659_v2 = vmax.f32 %v1605_v63, 0.0  ;;  %v16468_v3 = vpop.f32.mrb[8].mxu1  ;;  %19817 = vmatpush3.bf16.msra.mxu0 %v19814_v53  ;;  %v13605_v63 = vld [vmem:[%s22376_s15 + $0xc0] sm:$0xff] }
 0x298   : > { %v1620_v5 = vadd.f32 %v16468_v3, %v22554_v31  ;;  %v1614_v6 = vpop.f32.mrb[9].mxu1  ;;  %19819 = vmatprep.subr.bf16.mxu0 %v19818_v62  ;;  %v13609_v3 = vld [vmem:[%s22376_s15 + $0xe0] sm:$0xff] }
 0x299   : > { %v1615_v8 = vadd.f32 %v22554_v31, %v1614_v6  ;;  %16503 = vmatprep.mubr.msk.f32.mxu0 %vm1677_vm0, %v1659_v2  ;;  %v13608_v2 = vld [vmem:[%s22376_s15 + $0xd8] sm:$0xff] }
 0x29a   : > { %16504 = vmatmul.mubr.msk.f32.gmra.mrb[22].mxu0 %vm1677_vm0, %v1660_v4  ;;  %v1662_v28 = vmax.f32 %v1620_v5, 0.0  ;;  %v13610_v4 = vld [vmem:[%s22376_s15 + $0xe8] sm:$0xff]  ;;  %v13611_v5 = vld [vmem:[%s22376_s15 + $0xf0] sm:$0xff]  ;;  %v13612_v6 = vld [vmem:[%s22376_s15 + $0xf8] sm:$0xff] }
 0x29b   : > { %v1661_v11 = vmax.f32 %v1615_v8, 0.0  ;;  %v16471_v12 = vpop.f32.mrb[10].mxu1  ;;  %19821 = vmatpush3.bf16.msra.mxu0 %v19818_v62  ;;  %v13604_v62 = vld [vmem:[%s22376_s15 + $0xb8] sm:$0xff] }
 0x29c   : > { %v1630_v29 = vadd.f32 %v16471_v12, %v22554_v31  ;;  %v1624_v30 = vpop.f32.mrb[11].mxu1  ;;  %19823 = vmatprep.subr.bf16.mxu0 %v19822_v7 }
 0x29d   : > { %v1625_v33 = vadd.f32 %v22554_v31, %v1624_v30  ;;  %16506 = vmatprep.mubr.msk.f32.mxu0 %vm1677_vm0, %v1661_v11 }
 0x29e   : > { %16507 = vmatmul.mubr.msk.f32.gmra.mrb[24].mxu0 %vm1677_vm0, %v1662_v28  ;;  %v1664_v38 = vmax.f32 %v1630_v29, 0.0 }
 0x29f   : > { %v1663_v36 = vmax.f32 %v1625_v33, 0.0  ;;  %v16474_v37 = vpop.f32.mrb[12].mxu1  ;;  %19825 = vmatpush3.bf16.msra.mxu0 %v19822_v7 }
 0x2a0   : > { %v1640_v39 = vadd.f32 %v16474_v37, %v22554_v31  ;;  %v1634_v41 = vpop.f32.mrb[13].mxu1  ;;  %19827 = vmatprep.subr.bf16.mxu0 %v19826_v32 }
 0x2a1   : > { %v1635_v43 = vadd.f32 %v22554_v31, %v1634_v41  ;;  %16509 = vmatprep.mubr.msk.f32.mxu0 %vm1677_vm0, %v1663_v36 }
 0x2a2   : > { %16510 = vmatmul.mubr.msk.f32.gmra.mrb[26].mxu0 %vm1677_vm0, %v1664_v38  ;;  %v1666_v48 = vmax.f32 %v1640_v39, 0.0 }
 0x2a3   : > { %v1665_v46 = vmax.f32 %v1635_v43, 0.0  ;;  %v16477_v47 = vpop.f32.mrb[14].mxu1  ;;  %19829 = vmatpush3.bf16.msra.mxu0 %v19826_v32 }
 0x2a4   : > { %v1650_v49 = vadd.f32 %v16477_v47, %v22554_v31  ;;  %v1644_v50 = vpop.f32.mrb[15].mxu1  ;;  %19831 = vmatprep.subr.bf16.mxu0 %v19830_v42 }
 0x2a5   : > { %v1645_v52 = vadd.f32 %v22554_v31, %v1644_v50  ;;  %16512 = vmatprep.mubr.msk.f32.mxu0 %vm1677_vm0, %v1665_v46 }
 0x2a6   : > { %16513 = vmatmul.mubr.msk.f32.gmra.mrb[28].mxu0 %vm1677_vm0, %v1666_v48  ;;  %v1668_v54 = vmax.f32 %v1650_v49, 0.0 }
 0x2a7   : > { %v1667_v53 = vmax.f32 %v1645_v52, 0.0  ;;  %19833 = vmatpush3.bf16.msra.mxu0 %v19830_v42 }
 0x2a8   : > { %19835 = vmatprep.subr.bf16.mxu0 %v19834_v51 }
 0x2a9   : > { %16515 = vmatprep.mubr.msk.f32.mxu0 %vm1677_vm0, %v1667_v53 }
 0x2aa   : > { %16516 = vmatmul.mubr.msk.f32.gmra.mrb[30].mxu0 %vm1677_vm0, %v1668_v54 }
 0x2ab   : > { %19837 = vmatpush3.bf16.msra.mxu0 %v19834_v51  ;;  %16606 = vmatprep.mubr.f32.mxu0 %v13597_v55 }
 0x2ae   : > { %16607 = vmatmul.mubr.f32.vlgmr.msra.gmra.mrb[32].mxu0 %v13598_v56 }
 0x2af   : > { %16609 = vmatprep.mubr.f32.mxu0 %v13599_v57 }
 0x2b2   : > { %16610 = vmatmul.mubr.f32.gmra.mrb[34].mxu0 %v13600_v58 }
 0x2b3   : > { %16612 = vmatprep.mubr.f32.mxu0 %v13601_v59 }
 0x2b6   : > { %16613 = vmatmul.mubr.f32.gmra.mrb[36].mxu0 %v13602_v60 }
 0x2b7   : > { %16615 = vmatprep.mubr.f32.mxu0 %v13603_v61 }
 0x2ba   : > { %16616 = vmatmul.mubr.f32.gmra.mrb[38].mxu0 %v13604_v62 }
 0x2bb   : > { %16618 = vmatprep.mubr.f32.mxu0 %v13605_v63 }
 0x2be   : > { %16619 = vmatmul.mubr.f32.gmra.mrb[40].mxu0 %v13606_v0 }
 0x2bf   : > { %16621 = vmatprep.mubr.f32.mxu0 %v13607_v1 }
 0x2c2   : > { %16622 = vmatmul.mubr.f32.gmra.mrb[42].mxu0 %v13608_v2 }
 0x2c3   : > { %16624 = vmatprep.mubr.f32.mxu0 %v13609_v3 }
 0x2c6   : > { %16625 = vmatmul.mubr.f32.gmra.mrb[44].mxu0 %v13610_v4 }
 0x2c7   : > { %16627 = vmatprep.mubr.f32.mxu0 %v13611_v5 }
 0x2ca   : > { %16628 = vmatmul.mubr.f32.gmra.mrb[46].mxu0 %v13612_v6 }
 0x361   : > { %v16496_v7 = vpop.f32.mrb[16].mxu0 }
 0x362   : > { %v1792_v8 = vpop.f32.mrb[17].mxu0 }
 0x363   : > { %v19774_v9 = vpack.c.bf16 %v16496_v7, %v1792_v8 }
 0x365   : > { %v16499_v10 = vpop.f32.mrb[18].mxu0  ;;  %19775 = vmatprep.subr.bf16.mxu1 %v19774_v9 }
 0x366   : > { %v1802_v11 = vpop.f32.mrb[19].mxu0  ;;  %19777 = vmatpush3.bf16.msra.mxu1 %v19774_v9 }
 0x367   : > { %v19778_v12 = vpack.c.bf16 %v16499_v10, %v1802_v11 }
 0x369   : > { %v16502_v28 = vpop.f32.mrb[20].mxu0  ;;  %19779 = vmatprep.subr.bf16.mxu1 %v19778_v12 }
 0x36a   : > { %v1812_v29 = vpop.f32.mrb[21].mxu0  ;;  %19781 = vmatpush3.bf16.msra.mxu1 %v19778_v12 }
 0x36b   : > { %v19782_v30 = vpack.c.bf16 %v16502_v28, %v1812_v29 }
 0x36d   : > { %v16505_v32 = vpop.f32.mrb[22].mxu0  ;;  %19783 = vmatprep.subr.bf16.mxu1 %v19782_v30 }
 0x36e   : > { %v1822_v33 = vpop.f32.mrb[23].mxu0  ;;  %19785 = vmatpush3.bf16.msra.mxu1 %v19782_v30 }
 0x36f   : > { %v19786_v34 = vpack.c.bf16 %v16505_v32, %v1822_v33 }
 0x371   : > { %v16508_v35 = vpop.f32.mrb[24].mxu0  ;;  %19787 = vmatprep.subr.bf16.mxu1 %v19786_v34 }
 0x372   : > { %v1832_v36 = vpop.f32.mrb[25].mxu0  ;;  %19789 = vmatpush3.bf16.msra.mxu1 %v19786_v34 }
 0x373   : > { %v19790_v37 = vpack.c.bf16 %v16508_v35, %v1832_v36 }
 0x375   : > { %v16511_v38 = vpop.f32.mrb[26].mxu0  ;;  %19791 = vmatprep.subr.bf16.mxu1 %v19790_v37 }
 0x376   : > { %v1842_v39 = vpop.f32.mrb[27].mxu0  ;;  %19793 = vmatpush3.bf16.msra.mxu1 %v19790_v37 }
 0x377   : > { %v19794_v41 = vpack.c.bf16 %v16511_v38, %v1842_v39 }
 0x379   : > { %v16514_v42 = vpop.f32.mrb[28].mxu0  ;;  %19795 = vmatprep.subr.bf16.mxu1 %v19794_v41 }
 0x37a   : > { %v1852_v43 = vpop.f32.mrb[29].mxu0  ;;  %19797 = vmatpush3.bf16.msra.mxu1 %v19794_v41 }
 0x37b   : > { %v19798_v44 = vpack.c.bf16 %v16514_v42, %v1852_v43 }
 0x37d   : > { %v16517_v45 = vpop.f32.mrb[30].mxu0  ;;  %19799 = vmatprep.subr.bf16.mxu1 %v19798_v44 }
 0x37e   : > { %v1862_v46 = vpop.f32.mrb[31].mxu0  ;;  %19801 = vmatpush3.bf16.msra.mxu1 %v19798_v44 }
 0x37f   : > { %v19802_v47 = vpack.c.bf16 %v16517_v45, %v1862_v46 }
 0x381   : > { %19803 = vmatprep.subr.bf16.mxu1 %v19802_v47  ;;  %v16608_v48 = vpop.f32.mrb[32].mxu0 }
 0x382   : > { %19805 = vmatpush3.bf16.msra.mxu1 %v19802_v47  ;;  %v2139_v49 = vpop.f32.mrb[33].mxu0 }
 0x383   : > { %v19838_v50 = vpack.c.bf16 %v16608_v48, %v2139_v49 }
 0x385   : > { %16551 = vmatmul.mubr.f32.vlgmr.msra.gmra.mrb[16].mxu1 %v22457_v13  ;;  %v16611_v51 = vpop.f32.mrb[34].mxu0  ;;  %19839 = vmatprep.subr.bf16.mxu1 %v19838_v50 }
 0x386   : > { %v2149_v52 = vpop.f32.mrb[35].mxu0  ;;  %19841 = vmatpush3.bf16.msra.mxu1 %v19838_v50  ;;  %16553 = vmatprep.mubr.f32.mxu1 %v22462_v14 }
 0x387   : > { %v19842_v53 = vpack.c.bf16 %v16611_v51, %v2149_v52 }
 0x389   : > { %16554 = vmatmul.mubr.f32.gmra.mrb[18].mxu1 %v22469_v15  ;;  %v16614_v54 = vpop.f32.mrb[36].mxu0  ;;  %19843 = vmatprep.subr.bf16.mxu1 %v19842_v53 }
 0x38a   : > { %v2159_v55 = vpop.f32.mrb[37].mxu0  ;;  %19845 = vmatpush3.bf16.msra.mxu1 %v19842_v53  ;;  %16556 = vmatprep.mubr.f32.mxu1 %v22474_v16 }
 0x38b   : > { %v19846_v56 = vpack.c.bf16 %v16614_v54, %v2159_v55 }
 0x38d   : > { %16557 = vmatmul.mubr.f32.gmra.mrb[20].mxu1 %v22481_v17  ;;  %v16617_v57 = vpop.f32.mrb[38].mxu0  ;;  %19847 = vmatprep.subr.bf16.mxu1 %v19846_v56 }
 0x38e   : > { %v2169_v58 = vpop.f32.mrb[39].mxu0  ;;  %19849 = vmatpush3.bf16.msra.mxu1 %v19846_v56  ;;  %16559 = vmatprep.mubr.f32.mxu1 %v22486_v18 }
 0x38f   : > { %v19850_v59 = vpack.c.bf16 %v16617_v57, %v2169_v58 }
 0x391   : > { %16560 = vmatmul.mubr.f32.gmra.mrb[22].mxu1 %v22493_v19  ;;  %v16620_v60 = vpop.f32.mrb[40].mxu0  ;;  %19851 = vmatprep.subr.bf16.mxu1 %v19850_v59 }
 0x392   : > { %v2179_v61 = vpop.f32.mrb[41].mxu0  ;;  %19853 = vmatpush3.bf16.msra.mxu1 %v19850_v59  ;;  %16562 = vmatprep.mubr.f32.mxu1 %v22498_v20 }
 0x393   : > { %v19854_v62 = vpack.c.bf16 %v16620_v60, %v2179_v61  ;;  %v13671_v61 = vld [vmem:[%s26648_s2 + $0x110] sm:$0xff] }
 0x395   : > { %16563 = vmatmul.mubr.f32.gmra.mrb[24].mxu1 %v22505_v21  ;;  %v16623_v63 = vpop.f32.mrb[42].mxu0  ;;  %19855 = vmatprep.subr.bf16.mxu1 %v19854_v62 }
 0x396   : > { %v2189_v0 = vpop.f32.mrb[43].mxu0  ;;  %19857 = vmatpush3.bf16.msra.mxu1 %v19854_v62  ;;  %16565 = vmatprep.mubr.f32.mxu1 %v22510_v22  ;;  %v13672_v62 = vld [vmem:[%s26648_s2 + $0x118] sm:$0xff] }
 0x397   : > { %v19858_v1 = vpack.c.bf16 %v16623_v63, %v2189_v0 }
 0x399   : > { %16566 = vmatmul.mubr.f32.gmra.mrb[26].mxu1 %v22517_v23  ;;  %v16626_v2 = vpop.f32.mrb[44].mxu0  ;;  %19859 = vmatprep.subr.bf16.mxu1 %v19858_v1 }
 0x39a   : > { %v2199_v3 = vpop.f32.mrb[45].mxu0  ;;  %19861 = vmatpush3.bf16.msra.mxu1 %v19858_v1  ;;  %16568 = vmatprep.mubr.f32.mxu1 %v22522_v24 }
 0x39b   : > { %v19862_v4 = vpack.c.bf16 %v16626_v2, %v2199_v3 }
 0x39d   : > { %16569 = vmatmul.mubr.f32.gmra.mrb[28].mxu1 %v22529_v25  ;;  %v16629_v5 = vpop.f32.mrb[46].mxu0  ;;  %19863 = vmatprep.subr.bf16.mxu1 %v19862_v4 }
 0x39e   : > { %v2209_v6 = vpop.f32.mrb[47].mxu0  ;;  %19865 = vmatpush3.bf16.msra.mxu1 %v19862_v4  ;;  %16571 = vmatprep.mubr.f32.mxu1 %v22534_v26  ;;  %v19922_v4 = vpack.c.bf16 %v13672_v62, %v13671_v61 }
 0x39f   : > { %v19866_v7 = vpack.c.bf16 %v16629_v5, %v2209_v6  ;;  %v13673_v6 = vld [vmem:[%s26648_s2 + $0x120] sm:$0xff] }
 0x3a1   : > { %16572 = vmatmul.mubr.f32.gmra.mrb[30].mxu1 %v22541_v27  ;;  %19867 = vmatprep.subr.bf16.mxu1 %v19866_v7 }
 0x3a2   : > { %19869 = vmatpush3.bf16.msra.mxu1 %v19866_v7  ;;  %16662 = vmatprep.mubr.f32.mxu1 %v22427_v40  ;;  %v13674_v7 = vld [vmem:[%s26648_s2 + $0x128] sm:$0xff] }
 0x3a5   : > { %16663 = vmatmul.mubr.f32.vlgmr.msra.gmra.mrb[32].mxu1 %v22457_v13  ;;  %v13629_v13 = vld [vmem:[%s26650_s4 + $0x40] sm:$0xff] }
 0x3a6   : > { %16665 = vmatprep.mubr.f32.mxu1 %v22462_v14  ;;  %v13630_v14 = vld [vmem:[%s26650_s4 + $0x48] sm:$0xff] }
 0x3a9   : > { %16666 = vmatmul.mubr.f32.gmra.mrb[34].mxu1 %v22469_v15  ;;  %v19870_v15 = vpack.c.bf16 %v13630_v14, %v13629_v13 }
 0x3aa   : > { %16668 = vmatprep.mubr.f32.mxu1 %v22474_v16  ;;  %v13631_v16 = vld [vmem:[%s26650_s4 + $0x50] sm:$0xff] }
 0x3ab   : > { %19871 = vmatprep.subr.bf16.mxu0 %v19870_v15 }
 0x3ac   : > { %19873 = vmatpush3.bf16.msra.mxu0 %v19870_v15 }
 0x3ad   : > { %16669 = vmatmul.mubr.f32.gmra.mrb[36].mxu1 %v22481_v17  ;;  %v13632_v17 = vld [vmem:[%s26650_s4 + $0x58] sm:$0xff] }
 0x3ae   : > { %16671 = vmatprep.mubr.f32.mxu1 %v22486_v18  ;;  %v13633_v18 = vld [vmem:[%s26650_s4 + $0x60] sm:$0xff] }
 0x3b1   : > { %16672 = vmatmul.mubr.f32.gmra.mrb[38].mxu1 %v22493_v19  ;;  %v13634_v19 = vld [vmem:[%s26650_s4 + $0x68] sm:$0xff] }
 0x3b2   : > { %16674 = vmatprep.mubr.f32.mxu1 %v22498_v20  ;;  %v19878_v20 = vpack.c.bf16 %v13634_v19, %v13633_v18  ;;  %v13675_v19 = vld [vmem:[%s26648_s2 + $0x130] sm:$0xff] }
 0x3b5   : > { %16675 = vmatmul.mubr.f32.gmra.mrb[40].mxu1 %v22505_v21  ;;  %v13635_v21 = vld [vmem:[%s26650_s4 + $0x70] sm:$0xff] }
 0x3b6   : > { %16677 = vmatprep.mubr.f32.mxu1 %v22510_v22  ;;  %v13636_v22 = vld [vmem:[%s26650_s4 + $0x78] sm:$0xff] }
 0x3b9   : > { %16678 = vmatmul.mubr.f32.gmra.mrb[42].mxu1 %v22517_v23  ;;  %v19882_v23 = vpack.c.bf16 %v13636_v22, %v13635_v21 }
 0x3ba   : > { %16680 = vmatprep.mubr.f32.mxu1 %v22522_v24  ;;  %v13669_v24 = vld [vmem:[%s26648_s2 + $0x100] sm:$0xff] }
 0x3bd   : > { %16681 = vmatmul.mubr.f32.gmra.mrb[44].mxu1 %v22529_v25  ;;  %v13670_v25 = vld [vmem:[%s26648_s2 + $0x108] sm:$0xff] }
 0x3be   : > { %16683 = vmatprep.mubr.f32.mxu1 %v22534_v26  ;;  %v22708_v26 = vpack.c.bf16 %v13670_v25, %v13669_v24 }
 0x3c1   : > { %16684 = vmatmul.mubr.f32.gmra.mrb[46].mxu1 %v22541_v27  ;;  %v22715_v27 = vld [vmem:[%s26651_s5] ss:$0 sm:$0xff] }
 0x3c2   : > { %16758 = vmatprep.mubr.f32.mxu1 %v22427_v40  ;;  %v19874_v40 = vpack.c.bf16 %v13632_v17, %v13631_v16 }
 0x3c4   : > { %19875 = vmatprep.subr.bf16.mxu0 %v19874_v40 }
 0x3c5   : > { %19877 = vmatpush3.bf16.msra.mxu0 %v19874_v40  ;;  %v19926_v40 = vpack.c.bf16 %v13674_v7, %v13673_v6  ;;  %v13660_v6 = vld [vmem:[%s22376_s15 + $0x138] sm:$0xff]  ;;  %v13661_v7 = vld [vmem:[%s22376_s15 + $0x140] sm:$0xff] }
 0x3c6   : > { %19879 = vmatprep.subr.bf16.mxu0 %v19878_v20 }
 0x3c9   : > { %19881 = vmatpush3.bf16.msra.mxu0 %v19878_v20  ;;  %v13676_v20 = vld [vmem:[%s26648_s2 + $0x138] sm:$0xff] }
 0x3ca   : > { %19883 = vmatprep.subr.bf16.mxu0 %v19882_v23 }
 0x3cd   : > { %19885 = vmatpush3.bf16.msra.mxu0 %v19882_v23 }
 0x3ce   : > { %19919 = vmatprep.subr.bf16.mxu0 %v22708_v26 }
 0x458   : > { %v16552_v8 = vpop.f32.mrb[16].mxu1 }
 0x459   : > { %v1949_v9 = vadd.f32 %v16552_v8, %v22715_v27  ;;  %v1943_v10 = vpop.f32.mrb[17].mxu1 }
 0x45a   : > { %v1944_v11 = vadd.f32 %v22715_v27, %v1943_v10  ;;  %v13678_v10 = vld [vmem:[%s26648_s2 + $0x148] sm:$0xff] }
 0x45b   : > { %2024 = vst.msk [vmem:[%s22719_s10 + $0x10] sm:$0xff] %vm2022_vm1, %v1949_v9  ;;  %v13677_v9 = vld [vmem:[%s26648_s2 + $0x140] sm:$0xff] }
 0x45c   : > { %v16555_v12 = vpop.f32.mrb[18].mxu1  ;;  %2023 = vst.msk [vmem:[%s22719_s10] sm:$0xff] %vm2022_vm1, %v1944_v11 }
 0x45d   : > { %v1959_v28 = vadd.f32 %v16555_v12, %v22715_v27  ;;  %v1953_v29 = vpop.f32.mrb[19].mxu1 }
 0x45e   : > { %v1954_v30 = vadd.f32 %v22715_v27, %v1953_v29 }
 0x45f   : > { %2026 = vst.msk [vmem:[%s22719_s10 + $0x30] sm:$0xff] %vm2022_vm1, %v1959_v28 }
 0x460   : > { %v16558_v32 = vpop.f32.mrb[20].mxu1  ;;  %2025 = vst.msk [vmem:[%s22719_s10 + $0x20] sm:$0xff] %vm2022_vm1, %v1954_v30 }
 0x461   : > { %v1969_v33 = vadd.f32 %v16558_v32, %v22715_v27  ;;  %v1963_v34 = vpop.f32.mrb[21].mxu1  ;;  %v19934_v32 = vpack.c.bf16 %v13678_v10, %v13677_v9 }
 0x462   : > { %v1964_v35 = vadd.f32 %v22715_v27, %v1963_v34  ;;  %v13679_v34 = vld [vmem:[%s26648_s2 + $0x150] sm:$0xff] }
 0x463   : > { %2028 = vst.msk [vmem:[%s22719_s10 + $0x50] sm:$0xff] %vm2022_vm1, %v1969_v33 }
 0x464   : > { %v16561_v36 = vpop.f32.mrb[22].mxu1  ;;  %2027 = vst.msk [vmem:[%s22719_s10 + $0x40] sm:$0xff] %vm2022_vm1, %v1964_v35  ;;  %v13680_v35 = vld [vmem:[%s26648_s2 + $0x158] sm:$0xff] }
 0x465   : > { %v1979_v37 = vadd.f32 %v16561_v36, %v22715_v27  ;;  %v1973_v38 = vpop.f32.mrb[23].mxu1 }
 0x466   : > { %v1974_v39 = vadd.f32 %v22715_v27, %v1973_v38 }
 0x467   : > { %2030 = vst.msk [vmem:[%s22719_s10 + $0x70] sm:$0xff] %vm2022_vm1, %v1979_v37 }
 0x468   : > { %v16564_v41 = vpop.f32.mrb[24].mxu1  ;;  %2029 = vst.msk [vmem:[%s22719_s10 + $0x60] sm:$0xff] %vm2022_vm1, %v1974_v39 }
 0x469   : > { %v1989_v42 = vadd.f32 %v16564_v41, %v22715_v27  ;;  %v1983_v43 = vpop.f32.mrb[25].mxu1 }
 0x46a   : > { %v1984_v44 = vadd.f32 %v22715_v27, %v1983_v43 }
 0x46b   : > { %2032 = vst.msk [vmem:[%s22719_s10 + $0x90] sm:$0xff] %vm2022_vm1, %v1989_v42  ;;  %v19938_v42 = vpack.c.bf16 %v13680_v35, %v13679_v34 }
 0x46c   : > { %v16567_v45 = vpop.f32.mrb[26].mxu1  ;;  %2031 = vst.msk [vmem:[%s22719_s10 + $0x80] sm:$0xff] %vm2022_vm1, %v1984_v44  ;;  %v13681_v44 = vld [vmem:[%s26648_s2 + $0x160] sm:$0xff] }
 0x46d   : > { %v1999_v46 = vadd.f32 %v16567_v45, %v22715_v27  ;;  %v1993_v47 = vpop.f32.mrb[27].mxu1  ;;  %v13682_v45 = vld [vmem:[%s26648_s2 + $0x168] sm:$0xff] }
 0x46e   : > { %v1994_v48 = vadd.f32 %v22715_v27, %v1993_v47 }
 0x46f   : > { %2034 = vst.msk [vmem:[%s22719_s10 + $0xb0] sm:$0xff] %vm2022_vm1, %v1999_v46 }
 0x470   : > { %v16570_v49 = vpop.f32.mrb[28].mxu1  ;;  %2033 = vst.msk [vmem:[%s22719_s10 + $0xa0] sm:$0xff] %vm2022_vm1, %v1994_v48 }
 0x471   : > { %v2009_v50 = vadd.f32 %v16570_v49, %v22715_v27  ;;  %v2003_v51 = vpop.f32.mrb[29].mxu1 }
 0x472   : > { %v2004_v52 = vadd.f32 %v22715_v27, %v2003_v51  ;;  %v19942_v51 = vpack.c.bf16 %v13682_v45, %v13681_v44  ;;  %v22861_v44 = vld [vmem:[%s26647_s1 + $0x8] sm:$0xff] }
 0x473   : > { %2036 = vst.msk [vmem:[%s22719_s10 + $0xd0] sm:$0xff] %vm2022_vm1, %v2009_v50 }
 0x474   : > { %v16573_v53 = vpop.f32.mrb[30].mxu1  ;;  %2035 = vst.msk [vmem:[%s22719_s10 + $0xc0] sm:$0xff] %vm2022_vm1, %v2004_v52 }
 0x475   : > { %v2019_v54 = vadd.f32 %v16573_v53, %v22715_v27  ;;  %v2013_v55 = vpop.f32.mrb[31].mxu1  ;;  %v13683_v53 = vld [vmem:[%s26648_s2 + $0x170] sm:$0xff] }
 0x476   : > { %v2014_v56 = vadd.f32 %v22715_v27, %v2013_v55 }
 0x477   : > { %2038 = vst.msk [vmem:[%s22719_s10 + $0xf0] sm:$0xff] %vm2022_vm1, %v2019_v54  ;;  %v13684_v54 = vld [vmem:[%s26648_s2 + $0x178] sm:$0xff] }
 0x478   : > { %v16664_v57 = vpop.f32.mrb[32].mxu1  ;;  %2037 = vst.msk [vmem:[%s22719_s10 + $0xe0] sm:$0xff] %vm2022_vm1, %v2014_v56 }
 0x479   : > { %v2290_v58 = vadd.f32 %v16664_v57, %v22554_v31  ;;  %v2284_v59 = vpop.f32.mrb[33].mxu1 }
 0x47a   : > { %v2285_v60 = vadd.f32 %v22554_v31, %v2284_v59 }
 0x47b   : > { %v2364_v1 = vmax.f32 %v2290_v58, 0.0 }
 0x47c   : > { %v2363_v63 = vmax.f32 %v2285_v60, 0.0  ;;  %v16667_v0 = vpop.f32.mrb[34].mxu1  ;;  %v19946_v60 = vpack.c.bf16 %v13684_v54, %v13683_v53  ;;  %v22885_v54 = vld [vmem:[%s26647_s1 + $0x28] sm:$0xff] }
 0x47d   : > { %v2300_v2 = vadd.f32 %v16667_v0, %v22554_v31  ;;  %v2294_v3 = vpop.f32.mrb[35].mxu1  ;;  %v13653_v0 = vld [vmem:[%s22376_s15 + $0x100] sm:$0xff] }
 0x47e   : > { %v2295_v5 = vadd.f32 %v22554_v31, %v2294_v3  ;;  %16702 = vmatprep.mubr.msk.f32.mxu0 %vm1677_vm0, %v2363_v63  ;;  %v13657_v3 = vld [vmem:[%s22376_s15 + $0x120] sm:$0xff] }
 0x47f   : > { %16703 = vmatmul.mubr.msk.f32.vlgmr.msra.gmra.mrb[48].mxu0 %vm1677_vm0, %v2364_v1  ;;  %v2366_v15 = vmax.f32 %v2300_v2, 0.0  ;;  %v13655_v1 = vld [vmem:[%s22376_s15 + $0x110] sm:$0xff]  ;;  %v13656_v2 = vld [vmem:[%s22376_s15 + $0x118] sm:$0xff] }
 0x480   : > { %v2365_v13 = vmax.f32 %v2295_v5, 0.0  ;;  %v16670_v14 = vpop.f32.mrb[36].mxu1  ;;  %19921 = vmatpush3.bf16.msra.mxu0 %v22708_v26  ;;  %v19930_v26 = vpack.c.bf16 %v13676_v20, %v13675_v19  ;;  %v13659_v5 = vld [vmem:[%s22376_s15 + $0x130] sm:$0xff] }
 0x481   : > { %v2310_v16 = vadd.f32 %v16670_v14, %v22554_v31  ;;  %v2304_v17 = vpop.f32.mrb[37].mxu1  ;;  %19923 = vmatprep.subr.bf16.mxu0 %v19922_v4  ;;  %v13663_v14 = vld [vmem:[%s22376_s15 + $0x150] sm:$0xff] }
 0x482   : > { %v2305_v18 = vadd.f32 %v22554_v31, %v2304_v17  ;;  %16705 = vmatprep.mubr.msk.f32.mxu0 %vm1677_vm0, %v2365_v13  ;;  %v13662_v13 = vld [vmem:[%s22376_s15 + $0x148] sm:$0xff] }
 0x483   : > { %16706 = vmatmul.mubr.msk.f32.gmra.mrb[50].mxu0 %vm1677_vm0, %v2366_v15  ;;  %v2368_v23 = vmax.f32 %v2310_v16, 0.0  ;;  %v13664_v15 = vld [vmem:[%s22376_s15 + $0x158] sm:$0xff]  ;;  %v13665_v16 = vld [vmem:[%s22376_s15 + $0x160] sm:$0xff]  ;;  %v13666_v17 = vld [vmem:[%s22376_s15 + $0x168] sm:$0xff] }
 0x484   : > { %v2367_v21 = vmax.f32 %v2305_v18, 0.0  ;;  %v16673_v22 = vpop.f32.mrb[38].mxu1  ;;  %19925 = vmatpush3.bf16.msra.mxu0 %v19922_v4  ;;  %v13658_v4 = vld [vmem:[%s22376_s15 + $0x128] sm:$0xff]  ;;  %v13668_v18 = vld [vmem:[%s22376_s15 + $0x178] sm:$0xff] }
 0x485   : > { %v2320_v24 = vadd.f32 %v16673_v22, %v22554_v31  ;;  %v2314_v25 = vpop.f32.mrb[39].mxu1  ;;  %19927 = vmatprep.subr.bf16.mxu0 %v19926_v40 }
 0x486   : > { %v2315_v8 = vadd.f32 %v22554_v31, %v2314_v25  ;;  %16708 = vmatprep.mubr.msk.f32.mxu0 %vm1677_vm0, %v2367_v21 }
 0x487   : > { %16709 = vmatmul.mubr.msk.f32.gmra.mrb[52].mxu0 %vm1677_vm0, %v2368_v23  ;;  %v2370_v28 = vmax.f32 %v2320_v24, 0.0 }
 0x488   : > { %v2369_v11 = vmax.f32 %v2315_v8, 0.0  ;;  %v16676_v12 = vpop.f32.mrb[40].mxu1  ;;  %19929 = vmatpush3.bf16.msra.mxu0 %v19926_v40  ;;  %v13667_v40 = vld [vmem:[%s22376_s15 + $0x170] sm:$0xff] }
 0x489   : > { %v2330_v29 = vadd.f32 %v16676_v12, %v22554_v31  ;;  %v2324_v30 = vpop.f32.mrb[41].mxu1  ;;  %19931 = vmatprep.subr.bf16.mxu0 %v19930_v26 }
 0x48a   : > { %v2325_v33 = vadd.f32 %v22554_v31, %v2324_v30  ;;  %16711 = vmatprep.mubr.msk.f32.mxu0 %vm1677_vm0, %v2369_v11 }
 0x48b   : > { %16712 = vmatmul.mubr.msk.f32.gmra.mrb[54].mxu0 %vm1677_vm0, %v2370_v28  ;;  %v2372_v38 = vmax.f32 %v2330_v29, 0.0 }
 0x48c   : > { %v2371_v36 = vmax.f32 %v2325_v33, 0.0  ;;  %v16679_v37 = vpop.f32.mrb[42].mxu1  ;;  %19933 = vmatpush3.bf16.msra.mxu0 %v19930_v26 }
 0x48d   : > { %v2340_v39 = vadd.f32 %v16679_v37, %v22554_v31  ;;  %v2334_v41 = vpop.f32.mrb[43].mxu1  ;;  %19935 = vmatprep.subr.bf16.mxu0 %v19934_v32 }
 0x48e   : > { %v2335_v43 = vadd.f32 %v22554_v31, %v2334_v41  ;;  %16714 = vmatprep.mubr.msk.f32.mxu0 %vm1677_vm0, %v2371_v36 }
 0x48f   : > { %16715 = vmatmul.mubr.msk.f32.gmra.mrb[56].mxu0 %vm1677_vm0, %v2372_v38  ;;  %v2374_v48 = vmax.f32 %v2340_v39, 0.0 }
 0x490   : > { %v2373_v46 = vmax.f32 %v2335_v43, 0.0  ;;  %v16682_v47 = vpop.f32.mrb[44].mxu1  ;;  %19937 = vmatpush3.bf16.msra.mxu0 %v19934_v32 }
 0x491   : > { %v2350_v49 = vadd.f32 %v16682_v47, %v22554_v31  ;;  %v2344_v50 = vpop.f32.mrb[45].mxu1  ;;  %19939 = vmatprep.subr.bf16.mxu0 %v19938_v42  ;;  %v22867_v47 = vld [vmem:[%s26647_s1 + $0x10] sm:$0xff] }
 0x492   : > { %v2345_v52 = vadd.f32 %v22554_v31, %v2344_v50  ;;  %16717 = vmatprep.mubr.msk.f32.mxu0 %vm1677_vm0, %v2373_v46 }
 0x493   : > { %16718 = vmatmul.mubr.msk.f32.gmra.mrb[58].mxu0 %vm1677_vm0, %v2374_v48  ;;  %v2376_v57 = vmax.f32 %v2350_v49, 0.0  ;;  %v22873_v49 = vld [vmem:[%s26647_s1 + $0x18] sm:$0xff] }
 0x494   : > { %v2375_v55 = vmax.f32 %v2345_v52, 0.0  ;;  %v16685_v56 = vpop.f32.mrb[46].mxu1  ;;  %19941 = vmatpush3.bf16.msra.mxu0 %v19938_v42  ;;  %v22879_v52 = vld [vmem:[%s26647_s1 + $0x20] sm:$0xff] }
 0x495   : > { %v2360_v58 = vadd.f32 %v16685_v56, %v22554_v31  ;;  %v2354_v59 = vpop.f32.mrb[47].mxu1  ;;  %19943 = vmatprep.subr.bf16.mxu0 %v19942_v51 }
 0x496   : > { %v2355_v61 = vadd.f32 %v22554_v31, %v2354_v59  ;;  %16720 = vmatprep.mubr.msk.f32.mxu0 %vm1677_vm0, %v2375_v55  ;;  %v13654_v31 = vld [vmem:[%s22376_s15 + $0x108] sm:$0xff]  ;;  %v22897_v59 = vld [vmem:[%s26647_s1 + $0x38] sm:$0xff] }
 0x497   : > { %16721 = vmatmul.mubr.msk.f32.gmra.mrb[60].mxu0 %vm1677_vm0, %v2376_v57  ;;  %v2378_v63 = vmax.f32 %v2360_v58, 0.0  ;;  %v22891_v57 = vld [vmem:[%s26647_s1 + $0x30] sm:$0xff] }
 0x498   : > { %v2377_v62 = vmax.f32 %v2355_v61, 0.0  ;;  %19945 = vmatpush3.bf16.msra.mxu0 %v19942_v51 }
 0x499   : > { %19947 = vmatprep.subr.bf16.mxu0 %v19946_v60 }
 0x49a   : > { %16723 = vmatprep.mubr.msk.f32.mxu0 %vm1677_vm0, %v2377_v62  ;;  %v22903_v62 = vld [vmem:[%s26647_s1 + $0x40] sm:$0xff] }
 0x49b   : > { %16724 = vmatmul.mubr.msk.f32.gmra.mrb[62].mxu0 %vm1677_vm0, %v2378_v63 }
 0x49c   : > { %19949 = vmatpush3.bf16.msra.mxu0 %v19946_v60  ;;  %16814 = vmatprep.mubr.f32.mxu0 %v13653_v0  ;;  %v22909_v0 = vld [vmem:[%s26647_s1 + $0x48] sm:$0xff] }
 0x49f   : > { %16815 = vmatmul.mubr.f32.vlgmr.msra.gmra.mrb[64].mxu0 %v13654_v31 }
 0x4a0   : > { %16817 = vmatprep.mubr.f32.mxu0 %v13655_v1 }
 0x4a3   : > { %16818 = vmatmul.mubr.f32.gmra.mrb[66].mxu0 %v13656_v2  ;;  %v22915_v2 = vld [vmem:[%s26647_s1 + $0x50] sm:$0xff] }
 0x4a4   : > { %16820 = vmatprep.mubr.f32.mxu0 %v13657_v3 }
 0x4a7   : > { %16821 = vmatmul.mubr.f32.gmra.mrb[68].mxu0 %v13658_v4  ;;  %v22921_v4 = vld [vmem:[%s26647_s1 + $0x58] sm:$0xff] }
 0x4a8   : > { %16823 = vmatprep.mubr.f32.mxu0 %v13659_v5 }
 0x4ab   : > { %16824 = vmatmul.mubr.f32.gmra.mrb[70].mxu0 %v13660_v6 }
 0x4ac   : > { %16826 = vmatprep.mubr.f32.mxu0 %v13661_v7  ;;  %v22927_v7 = vld [vmem:[%s26647_s1 + $0x60] sm:$0xff] }
 0x4af   : > { %16827 = vmatmul.mubr.f32.gmra.mrb[72].mxu0 %v13662_v13 }
 0x4b0   : > { %16829 = vmatprep.mubr.f32.mxu0 %v13663_v14  ;;  %v22933_v14 = vld [vmem:[%s26647_s1 + $0x68] sm:$0xff] }
 0x4b3   : > { %16830 = vmatmul.mubr.f32.gmra.mrb[74].mxu0 %v13664_v15 }
 0x4b4   : > { %16832 = vmatprep.mubr.f32.mxu0 %v13665_v16 }
 0x4b7   : > { %16833 = vmatmul.mubr.f32.gmra.mrb[76].mxu0 %v13666_v17  ;;  %v22939_v17 = vld [vmem:[%s26647_s1 + $0x70] sm:$0xff] }
 0x4b8   : > { %16835 = vmatprep.mubr.f32.mxu0 %v13667_v40 }
 0x4bb   : > { %16836 = vmatmul.mubr.f32.gmra.mrb[78].mxu0 %v13668_v18  ;;  %v22945_v18 = vld [vmem:[%s26647_s1 + $0x78] sm:$0xff] }
 0x552   : > { %v16704_v19 = vpop.f32.mrb[48].mxu0 }
 0x553   : > { %v2502_v20 = vpop.f32.mrb[49].mxu0 }
 0x554   : > { %v19886_v21 = vpack.c.bf16 %v16704_v19, %v2502_v20  ;;  %v22951_v19 = vld [vmem:[%s26647_s1] sm:$0xff] }
 0x555   : > { %v13685_v20 = vld [vmem:[%s26650_s4 + $0x80] sm:$0xff] }
 0x556   : > { %v16707_v22 = vpop.f32.mrb[50].mxu0  ;;  %19887 = vmatprep.subr.bf16.mxu1 %v19886_v21 }
 0x557   : > { %v2512_v23 = vpop.f32.mrb[51].mxu0  ;;  %19889 = vmatpush3.bf16.msra.mxu1 %v19886_v21  ;;  %v13686_v21 = vld [vmem:[%s26650_s4 + $0x88] sm:$0xff] }
 0x558   : > { %v19890_v24 = vpack.c.bf16 %v16707_v22, %v2512_v23  ;;  %v19982_v22 = vpack.c.bf16 %v13686_v21, %v13685_v20  ;;  %v13687_v23 = vld [vmem:[%s26650_s4 + $0x90] sm:$0xff]  ;;  %v23037_v21 = vld [vmem:[%s26649_s3] ss:$0 sm:$0xff] }
 0x55a   : > { %v16710_v25 = vpop.f32.mrb[52].mxu0  ;;  %19891 = vmatprep.subr.bf16.mxu1 %v19890_v24  ;;  %19983 = vmatprep.subr.bf16.mxu0 %v19982_v22 }
 0x55b   : > { %v2522_v26 = vpop.f32.mrb[53].mxu0  ;;  %19893 = vmatpush3.bf16.msra.mxu1 %v19890_v24  ;;  %19985 = vmatpush3.bf16.msra.mxu0 %v19982_v22  ;;  %v13688_v24 = vld [vmem:[%s26650_s4 + $0x98] sm:$0xff] }
 0x55c   : > { %v19894_v8 = vpack.c.bf16 %v16710_v25, %v2522_v26  ;;  %v19986_v25 = vpack.c.bf16 %v13688_v24, %v13687_v23  ;;  %v13689_v26 = vld [vmem:[%s26650_s4 + $0xa0] sm:$0xff] }
 0x55e   : > { %v16713_v9 = vpop.f32.mrb[54].mxu0  ;;  %19895 = vmatprep.subr.bf16.mxu1 %v19894_v8  ;;  %19987 = vmatprep.subr.bf16.mxu0 %v19986_v25 }
 0x55f   : > { %v2532_v10 = vpop.f32.mrb[55].mxu0  ;;  %19897 = vmatpush3.bf16.msra.mxu1 %v19894_v8  ;;  %19989 = vmatpush3.bf16.msra.mxu0 %v19986_v25  ;;  %v13690_v8 = vld [vmem:[%s26650_s4 + $0xa8] sm:$0xff]  ;;  %v13727_v25 = vld [vmem:[%s26648_s2 + $0x190] sm:$0xff] }
 0x560   : > { %v19898_v11 = vpack.c.bf16 %v16713_v9, %v2532_v10  ;;  %v19990_v9 = vpack.c.bf16 %v13690_v8, %v13689_v26  ;;  %v13691_v10 = vld [vmem:[%s26650_s4 + $0xb0] sm:$0xff]  ;;  %v13728_v26 = vld [vmem:[%s26648_s2 + $0x198] sm:$0xff] }
 0x562   : > { %v16716_v12 = vpop.f32.mrb[56].mxu0  ;;  %19899 = vmatprep.subr.bf16.mxu1 %v19898_v11  ;;  %19991 = vmatprep.subr.bf16.mxu0 %v19990_v9 }
 0x563   : > { %v2542_v28 = vpop.f32.mrb[57].mxu0  ;;  %19901 = vmatpush3.bf16.msra.mxu1 %v19898_v11  ;;  %19993 = vmatpush3.bf16.msra.mxu0 %v19990_v9  ;;  %v13692_v11 = vld [vmem:[%s26650_s4 + $0xb8] sm:$0xff] }
 0x564   : > { %v19902_v29 = vpack.c.bf16 %v16716_v12, %v2542_v28  ;;  %v19994_v12 = vpack.c.bf16 %v13692_v11, %v13691_v10  ;;  %v13725_v28 = vld [vmem:[%s26648_s2 + $0x180] sm:$0xff] }
 0x566   : > { %v16719_v30 = vpop.f32.mrb[58].mxu0  ;;  %19903 = vmatprep.subr.bf16.mxu1 %v19902_v29  ;;  %19995 = vmatprep.subr.bf16.mxu0 %v19994_v12 }
 0x567   : > { %v2552_v32 = vpop.f32.mrb[59].mxu0  ;;  %19905 = vmatpush3.bf16.msra.mxu1 %v19902_v29  ;;  %19997 = vmatpush3.bf16.msra.mxu0 %v19994_v12  ;;  %v13726_v29 = vld [vmem:[%s26648_s2 + $0x188] sm:$0xff]  ;;  %v20034_v12 = vpack.c.bf16 %v13728_v26, %v13727_v25 }
 0x568   : > { %v19906_v33 = vpack.c.bf16 %v16719_v30, %v2552_v32  ;;  %v23000_v30 = vpack.c.bf16 %v13726_v29, %v13725_v28  ;;  %v13729_v29 = vld [vmem:[%s26648_s2 + $0x1a0] sm:$0xff] }
 0x56a   : > { %v16722_v34 = vpop.f32.mrb[60].mxu0  ;;  %19907 = vmatprep.subr.bf16.mxu1 %v19906_v33  ;;  %20031 = vmatprep.subr.bf16.mxu0 %v23000_v30 }
 0x56b   : > { %v2562_v35 = vpop.f32.mrb[61].mxu0  ;;  %19909 = vmatpush3.bf16.msra.mxu1 %v19906_v33 }
 0x56c   : > { %v19910_v36 = vpack.c.bf16 %v16722_v34, %v2562_v35 }
 0x56e   : > { %v16725_v37 = vpop.f32.mrb[62].mxu0  ;;  %19911 = vmatprep.subr.bf16.mxu1 %v19910_v36 }
 0x56f   : > { %v2572_v38 = vpop.f32.mrb[63].mxu0  ;;  %19913 = vmatpush3.bf16.msra.mxu1 %v19910_v36 }
 0x570   : > { %v19914_v39 = vpack.c.bf16 %v16725_v37, %v2572_v38 }
 0x572   : > { %19915 = vmatprep.subr.bf16.mxu1 %v19914_v39  ;;  %v16816_v41 = vpop.f32.mrb[64].mxu0 }
 0x573   : > { %19917 = vmatpush3.bf16.msra.mxu1 %v19914_v39  ;;  %v2907_v42 = vpop.f32.mrb[65].mxu0 }
 0x574   : > { %v19950_v43 = vpack.c.bf16 %v16816_v41, %v2907_v42 }
 0x576   : > { %16759 = vmatmul.mubr.f32.vlgmr.msra.gmra.mrb[48].mxu1 %v22861_v44  ;;  %v16819_v45 = vpop.f32.mrb[66].mxu0  ;;  %19951 = vmatprep.subr.bf16.mxu1 %v19950_v43 }
 0x577   : > { %v2917_v46 = vpop.f32.mrb[67].mxu0  ;;  %19953 = vmatpush3.bf16.msra.mxu1 %v19950_v43  ;;  %16761 = vmatprep.mubr.f32.mxu1 %v22867_v47 }
 0x578   : > { %v19954_v48 = vpack.c.bf16 %v16819_v45, %v2917_v46 }
 0x57a   : > { %16762 = vmatmul.mubr.f32.gmra.mrb[50].mxu1 %v22873_v49  ;;  %v16822_v50 = vpop.f32.mrb[68].mxu0  ;;  %19955 = vmatprep.subr.bf16.mxu1 %v19954_v48 }
 0x57b   : > { %v2927_v51 = vpop.f32.mrb[69].mxu0  ;;  %19957 = vmatpush3.bf16.msra.mxu1 %v19954_v48  ;;  %16764 = vmatprep.mubr.f32.mxu1 %v22879_v52 }
 0x57c   : > { %v19958_v53 = vpack.c.bf16 %v16822_v50, %v2927_v51 }
 0x57e   : > { %16765 = vmatmul.mubr.f32.gmra.mrb[52].mxu1 %v22885_v54  ;;  %v16825_v55 = vpop.f32.mrb[70].mxu0  ;;  %19959 = vmatprep.subr.bf16.mxu1 %v19958_v53 }
 0x57f   : > { %v2937_v56 = vpop.f32.mrb[71].mxu0  ;;  %19961 = vmatpush3.bf16.msra.mxu1 %v19958_v53  ;;  %16767 = vmatprep.mubr.f32.mxu1 %v22891_v57 }
 0x580   : > { %v19962_v58 = vpack.c.bf16 %v16825_v55, %v2937_v56 }
 0x582   : > { %16768 = vmatmul.mubr.f32.gmra.mrb[54].mxu1 %v22897_v59  ;;  %v16828_v60 = vpop.f32.mrb[72].mxu0  ;;  %19963 = vmatprep.subr.bf16.mxu1 %v19962_v58 }
 0x583   : > { %v2947_v61 = vpop.f32.mrb[73].mxu0  ;;  %19965 = vmatpush3.bf16.msra.mxu1 %v19962_v58  ;;  %16770 = vmatprep.mubr.f32.mxu1 %v22903_v62 }
 0x584   : > { %v19966_v63 = vpack.c.bf16 %v16828_v60, %v2947_v61 }
 0x586   : > { %16771 = vmatmul.mubr.f32.gmra.mrb[56].mxu1 %v22909_v0  ;;  %v16831_v31 = vpop.f32.mrb[74].mxu0  ;;  %19967 = vmatprep.subr.bf16.mxu1 %v19966_v63 }
 0x587   : > { %v2957_v1 = vpop.f32.mrb[75].mxu0  ;;  %19969 = vmatpush3.bf16.msra.mxu1 %v19966_v63  ;;  %16773 = vmatprep.mubr.f32.mxu1 %v22915_v2 }
 0x588   : > { %v19970_v3 = vpack.c.bf16 %v16831_v31, %v2957_v1 }
 0x58a   : > { %16774 = vmatmul.mubr.f32.gmra.mrb[58].mxu1 %v22921_v4  ;;  %v16834_v5 = vpop.f32.mrb[76].mxu0  ;;  %19971 = vmatprep.subr.bf16.mxu1 %v19970_v3 }
 0x58b   : > { %v2967_v6 = vpop.f32.mrb[77].mxu0  ;;  %19973 = vmatpush3.bf16.msra.mxu1 %v19970_v3  ;;  %16776 = vmatprep.mubr.f32.mxu1 %v22927_v7 }
 0x58c   : > { %v19974_v13 = vpack.c.bf16 %v16834_v5, %v2967_v6 }
 0x58e   : > { %16777 = vmatmul.mubr.f32.gmra.mrb[60].mxu1 %v22933_v14  ;;  %v16837_v15 = vpop.f32.mrb[78].mxu0  ;;  %19975 = vmatprep.subr.bf16.mxu1 %v19974_v13 }
 0x58f   : > { %v2977_v16 = vpop.f32.mrb[79].mxu0  ;;  %19977 = vmatpush3.bf16.msra.mxu1 %v19974_v13  ;;  %16779 = vmatprep.mubr.f32.mxu1 %v22939_v17 }
 0x590   : > { %v19978_v40 = vpack.c.bf16 %v16837_v15, %v2977_v16 }
 0x592   : > { %16780 = vmatmul.mubr.f32.gmra.mrb[62].mxu1 %v22945_v18  ;;  %19979 = vmatprep.subr.bf16.mxu1 %v19978_v40 }
 0x593   : > { %19981 = vmatpush3.bf16.msra.mxu1 %v19978_v40  ;;  %16870 = vmatprep.mubr.f32.mxu1 %v22951_v19 }
 0x596   : > { %16871 = vmatmul.mubr.f32.vlgmr.msra.gmra.mrb[64].mxu1 %v22861_v44 }
 0x597   : > { %16873 = vmatprep.mubr.f32.mxu1 %v22867_v47 }
 0x59a   : > { %16874 = vmatmul.mubr.f32.gmra.mrb[66].mxu1 %v22873_v49 }
 0x59b   : > { %16876 = vmatprep.mubr.f32.mxu1 %v22879_v52 }
 0x59e   : > { %16877 = vmatmul.mubr.f32.gmra.mrb[68].mxu1 %v22885_v54 }
 0x59f   : > { %16879 = vmatprep.mubr.f32.mxu1 %v22891_v57 }
 0x5a2   : > { %16880 = vmatmul.mubr.f32.gmra.mrb[70].mxu1 %v22897_v59 }
 0x5a3   : > { %16882 = vmatprep.mubr.f32.mxu1 %v22903_v62 }
 0x5a6   : > { %16883 = vmatmul.mubr.f32.gmra.mrb[72].mxu1 %v22909_v0 }
 0x5a7   : > { %16885 = vmatprep.mubr.f32.mxu1 %v22915_v2 }
 0x5aa   : > { %16886 = vmatmul.mubr.f32.gmra.mrb[74].mxu1 %v22921_v4 }
 0x5ab   : > { %16888 = vmatprep.mubr.f32.mxu1 %v22927_v7 }
 0x5ae   : > { %16889 = vmatmul.mubr.f32.gmra.mrb[76].mxu1 %v22933_v14 }
 0x5af   : > { %16891 = vmatprep.mubr.f32.mxu1 %v22939_v17 }
 0x5b2   : > { %16892 = vmatmul.mubr.f32.gmra.mrb[78].mxu1 %v22945_v18 }
 0x5b3   : > { %16966 = vmatprep.mubr.f32.mxu1 %v22951_v19 }
 0x649   : > { %v16760_v32 = vpop.f32.mrb[48].mxu1 }
 0x64a   : > { %v2647_v33 = vpop.f32.mrb[49].mxu1  ;;  %v2653_v34 = vadd.f32 %v16760_v32, %v22715_v27  ;;  %v13730_v32 = vld [vmem:[%s26648_s2 + $0x1a8] sm:$0xff] }
 0x64b   : > { %v2648_v36 = vadd.f32 %v22715_v27, %v2647_v33 }
 0x64c   : > { %2744 = vrot.lane.b32.xlu0 %v2653_v34, %s21738_s20 }
 0x64d   : > { %v16763_v35 = vpop.f32.mrb[50].mxu1 }
 0x64e   : > { %v2657_v37 = vpop.f32.mrb[51].mxu1  ;;  %v2663_v38 = vadd.f32 %v16763_v35, %v22715_v27 }
 0x64f   : > { %v2658_v41 = vadd.f32 %v22715_v27, %v2657_v37 }
 0x650   : > { %2748 = vrot.lane.b32.xlu1 %v2663_v38, %s21738_s20  ;;  %2742 = vrot.lane.b32.xlu0 %v2648_v36, %s21738_s20  ;;  %v20038_v38 = vpack.c.bf16 %v13730_v32, %v13729_v29 }
 0x651   : > { %v16766_v39 = vpop.f32.mrb[52].mxu1 }
 0x652   : > { %v2667_v42 = vpop.f32.mrb[53].mxu1  ;;  %v2673_v46 = vadd.f32 %v16766_v39, %v22715_v27 }
 0x653   : > { %v2668_v43 = vadd.f32 %v22715_v27, %v2667_v42  ;;  %v13732_v42 = vld [vmem:[%s26648_s2 + $0x1b8] sm:$0xff] }
 0x654   : > { %2746 = vrot.lane.b32.xlu1 %v2658_v41, %s21738_s20  ;;  %v13731_v41 = vld [vmem:[%s26648_s2 + $0x1b0] sm:$0xff] }
 0x655   : > { %v16769_v45 = vpop.f32.mrb[54].mxu1  ;;  %2750 = vrot.lane.b32.xlu0 %v2668_v43, %s21738_s20 }
 0x656   : > { %v2677_v48 = vpop.f32.mrb[55].mxu1  ;;  %v2683_v53 = vadd.f32 %v16769_v45, %v22715_v27 }
 0x657   : > { %v2678_v50 = vadd.f32 %v22715_v27, %v2677_v48 }
 0x658   : > { %2752 = vrot.lane.b32.xlu1 %v2673_v46, %s21738_s20 }
 0x659   : > { %v16772_v51 = vpop.f32.mrb[56].mxu1  ;;  %2754 = vrot.lane.b32.xlu0 %v2678_v50, %s21738_s20  ;;  %v20042_v50 = vpack.c.bf16 %v13732_v42, %v13731_v41  ;;  %v13709_v41 = vld [vmem:[%s22376_s15 + $0x180] sm:$0xff]  ;;  %v13710_v42 = vld [vmem:[%s22376_s15 + $0x188] sm:$0xff] }
 0x65a   : > { %v2687_v55 = vpop.f32.mrb[57].mxu1  ;;  %v2693_v60 = vadd.f32 %v16772_v51, %v22715_v27 }
 0x65b   : > { %v2688_v56 = vadd.f32 %v22715_v27, %v2687_v55  ;;  %v13734_v55 = vld [vmem:[%s26648_s2 + $0x1c8] sm:$0xff] }
 0x65c   : > { %2756 = vrot.lane.b32.xlu1 %v2683_v53, %s21738_s20  ;;  %v13733_v53 = vld [vmem:[%s26648_s2 + $0x1c0] sm:$0xff] }
 0x65d   : > { %v16775_v58 = vpop.f32.mrb[58].mxu1  ;;  %2758 = vrot.lane.b32.xlu0 %v2688_v56, %s21738_s20 }
 0x65e   : > { %v2697_v61 = vpop.f32.mrb[59].mxu1  ;;  %v2703_v1 = vadd.f32 %v16775_v58, %v22715_v27 }
 0x65f   : > { %v2698_v63 = vadd.f32 %v22715_v27, %v2697_v61 }
 0x660   : > { %2760 = vrot.lane.b32.xlu1 %v2693_v60, %s21738_s20 }
 0x661   : > { %v16778_v31 = vpop.f32.mrb[60].mxu1  ;;  %2762 = vrot.lane.b32.xlu0 %v2698_v63, %s21738_s20 }
 0x662   : > { %v2707_v3 = vpop.f32.mrb[61].mxu1  ;;  %v2713_v13 = vadd.f32 %v16778_v31, %v22715_v27  ;;  %v20046_v31 = vpack.c.bf16 %v13734_v55, %v13733_v53  ;;  %v13718_v53 = vld [vmem:[%s22376_s15 + $0x1c8] sm:$0xff]  ;;  %v13719_v55 = vld [vmem:[%s22376_s15 + $0x1d0] sm:$0xff] }
 0x663   : > { %v2708_v5 = vadd.f32 %v22715_v27, %v2707_v3  ;;  %v13735_v3 = vld [vmem:[%s26648_s2 + $0x1d0] sm:$0xff] }
 0x664   : > { %2764 = vrot.lane.b32.xlu1 %v2703_v1, %s21738_s20 }
 0x665   : > { %v16781_v6 = vpop.f32.mrb[62].mxu1  ;;  %2766 = vrot.lane.b32.xlu0 %v2708_v5, %s21738_s20  ;;  %v13736_v5 = vld [vmem:[%s26648_s2 + $0x1d8] sm:$0xff] }
 0x666   : > { %v2717_v15 = vpop.f32.mrb[63].mxu1  ;;  %v2723_v20 = vadd.f32 %v16781_v6, %v22715_v27 }
 0x667   : > { %v2718_v16 = vadd.f32 %v22715_v27, %v2717_v15 }
 0x668   : > { %2768 = vrot.lane.b32.xlu1 %v2713_v13, %s21738_s20 }
 0x669   : > { %v16872_v40 = vpop.f32.mrb[64].mxu1  ;;  %2770 = vrot.lane.b32.xlu0 %v2718_v16, %s21738_s20 }
 0x66a   : > { %v3058_v22 = vadd.f32 %v23037_v21, %v16872_v40  ;;  %v3052_v23 = vpop.f32.mrb[65].mxu1 }
 0x66b   : > { %v3053_v24 = vadd.f32 %v23037_v21, %v3052_v23  ;;  %v13737_v23 = vld [vmem:[%s26648_s2 + $0x1e0] sm:$0xff] }
 0x66c   : > { %2772 = vrot.lane.b32.xlu1 %v2723_v20, %s21738_s20  ;;  %v3132_v9 = vmax.f32 %v3058_v22, 0.0  ;;  %v20050_v20 = vpack.c.bf16 %v13736_v5, %v13735_v3 }
 0x66d   : > { %v3131_v27 = vmax.f32 %v3053_v24, 0.0  ;;  %v16875_v8 = vpop.f32.mrb[66].mxu1  ;;  %v13738_v24 = vld [vmem:[%s26648_s2 + $0x1e8] sm:$0xff] }
 0x66e   : > { %v3068_v10 = vadd.f32 %v23037_v21, %v16875_v8  ;;  %v3062_v11 = vpop.f32.mrb[67].mxu1 }
 0x66f   : > { %v3063_v28 = vadd.f32 %v23037_v21, %v3062_v11  ;;  %16910 = vmatprep.mubr.msk.f32.mxu0 %vm1677_vm0, %v3131_v27 }
 0x670   : > { %16911 = vmatmul.mubr.msk.f32.vlgmr.msra.gmra.mrb[80].mxu0 %vm1677_vm0, %v3132_v9  ;;  %v3134_v35 = vmax.f32 %v3068_v10, 0.0  ;;  %v20054_v10 = vpack.c.bf16 %v13738_v24, %v13737_v23 }
 0x671   : > { %v3133_v33 = vmax.f32 %v3063_v28, 0.0  ;;  %v16878_v34 = vpop.f32.mrb[68].mxu1  ;;  %20033 = vmatpush3.bf16.msra.mxu0 %v23000_v30  ;;  %v13740_v28 = vld [vmem:[%s26648_s2 + $0x1f8] sm:$0xff] }
 0x672   : > { %v3078_v36 = vadd.f32 %v23037_v21, %v16878_v34  ;;  %v3072_v37 = vpop.f32.mrb[69].mxu1  ;;  %20035 = vmatprep.subr.bf16.mxu0 %v20034_v12 }
 0x673   : > { %v3073_v39 = vadd.f32 %v23037_v21, %v3072_v37  ;;  %16913 = vmatprep.mubr.msk.f32.mxu0 %vm1677_vm0, %v3133_v33 }
 0x674   : > { %16914 = vmatmul.mubr.msk.f32.gmra.mrb[82].mxu0 %vm1677_vm0, %v3134_v35  ;;  %v3136_v45 = vmax.f32 %v3078_v36, 0.0 }
 0x675   : > { %v3135_v30 = vmax.f32 %v3073_v39, 0.0  ;;  %v16881_v43 = vpop.f32.mrb[70].mxu1  ;;  %20037 = vmatpush3.bf16.msra.mxu0 %v20034_v12  ;;  %v13739_v12 = vld [vmem:[%s26648_s2 + $0x1f0] sm:$0xff] }
 0x676   : > { %v3088_v46 = vadd.f32 %v23037_v21, %v16881_v43  ;;  %v3082_v48 = vpop.f32.mrb[71].mxu1  ;;  %20039 = vmatprep.subr.bf16.mxu0 %v20038_v38  ;;  %v20058_v36 = vpack.c.bf16 %v13740_v28, %v13739_v12  ;;  %v13712_v43 = vld [vmem:[%s22376_s15 + $0x198] sm:$0xff] }
 0x677   : > { %v3083_v51 = vadd.f32 %v23037_v21, %v3082_v48  ;;  %16916 = vmatprep.mubr.msk.f32.mxu0 %vm1677_vm0, %v3135_v30  ;;  %v13711_v30 = vld [vmem:[%s22376_s15 + $0x190] sm:$0xff] }
 0x678   : > { %16917 = vmatmul.mubr.msk.f32.gmra.mrb[84].mxu0 %vm1677_vm0, %v3136_v45  ;;  %v3138_v60 = vmax.f32 %v3088_v46, 0.0  ;;  %v13713_v45 = vld [vmem:[%s22376_s15 + $0x1a0] sm:$0xff]  ;;  %v13714_v46 = vld [vmem:[%s22376_s15 + $0x1a8] sm:$0xff]  ;;  %v13715_v48 = vld [vmem:[%s22376_s15 + $0x1b0] sm:$0xff] }
 0x679   : > { %v3137_v56 = vmax.f32 %v3083_v51, 0.0  ;;  %v16884_v58 = vpop.f32.mrb[72].mxu1  ;;  %20041 = vmatpush3.bf16.msra.mxu0 %v20038_v38  ;;  %v13717_v51 = vld [vmem:[%s22376_s15 + $0x1c0] sm:$0xff] }
 0x67a   : > { %v3098_v61 = vadd.f32 %v23037_v21, %v16884_v58  ;;  %v3092_v63 = vpop.f32.mrb[73].mxu1  ;;  %20043 = vmatprep.subr.bf16.mxu0 %v20042_v50  ;;  %v13721_v58 = vld [vmem:[%s22376_s15 + $0x1e0] sm:$0xff] }
 0x67b   : > { %v3093_v1 = vadd.f32 %v23037_v21, %v3092_v63  ;;  %16919 = vmatprep.mubr.msk.f32.mxu0 %vm1677_vm0, %v3137_v56  ;;  %v13720_v56 = vld [vmem:[%s22376_s15 + $0x1d8] sm:$0xff] }
 0x67c   : > { %16920 = vmatmul.mubr.msk.f32.gmra.mrb[86].mxu0 %vm1677_vm0, %v3138_v60  ;;  %v3140_v15 = vmax.f32 %v3098_v61, 0.0  ;;  %v13722_v60 = vld [vmem:[%s22376_s15 + $0x1e8] sm:$0xff]  ;;  %v13723_v61 = vld [vmem:[%s22376_s15 + $0x1f0] sm:$0xff]  ;;  %v13724_v63 = vld [vmem:[%s22376_s15 + $0x1f8] sm:$0xff] }
 0x67d   : > { %v3139_v6 = vmax.f32 %v3093_v1, 0.0  ;;  %v16887_v13 = vpop.f32.mrb[74].mxu1  ;;  %20045 = vmatpush3.bf16.msra.mxu0 %v20042_v50  ;;  %v13716_v50 = vld [vmem:[%s22376_s15 + $0x1b8] sm:$0xff] }
 0x67e   : > { %v3108_v16 = vadd.f32 %v23037_v21, %v16887_v13  ;;  %v3102_v40 = vpop.f32.mrb[75].mxu1  ;;  %20047 = vmatprep.subr.bf16.mxu0 %v20046_v31 }
 0x67f   : > { %v3103_v22 = vadd.f32 %v23037_v21, %v3102_v40  ;;  %16922 = vmatprep.mubr.msk.f32.mxu0 %vm1677_vm0, %v3139_v6 }
 0x680   : > { %16923 = vmatmul.mubr.msk.f32.gmra.mrb[88].mxu0 %vm1677_vm0, %v3140_v15  ;;  %v3142_v27 = vmax.f32 %v3108_v16, 0.0 }
 0x681   : > { %v3141_v25 = vmax.f32 %v3103_v22, 0.0  ;;  %v16890_v26 = vpop.f32.mrb[76].mxu1  ;;  %20049 = vmatpush3.bf16.msra.mxu0 %v20046_v31 }
 0x682   : > { %v3118_v8 = vadd.f32 %v23037_v21, %v16890_v26  ;;  %v3112_v9 = vpop.f32.mrb[77].mxu1  ;;  %20051 = vmatprep.subr.bf16.mxu0 %v20050_v20 }
 0x683   : > { %v3113_v11 = vadd.f32 %v23037_v21, %v3112_v9  ;;  %16925 = vmatprep.mubr.msk.f32.mxu0 %vm1677_vm0, %v3141_v25 }
 0x684   : > { %16926 = vmatmul.mubr.msk.f32.gmra.mrb[90].mxu0 %vm1677_vm0, %v3142_v27  ;;  %v3144_v33 = vmax.f32 %v3118_v8, 0.0 }
 0x685   : > { %v3143_v29 = vmax.f32 %v3113_v11, 0.0  ;;  %v16893_v32 = vpop.f32.mrb[78].mxu1  ;;  %20053 = vmatpush3.bf16.msra.mxu0 %v20050_v20 }
 0x686   : > { %v3128_v34 = vadd.f32 %v23037_v21, %v16893_v32  ;;  %v3122_v35 = vpop.f32.mrb[79].mxu1  ;;  %20055 = vmatprep.subr.bf16.mxu0 %v20054_v10 }
 0x687   : > { %v3123_v37 = vadd.f32 %v23037_v21, %v3122_v35  ;;  %16928 = vmatprep.mubr.msk.f32.mxu0 %vm1677_vm0, %v3143_v29 }
 0x688   : > { %16929 = vmatmul.mubr.msk.f32.gmra.mrb[92].mxu0 %vm1677_vm0, %v3144_v33  ;;  %v3146_v39 = vmax.f32 %v3128_v34, 0.0 }
 0x689   : > { %v3145_v38 = vmax.f32 %v3123_v37, 0.0  ;;  %20057 = vmatpush3.bf16.msra.mxu0 %v20054_v10 }
 0x68a   : > { %20059 = vmatprep.subr.bf16.mxu0 %v20058_v36 }
 0x68b   : > { %16931 = vmatprep.mubr.msk.f32.mxu0 %vm1677_vm0, %v3145_v38 }
 0x68c   : > { %16932 = vmatmul.mubr.msk.f32.gmra.mrb[94].mxu0 %vm1677_vm0, %v3146_v39 }
 0x68d   : > { %20061 = vmatpush3.bf16.msra.mxu0 %v20058_v36  ;;  %17022 = vmatprep.mubr.f32.mxu0 %v13709_v41 }
 0x690   : > { %17023 = vmatmul.mubr.f32.vlgmr.msra.gmra.mrb[96].mxu0 %v13710_v42 }
 0x691   : > { %17025 = vmatprep.mubr.f32.mxu0 %v13711_v30 }
 0x694   : > { %17026 = vmatmul.mubr.f32.gmra.mrb[98].mxu0 %v13712_v43 }
 0x695   : > { %17028 = vmatprep.mubr.f32.mxu0 %v13713_v45 }
 0x698   : > { %17029 = vmatmul.mubr.f32.gmra.mrb[100].mxu0 %v13714_v46 }
 0x699   : > { %17031 = vmatprep.mubr.f32.mxu0 %v13715_v48 }
 0x69c   : > { %17032 = vmatmul.mubr.f32.gmra.mrb[102].mxu0 %v13716_v50 }
 0x69d   : > { %17034 = vmatprep.mubr.f32.mxu0 %v13717_v51 }
 0x6a0   : > { %17035 = vmatmul.mubr.f32.gmra.mrb[104].mxu0 %v13718_v53 }
 0x6a1   : > { %17037 = vmatprep.mubr.f32.mxu0 %v13719_v55 }
 0x6a4   : > { %17038 = vmatmul.mubr.f32.gmra.mrb[106].mxu0 %v13720_v56 }
 0x6a5   : > { %17040 = vmatprep.mubr.f32.mxu0 %v13721_v58 }
 0x6a8   : > { %17041 = vmatmul.mubr.f32.gmra.mrb[108].mxu0 %v13722_v60 }
 0x6a9   : > { %17043 = vmatprep.mubr.f32.mxu0 %v13723_v61 }
 0x6ac   : > { %17044 = vmatmul.mubr.f32.gmra.mrb[110].mxu0 %v13724_v63 }
 0x6be   : > { %v2745_v31 = vpop.permute.xlu0 %2744 }
 0x6bf   : > { %2792 = vst.msk [vmem:[%s22719_s10 + $0x10] sm:$0xff] %vm2790_vm2, %v2745_v31 }
 0x6c2   : > { %v2749_v1 = vpop.permute.xlu1 %2748  ;;  %v2743_v3 = vpop.permute.xlu0 %2742 }
 0x6c3   : > { %2794 = vst.msk [vmem:[%s22719_s10 + $0x30] sm:$0xff] %vm2790_vm2, %v2749_v1  ;;  %2791 = vst.msk [vmem:[%s22719_s10] sm:$0xff] %vm2790_vm2, %v2743_v3 }
 0x6c6   : > { %v2747_v5 = vpop.permute.xlu1 %2746 }
 0x6c7   : > { %2793 = vst.msk [vmem:[%s22719_s10 + $0x20] sm:$0xff] %vm2790_vm2, %v2747_v5  ;;  %v2751_v6 = vpop.permute.xlu0 %2750 }
 0x6c8   : > { %2795 = vst.msk [vmem:[%s22719_s10 + $0x40] sm:$0xff] %vm2790_vm2, %v2751_v6 }
 0x6ca   : > { %v2753_v13 = vpop.permute.xlu1 %2752 }
 0x6cb   : > { %2796 = vst.msk [vmem:[%s22719_s10 + $0x50] sm:$0xff] %vm2790_vm2, %v2753_v13  ;;  %v2755_v15 = vpop.permute.xlu0 %2754 }
 0x6cc   : > { %2797 = vst.msk [vmem:[%s22719_s10 + $0x60] sm:$0xff] %vm2790_vm2, %v2755_v15 }
 0x6ce   : > { %v2757_v16 = vpop.permute.xlu1 %2756 }
 0x6cf   : > { %2798 = vst.msk [vmem:[%s22719_s10 + $0x70] sm:$0xff] %vm2790_vm2, %v2757_v16  ;;  %v2759_v40 = vpop.permute.xlu0 %2758 }
 0x6d0   : > { %2799 = vst.msk [vmem:[%s22719_s10 + $0x80] sm:$0xff] %vm2790_vm2, %v2759_v40 }
 0x6d2   : > { %v2761_v20 = vpop.permute.xlu1 %2760 }
 0x6d3   : > { %2800 = vst.msk [vmem:[%s22719_s10 + $0x90] sm:$0xff] %vm2790_vm2, %v2761_v20  ;;  %v2763_v22 = vpop.permute.xlu0 %2762 }
 0x6d4   : > { %2801 = vst.msk [vmem:[%s22719_s10 + $0xa0] sm:$0xff] %vm2790_vm2, %v2763_v22 }
 0x6d6   : > { %v2765_v23 = vpop.permute.xlu1 %2764 }
 0x6d7   : > { %2802 = vst.msk [vmem:[%s22719_s10 + $0xb0] sm:$0xff] %vm2790_vm2, %v2765_v23  ;;  %v2767_v24 = vpop.permute.xlu0 %2766 }
 0x6d8   : > { %2803 = vst.msk [vmem:[%s22719_s10 + $0xc0] sm:$0xff] %vm2790_vm2, %v2767_v24 }
 0x6da   : > { %v2769_v25 = vpop.permute.xlu1 %2768 }
 0x6db   : > { %2804 = vst.msk [vmem:[%s22719_s10 + $0xd0] sm:$0xff] %vm2790_vm2, %v2769_v25  ;;  %v2771_v26 = vpop.permute.xlu0 %2770 }
 0x6dc   : > { %2805 = vst.msk [vmem:[%s22719_s10 + $0xe0] sm:$0xff] %vm2790_vm2, %v2771_v26 }
 0x6de   : > { %v2773_v27 = vpop.permute.xlu1 %2772 }
 0x6df   : > { %2806 = vst.msk [vmem:[%s22719_s10 + $0xf0] sm:$0xff] %vm2790_vm2, %v2773_v27 }
 0x743   : > { %v16912_v8 = vpop.f32.mrb[80].mxu0 }
 0x744   : > { %v3270_v9 = vpop.f32.mrb[81].mxu0 }
 0x745   : > { %v19998_v10 = vpack.c.bf16 %v16912_v8, %v3270_v9  ;;  %v23231_v9 = vld [vmem:[%s26651_s5] ss:$0 sm:$0xff] }
 0x747   : > { %v16915_v11 = vpop.f32.mrb[82].mxu0  ;;  %19999 = vmatprep.subr.bf16.mxu1 %v19998_v10 }
 0x748   : > { %v3280_v12 = vpop.f32.mrb[83].mxu0  ;;  %20001 = vmatpush3.bf16.msra.mxu1 %v19998_v10 }
 0x749   : > { %v20002_v28 = vpack.c.bf16 %v16915_v11, %v3280_v12 }
 0x74b   : > { %v16918_v29 = vpop.f32.mrb[84].mxu0  ;;  %20003 = vmatprep.subr.bf16.mxu1 %v20002_v28 }
 0x74c   : > { %v3290_v32 = vpop.f32.mrb[85].mxu0  ;;  %20005 = vmatpush3.bf16.msra.mxu1 %v20002_v28 }
 0x74d   : > { %v20006_v33 = vpack.c.bf16 %v16918_v29, %v3290_v32 }
 0x74f   : > { %v16921_v34 = vpop.f32.mrb[86].mxu0  ;;  %20007 = vmatprep.subr.bf16.mxu1 %v20006_v33 }
 0x750   : > { %v3300_v35 = vpop.f32.mrb[87].mxu0  ;;  %20009 = vmatpush3.bf16.msra.mxu1 %v20006_v33 }
 0x751   : > { %v20010_v36 = vpack.c.bf16 %v16921_v34, %v3300_v35 }
 0x753   : > { %v16924_v37 = vpop.f32.mrb[88].mxu0  ;;  %20011 = vmatprep.subr.bf16.mxu1 %v20010_v36 }
 0x754   : > { %v3310_v38 = vpop.f32.mrb[89].mxu0  ;;  %20013 = vmatpush3.bf16.msra.mxu1 %v20010_v36 }
 0x755   : > { %v20014_v39 = vpack.c.bf16 %v16924_v37, %v3310_v38 }
 0x757   : > { %v16927_v41 = vpop.f32.mrb[90].mxu0  ;;  %20015 = vmatprep.subr.bf16.mxu1 %v20014_v39 }
 0x758   : > { %v3320_v42 = vpop.f32.mrb[91].mxu0  ;;  %20017 = vmatpush3.bf16.msra.mxu1 %v20014_v39 }
 0x759   : > { %v20018_v30 = vpack.c.bf16 %v16927_v41, %v3320_v42 }
 0x75b   : > { %v16930_v43 = vpop.f32.mrb[92].mxu0  ;;  %20019 = vmatprep.subr.bf16.mxu1 %v20018_v30 }
 0x75c   : > { %v3330_v45 = vpop.f32.mrb[93].mxu0  ;;  %20021 = vmatpush3.bf16.msra.mxu1 %v20018_v30 }
 0x75d   : > { %v20022_v46 = vpack.c.bf16 %v16930_v43, %v3330_v45 }
 0x75f   : > { %v16933_v48 = vpop.f32.mrb[94].mxu0  ;;  %20023 = vmatprep.subr.bf16.mxu1 %v20022_v46 }
 0x760   : > { %v3340_v50 = vpop.f32.mrb[95].mxu0  ;;  %20025 = vmatpush3.bf16.msra.mxu1 %v20022_v46 }
 0x761   : > { %v20026_v51 = vpack.c.bf16 %v16933_v48, %v3340_v50 }
 0x763   : > { %20027 = vmatprep.subr.bf16.mxu1 %v20026_v51  ;;  %v17024_v53 = vpop.f32.mrb[96].mxu0 }
 0x764   : > { %20029 = vmatpush3.bf16.msra.mxu1 %v20026_v51  ;;  %v3675_v55 = vpop.f32.mrb[97].mxu0 }
 0x765   : > { %v20062_v56 = vpack.c.bf16 %v17024_v53, %v3675_v55 }
 0x767   : > { %16967 = vmatmul.mubr.f32.vlgmr.msra.gmra.mrb[80].mxu1 %v22861_v44  ;;  %v17027_v58 = vpop.f32.mrb[98].mxu0  ;;  %20063 = vmatprep.subr.bf16.mxu1 %v20062_v56 }
 0x768   : > { %v3685_v60 = vpop.f32.mrb[99].mxu0  ;;  %20065 = vmatpush3.bf16.msra.mxu1 %v20062_v56  ;;  %16969 = vmatprep.mubr.f32.mxu1 %v22867_v47 }
 0x769   : > { %v20066_v61 = vpack.c.bf16 %v17027_v58, %v3685_v60 }
 0x76b   : > { %16970 = vmatmul.mubr.f32.gmra.mrb[82].mxu1 %v22873_v49  ;;  %v17030_v63 = vpop.f32.mrb[100].mxu0  ;;  %20067 = vmatprep.subr.bf16.mxu1 %v20066_v61 }
 0x76c   : > { %v3695_v31 = vpop.f32.mrb[101].mxu0  ;;  %20069 = vmatpush3.bf16.msra.mxu1 %v20066_v61  ;;  %16972 = vmatprep.mubr.f32.mxu1 %v22879_v52 }
 0x76d   : > { %v20070_v1 = vpack.c.bf16 %v17030_v63, %v3695_v31 }
 0x76f   : > { %16973 = vmatmul.mubr.f32.gmra.mrb[84].mxu1 %v22885_v54  ;;  %v17033_v3 = vpop.f32.mrb[102].mxu0  ;;  %20071 = vmatprep.subr.bf16.mxu1 %v20070_v1 }
 0x770   : > { %v3705_v5 = vpop.f32.mrb[103].mxu0  ;;  %20073 = vmatpush3.bf16.msra.mxu1 %v20070_v1  ;;  %16975 = vmatprep.mubr.f32.mxu1 %v22891_v57 }
 0x771   : > { %v20074_v6 = vpack.c.bf16 %v17033_v3, %v3705_v5 }
 0x773   : > { %16976 = vmatmul.mubr.f32.gmra.mrb[86].mxu1 %v22897_v59  ;;  %v17036_v13 = vpop.f32.mrb[104].mxu0  ;;  %20075 = vmatprep.subr.bf16.mxu1 %v20074_v6 }
 0x774   : > { %v3715_v15 = vpop.f32.mrb[105].mxu0  ;;  %20077 = vmatpush3.bf16.msra.mxu1 %v20074_v6  ;;  %16978 = vmatprep.mubr.f32.mxu1 %v22903_v62 }
 0x775   : > { %v20078_v16 = vpack.c.bf16 %v17036_v13, %v3715_v15  ;;  %v13783_v15 = vld [vmem:[%s26648_s2 + $0x210] sm:$0xff] }
 0x777   : > { %16979 = vmatmul.mubr.f32.gmra.mrb[88].mxu1 %v22909_v0  ;;  %v17039_v40 = vpop.f32.mrb[106].mxu0  ;;  %20079 = vmatprep.subr.bf16.mxu1 %v20078_v16 }
 0x778   : > { %v3725_v20 = vpop.f32.mrb[107].mxu0  ;;  %20081 = vmatpush3.bf16.msra.mxu1 %v20078_v16  ;;  %16981 = vmatprep.mubr.f32.mxu1 %v22915_v2  ;;  %v13784_v16 = vld [vmem:[%s26648_s2 + $0x218] sm:$0xff] }
 0x779   : > { %v20082_v22 = vpack.c.bf16 %v17039_v40, %v3725_v20 }
 0x77b   : > { %16982 = vmatmul.mubr.f32.gmra.mrb[90].mxu1 %v22921_v4  ;;  %v17042_v23 = vpop.f32.mrb[108].mxu0  ;;  %20083 = vmatprep.subr.bf16.mxu1 %v20082_v22 }
 0x77c   : > { %v3735_v24 = vpop.f32.mrb[109].mxu0  ;;  %20085 = vmatpush3.bf16.msra.mxu1 %v20082_v22  ;;  %16984 = vmatprep.mubr.f32.mxu1 %v22927_v7 }
 0x77d   : > { %v20086_v25 = vpack.c.bf16 %v17042_v23, %v3735_v24 }
 0x77f   : > { %16985 = vmatmul.mubr.f32.gmra.mrb[92].mxu1 %v22933_v14  ;;  %v17045_v26 = vpop.f32.mrb[110].mxu0  ;;  %20087 = vmatprep.subr.bf16.mxu1 %v20086_v25 }
 0x780   : > { %v3745_v27 = vpop.f32.mrb[111].mxu0  ;;  %20089 = vmatpush3.bf16.msra.mxu1 %v20086_v25  ;;  %16987 = vmatprep.mubr.f32.mxu1 %v22939_v17  ;;  %v20146_v25 = vpack.c.bf16 %v13784_v16, %v13783_v15 }
 0x781   : > { %v20090_v8 = vpack.c.bf16 %v17045_v26, %v3745_v27  ;;  %v13785_v27 = vld [vmem:[%s26648_s2 + $0x220] sm:$0xff] }
 0x783   : > { %16988 = vmatmul.mubr.f32.gmra.mrb[94].mxu1 %v22945_v18  ;;  %20091 = vmatprep.subr.bf16.mxu1 %v20090_v8 }
 0x784   : > { %20093 = vmatpush3.bf16.msra.mxu1 %v20090_v8  ;;  %17078 = vmatprep.mubr.f32.mxu1 %v22951_v19  ;;  %v13786_v8 = vld [vmem:[%s26648_s2 + $0x228] sm:$0xff] }
 0x787   : > { %17079 = vmatmul.mubr.f32.vlgmr.msra.gmra.mrb[96].mxu1 %v22861_v44  ;;  %v13741_v44 = vld [vmem:[%s26650_s4 + $0xc0] sm:$0xff] }
 0x788   : > { %17081 = vmatprep.mubr.f32.mxu1 %v22867_v47  ;;  %v13742_v47 = vld [vmem:[%s26650_s4 + $0xc8] sm:$0xff] }
 0x78b   : > { %17082 = vmatmul.mubr.f32.gmra.mrb[98].mxu1 %v22873_v49  ;;  %v20094_v49 = vpack.c.bf16 %v13742_v47, %v13741_v44 }
 0x78c   : > { %17084 = vmatprep.mubr.f32.mxu1 %v22879_v52  ;;  %v13743_v52 = vld [vmem:[%s26650_s4 + $0xd0] sm:$0xff] }
 0x78d   : > { %20095 = vmatprep.subr.bf16.mxu0 %v20094_v49 }
 0x78e   : > { %20097 = vmatpush3.bf16.msra.mxu0 %v20094_v49 }
 0x78f   : > { %17085 = vmatmul.mubr.f32.gmra.mrb[100].mxu1 %v22885_v54  ;;  %v13744_v54 = vld [vmem:[%s26650_s4 + $0xd8] sm:$0xff] }
 0x790   : > { %17087 = vmatprep.mubr.f32.mxu1 %v22891_v57  ;;  %v20098_v57 = vpack.c.bf16 %v13744_v54, %v13743_v52 }
 0x792   : > { %20099 = vmatprep.subr.bf16.mxu0 %v20098_v57 }
 0x793   : > { %17088 = vmatmul.mubr.f32.gmra.mrb[102].mxu1 %v22897_v59  ;;  %20101 = vmatpush3.bf16.msra.mxu0 %v20098_v57  ;;  %v13745_v59 = vld [vmem:[%s26650_s4 + $0xe0] sm:$0xff]  ;;  %v20150_v57 = vpack.c.bf16 %v13786_v8, %v13785_v27  ;;  %v13772_v27 = vld [vmem:[%s22376_s15 + $0x238] sm:$0xff] }
 0x794   : > { %17090 = vmatprep.mubr.f32.mxu1 %v22903_v62  ;;  %v13746_v62 = vld [vmem:[%s26650_s4 + $0xe8] sm:$0xff]  ;;  %v13773_v8 = vld [vmem:[%s22376_s15 + $0x240] sm:$0xff] }
 0x797   : > { %17091 = vmatmul.mubr.f32.gmra.mrb[104].mxu1 %v22909_v0  ;;  %v20102_v0 = vpack.c.bf16 %v13746_v62, %v13745_v59  ;;  %v13787_v62 = vld [vmem:[%s26648_s2 + $0x230] sm:$0xff] }
 0x798   : > { %17093 = vmatprep.mubr.f32.mxu1 %v22915_v2  ;;  %v13747_v2 = vld [vmem:[%s26650_s4 + $0xf0] sm:$0xff] }
 0x799   : > { %20103 = vmatprep.subr.bf16.mxu0 %v20102_v0 }
 0x79a   : > { %20105 = vmatpush3.bf16.msra.mxu0 %v20102_v0  ;;  %v13788_v0 = vld [vmem:[%s26648_s2 + $0x238] sm:$0xff] }
 0x79b   : > { %17094 = vmatmul.mubr.f32.gmra.mrb[106].mxu1 %v22921_v4  ;;  %v13748_v4 = vld [vmem:[%s26650_s4 + $0xf8] sm:$0xff] }
 0x79c   : > { %17096 = vmatprep.mubr.f32.mxu1 %v22927_v7  ;;  %v20106_v7 = vpack.c.bf16 %v13748_v4, %v13747_v2 }
 0x79e   : > { %20107 = vmatprep.subr.bf16.mxu0 %v20106_v7 }
 0x79f   : > { %17097 = vmatmul.mubr.f32.gmra.mrb[108].mxu1 %v22933_v14  ;;  %20109 = vmatpush3.bf16.msra.mxu0 %v20106_v7  ;;  %v13781_v14 = vld [vmem:[%s26648_s2 + $0x200] sm:$0xff] }
 0x7a0   : > { %17099 = vmatprep.mubr.f32.mxu1 %v22939_v17  ;;  %v13782_v17 = vld [vmem:[%s26648_s2 + $0x208] sm:$0xff] }
 0x7a3   : > { %17100 = vmatmul.mubr.f32.gmra.mrb[110].mxu1 %v22945_v18  ;;  %v23225_v18 = vpack.c.bf16 %v13782_v17, %v13781_v14 }
 0x7a4   : > { %17174 = vmatprep.mubr.f32.mxu1 %v22951_v19 }
 0x7a5   : > { %20143 = vmatprep.subr.bf16.mxu0 %v23225_v18 }
 0x83a   : > { %v16968_v19 = vpop.f32.mrb[80].mxu1 }
 0x83b   : > { %v3421_v10 = vadd.f32 %v23231_v9, %v16968_v19  ;;  %v3415_v11 = vpop.f32.mrb[81].mxu1 }
 0x83c   : > { %v3416_v12 = vadd.f32 %v23231_v9, %v3415_v11  ;;  %v13790_v11 = vld [vmem:[%s26648_s2 + $0x248] sm:$0xff] }
 0x83d   : > { %3512 = vrot.lane.b32.xlu1 %v3421_v10, %s21739_s17  ;;  %v13789_v10 = vld [vmem:[%s26648_s2 + $0x240] sm:$0xff] }
 0x83e   : > { %v16971_v28 = vpop.f32.mrb[82].mxu1  ;;  %3510 = vrot.lane.b32.xlu0 %v3416_v12, %s21739_s17 }
 0x83f   : > { %v3431_v29 = vadd.f32 %v23231_v9, %v16971_v28  ;;  %v3425_v32 = vpop.f32.mrb[83].mxu1 }
 0x840   : > { %v3426_v33 = vadd.f32 %v23231_v9, %v3425_v32 }
 0x841   : > { %3516 = vrot.lane.b32.xlu1 %v3431_v29, %s21739_s17 }
 0x842   : > { %v16974_v34 = vpop.f32.mrb[84].mxu1  ;;  %3514 = vrot.lane.b32.xlu0 %v3426_v33, %s21739_s17 }
 0x843   : > { %v3441_v35 = vadd.f32 %v23231_v9, %v16974_v34  ;;  %v3435_v36 = vpop.f32.mrb[85].mxu1  ;;  %v20158_v34 = vpack.c.bf16 %v13790_v11, %v13789_v10 }
 0x844   : > { %v3436_v37 = vadd.f32 %v23231_v9, %v3435_v36  ;;  %v13791_v36 = vld [vmem:[%s26648_s2 + $0x250] sm:$0xff] }
 0x845   : > { %3520 = vrot.lane.b32.xlu1 %v3441_v35, %s21739_s17 }
 0x846   : > { %v16977_v38 = vpop.f32.mrb[86].mxu1  ;;  %3518 = vrot.lane.b32.xlu0 %v3436_v37, %s21739_s17  ;;  %v13792_v37 = vld [vmem:[%s26648_s2 + $0x258] sm:$0xff] }
 0x847   : > { %v3451_v39 = vadd.f32 %v23231_v9, %v16977_v38  ;;  %v3445_v41 = vpop.f32.mrb[87].mxu1 }
 0x848   : > { %v3446_v42 = vadd.f32 %v23231_v9, %v3445_v41 }
 0x849   : > { %3524 = vrot.lane.b32.xlu1 %v3451_v39, %s21739_s17 }
 0x84a   : > { %v16980_v30 = vpop.f32.mrb[88].mxu1  ;;  %3522 = vrot.lane.b32.xlu0 %v3446_v42, %s21739_s17 }
 0x84b   : > { %v3461_v43 = vadd.f32 %v23231_v9, %v16980_v30  ;;  %v3455_v45 = vpop.f32.mrb[89].mxu1 }
 0x84c   : > { %v3456_v46 = vadd.f32 %v23231_v9, %v3455_v45 }
 0x84d   : > { %3528 = vrot.lane.b32.xlu1 %v3461_v43, %s21739_s17  ;;  %v20162_v43 = vpack.c.bf16 %v13792_v37, %v13791_v36 }
 0x84e   : > { %v16983_v48 = vpop.f32.mrb[90].mxu1  ;;  %3526 = vrot.lane.b32.xlu0 %v3456_v46, %s21739_s17  ;;  %v13793_v46 = vld [vmem:[%s26648_s2 + $0x260] sm:$0xff] }
 0x84f   : > { %v3471_v50 = vadd.f32 %v23231_v9, %v16983_v48  ;;  %v3465_v51 = vpop.f32.mrb[91].mxu1  ;;  %v13794_v48 = vld [vmem:[%s26648_s2 + $0x268] sm:$0xff] }
 0x850   : > { %v3466_v53 = vadd.f32 %v23231_v9, %v3465_v51 }
 0x851   : > { %3532 = vrot.lane.b32.xlu1 %v3471_v50, %s21739_s17 }
 0x852   : > { %v16986_v55 = vpop.f32.mrb[92].mxu1  ;;  %3530 = vrot.lane.b32.xlu0 %v3466_v53, %s21739_s17 }
 0x853   : > { %v3481_v56 = vadd.f32 %v23231_v9, %v16986_v55  ;;  %v3475_v58 = vpop.f32.mrb[93].mxu1 }
 0x854   : > { %v3476_v60 = vadd.f32 %v23231_v9, %v3475_v58  ;;  %v20166_v58 = vpack.c.bf16 %v13794_v48, %v13793_v46 }
 0x855   : > { %3536 = vrot.lane.b32.xlu1 %v3481_v56, %s21739_s17 }
 0x856   : > { %v16989_v61 = vpop.f32.mrb[94].mxu1  ;;  %3534 = vrot.lane.b32.xlu0 %v3476_v60, %s21739_s17 }
 0x857   : > { %v3491_v63 = vadd.f32 %v23231_v9, %v16989_v61  ;;  %v3485_v31 = vpop.f32.mrb[95].mxu1  ;;  %v13795_v61 = vld [vmem:[%s26648_s2 + $0x270] sm:$0xff] }
 0x858   : > { %v3486_v1 = vadd.f32 %v23231_v9, %v3485_v31 }
 0x859   : > { %3540 = vrot.lane.b32.xlu1 %v3491_v63, %s21739_s17  ;;  %v13796_v63 = vld [vmem:[%s26648_s2 + $0x278] sm:$0xff] }
 0x85a   : > { %v17080_v3 = vpop.f32.mrb[96].mxu1  ;;  %3538 = vrot.lane.b32.xlu0 %v3486_v1, %s21739_s17 }
 0x85b   : > { %v3826_v5 = vadd.f32 %v23037_v21, %v17080_v3  ;;  %v3820_v6 = vpop.f32.mrb[97].mxu1 }
 0x85c   : > { %v3821_v13 = vadd.f32 %v23037_v21, %v3820_v6 }
 0x85d   : > { %v3900_v22 = vmax.f32 %v3826_v5, 0.0 }
 0x85e   : > { %v3899_v40 = vmax.f32 %v3821_v13, 0.0  ;;  %v17083_v20 = vpop.f32.mrb[98].mxu1  ;;  %v20170_v13 = vpack.c.bf16 %v13796_v63, %v13795_v61 }
 0x85f   : > { %v3836_v23 = vadd.f32 %v23037_v21, %v17083_v20  ;;  %v3830_v24 = vpop.f32.mrb[99].mxu1  ;;  %v13765_v20 = vld [vmem:[%s22376_s15 + $0x200] sm:$0xff] }
 0x860   : > { %v3831_v26 = vadd.f32 %v23037_v21, %v3830_v24  ;;  %17118 = vmatprep.mubr.msk.f32.mxu0 %vm1677_vm0, %v3899_v40  ;;  %v13769_v24 = vld [vmem:[%s22376_s15 + $0x220] sm:$0xff] }
 0x861   : > { %17119 = vmatmul.mubr.msk.f32.vlgmr.msra.gmra.mrb[112].mxu0 %vm1677_vm0, %v3900_v22  ;;  %v3902_v49 = vmax.f32 %v3836_v23, 0.0  ;;  %v13767_v22 = vld [vmem:[%s22376_s15 + $0x210] sm:$0xff]  ;;  %v13768_v23 = vld [vmem:[%s22376_s15 + $0x218] sm:$0xff] }
 0x862   : > { %v3901_v44 = vmax.f32 %v3831_v26, 0.0  ;;  %v17086_v47 = vpop.f32.mrb[100].mxu1  ;;  %20145 = vmatpush3.bf16.msra.mxu0 %v23225_v18  ;;  %v20154_v18 = vpack.c.bf16 %v13788_v0, %v13787_v62  ;;  %v13771_v26 = vld [vmem:[%s22376_s15 + $0x230] sm:$0xff] }
 0x863   : > { %v3846_v52 = vadd.f32 %v23037_v21, %v17086_v47  ;;  %v3840_v54 = vpop.f32.mrb[101].mxu1  ;;  %20147 = vmatprep.subr.bf16.mxu0 %v20146_v25  ;;  %v13775_v47 = vld [vmem:[%s22376_s15 + $0x250] sm:$0xff] }
 0x864   : > { %v3841_v59 = vadd.f32 %v23037_v21, %v3840_v54  ;;  %17121 = vmatprep.mubr.msk.f32.mxu0 %vm1677_vm0, %v3901_v44  ;;  %v13774_v44 = vld [vmem:[%s22376_s15 + $0x248] sm:$0xff] }
 0x865   : > { %17122 = vmatmul.mubr.msk.f32.gmra.mrb[114].mxu0 %vm1677_vm0, %v3902_v49  ;;  %v3904_v7 = vmax.f32 %v3846_v52, 0.0  ;;  %v13776_v49 = vld [vmem:[%s22376_s15 + $0x258] sm:$0xff]  ;;  %v13777_v52 = vld [vmem:[%s22376_s15 + $0x260] sm:$0xff]  ;;  %v13778_v54 = vld [vmem:[%s22376_s15 + $0x268] sm:$0xff] }
 0x866   : > { %v3903_v2 = vmax.f32 %v3841_v59, 0.0  ;;  %v17089_v4 = vpop.f32.mrb[102].mxu1  ;;  %20149 = vmatpush3.bf16.msra.mxu0 %v20146_v25  ;;  %v13770_v25 = vld [vmem:[%s22376_s15 + $0x228] sm:$0xff]  ;;  %v13780_v59 = vld [vmem:[%s22376_s15 + $0x278] sm:$0xff] }
 0x867   : > { %v3856_v14 = vadd.f32 %v23037_v21, %v17089_v4  ;;  %v3850_v17 = vpop.f32.mrb[103].mxu1  ;;  %20151 = vmatprep.subr.bf16.mxu0 %v20150_v57 }
 0x868   : > { %v3851_v19 = vadd.f32 %v23037_v21, %v3850_v17  ;;  %17124 = vmatprep.mubr.msk.f32.mxu0 %vm1677_vm0, %v3903_v2 }
 0x869   : > { %17125 = vmatmul.mubr.msk.f32.gmra.mrb[116].mxu0 %vm1677_vm0, %v3904_v7  ;;  %v3906_v29 = vmax.f32 %v3856_v14, 0.0 }
 0x86a   : > { %v3905_v12 = vmax.f32 %v3851_v19, 0.0  ;;  %v17092_v28 = vpop.f32.mrb[104].mxu1  ;;  %20153 = vmatpush3.bf16.msra.mxu0 %v20150_v57  ;;  %v13779_v57 = vld [vmem:[%s22376_s15 + $0x270] sm:$0xff] }
 0x86b   : > { %v3866_v32 = vadd.f32 %v23037_v21, %v17092_v28  ;;  %v3860_v33 = vpop.f32.mrb[105].mxu1  ;;  %20155 = vmatprep.subr.bf16.mxu0 %v20154_v18 }
 0x86c   : > { %v3861_v35 = vadd.f32 %v23037_v21, %v3860_v33  ;;  %17127 = vmatprep.mubr.msk.f32.mxu0 %vm1677_vm0, %v3905_v12 }
 0x86d   : > { %17128 = vmatmul.mubr.msk.f32.gmra.mrb[118].mxu0 %vm1677_vm0, %v3906_v29  ;;  %v3908_v41 = vmax.f32 %v3866_v32, 0.0 }
 0x86e   : > { %v3907_v38 = vmax.f32 %v3861_v35, 0.0  ;;  %v17095_v39 = vpop.f32.mrb[106].mxu1  ;;  %20157 = vmatpush3.bf16.msra.mxu0 %v20154_v18 }
 0x86f   : > { %v3876_v42 = vadd.f32 %v23037_v21, %v17095_v39  ;;  %v3870_v30 = vpop.f32.mrb[107].mxu1  ;;  %20159 = vmatprep.subr.bf16.mxu0 %v20158_v34 }
 0x870   : > { %v3871_v45 = vadd.f32 %v23037_v21, %v3870_v30  ;;  %17130 = vmatprep.mubr.msk.f32.mxu0 %vm1677_vm0, %v3907_v38 }
 0x871   : > { %17131 = vmatmul.mubr.msk.f32.gmra.mrb[120].mxu0 %vm1677_vm0, %v3908_v41  ;;  %v3910_v53 = vmax.f32 %v3876_v42, 0.0 }
 0x872   : > { %v3909_v50 = vmax.f32 %v3871_v45, 0.0  ;;  %v17098_v51 = vpop.f32.mrb[108].mxu1  ;;  %20161 = vmatpush3.bf16.msra.mxu0 %v20158_v34 }
 0x873   : > { %v3886_v55 = vadd.f32 %v23037_v21, %v17098_v51  ;;  %v3880_v56 = vpop.f32.mrb[109].mxu1  ;;  %20163 = vmatprep.subr.bf16.mxu0 %v20162_v43 }
 0x874   : > { %v3881_v60 = vadd.f32 %v23037_v21, %v3880_v56  ;;  %17133 = vmatprep.mubr.msk.f32.mxu0 %vm1677_vm0, %v3909_v50 }
 0x875   : > { %17134 = vmatmul.mubr.msk.f32.gmra.mrb[122].mxu0 %vm1677_vm0, %v3910_v53  ;;  %v3912_v3 = vmax.f32 %v3886_v55, 0.0 }
 0x876   : > { %v3911_v31 = vmax.f32 %v3881_v60, 0.0  ;;  %v17101_v1 = vpop.f32.mrb[110].mxu1  ;;  %20165 = vmatpush3.bf16.msra.mxu0 %v20162_v43 }
 0x877   : > { %v3896_v5 = vadd.f32 %v23037_v21, %v17101_v1  ;;  %v3890_v6 = vpop.f32.mrb[111].mxu1  ;;  %20167 = vmatprep.subr.bf16.mxu0 %v20166_v58 }
 0x878   : > { %v3891_v15 = vadd.f32 %v23037_v21, %v3890_v6  ;;  %17136 = vmatprep.mubr.msk.f32.mxu0 %vm1677_vm0, %v3911_v31  ;;  %v13766_v21 = vld [vmem:[%s22376_s15 + $0x208] sm:$0xff] }
 0x879   : > { %17137 = vmatmul.mubr.msk.f32.gmra.mrb[124].mxu0 %vm1677_vm0, %v3912_v3  ;;  %v3914_v40 = vmax.f32 %v3896_v5, 0.0 }
 0x87a   : > { %v3913_v16 = vmax.f32 %v3891_v15, 0.0  ;;  %20169 = vmatpush3.bf16.msra.mxu0 %v20166_v58 }
 0x87b   : > { %20171 = vmatprep.subr.bf16.mxu0 %v20170_v13 }
 0x87c   : > { %17139 = vmatprep.mubr.msk.f32.mxu0 %vm1677_vm0, %v3913_v16 }
 0x87d   : > { %17140 = vmatmul.mubr.msk.f32.gmra.mrb[126].mxu0 %vm1677_vm0, %v3914_v40  ;;  %v23397_v40 = vld [vmem:[%s26647_s1 + $0x10] sm:$0xff] }
 0x87e   : > { %20173 = vmatpush3.bf16.msra.mxu0 %v20170_v13  ;;  %17230 = vmatprep.mubr.f32.mxu0 %v13765_v20  ;;  %v23391_v13 = vld [vmem:[%s26647_s1 + $0x8] sm:$0xff] }
 0x881   : > { %17231 = vmatmul.mubr.f32.vlgmr.msra.gmra.mrb[128].mxu0 %v13766_v21  ;;  %v23403_v21 = vld [vmem:[%s26647_s1 + $0x18] sm:$0xff] }
 0x882   : > { %17233 = vmatprep.mubr.f32.mxu0 %v13767_v22 }
 0x885   : > { %17234 = vmatmul.mubr.f32.gmra.mrb[130].mxu0 %v13768_v23 }
 0x886   : > { %17236 = vmatprep.mubr.f32.mxu0 %v13769_v24  ;;  %v23409_v24 = vld [vmem:[%s26647_s1 + $0x20] sm:$0xff] }
 0x889   : > { %17237 = vmatmul.mubr.f32.gmra.mrb[132].mxu0 %v13770_v25 }
 0x88a   : > { %17239 = vmatprep.mubr.f32.mxu0 %v13771_v26  ;;  %v23415_v26 = vld [vmem:[%s26647_s1 + $0x28] sm:$0xff] }
 0x88d   : > { %17240 = vmatmul.mubr.f32.gmra.mrb[134].mxu0 %v13772_v27 }
 0x88e   : > { %17242 = vmatprep.mubr.f32.mxu0 %v13773_v8 }
 0x891   : > { %17243 = vmatmul.mubr.f32.gmra.mrb[136].mxu0 %v13774_v44  ;;  %v23421_v44 = vld [vmem:[%s26647_s1 + $0x30] sm:$0xff] }
 0x892   : > { %17245 = vmatprep.mubr.f32.mxu0 %v13775_v47 }
 0x895   : > { %17246 = vmatmul.mubr.f32.gmra.mrb[138].mxu0 %v13776_v49  ;;  %v23427_v49 = vld [vmem:[%s26647_s1 + $0x38] sm:$0xff] }
 0x896   : > { %17248 = vmatprep.mubr.f32.mxu0 %v13777_v52 }
 0x899   : > { %17249 = vmatmul.mubr.f32.gmra.mrb[140].mxu0 %v13778_v54 }
 0x89a   : > { %17251 = vmatprep.mubr.f32.mxu0 %v13779_v57  ;;  %v23433_v57 = vld [vmem:[%s26647_s1 + $0x40] sm:$0xff] }
 0x89d   : > { %17252 = vmatmul.mubr.f32.gmra.mrb[142].mxu0 %v13780_v59 }
 0x8af   : > { %v3513_v62 = vpop.permute.xlu1 %3512 }
 0x8b0   : > { %3560 = vst.msk [vmem:[%s22719_s10 + $0x10] sm:$0xff] %vm3558_vm3, %v3513_v62  ;;  %v3511_v0 = vpop.permute.xlu0 %3510  ;;  %v23439_v62 = vld [vmem:[%s26647_s1 + $0x48] sm:$0xff] }
 0x8b1   : > { %3559 = vst.msk [vmem:[%s22719_s10] sm:$0xff] %vm3558_vm3, %v3511_v0 }
 0x8b3   : > { %v3517_v2 = vpop.permute.xlu1 %3516 }
 0x8b4   : > { %3562 = vst.msk [vmem:[%s22719_s10 + $0x30] sm:$0xff] %vm3558_vm3, %v3517_v2  ;;  %v3515_v4 = vpop.permute.xlu0 %3514 }
 0x8b5   : > { %3561 = vst.msk [vmem:[%s22719_s10 + $0x20] sm:$0xff] %vm3558_vm3, %v3515_v4  ;;  %v23445_v4 = vld [vmem:[%s26647_s1 + $0x50] sm:$0xff] }
 0x8b7   : > { %v3521_v7 = vpop.permute.xlu1 %3520 }
 0x8b8   : > { %3564 = vst.msk [vmem:[%s22719_s10 + $0x50] sm:$0xff] %vm3558_vm3, %v3521_v7  ;;  %v3519_v14 = vpop.permute.xlu0 %3518 }
 0x8b9   : > { %3563 = vst.msk [vmem:[%s22719_s10 + $0x40] sm:$0xff] %vm3558_vm3, %v3519_v14  ;;  %v23451_v14 = vld [vmem:[%s26647_s1 + $0x58] sm:$0xff] }
 0x8bb   : > { %v3525_v17 = vpop.permute.xlu1 %3524 }
 0x8bc   : > { %3566 = vst.msk [vmem:[%s22719_s10 + $0x70] sm:$0xff] %vm3558_vm3, %v3525_v17  ;;  %v3523_v18 = vpop.permute.xlu0 %3522 }
 0x8bd   : > { %3565 = vst.msk [vmem:[%s22719_s10 + $0x60] sm:$0xff] %vm3558_vm3, %v3523_v18 }
 0x8bf   : > { %v3529_v19 = vpop.permute.xlu1 %3528 }
 0x8c0   : > { %3568 = vst.msk [vmem:[%s22719_s10 + $0x90] sm:$0xff] %vm3558_vm3, %v3529_v19  ;;  %v3527_v10 = vpop.permute.xlu0 %3526  ;;  %v23457_v19 = vld [vmem:[%s26647_s1 + $0x60] sm:$0xff] }
 0x8c1   : > { %3567 = vst.msk [vmem:[%s22719_s10 + $0x80] sm:$0xff] %vm3558_vm3, %v3527_v10 }
 0x8c3   : > { %v3533_v11 = vpop.permute.xlu1 %3532 }
 0x8c4   : > { %3570 = vst.msk [vmem:[%s22719_s10 + $0xb0] sm:$0xff] %vm3558_vm3, %v3533_v11  ;;  %v3531_v12 = vpop.permute.xlu0 %3530  ;;  %v23463_v11 = vld [vmem:[%s26647_s1 + $0x68] sm:$0xff] }
 0x8c5   : > { %3569 = vst.msk [vmem:[%s22719_s10 + $0xa0] sm:$0xff] %vm3558_vm3, %v3531_v12 }
 0x8c7   : > { %v3537_v28 = vpop.permute.xlu1 %3536 }
 0x8c8   : > { %3572 = vst.msk [vmem:[%s22719_s10 + $0xd0] sm:$0xff] %vm3558_vm3, %v3537_v28  ;;  %v3535_v29 = vpop.permute.xlu0 %3534 }
 0x8c9   : > { %3571 = vst.msk [vmem:[%s22719_s10 + $0xc0] sm:$0xff] %vm3558_vm3, %v3535_v29  ;;  %v23469_v29 = vld [vmem:[%s26647_s1 + $0x70] sm:$0xff] }
 0x8cb   : > { %v3541_v32 = vpop.permute.xlu1 %3540 }
 0x8cc   : > { %3574 = vst.msk [vmem:[%s22719_s10 + $0xf0] sm:$0xff] %vm3558_vm3, %v3541_v32  ;;  %v3539_v33 = vpop.permute.xlu0 %3538 }
 0x8cd   : > { %3573 = vst.msk [vmem:[%s22719_s10 + $0xe0] sm:$0xff] %vm3558_vm3, %v3539_v33  ;;  %v23475_v33 = vld [vmem:[%s26647_s1 + $0x78] sm:$0xff] }
 0x934   : > { %v17120_v34 = vpop.f32.mrb[112].mxu0 }
 0x935   : > { %v4038_v35 = vpop.f32.mrb[113].mxu0 }
 0x936   : > { %v20110_v36 = vpack.c.bf16 %v17120_v34, %v4038_v35  ;;  %v23481_v34 = vld [vmem:[%s26647_s1] sm:$0xff] }
 0x937   : > { %v13797_v35 = vld [vmem:[%s26650_s4 + $0x100] sm:$0xff] }
 0x938   : > { %v17123_v37 = vpop.f32.mrb[114].mxu0  ;;  %20111 = vmatprep.subr.bf16.mxu1 %v20110_v36 }
 0x939   : > { %v4048_v38 = vpop.f32.mrb[115].mxu0  ;;  %20113 = vmatpush3.bf16.msra.mxu1 %v20110_v36  ;;  %v13798_v36 = vld [vmem:[%s26650_s4 + $0x108] sm:$0xff] }
 0x93a   : > { %v20114_v39 = vpack.c.bf16 %v17123_v37, %v4048_v38  ;;  %v20206_v37 = vpack.c.bf16 %v13798_v36, %v13797_v35  ;;  %v13799_v38 = vld [vmem:[%s26650_s4 + $0x110] sm:$0xff]  ;;  %v23568_v36 = vld [vmem:[%s26649_s3] ss:$0 sm:$0xff] }
 0x93c   : > { %v17126_v41 = vpop.f32.mrb[116].mxu0  ;;  %20115 = vmatprep.subr.bf16.mxu1 %v20114_v39  ;;  %20207 = vmatprep.subr.bf16.mxu0 %v20206_v37 }
 0x93d   : > { %v4058_v42 = vpop.f32.mrb[117].mxu0  ;;  %20117 = vmatpush3.bf16.msra.mxu1 %v20114_v39  ;;  %20209 = vmatpush3.bf16.msra.mxu0 %v20206_v37  ;;  %v13800_v39 = vld [vmem:[%s26650_s4 + $0x118] sm:$0xff] }
 0x93e   : > { %v20118_v30 = vpack.c.bf16 %v17126_v41, %v4058_v42  ;;  %v20210_v41 = vpack.c.bf16 %v13800_v39, %v13799_v38  ;;  %v13801_v42 = vld [vmem:[%s26650_s4 + $0x120] sm:$0xff] }
 0x940   : > { %v17129_v43 = vpop.f32.mrb[118].mxu0  ;;  %20119 = vmatprep.subr.bf16.mxu1 %v20118_v30  ;;  %20211 = vmatprep.subr.bf16.mxu0 %v20210_v41 }
 0x941   : > { %v4068_v45 = vpop.f32.mrb[119].mxu0  ;;  %20121 = vmatpush3.bf16.msra.mxu1 %v20118_v30  ;;  %20213 = vmatpush3.bf16.msra.mxu0 %v20210_v41  ;;  %v13802_v30 = vld [vmem:[%s26650_s4 + $0x128] sm:$0xff]  ;;  %v13839_v41 = vld [vmem:[%s26648_s2 + $0x290] sm:$0xff] }
 0x942   : > { %v20122_v46 = vpack.c.bf16 %v17129_v43, %v4068_v45  ;;  %v20214_v43 = vpack.c.bf16 %v13802_v30, %v13801_v42  ;;  %v13803_v45 = vld [vmem:[%s26650_s4 + $0x130] sm:$0xff] }
 0x944   : > { %v17132_v48 = vpop.f32.mrb[120].mxu0  ;;  %20123 = vmatprep.subr.bf16.mxu1 %v20122_v46  ;;  %20215 = vmatprep.subr.bf16.mxu0 %v20214_v43 }
 0x945   : > { %v4078_v50 = vpop.f32.mrb[121].mxu0  ;;  %20125 = vmatpush3.bf16.msra.mxu1 %v20122_v46  ;;  %20217 = vmatpush3.bf16.msra.mxu0 %v20214_v43  ;;  %v13804_v46 = vld [vmem:[%s26650_s4 + $0x138] sm:$0xff] }
 0x946   : > { %v20126_v51 = vpack.c.bf16 %v17132_v48, %v4078_v50  ;;  %v20218_v48 = vpack.c.bf16 %v13804_v46, %v13803_v45  ;;  %v13837_v50 = vld [vmem:[%s26648_s2 + $0x280] sm:$0xff] }
 0x948   : > { %v17135_v53 = vpop.f32.mrb[122].mxu0  ;;  %20127 = vmatprep.subr.bf16.mxu1 %v20126_v51  ;;  %20219 = vmatprep.subr.bf16.mxu0 %v20218_v48 }
 0x949   : > { %v4088_v55 = vpop.f32.mrb[123].mxu0  ;;  %20129 = vmatpush3.bf16.msra.mxu1 %v20126_v51  ;;  %20221 = vmatpush3.bf16.msra.mxu0 %v20218_v48  ;;  %v13838_v51 = vld [vmem:[%s26648_s2 + $0x288] sm:$0xff] }
 0x94a   : > { %v20130_v56 = vpack.c.bf16 %v17135_v53, %v4088_v55  ;;  %v23530_v53 = vpack.c.bf16 %v13838_v51, %v13837_v50  ;;  %v13841_v51 = vld [vmem:[%s26648_s2 + $0x2a0] sm:$0xff] }
 0x94c   : > { %v17138_v58 = vpop.f32.mrb[124].mxu0  ;;  %20131 = vmatprep.subr.bf16.mxu1 %v20130_v56  ;;  %20255 = vmatprep.subr.bf16.mxu0 %v23530_v53 }
 0x94d   : > { %v4098_v60 = vpop.f32.mrb[125].mxu0  ;;  %20133 = vmatpush3.bf16.msra.mxu1 %v20130_v56 }
 0x94e   : > { %v20134_v61 = vpack.c.bf16 %v17138_v58, %v4098_v60 }
 0x950   : > { %v17141_v63 = vpop.f32.mrb[126].mxu0  ;;  %20135 = vmatprep.subr.bf16.mxu1 %v20134_v61 }
 0x951   : > { %v4108_v31 = vpop.f32.mrb[127].mxu0  ;;  %20137 = vmatpush3.bf16.msra.mxu1 %v20134_v61 }
 0x952   : > { %v20138_v1 = vpack.c.bf16 %v17141_v63, %v4108_v31 }
 0x954   : > { %20139 = vmatprep.subr.bf16.mxu1 %v20138_v1  ;;  %v17232_v3 = vpop.f32.mrb[128].mxu0 }
 0x955   : > { %20141 = vmatpush3.bf16.msra.mxu1 %v20138_v1  ;;  %v4443_v5 = vpop.f32.mrb[129].mxu0 }
 0x956   : > { %v20174_v6 = vpack.c.bf16 %v17232_v3, %v4443_v5 }
 0x958   : > { %17175 = vmatmul.mubr.f32.vlgmr.msra.gmra.mrb[112].mxu1 %v23391_v13  ;;  %v17235_v15 = vpop.f32.mrb[130].mxu0  ;;  %20175 = vmatprep.subr.bf16.mxu1 %v20174_v6 }
 0x959   : > { %v4453_v16 = vpop.f32.mrb[131].mxu0  ;;  %20177 = vmatpush3.bf16.msra.mxu1 %v20174_v6  ;;  %17177 = vmatprep.mubr.f32.mxu1 %v23397_v40 }
 0x95a   : > { %v20178_v20 = vpack.c.bf16 %v17235_v15, %v4453_v16 }
 0x95c   : > { %17178 = vmatmul.mubr.f32.gmra.mrb[114].mxu1 %v23403_v21  ;;  %v17238_v22 = vpop.f32.mrb[132].mxu0  ;;  %20179 = vmatprep.subr.bf16.mxu1 %v20178_v20 }
 0x95d   : > { %v4463_v23 = vpop.f32.mrb[133].mxu0  ;;  %20181 = vmatpush3.bf16.msra.mxu1 %v20178_v20  ;;  %17180 = vmatprep.mubr.f32.mxu1 %v23409_v24 }
 0x95e   : > { %v20182_v25 = vpack.c.bf16 %v17238_v22, %v4463_v23 }
 0x960   : > { %17181 = vmatmul.mubr.f32.gmra.mrb[116].mxu1 %v23415_v26  ;;  %v17241_v27 = vpop.f32.mrb[134].mxu0  ;;  %20183 = vmatprep.subr.bf16.mxu1 %v20182_v25 }
 0x961   : > { %v4473_v8 = vpop.f32.mrb[135].mxu0  ;;  %20185 = vmatpush3.bf16.msra.mxu1 %v20182_v25  ;;  %17183 = vmatprep.mubr.f32.mxu1 %v23421_v44 }
 0x962   : > { %v20186_v47 = vpack.c.bf16 %v17241_v27, %v4473_v8 }
 0x964   : > { %17184 = vmatmul.mubr.f32.gmra.mrb[118].mxu1 %v23427_v49  ;;  %v17244_v52 = vpop.f32.mrb[136].mxu0  ;;  %20187 = vmatprep.subr.bf16.mxu1 %v20186_v47 }
 0x965   : > { %v4483_v54 = vpop.f32.mrb[137].mxu0  ;;  %20189 = vmatpush3.bf16.msra.mxu1 %v20186_v47  ;;  %17186 = vmatprep.mubr.f32.mxu1 %v23433_v57 }
 0x966   : > { %v20190_v59 = vpack.c.bf16 %v17244_v52, %v4483_v54 }
 0x968   : > { %17187 = vmatmul.mubr.f32.gmra.mrb[120].mxu1 %v23439_v62  ;;  %v17247_v0 = vpop.f32.mrb[138].mxu0  ;;  %20191 = vmatprep.subr.bf16.mxu1 %v20190_v59 }
 0x969   : > { %v4493_v2 = vpop.f32.mrb[139].mxu0  ;;  %20193 = vmatpush3.bf16.msra.mxu1 %v20190_v59  ;;  %17189 = vmatprep.mubr.f32.mxu1 %v23445_v4 }
 0x96a   : > { %v20194_v7 = vpack.c.bf16 %v17247_v0, %v4493_v2 }
 0x96c   : > { %17190 = vmatmul.mubr.f32.gmra.mrb[122].mxu1 %v23451_v14  ;;  %v17250_v17 = vpop.f32.mrb[140].mxu0  ;;  %20195 = vmatprep.subr.bf16.mxu1 %v20194_v7 }
 0x96d   : > { %v4503_v18 = vpop.f32.mrb[141].mxu0  ;;  %20197 = vmatpush3.bf16.msra.mxu1 %v20194_v7  ;;  %17192 = vmatprep.mubr.f32.mxu1 %v23457_v19 }
 0x96e   : > { %v20198_v10 = vpack.c.bf16 %v17250_v17, %v4503_v18 }
 0x970   : > { %17193 = vmatmul.mubr.f32.gmra.mrb[124].mxu1 %v23463_v11  ;;  %v17253_v12 = vpop.f32.mrb[142].mxu0  ;;  %20199 = vmatprep.subr.bf16.mxu1 %v20198_v10 }
 0x971   : > { %v4513_v28 = vpop.f32.mrb[143].mxu0  ;;  %20201 = vmatpush3.bf16.msra.mxu1 %v20198_v10  ;;  %17195 = vmatprep.mubr.f32.mxu1 %v23469_v29 }
 0x972   : > { %v20202_v32 = vpack.c.bf16 %v17253_v12, %v4513_v28 }
 0x974   : > { %17196 = vmatmul.mubr.f32.gmra.mrb[126].mxu1 %v23475_v33  ;;  %20203 = vmatprep.subr.bf16.mxu1 %v20202_v32 }
 0x975   : > { %20205 = vmatpush3.bf16.msra.mxu1 %v20202_v32  ;;  %17286 = vmatprep.mubr.f32.mxu1 %v23481_v34 }
 0x978   : > { %17287 = vmatmul.mubr.f32.vlgmr.msra.gmra.mrb[128].mxu1 %v23391_v13 }
 0x979   : > { %17289 = vmatprep.mubr.f32.mxu1 %v23397_v40 }
 0x97c   : > { %17290 = vmatmul.mubr.f32.gmra.mrb[130].mxu1 %v23403_v21 }
 0x97d   : > { %17292 = vmatprep.mubr.f32.mxu1 %v23409_v24 }
 0x980   : > { %17293 = vmatmul.mubr.f32.gmra.mrb[132].mxu1 %v23415_v26 }
 0x981   : > { %17295 = vmatprep.mubr.f32.mxu1 %v23421_v44 }
 0x984   : > { %17296 = vmatmul.mubr.f32.gmra.mrb[134].mxu1 %v23427_v49 }
 0x985   : > { %17298 = vmatprep.mubr.f32.mxu1 %v23433_v57 }
 0x988   : > { %17299 = vmatmul.mubr.f32.gmra.mrb[136].mxu1 %v23439_v62 }
 0x989   : > { %17301 = vmatprep.mubr.f32.mxu1 %v23445_v4 }
 0x98c   : > { %17302 = vmatmul.mubr.f32.gmra.mrb[138].mxu1 %v23451_v14 }
 0x98d   : > { %17304 = vmatprep.mubr.f32.mxu1 %v23457_v19 }
 0x990   : > { %17305 = vmatmul.mubr.f32.gmra.mrb[140].mxu1 %v23463_v11 }
 0x991   : > { %17307 = vmatprep.mubr.f32.mxu1 %v23469_v29 }
 0x994   : > { %17308 = vmatmul.mubr.f32.gmra.mrb[142].mxu1 %v23475_v33 }
 0x995   : > { %17382 = vmatprep.mubr.f32.mxu1 %v23481_v34 }
 0xa2b   : > { %v17176_v55 = vpop.f32.mrb[112].mxu1 }
 0xa2c   : > { %v4189_v56 = vadd.f32 %v23231_v9, %v17176_v55  ;;  %v4183_v58 = vpop.f32.mrb[113].mxu1  ;;  %v13842_v55 = vld [vmem:[%s26648_s2 + $0x2a8] sm:$0xff] }
 0xa2d   : > { %v4184_v60 = vadd.f32 %v23231_v9, %v4183_v58 }
 0xa2e   : > { %4280 = vrot.lane.b32.xlu1 %v4189_v56, %s21740_s18 }
 0xa2f   : > { %v17179_v61 = vpop.f32.mrb[114].mxu1  ;;  %4278 = vrot.lane.b32.xlu0 %v4184_v60, %s21740_s18 }
 0xa30   : > { %v4199_v63 = vadd.f32 %v23231_v9, %v17179_v61  ;;  %v4193_v31 = vpop.f32.mrb[115].mxu1 }
 0xa31   : > { %v4194_v1 = vadd.f32 %v23231_v9, %v4193_v31  ;;  %v20262_v31 = vpack.c.bf16 %v13842_v55, %v13841_v51 }
 0xa32   : > { %4284 = vrot.lane.b32.xlu1 %v4199_v63, %s21740_s18 }
 0xa33   : > { %v17182_v3 = vpop.f32.mrb[116].mxu1  ;;  %4282 = vrot.lane.b32.xlu0 %v4194_v1, %s21740_s18 }
 0xa34   : > { %v4209_v5 = vadd.f32 %v23231_v9, %v17182_v3  ;;  %v4203_v6 = vpop.f32.mrb[117].mxu1  ;;  %v13843_v3 = vld [vmem:[%s26648_s2 + $0x2b0] sm:$0xff] }
 0xa35   : > { %v4204_v15 = vadd.f32 %v23231_v9, %v4203_v6 }
 0xa36   : > { %4288 = vrot.lane.b32.xlu1 %v4209_v5, %s21740_s18  ;;  %v13844_v5 = vld [vmem:[%s26648_s2 + $0x2b8] sm:$0xff] }
 0xa37   : > { %v17185_v16 = vpop.f32.mrb[118].mxu1  ;;  %4286 = vrot.lane.b32.xlu0 %v4204_v15, %s21740_s18 }
 0xa38   : > { %v4219_v20 = vadd.f32 %v23231_v9, %v17185_v16  ;;  %v4213_v22 = vpop.f32.mrb[119].mxu1 }
 0xa39   : > { %v4214_v23 = vadd.f32 %v23231_v9, %v4213_v22  ;;  %v20266_v22 = vpack.c.bf16 %v13844_v5, %v13843_v3  ;;  %v13821_v3 = vld [vmem:[%s22376_s15 + $0x280] sm:$0xff]  ;;  %v13822_v5 = vld [vmem:[%s22376_s15 + $0x288] sm:$0xff] }
 0xa3a   : > { %4292 = vrot.lane.b32.xlu1 %v4219_v20, %s21740_s18 }
 0xa3b   : > { %v17188_v25 = vpop.f32.mrb[120].mxu1  ;;  %4290 = vrot.lane.b32.xlu0 %v4214_v23, %s21740_s18 }
 0xa3c   : > { %v4229_v27 = vadd.f32 %v23231_v9, %v17188_v25  ;;  %v4223_v8 = vpop.f32.mrb[121].mxu1  ;;  %v13845_v25 = vld [vmem:[%s26648_s2 + $0x2c0] sm:$0xff] }
 0xa3d   : > { %v4224_v47 = vadd.f32 %v23231_v9, %v4223_v8 }
 0xa3e   : > { %4296 = vrot.lane.b32.xlu1 %v4229_v27, %s21740_s18  ;;  %v13846_v27 = vld [vmem:[%s26648_s2 + $0x2c8] sm:$0xff] }
 0xa3f   : > { %v17191_v52 = vpop.f32.mrb[122].mxu1  ;;  %4294 = vrot.lane.b32.xlu0 %v4224_v47, %s21740_s18 }
 0xa40   : > { %v4239_v54 = vadd.f32 %v23231_v9, %v17191_v52  ;;  %v4233_v59 = vpop.f32.mrb[123].mxu1 }
 0xa41   : > { %v4234_v0 = vadd.f32 %v23231_v9, %v4233_v59 }
 0xa42   : > { %4300 = vrot.lane.b32.xlu1 %v4239_v54, %s21740_s18 }
 0xa43   : > { %v17194_v2 = vpop.f32.mrb[124].mxu1  ;;  %4298 = vrot.lane.b32.xlu0 %v4234_v0, %s21740_s18  ;;  %v20270_v0 = vpack.c.bf16 %v13846_v27, %v13845_v25  ;;  %v13830_v25 = vld [vmem:[%s22376_s15 + $0x2c8] sm:$0xff]  ;;  %v13831_v27 = vld [vmem:[%s22376_s15 + $0x2d0] sm:$0xff] }
 0xa44   : > { %v4249_v7 = vadd.f32 %v23231_v9, %v17194_v2  ;;  %v4243_v17 = vpop.f32.mrb[125].mxu1 }
 0xa45   : > { %v4244_v18 = vadd.f32 %v23231_v9, %v4243_v17  ;;  %v13848_v17 = vld [vmem:[%s26648_s2 + $0x2d8] sm:$0xff] }
 0xa46   : > { %4304 = vrot.lane.b32.xlu1 %v4249_v7, %s21740_s18  ;;  %v13847_v7 = vld [vmem:[%s26648_s2 + $0x2d0] sm:$0xff] }
 0xa47   : > { %v17197_v10 = vpop.f32.mrb[126].mxu1  ;;  %4302 = vrot.lane.b32.xlu0 %v4244_v18, %s21740_s18 }
 0xa48   : > { %v4259_v12 = vadd.f32 %v23231_v9, %v17197_v10  ;;  %v4253_v28 = vpop.f32.mrb[127].mxu1 }
 0xa49   : > { %v4254_v32 = vadd.f32 %v23231_v9, %v4253_v28  ;;  %v13840_v9 = vld [vmem:[%s26648_s2 + $0x298] sm:$0xff] }
 0xa4a   : > { %4308 = vrot.lane.b32.xlu1 %v4259_v12, %s21740_s18  ;;  %v20258_v48 = vpack.c.bf16 %v13840_v9, %v13839_v41 }
 0xa4b   : > { %v17288_v35 = vpop.f32.mrb[128].mxu1  ;;  %4306 = vrot.lane.b32.xlu0 %v4254_v32, %s21740_s18 }
 0xa4c   : > { %v4594_v37 = vadd.f32 %v23568_v36, %v17288_v35  ;;  %v4588_v38 = vpop.f32.mrb[129].mxu1  ;;  %v20274_v35 = vpack.c.bf16 %v13848_v17, %v13847_v7 }
 0xa4d   : > { %v4589_v39 = vadd.f32 %v23568_v36, %v4588_v38  ;;  %v13849_v38 = vld [vmem:[%s26648_s2 + $0x2e0] sm:$0xff] }
 0xa4e   : > { %v4668_v43 = vmax.f32 %v4594_v37, 0.0 }
 0xa4f   : > { %v4667_v42 = vmax.f32 %v4589_v39, 0.0  ;;  %v17291_v30 = vpop.f32.mrb[130].mxu1  ;;  %v13850_v39 = vld [vmem:[%s26648_s2 + $0x2e8] sm:$0xff] }
 0xa50   : > { %v4604_v45 = vadd.f32 %v23568_v36, %v17291_v30  ;;  %v4598_v46 = vpop.f32.mrb[131].mxu1 }
 0xa51   : > { %v4599_v50 = vadd.f32 %v23568_v36, %v4598_v46  ;;  %17326 = vmatprep.mubr.msk.f32.mxu0 %vm1677_vm0, %v4667_v42 }
 0xa52   : > { %17327 = vmatmul.mubr.msk.f32.vlgmr.msra.gmra.mrb[144].mxu0 %vm1677_vm0, %v4668_v43  ;;  %v4670_v60 = vmax.f32 %v4604_v45, 0.0  ;;  %v20278_v45 = vpack.c.bf16 %v13850_v39, %v13849_v38 }
 0xa53   : > { %v4669_v56 = vmax.f32 %v4599_v50, 0.0  ;;  %v17294_v58 = vpop.f32.mrb[132].mxu1  ;;  %20257 = vmatpush3.bf16.msra.mxu0 %v23530_v53  ;;  %v13852_v50 = vld [vmem:[%s26648_s2 + $0x2f8] sm:$0xff] }
 0xa54   : > { %v4614_v61 = vadd.f32 %v23568_v36, %v17294_v58  ;;  %v4608_v63 = vpop.f32.mrb[133].mxu1  ;;  %20259 = vmatprep.subr.bf16.mxu0 %v20258_v48 }
 0xa55   : > { %v4609_v1 = vadd.f32 %v23568_v36, %v4608_v63  ;;  %17329 = vmatprep.mubr.msk.f32.mxu0 %vm1677_vm0, %v4669_v56 }
 0xa56   : > { %17330 = vmatmul.mubr.msk.f32.gmra.mrb[146].mxu0 %vm1677_vm0, %v4670_v60  ;;  %v4672_v15 = vmax.f32 %v4614_v61, 0.0 }
 0xa57   : > { %v4671_v53 = vmax.f32 %v4609_v1, 0.0  ;;  %v17297_v6 = vpop.f32.mrb[134].mxu1  ;;  %20261 = vmatpush3.bf16.msra.mxu0 %v20258_v48  ;;  %v13851_v48 = vld [vmem:[%s26648_s2 + $0x2f0] sm:$0xff] }
 0xa58   : > { %v4624_v16 = vadd.f32 %v23568_v36, %v17297_v6  ;;  %v4618_v20 = vpop.f32.mrb[135].mxu1  ;;  %20263 = vmatprep.subr.bf16.mxu0 %v20262_v31  ;;  %v20282_v61 = vpack.c.bf16 %v13852_v50, %v13851_v48  ;;  %v13824_v6 = vld [vmem:[%s22376_s15 + $0x298] sm:$0xff] }
 0xa59   : > { %v4619_v23 = vadd.f32 %v23568_v36, %v4618_v20  ;;  %17332 = vmatprep.mubr.msk.f32.mxu0 %vm1677_vm0, %v4671_v53  ;;  %v13823_v53 = vld [vmem:[%s22376_s15 + $0x290] sm:$0xff] }
 0xa5a   : > { %17333 = vmatmul.mubr.msk.f32.gmra.mrb[148].mxu0 %vm1677_vm0, %v4672_v15  ;;  %v4674_v52 = vmax.f32 %v4624_v16, 0.0  ;;  %v13825_v15 = vld [vmem:[%s22376_s15 + $0x2a0] sm:$0xff]  ;;  %v13826_v16 = vld [vmem:[%s22376_s15 + $0x2a8] sm:$0xff]  ;;  %v13827_v20 = vld [vmem:[%s22376_s15 + $0x2b0] sm:$0xff] }
 0xa5b   : > { %v4673_v8 = vmax.f32 %v4619_v23, 0.0  ;;  %v17300_v47 = vpop.f32.mrb[136].mxu1  ;;  %20265 = vmatpush3.bf16.msra.mxu0 %v20262_v31  ;;  %v13829_v23 = vld [vmem:[%s22376_s15 + $0x2c0] sm:$0xff] }
 0xa5c   : > { %v4634_v54 = vadd.f32 %v23568_v36, %v17300_v47  ;;  %v4628_v59 = vpop.f32.mrb[137].mxu1  ;;  %20267 = vmatprep.subr.bf16.mxu0 %v20266_v22  ;;  %v13833_v47 = vld [vmem:[%s22376_s15 + $0x2e0] sm:$0xff] }
 0xa5d   : > { %v4629_v2 = vadd.f32 %v23568_v36, %v4628_v59  ;;  %17335 = vmatprep.mubr.msk.f32.mxu0 %vm1677_vm0, %v4673_v8  ;;  %v13832_v8 = vld [vmem:[%s22376_s15 + $0x2d8] sm:$0xff] }
 0xa5e   : > { %17336 = vmatmul.mubr.msk.f32.gmra.mrb[150].mxu0 %vm1677_vm0, %v4674_v52  ;;  %v4676_v12 = vmax.f32 %v4634_v54, 0.0  ;;  %v13834_v52 = vld [vmem:[%s22376_s15 + $0x2e8] sm:$0xff]  ;;  %v13835_v54 = vld [vmem:[%s22376_s15 + $0x2f0] sm:$0xff]  ;;  %v13836_v59 = vld [vmem:[%s22376_s15 + $0x2f8] sm:$0xff] }
 0xa5f   : > { %v4675_v18 = vmax.f32 %v4629_v2, 0.0  ;;  %v17303_v10 = vpop.f32.mrb[138].mxu1  ;;  %20269 = vmatpush3.bf16.msra.mxu0 %v20266_v22  ;;  %v13828_v22 = vld [vmem:[%s22376_s15 + $0x2b8] sm:$0xff] }
 0xa60   : > { %v4644_v28 = vadd.f32 %v23568_v36, %v17303_v10  ;;  %v4638_v32 = vpop.f32.mrb[139].mxu1  ;;  %20271 = vmatprep.subr.bf16.mxu0 %v20270_v0 }
 0xa61   : > { %v4639_v37 = vadd.f32 %v23568_v36, %v4638_v32  ;;  %17338 = vmatprep.mubr.msk.f32.mxu0 %vm1677_vm0, %v4675_v18 }
 0xa62   : > { %17339 = vmatmul.mubr.msk.f32.gmra.mrb[152].mxu0 %vm1677_vm0, %v4676_v12  ;;  %v4678_v42 = vmax.f32 %v4644_v28, 0.0 }
 0xa63   : > { %v4677_v41 = vmax.f32 %v4639_v37, 0.0  ;;  %v17306_v9 = vpop.f32.mrb[140].mxu1  ;;  %20273 = vmatpush3.bf16.msra.mxu0 %v20270_v0 }
 0xa64   : > { %v4654_v30 = vadd.f32 %v23568_v36, %v17306_v9  ;;  %v4648_v43 = vpop.f32.mrb[141].mxu1  ;;  %20275 = vmatprep.subr.bf16.mxu0 %v20274_v35 }
 0xa65   : > { %v4649_v46 = vadd.f32 %v23568_v36, %v4648_v43  ;;  %17341 = vmatprep.mubr.msk.f32.mxu0 %vm1677_vm0, %v4677_v41 }
 0xa66   : > { %17342 = vmatmul.mubr.msk.f32.gmra.mrb[154].mxu0 %vm1677_vm0, %v4678_v42  ;;  %v4680_v56 = vmax.f32 %v4654_v30, 0.0 }
 0xa67   : > { %v4679_v51 = vmax.f32 %v4649_v46, 0.0  ;;  %v17309_v55 = vpop.f32.mrb[142].mxu1  ;;  %20277 = vmatpush3.bf16.msra.mxu0 %v20274_v35 }
 0xa68   : > { %v4664_v58 = vadd.f32 %v23568_v36, %v17309_v55  ;;  %v4658_v60 = vpop.f32.mrb[143].mxu1  ;;  %20279 = vmatprep.subr.bf16.mxu0 %v20278_v45 }
 0xa69   : > { %v4659_v63 = vadd.f32 %v23568_v36, %v4658_v60  ;;  %17344 = vmatprep.mubr.msk.f32.mxu0 %vm1677_vm0, %v4679_v51 }
 0xa6a   : > { %17345 = vmatmul.mubr.msk.f32.gmra.mrb[156].mxu0 %vm1677_vm0, %v4680_v56  ;;  %v4682_v1 = vmax.f32 %v4664_v58, 0.0 }
 0xa6b   : > { %v4681_v31 = vmax.f32 %v4659_v63, 0.0  ;;  %20281 = vmatpush3.bf16.msra.mxu0 %v20278_v45 }
 0xa6c   : > { %20283 = vmatprep.subr.bf16.mxu0 %v20282_v61 }
 0xa6d   : > { %17347 = vmatprep.mubr.msk.f32.mxu0 %vm1677_vm0, %v4681_v31 }
 0xa6e   : > { %17348 = vmatmul.mubr.msk.f32.gmra.mrb[158].mxu0 %vm1677_vm0, %v4682_v1 }
 0xa6f   : > { %20285 = vmatpush3.bf16.msra.mxu0 %v20282_v61  ;;  %17438 = vmatprep.mubr.f32.mxu0 %v13821_v3 }
 0xa72   : > { %17439 = vmatmul.mubr.f32.vlgmr.msra.gmra.mrb[160].mxu0 %v13822_v5 }
 0xa73   : > { %17441 = vmatprep.mubr.f32.mxu0 %v13823_v53 }
 0xa76   : > { %17442 = vmatmul.mubr.f32.gmra.mrb[162].mxu0 %v13824_v6 }
 0xa77   : > { %17444 = vmatprep.mubr.f32.mxu0 %v13825_v15 }
 0xa7a   : > { %17445 = vmatmul.mubr.f32.gmra.mrb[164].mxu0 %v13826_v16 }
 0xa7b   : > { %17447 = vmatprep.mubr.f32.mxu0 %v13827_v20 }
 0xa7e   : > { %17448 = vmatmul.mubr.f32.gmra.mrb[166].mxu0 %v13828_v22 }
 0xa7f   : > { %17450 = vmatprep.mubr.f32.mxu0 %v13829_v23 }
 0xa82   : > { %17451 = vmatmul.mubr.f32.gmra.mrb[168].mxu0 %v13830_v25 }
 0xa83   : > { %17453 = vmatprep.mubr.f32.mxu0 %v13831_v27 }
 0xa86   : > { %17454 = vmatmul.mubr.f32.gmra.mrb[170].mxu0 %v13832_v8 }
 0xa87   : > { %17456 = vmatprep.mubr.f32.mxu0 %v13833_v47 }
 0xa8a   : > { %17457 = vmatmul.mubr.f32.gmra.mrb[172].mxu0 %v13834_v52 }
 0xa8b   : > { %17459 = vmatprep.mubr.f32.mxu0 %v13835_v54 }
 0xa8e   : > { %17460 = vmatmul.mubr.f32.gmra.mrb[174].mxu0 %v13836_v59 }
 0xaa0   : > { %v4281_v0 = vpop.permute.xlu1 %4280 }
 0xaa1   : > { %4328 = vst.msk [vmem:[%s22719_s10 + $0x10] sm:$0xff] %vm4326_vm4, %v4281_v0  ;;  %v4279_v2 = vpop.permute.xlu0 %4278 }
 0xaa2   : > { %4327 = vst.msk [vmem:[%s22719_s10] sm:$0xff] %vm4326_vm4, %v4279_v2 }
 0xaa4   : > { %v4285_v7 = vpop.permute.xlu1 %4284 }
 0xaa5   : > { %4330 = vst.msk [vmem:[%s22719_s10 + $0x30] sm:$0xff] %vm4326_vm4, %v4285_v7  ;;  %v4283_v17 = vpop.permute.xlu0 %4282 }
 0xaa6   : > { %4329 = vst.msk [vmem:[%s22719_s10 + $0x20] sm:$0xff] %vm4326_vm4, %v4283_v17 }
 0xaa8   : > { %v4289_v18 = vpop.permute.xlu1 %4288 }
 0xaa9   : > { %4332 = vst.msk [vmem:[%s22719_s10 + $0x50] sm:$0xff] %vm4326_vm4, %v4289_v18  ;;  %v4287_v10 = vpop.permute.xlu0 %4286 }
 0xaaa   : > { %4331 = vst.msk [vmem:[%s22719_s10 + $0x40] sm:$0xff] %vm4326_vm4, %v4287_v10 }
 0xaac   : > { %v4293_v12 = vpop.permute.xlu1 %4292 }
 0xaad   : > { %4334 = vst.msk [vmem:[%s22719_s10 + $0x70] sm:$0xff] %vm4326_vm4, %v4293_v12  ;;  %v4291_v28 = vpop.permute.xlu0 %4290 }
 0xaae   : > { %4333 = vst.msk [vmem:[%s22719_s10 + $0x60] sm:$0xff] %vm4326_vm4, %v4291_v28 }
 0xab0   : > { %v4297_v32 = vpop.permute.xlu1 %4296 }
 0xab1   : > { %4336 = vst.msk [vmem:[%s22719_s10 + $0x90] sm:$0xff] %vm4326_vm4, %v4297_v32  ;;  %v4295_v35 = vpop.permute.xlu0 %4294 }
 0xab2   : > { %4335 = vst.msk [vmem:[%s22719_s10 + $0x80] sm:$0xff] %vm4326_vm4, %v4295_v35 }
 0xab4   : > { %v4301_v37 = vpop.permute.xlu1 %4300 }
 0xab5   : > { %4338 = vst.msk [vmem:[%s22719_s10 + $0xb0] sm:$0xff] %vm4326_vm4, %v4301_v37  ;;  %v4299_v38 = vpop.permute.xlu0 %4298 }
 0xab6   : > { %4337 = vst.msk [vmem:[%s22719_s10 + $0xa0] sm:$0xff] %vm4326_vm4, %v4299_v38 }
 0xab8   : > { %v4305_v39 = vpop.permute.xlu1 %4304 }
 0xab9   : > { %4340 = vst.msk [vmem:[%s22719_s10 + $0xd0] sm:$0xff] %vm4326_vm4, %v4305_v39  ;;  %v4303_v41 = vpop.permute.xlu0 %4302 }
 0xaba   : > { %4339 = vst.msk [vmem:[%s22719_s10 + $0xc0] sm:$0xff] %vm4326_vm4, %v4303_v41 }
 0xabc   : > { %v4309_v9 = vpop.permute.xlu1 %4308 }
 0xabd   : > { %4342 = vst.msk [vmem:[%s22719_s10 + $0xf0] sm:$0xff] %vm4326_vm4, %v4309_v9  ;;  %v4307_v42 = vpop.permute.xlu0 %4306 }
 0xabe   : > { %4341 = vst.msk [vmem:[%s22719_s10 + $0xe0] sm:$0xff] %vm4326_vm4, %v4307_v42 }
 0xb25   : > { %v17328_v30 = vpop.f32.mrb[144].mxu0 }
 0xb26   : > { %v4806_v43 = vpop.f32.mrb[145].mxu0 }
 0xb27   : > { %v20222_v45 = vpack.c.bf16 %v17328_v30, %v4806_v43  ;;  %v23761_v43 = vld [vmem:[%s26651_s5] ss:$0 sm:$0xff] }
 0xb29   : > { %v17331_v46 = vpop.f32.mrb[146].mxu0  ;;  %20223 = vmatprep.subr.bf16.mxu1 %v20222_v45 }
 0xb2a   : > { %v4816_v48 = vpop.f32.mrb[147].mxu0  ;;  %20225 = vmatpush3.bf16.msra.mxu1 %v20222_v45 }
 0xb2b   : > { %v20226_v50 = vpack.c.bf16 %v17331_v46, %v4816_v48 }
 0xb2d   : > { %v17334_v51 = vpop.f32.mrb[148].mxu0  ;;  %20227 = vmatprep.subr.bf16.mxu1 %v20226_v50 }
 0xb2e   : > { %v4826_v55 = vpop.f32.mrb[149].mxu0  ;;  %20229 = vmatpush3.bf16.msra.mxu1 %v20226_v50 }
 0xb2f   : > { %v20230_v56 = vpack.c.bf16 %v17334_v51, %v4826_v55 }
 0xb31   : > { %v17337_v58 = vpop.f32.mrb[150].mxu0  ;;  %20231 = vmatprep.subr.bf16.mxu1 %v20230_v56 }
 0xb32   : > { %v4836_v60 = vpop.f32.mrb[151].mxu0  ;;  %20233 = vmatpush3.bf16.msra.mxu1 %v20230_v56 }
 0xb33   : > { %v20234_v61 = vpack.c.bf16 %v17337_v58, %v4836_v60 }
 0xb35   : > { %v17340_v63 = vpop.f32.mrb[152].mxu0  ;;  %20235 = vmatprep.subr.bf16.mxu1 %v20234_v61 }
 0xb36   : > { %v4846_v31 = vpop.f32.mrb[153].mxu0  ;;  %20237 = vmatpush3.bf16.msra.mxu1 %v20234_v61 }
 0xb37   : > { %v20238_v1 = vpack.c.bf16 %v17340_v63, %v4846_v31 }
 0xb39   : > { %v17343_v3 = vpop.f32.mrb[154].mxu0  ;;  %20239 = vmatprep.subr.bf16.mxu1 %v20238_v1 }
 0xb3a   : > { %v4856_v5 = vpop.f32.mrb[155].mxu0  ;;  %20241 = vmatpush3.bf16.msra.mxu1 %v20238_v1 }
 0xb3b   : > { %v20242_v53 = vpack.c.bf16 %v17343_v3, %v4856_v5 }
 0xb3d   : > { %v17346_v6 = vpop.f32.mrb[156].mxu0  ;;  %20243 = vmatprep.subr.bf16.mxu1 %v20242_v53 }
 0xb3e   : > { %v4866_v15 = vpop.f32.mrb[157].mxu0  ;;  %20245 = vmatpush3.bf16.msra.mxu1 %v20242_v53 }
 0xb3f   : > { %v20246_v16 = vpack.c.bf16 %v17346_v6, %v4866_v15 }
 0xb41   : > { %v17349_v20 = vpop.f32.mrb[158].mxu0  ;;  %20247 = vmatprep.subr.bf16.mxu1 %v20246_v16 }
 0xb42   : > { %v4876_v22 = vpop.f32.mrb[159].mxu0  ;;  %20249 = vmatpush3.bf16.msra.mxu1 %v20246_v16 }
 0xb43   : > { %v20250_v23 = vpack.c.bf16 %v17349_v20, %v4876_v22 }
 0xb45   : > { %20251 = vmatprep.subr.bf16.mxu1 %v20250_v23  ;;  %v17440_v25 = vpop.f32.mrb[160].mxu0 }
 0xb46   : > { %20253 = vmatpush3.bf16.msra.mxu1 %v20250_v23  ;;  %v5211_v27 = vpop.f32.mrb[161].mxu0 }
 0xb47   : > { %v20286_v8 = vpack.c.bf16 %v17440_v25, %v5211_v27 }
 0xb49   : > { %17383 = vmatmul.mubr.f32.vlgmr.msra.gmra.mrb[144].mxu1 %v23391_v13  ;;  %v17443_v47 = vpop.f32.mrb[162].mxu0  ;;  %20287 = vmatprep.subr.bf16.mxu1 %v20286_v8 }
 0xb4a   : > { %v5221_v52 = vpop.f32.mrb[163].mxu0  ;;  %20289 = vmatpush3.bf16.msra.mxu1 %v20286_v8  ;;  %17385 = vmatprep.mubr.f32.mxu1 %v23397_v40 }
 0xb4b   : > { %v20290_v54 = vpack.c.bf16 %v17443_v47, %v5221_v52 }
 0xb4d   : > { %17386 = vmatmul.mubr.f32.gmra.mrb[146].mxu1 %v23403_v21  ;;  %v17446_v59 = vpop.f32.mrb[164].mxu0  ;;  %20291 = vmatprep.subr.bf16.mxu1 %v20290_v54 }
 0xb4e   : > { %v5231_v0 = vpop.f32.mrb[165].mxu0  ;;  %20293 = vmatpush3.bf16.msra.mxu1 %v20290_v54  ;;  %17388 = vmatprep.mubr.f32.mxu1 %v23409_v24 }
 0xb4f   : > { %v20294_v2 = vpack.c.bf16 %v17446_v59, %v5231_v0 }
 0xb51   : > { %17389 = vmatmul.mubr.f32.gmra.mrb[148].mxu1 %v23415_v26  ;;  %v17449_v7 = vpop.f32.mrb[166].mxu0  ;;  %20295 = vmatprep.subr.bf16.mxu1 %v20294_v2 }
 0xb52   : > { %v5241_v17 = vpop.f32.mrb[167].mxu0  ;;  %20297 = vmatpush3.bf16.msra.mxu1 %v20294_v2  ;;  %17391 = vmatprep.mubr.f32.mxu1 %v23421_v44 }
 0xb53   : > { %v20298_v18 = vpack.c.bf16 %v17449_v7, %v5241_v17 }
 0xb55   : > { %17392 = vmatmul.mubr.f32.gmra.mrb[150].mxu1 %v23427_v49  ;;  %v17452_v10 = vpop.f32.mrb[168].mxu0  ;;  %20299 = vmatprep.subr.bf16.mxu1 %v20298_v18 }
 0xb56   : > { %v5251_v12 = vpop.f32.mrb[169].mxu0  ;;  %20301 = vmatpush3.bf16.msra.mxu1 %v20298_v18  ;;  %17394 = vmatprep.mubr.f32.mxu1 %v23433_v57 }
 0xb57   : > { %v20302_v28 = vpack.c.bf16 %v17452_v10, %v5251_v12  ;;  %v13895_v12 = vld [vmem:[%s26648_s2 + $0x310] sm:$0xff] }
 0xb59   : > { %17395 = vmatmul.mubr.f32.gmra.mrb[152].mxu1 %v23439_v62  ;;  %v17455_v32 = vpop.f32.mrb[170].mxu0  ;;  %20303 = vmatprep.subr.bf16.mxu1 %v20302_v28 }
 0xb5a   : > { %v5261_v35 = vpop.f32.mrb[171].mxu0  ;;  %20305 = vmatpush3.bf16.msra.mxu1 %v20302_v28  ;;  %17397 = vmatprep.mubr.f32.mxu1 %v23445_v4  ;;  %v13896_v28 = vld [vmem:[%s26648_s2 + $0x318] sm:$0xff] }
 0xb5b   : > { %v20306_v37 = vpack.c.bf16 %v17455_v32, %v5261_v35 }
 0xb5d   : > { %17398 = vmatmul.mubr.f32.gmra.mrb[154].mxu1 %v23451_v14  ;;  %v17458_v38 = vpop.f32.mrb[172].mxu0  ;;  %20307 = vmatprep.subr.bf16.mxu1 %v20306_v37 }
 0xb5e   : > { %v5271_v39 = vpop.f32.mrb[173].mxu0  ;;  %20309 = vmatpush3.bf16.msra.mxu1 %v20306_v37  ;;  %17400 = vmatprep.mubr.f32.mxu1 %v23457_v19 }
 0xb5f   : > { %v20310_v41 = vpack.c.bf16 %v17458_v38, %v5271_v39 }
 0xb61   : > { %17401 = vmatmul.mubr.f32.gmra.mrb[156].mxu1 %v23463_v11  ;;  %v17461_v9 = vpop.f32.mrb[174].mxu0  ;;  %20311 = vmatprep.subr.bf16.mxu1 %v20310_v41 }
 0xb62   : > { %v5281_v42 = vpop.f32.mrb[175].mxu0  ;;  %20313 = vmatpush3.bf16.msra.mxu1 %v20310_v41  ;;  %17403 = vmatprep.mubr.f32.mxu1 %v23469_v29  ;;  %v20370_v41 = vpack.c.bf16 %v13896_v28, %v13895_v12 }
 0xb63   : > { %v20314_v30 = vpack.c.bf16 %v17461_v9, %v5281_v42  ;;  %v13897_v42 = vld [vmem:[%s26648_s2 + $0x320] sm:$0xff] }
 0xb65   : > { %17404 = vmatmul.mubr.f32.gmra.mrb[158].mxu1 %v23475_v33  ;;  %20315 = vmatprep.subr.bf16.mxu1 %v20314_v30 }
 0xb66   : > { %20317 = vmatpush3.bf16.msra.mxu1 %v20314_v30  ;;  %17494 = vmatprep.mubr.f32.mxu1 %v23481_v34  ;;  %v13898_v30 = vld [vmem:[%s26648_s2 + $0x328] sm:$0xff] }
 0xb69   : > { %17495 = vmatmul.mubr.f32.vlgmr.msra.gmra.mrb[160].mxu1 %v23391_v13  ;;  %v13853_v13 = vld [vmem:[%s26650_s4 + $0x140] sm:$0xff] }
 0xb6a   : > { %17497 = vmatprep.mubr.f32.mxu1 %v23397_v40  ;;  %v13854_v40 = vld [vmem:[%s26650_s4 + $0x148] sm:$0xff] }
 0xb6d   : > { %17498 = vmatmul.mubr.f32.gmra.mrb[162].mxu1 %v23403_v21  ;;  %v20318_v21 = vpack.c.bf16 %v13854_v40, %v13853_v13 }
 0xb6e   : > { %17500 = vmatprep.mubr.f32.mxu1 %v23409_v24  ;;  %v13855_v24 = vld [vmem:[%s26650_s4 + $0x150] sm:$0xff] }
 0xb6f   : > { %20319 = vmatprep.subr.bf16.mxu0 %v20318_v21 }
 0xb70   : > { %20321 = vmatpush3.bf16.msra.mxu0 %v20318_v21 }
 0xb71   : > { %17501 = vmatmul.mubr.f32.gmra.mrb[164].mxu1 %v23415_v26  ;;  %v13856_v26 = vld [vmem:[%s26650_s4 + $0x158] sm:$0xff] }
 0xb72   : > { %17503 = vmatprep.mubr.f32.mxu1 %v23421_v44  ;;  %v20322_v44 = vpack.c.bf16 %v13856_v26, %v13855_v24 }
 0xb74   : > { %20323 = vmatprep.subr.bf16.mxu0 %v20322_v44 }
 0xb75   : > { %17504 = vmatmul.mubr.f32.gmra.mrb[166].mxu1 %v23427_v49  ;;  %20325 = vmatpush3.bf16.msra.mxu0 %v20322_v44  ;;  %v13857_v49 = vld [vmem:[%s26650_s4 + $0x160] sm:$0xff]  ;;  %v20374_v44 = vpack.c.bf16 %v13898_v30, %v13897_v42  ;;  %v13884_v42 = vld [vmem:[%s22376_s15 + $0x338] sm:$0xff] }
 0xb76   : > { %17506 = vmatprep.mubr.f32.mxu1 %v23433_v57  ;;  %v13858_v57 = vld [vmem:[%s26650_s4 + $0x168] sm:$0xff]  ;;  %v13885_v30 = vld [vmem:[%s22376_s15 + $0x340] sm:$0xff] }
 0xb79   : > { %17507 = vmatmul.mubr.f32.gmra.mrb[168].mxu1 %v23439_v62  ;;  %v20326_v62 = vpack.c.bf16 %v13858_v57, %v13857_v49  ;;  %v13899_v57 = vld [vmem:[%s26648_s2 + $0x330] sm:$0xff] }
 0xb7a   : > { %17509 = vmatprep.mubr.f32.mxu1 %v23445_v4  ;;  %v13859_v4 = vld [vmem:[%s26650_s4 + $0x170] sm:$0xff] }
 0xb7b   : > { %20327 = vmatprep.subr.bf16.mxu0 %v20326_v62 }
 0xb7c   : > { %20329 = vmatpush3.bf16.msra.mxu0 %v20326_v62  ;;  %v13900_v62 = vld [vmem:[%s26648_s2 + $0x338] sm:$0xff] }
 0xb7d   : > { %17510 = vmatmul.mubr.f32.gmra.mrb[170].mxu1 %v23451_v14  ;;  %v13860_v14 = vld [vmem:[%s26650_s4 + $0x178] sm:$0xff] }
 0xb7e   : > { %17512 = vmatprep.mubr.f32.mxu1 %v23457_v19  ;;  %v20330_v19 = vpack.c.bf16 %v13860_v14, %v13859_v4 }
 0xb80   : > { %20331 = vmatprep.subr.bf16.mxu0 %v20330_v19 }
 0xb81   : > { %17513 = vmatmul.mubr.f32.gmra.mrb[172].mxu1 %v23463_v11  ;;  %20333 = vmatpush3.bf16.msra.mxu0 %v20330_v19  ;;  %v13893_v11 = vld [vmem:[%s26648_s2 + $0x300] sm:$0xff] }
 0xb82   : > { %17515 = vmatprep.mubr.f32.mxu1 %v23469_v29  ;;  %v13894_v29 = vld [vmem:[%s26648_s2 + $0x308] sm:$0xff] }
 0xb85   : > { %17516 = vmatmul.mubr.f32.gmra.mrb[174].mxu1 %v23475_v33  ;;  %v23755_v33 = vpack.c.bf16 %v13894_v29, %v13893_v11 }
 0xb86   : > { %17590 = vmatprep.mubr.f32.mxu1 %v23481_v34 }
 0xb87   : > { %20367 = vmatprep.subr.bf16.mxu0 %v23755_v33 }
 0xc1c   : > { %v17384_v34 = vpop.f32.mrb[144].mxu1 }
 0xc1d   : > { %v4957_v45 = vadd.f32 %v23761_v43, %v17384_v34  ;;  %v4951_v46 = vpop.f32.mrb[145].mxu1 }
 0xc1e   : > { %v4952_v48 = vadd.f32 %v23761_v43, %v4951_v46  ;;  %v13902_v46 = vld [vmem:[%s26648_s2 + $0x348] sm:$0xff] }
 0xc1f   : > { %5048 = vrot.lane.b32.xlu1 %v4957_v45, %s21741_s14  ;;  %v13901_v45 = vld [vmem:[%s26648_s2 + $0x340] sm:$0xff] }
 0xc20   : > { %v17387_v50 = vpop.f32.mrb[146].mxu1  ;;  %5046 = vrot.lane.b32.xlu0 %v4952_v48, %s21741_s14 }
 0xc21   : > { %v4967_v51 = vadd.f32 %v23761_v43, %v17387_v50  ;;  %v4961_v55 = vpop.f32.mrb[147].mxu1 }
 0xc22   : > { %v4962_v56 = vadd.f32 %v23761_v43, %v4961_v55 }
 0xc23   : > { %5052 = vrot.lane.b32.xlu1 %v4967_v51, %s21741_s14 }
 0xc24   : > { %v17390_v58 = vpop.f32.mrb[148].mxu1  ;;  %5050 = vrot.lane.b32.xlu0 %v4962_v56, %s21741_s14 }
 0xc25   : > { %v4977_v60 = vadd.f32 %v23761_v43, %v17390_v58  ;;  %v4971_v61 = vpop.f32.mrb[149].mxu1  ;;  %v20382_v58 = vpack.c.bf16 %v13902_v46, %v13901_v45 }
 0xc26   : > { %v4972_v63 = vadd.f32 %v23761_v43, %v4971_v61  ;;  %v13903_v61 = vld [vmem:[%s26648_s2 + $0x350] sm:$0xff] }
 0xc27   : > { %5056 = vrot.lane.b32.xlu1 %v4977_v60, %s21741_s14 }
 0xc28   : > { %v17393_v31 = vpop.f32.mrb[150].mxu1  ;;  %5054 = vrot.lane.b32.xlu0 %v4972_v63, %s21741_s14  ;;  %v13904_v63 = vld [vmem:[%s26648_s2 + $0x358] sm:$0xff] }
 0xc29   : > { %v4987_v1 = vadd.f32 %v23761_v43, %v17393_v31  ;;  %v4981_v3 = vpop.f32.mrb[151].mxu1 }
 0xc2a   : > { %v4982_v5 = vadd.f32 %v23761_v43, %v4981_v3 }
 0xc2b   : > { %5060 = vrot.lane.b32.xlu1 %v4987_v1, %s21741_s14 }
 0xc2c   : > { %v17396_v53 = vpop.f32.mrb[152].mxu1  ;;  %5058 = vrot.lane.b32.xlu0 %v4982_v5, %s21741_s14 }
 0xc2d   : > { %v4997_v6 = vadd.f32 %v23761_v43, %v17396_v53  ;;  %v4991_v15 = vpop.f32.mrb[153].mxu1 }
 0xc2e   : > { %v4992_v16 = vadd.f32 %v23761_v43, %v4991_v15 }
 0xc2f   : > { %5064 = vrot.lane.b32.xlu1 %v4997_v6, %s21741_s14  ;;  %v20386_v6 = vpack.c.bf16 %v13904_v63, %v13903_v61 }
 0xc30   : > { %v17399_v20 = vpop.f32.mrb[154].mxu1  ;;  %5062 = vrot.lane.b32.xlu0 %v4992_v16, %s21741_s14  ;;  %v13905_v16 = vld [vmem:[%s26648_s2 + $0x360] sm:$0xff] }
 0xc31   : > { %v5007_v22 = vadd.f32 %v23761_v43, %v17399_v20  ;;  %v5001_v23 = vpop.f32.mrb[155].mxu1  ;;  %v13906_v20 = vld [vmem:[%s26648_s2 + $0x368] sm:$0xff] }
 0xc32   : > { %v5002_v25 = vadd.f32 %v23761_v43, %v5001_v23 }
 0xc33   : > { %5068 = vrot.lane.b32.xlu1 %v5007_v22, %s21741_s14 }
 0xc34   : > { %v17402_v27 = vpop.f32.mrb[156].mxu1  ;;  %5066 = vrot.lane.b32.xlu0 %v5002_v25, %s21741_s14 }
 0xc35   : > { %v5017_v8 = vadd.f32 %v23761_v43, %v17402_v27  ;;  %v5011_v47 = vpop.f32.mrb[157].mxu1 }
 0xc36   : > { %v5012_v52 = vadd.f32 %v23761_v43, %v5011_v47  ;;  %v20390_v47 = vpack.c.bf16 %v13906_v20, %v13905_v16 }
 0xc37   : > { %5072 = vrot.lane.b32.xlu1 %v5017_v8, %s21741_s14 }
 0xc38   : > { %v17405_v54 = vpop.f32.mrb[158].mxu1  ;;  %5070 = vrot.lane.b32.xlu0 %v5012_v52, %s21741_s14 }
 0xc39   : > { %v5027_v59 = vadd.f32 %v23761_v43, %v17405_v54  ;;  %v5021_v0 = vpop.f32.mrb[159].mxu1  ;;  %v13907_v54 = vld [vmem:[%s26648_s2 + $0x370] sm:$0xff] }
 0xc3a   : > { %v5022_v2 = vadd.f32 %v23761_v43, %v5021_v0 }
 0xc3b   : > { %5076 = vrot.lane.b32.xlu1 %v5027_v59, %s21741_s14  ;;  %v13908_v59 = vld [vmem:[%s26648_s2 + $0x378] sm:$0xff] }
 0xc3c   : > { %v17496_v7 = vpop.f32.mrb[160].mxu1  ;;  %5074 = vrot.lane.b32.xlu0 %v5022_v2, %s21741_s14 }
 0xc3d   : > { %v5362_v17 = vadd.f32 %v23568_v36, %v17496_v7  ;;  %v5356_v18 = vpop.f32.mrb[161].mxu1 }
 0xc3e   : > { %v5357_v10 = vadd.f32 %v23568_v36, %v5356_v18 }
 0xc3f   : > { %v5436_v37 = vmax.f32 %v5362_v17, 0.0 }
 0xc40   : > { %v5435_v32 = vmax.f32 %v5357_v10, 0.0  ;;  %v17499_v35 = vpop.f32.mrb[162].mxu1  ;;  %v20394_v10 = vpack.c.bf16 %v13908_v59, %v13907_v54 }
 0xc41   : > { %v5372_v38 = vadd.f32 %v23568_v36, %v17499_v35  ;;  %v5366_v39 = vpop.f32.mrb[163].mxu1  ;;  %v13877_v35 = vld [vmem:[%s22376_s15 + $0x300] sm:$0xff] }
 0xc42   : > { %v5367_v9 = vadd.f32 %v23568_v36, %v5366_v39  ;;  %17534 = vmatprep.mubr.msk.f32.mxu0 %vm1677_vm0, %v5435_v32  ;;  %v13881_v39 = vld [vmem:[%s22376_s15 + $0x320] sm:$0xff] }
 0xc43   : > { %17535 = vmatmul.mubr.msk.f32.vlgmr.msra.gmra.mrb[176].mxu0 %vm1677_vm0, %v5436_v37  ;;  %v5438_v21 = vmax.f32 %v5372_v38, 0.0  ;;  %v13879_v37 = vld [vmem:[%s22376_s15 + $0x310] sm:$0xff]  ;;  %v13880_v38 = vld [vmem:[%s22376_s15 + $0x318] sm:$0xff] }
 0xc44   : > { %v5437_v13 = vmax.f32 %v5367_v9, 0.0  ;;  %v17502_v40 = vpop.f32.mrb[164].mxu1  ;;  %20369 = vmatpush3.bf16.msra.mxu0 %v23755_v33  ;;  %v20378_v33 = vpack.c.bf16 %v13900_v62, %v13899_v57  ;;  %v13883_v9 = vld [vmem:[%s22376_s15 + $0x330] sm:$0xff] }
 0xc45   : > { %v5382_v24 = vadd.f32 %v23568_v36, %v17502_v40  ;;  %v5376_v26 = vpop.f32.mrb[165].mxu1  ;;  %20371 = vmatprep.subr.bf16.mxu0 %v20370_v41  ;;  %v13887_v40 = vld [vmem:[%s22376_s15 + $0x350] sm:$0xff] }
 0xc46   : > { %v5377_v49 = vadd.f32 %v23568_v36, %v5376_v26  ;;  %17537 = vmatprep.mubr.msk.f32.mxu0 %vm1677_vm0, %v5437_v13  ;;  %v13886_v13 = vld [vmem:[%s22376_s15 + $0x348] sm:$0xff] }
 0xc47   : > { %17538 = vmatmul.mubr.msk.f32.gmra.mrb[178].mxu0 %vm1677_vm0, %v5438_v21  ;;  %v5440_v19 = vmax.f32 %v5382_v24, 0.0  ;;  %v13888_v21 = vld [vmem:[%s22376_s15 + $0x358] sm:$0xff]  ;;  %v13889_v24 = vld [vmem:[%s22376_s15 + $0x360] sm:$0xff]  ;;  %v13890_v26 = vld [vmem:[%s22376_s15 + $0x368] sm:$0xff] }
 0xc48   : > { %v5439_v4 = vmax.f32 %v5377_v49, 0.0  ;;  %v17505_v14 = vpop.f32.mrb[166].mxu1  ;;  %20373 = vmatpush3.bf16.msra.mxu0 %v20370_v41  ;;  %v13882_v41 = vld [vmem:[%s22376_s15 + $0x328] sm:$0xff]  ;;  %v13892_v49 = vld [vmem:[%s22376_s15 + $0x378] sm:$0xff] }
 0xc49   : > { %v5392_v11 = vadd.f32 %v23568_v36, %v17505_v14  ;;  %v5386_v29 = vpop.f32.mrb[167].mxu1  ;;  %20375 = vmatprep.subr.bf16.mxu0 %v20374_v44 }
 0xc4a   : > { %v5387_v34 = vadd.f32 %v23568_v36, %v5386_v29  ;;  %17540 = vmatprep.mubr.msk.f32.mxu0 %vm1677_vm0, %v5439_v4 }
 0xc4b   : > { %17541 = vmatmul.mubr.msk.f32.gmra.mrb[180].mxu0 %vm1677_vm0, %v5440_v19  ;;  %v5442_v51 = vmax.f32 %v5392_v11, 0.0 }
 0xc4c   : > { %v5441_v48 = vmax.f32 %v5387_v34, 0.0  ;;  %v17508_v50 = vpop.f32.mrb[168].mxu1  ;;  %20377 = vmatpush3.bf16.msra.mxu0 %v20374_v44  ;;  %v13891_v44 = vld [vmem:[%s22376_s15 + $0x370] sm:$0xff] }
 0xc4d   : > { %v5402_v55 = vadd.f32 %v23568_v36, %v17508_v50  ;;  %v5396_v56 = vpop.f32.mrb[169].mxu1  ;;  %20379 = vmatprep.subr.bf16.mxu0 %v20378_v33 }
 0xc4e   : > { %v5397_v60 = vadd.f32 %v23568_v36, %v5396_v56  ;;  %17543 = vmatprep.mubr.msk.f32.mxu0 %vm1677_vm0, %v5441_v48 }
 0xc4f   : > { %17544 = vmatmul.mubr.msk.f32.gmra.mrb[182].mxu0 %vm1677_vm0, %v5442_v51  ;;  %v5444_v3 = vmax.f32 %v5402_v55, 0.0 }
 0xc50   : > { %v5443_v31 = vmax.f32 %v5397_v60, 0.0  ;;  %v17511_v1 = vpop.f32.mrb[170].mxu1  ;;  %20381 = vmatpush3.bf16.msra.mxu0 %v20378_v33 }
 0xc51   : > { %v5412_v5 = vadd.f32 %v23568_v36, %v17511_v1  ;;  %v5406_v53 = vpop.f32.mrb[171].mxu1  ;;  %20383 = vmatprep.subr.bf16.mxu0 %v20382_v58 }
 0xc52   : > { %v5407_v15 = vadd.f32 %v23568_v36, %v5406_v53  ;;  %17546 = vmatprep.mubr.msk.f32.mxu0 %vm1677_vm0, %v5443_v31 }
 0xc53   : > { %17547 = vmatmul.mubr.msk.f32.gmra.mrb[184].mxu0 %vm1677_vm0, %v5444_v3  ;;  %v5446_v25 = vmax.f32 %v5412_v5, 0.0 }
 0xc54   : > { %v5445_v22 = vmax.f32 %v5407_v15, 0.0  ;;  %v17514_v23 = vpop.f32.mrb[172].mxu1  ;;  %20385 = vmatpush3.bf16.msra.mxu0 %v20382_v58 }
 0xc55   : > { %v5422_v27 = vadd.f32 %v23568_v36, %v17514_v23  ;;  %v5416_v8 = vpop.f32.mrb[173].mxu1  ;;  %20387 = vmatprep.subr.bf16.mxu0 %v20386_v6 }
 0xc56   : > { %v5417_v52 = vadd.f32 %v23568_v36, %v5416_v8  ;;  %17549 = vmatprep.mubr.msk.f32.mxu0 %vm1677_vm0, %v5445_v22 }
 0xc57   : > { %17550 = vmatmul.mubr.msk.f32.gmra.mrb[186].mxu0 %vm1677_vm0, %v5446_v25  ;;  %v5448_v7 = vmax.f32 %v5422_v27, 0.0 }
 0xc58   : > { %v5447_v0 = vmax.f32 %v5417_v52, 0.0  ;;  %v17517_v2 = vpop.f32.mrb[174].mxu1  ;;  %20389 = vmatpush3.bf16.msra.mxu0 %v20386_v6 }
 0xc59   : > { %v5432_v17 = vadd.f32 %v23568_v36, %v17517_v2  ;;  %v5426_v18 = vpop.f32.mrb[175].mxu1  ;;  %20391 = vmatprep.subr.bf16.mxu0 %v20390_v47 }
 0xc5a   : > { %v5427_v12 = vadd.f32 %v23568_v36, %v5426_v18  ;;  %17552 = vmatprep.mubr.msk.f32.mxu0 %vm1677_vm0, %v5447_v0  ;;  %v13878_v36 = vld [vmem:[%s22376_s15 + $0x308] sm:$0xff] }
 0xc5b   : > { %17553 = vmatmul.mubr.msk.f32.gmra.mrb[188].mxu0 %vm1677_vm0, %v5448_v7  ;;  %v5450_v32 = vmax.f32 %v5432_v17, 0.0 }
 0xc5c   : > { %v5449_v28 = vmax.f32 %v5427_v12, 0.0  ;;  %20393 = vmatpush3.bf16.msra.mxu0 %v20390_v47 }
 0xc5d   : > { %20395 = vmatprep.subr.bf16.mxu0 %v20394_v10 }
 0xc5e   : > { %17555 = vmatprep.mubr.msk.f32.mxu0 %vm1677_vm0, %v5449_v28 }
 0xc5f   : > { %17556 = vmatmul.mubr.msk.f32.gmra.mrb[190].mxu0 %vm1677_vm0, %v5450_v32  ;;  %v23927_v32 = vld [vmem:[%s26647_s1 + $0x10] sm:$0xff] }
 0xc60   : > { %20397 = vmatpush3.bf16.msra.mxu0 %v20394_v10  ;;  %17646 = vmatprep.mubr.f32.mxu0 %v13877_v35  ;;  %v23921_v10 = vld [vmem:[%s26647_s1 + $0x8] sm:$0xff] }
 0xc63   : > { %17647 = vmatmul.mubr.f32.vlgmr.msra.gmra.mrb[192].mxu0 %v13878_v36  ;;  %v23933_v36 = vld [vmem:[%s26647_s1 + $0x18] sm:$0xff] }
 0xc64   : > { %17649 = vmatprep.mubr.f32.mxu0 %v13879_v37 }
 0xc67   : > { %17650 = vmatmul.mubr.f32.gmra.mrb[194].mxu0 %v13880_v38 }
 0xc68   : > { %17652 = vmatprep.mubr.f32.mxu0 %v13881_v39  ;;  %v23939_v39 = vld [vmem:[%s26647_s1 + $0x20] sm:$0xff] }
 0xc6b   : > { %17653 = vmatmul.mubr.f32.gmra.mrb[196].mxu0 %v13882_v41 }
 0xc6c   : > { %17655 = vmatprep.mubr.f32.mxu0 %v13883_v9  ;;  %v23945_v9 = vld [vmem:[%s26647_s1 + $0x28] sm:$0xff] }
 0xc6f   : > { %17656 = vmatmul.mubr.f32.gmra.mrb[198].mxu0 %v13884_v42 }
 0xc70   : > { %17658 = vmatprep.mubr.f32.mxu0 %v13885_v30 }
 0xc73   : > { %17659 = vmatmul.mubr.f32.gmra.mrb[200].mxu0 %v13886_v13  ;;  %v23951_v13 = vld [vmem:[%s26647_s1 + $0x30] sm:$0xff] }
 0xc74   : > { %17661 = vmatprep.mubr.f32.mxu0 %v13887_v40 }
 0xc77   : > { %17662 = vmatmul.mubr.f32.gmra.mrb[202].mxu0 %v13888_v21  ;;  %v23957_v21 = vld [vmem:[%s26647_s1 + $0x38] sm:$0xff] }
 0xc78   : > { %17664 = vmatprep.mubr.f32.mxu0 %v13889_v24 }
 0xc7b   : > { %17665 = vmatmul.mubr.f32.gmra.mrb[204].mxu0 %v13890_v26 }
 0xc7c   : > { %17667 = vmatprep.mubr.f32.mxu0 %v13891_v44  ;;  %v23963_v44 = vld [vmem:[%s26647_s1 + $0x40] sm:$0xff] }
 0xc7f   : > { %17668 = vmatmul.mubr.f32.gmra.mrb[206].mxu0 %v13892_v49 }
 0xc91   : > { %v5049_v57 = vpop.permute.xlu1 %5048 }
 0xc92   : > { %5096 = vst.msk [vmem:[%s22719_s10 + $0x10] sm:$0xff] %vm5094_vm5, %v5049_v57  ;;  %v5047_v62 = vpop.permute.xlu0 %5046  ;;  %v23969_v57 = vld [vmem:[%s26647_s1 + $0x48] sm:$0xff] }
 0xc93   : > { %5095 = vst.msk [vmem:[%s22719_s10] sm:$0xff] %vm5094_vm5, %v5047_v62 }
 0xc95   : > { %v5053_v4 = vpop.permute.xlu1 %5052 }
 0xc96   : > { %5098 = vst.msk [vmem:[%s22719_s10 + $0x30] sm:$0xff] %vm5094_vm5, %v5053_v4  ;;  %v5051_v14 = vpop.permute.xlu0 %5050 }
 0xc97   : > { %5097 = vst.msk [vmem:[%s22719_s10 + $0x20] sm:$0xff] %vm5094_vm5, %v5051_v14  ;;  %v23975_v14 = vld [vmem:[%s26647_s1 + $0x50] sm:$0xff] }
 0xc99   : > { %v5057_v19 = vpop.permute.xlu1 %5056 }
 0xc9a   : > { %5100 = vst.msk [vmem:[%s22719_s10 + $0x50] sm:$0xff] %vm5094_vm5, %v5057_v19  ;;  %v5055_v11 = vpop.permute.xlu0 %5054 }
 0xc9b   : > { %5099 = vst.msk [vmem:[%s22719_s10 + $0x40] sm:$0xff] %vm5094_vm5, %v5055_v11  ;;  %v23981_v11 = vld [vmem:[%s26647_s1 + $0x58] sm:$0xff] }
 0xc9d   : > { %v5061_v29 = vpop.permute.xlu1 %5060 }
 0xc9e   : > { %5102 = vst.msk [vmem:[%s22719_s10 + $0x70] sm:$0xff] %vm5094_vm5, %v5061_v29  ;;  %v5059_v33 = vpop.permute.xlu0 %5058 }
 0xc9f   : > { %5101 = vst.msk [vmem:[%s22719_s10 + $0x60] sm:$0xff] %vm5094_vm5, %v5059_v33 }
 0xca1   : > { %v5065_v34 = vpop.permute.xlu1 %5064 }
 0xca2   : > { %5104 = vst.msk [vmem:[%s22719_s10 + $0x90] sm:$0xff] %vm5094_vm5, %v5065_v34  ;;  %v5063_v45 = vpop.permute.xlu0 %5062  ;;  %v23987_v34 = vld [vmem:[%s26647_s1 + $0x60] sm:$0xff] }
 0xca3   : > { %5103 = vst.msk [vmem:[%s22719_s10 + $0x80] sm:$0xff] %vm5094_vm5, %v5063_v45 }
 0xca5   : > { %v5069_v46 = vpop.permute.xlu1 %5068 }
 0xca6   : > { %5106 = vst.msk [vmem:[%s22719_s10 + $0xb0] sm:$0xff] %vm5094_vm5, %v5069_v46  ;;  %v5067_v48 = vpop.permute.xlu0 %5066  ;;  %v23993_v46 = vld [vmem:[%s26647_s1 + $0x68] sm:$0xff] }
 0xca7   : > { %5105 = vst.msk [vmem:[%s22719_s10 + $0xa0] sm:$0xff] %vm5094_vm5, %v5067_v48 }
 0xca9   : > { %v5073_v50 = vpop.permute.xlu1 %5072 }
 0xcaa   : > { %5108 = vst.msk [vmem:[%s22719_s10 + $0xd0] sm:$0xff] %vm5094_vm5, %v5073_v50  ;;  %v5071_v51 = vpop.permute.xlu0 %5070 }
 0xcab   : > { %5107 = vst.msk [vmem:[%s22719_s10 + $0xc0] sm:$0xff] %vm5094_vm5, %v5071_v51  ;;  %v23999_v51 = vld [vmem:[%s26647_s1 + $0x70] sm:$0xff] }
 0xcad   : > { %v5077_v55 = vpop.permute.xlu1 %5076 }
 0xcae   : > { %5110 = vst.msk [vmem:[%s22719_s10 + $0xf0] sm:$0xff] %vm5094_vm5, %v5077_v55  ;;  %v5075_v56 = vpop.permute.xlu0 %5074 }
 0xcaf   : > { %5109 = vst.msk [vmem:[%s22719_s10 + $0xe0] sm:$0xff] %vm5094_vm5, %v5075_v56  ;;  %v24005_v56 = vld [vmem:[%s26647_s1 + $0x78] sm:$0xff] }
 0xd16   : > { %v17536_v58 = vpop.f32.mrb[176].mxu0 }
 0xd17   : > { %v5574_v60 = vpop.f32.mrb[177].mxu0 }
 0xd18   : > { %v20334_v61 = vpack.c.bf16 %v17536_v58, %v5574_v60  ;;  %v24011_v58 = vld [vmem:[%s26647_s1] sm:$0xff] }
 0xd19   : > { %v13909_v60 = vld [vmem:[%s26650_s4 + $0x180] sm:$0xff] }
 0xd1a   : > { %v17539_v63 = vpop.f32.mrb[178].mxu0  ;;  %20335 = vmatprep.subr.bf16.mxu1 %v20334_v61 }
 0xd1b   : > { %v5584_v31 = vpop.f32.mrb[179].mxu0  ;;  %20337 = vmatpush3.bf16.msra.mxu1 %v20334_v61  ;;  %v13910_v61 = vld [vmem:[%s26650_s4 + $0x188] sm:$0xff] }
 0xd1c   : > { %v20338_v1 = vpack.c.bf16 %v17539_v63, %v5584_v31  ;;  %v20430_v63 = vpack.c.bf16 %v13910_v61, %v13909_v60  ;;  %v13911_v31 = vld [vmem:[%s26650_s4 + $0x190] sm:$0xff]  ;;  %v24098_v61 = vld [vmem:[%s26649_s3] ss:$0 sm:$0xff] }
 0xd1e   : > { %v17542_v3 = vpop.f32.mrb[180].mxu0  ;;  %20339 = vmatprep.subr.bf16.mxu1 %v20338_v1  ;;  %20431 = vmatprep.subr.bf16.mxu0 %v20430_v63 }
 0xd1f   : > { %v5594_v5 = vpop.f32.mrb[181].mxu0  ;;  %20341 = vmatpush3.bf16.msra.mxu1 %v20338_v1  ;;  %20433 = vmatpush3.bf16.msra.mxu0 %v20430_v63  ;;  %v13912_v1 = vld [vmem:[%s26650_s4 + $0x198] sm:$0xff] }
 0xd20   : > { %v20342_v53 = vpack.c.bf16 %v17542_v3, %v5594_v5  ;;  %v20434_v3 = vpack.c.bf16 %v13912_v1, %v13911_v31  ;;  %v13913_v5 = vld [vmem:[%s26650_s4 + $0x1a0] sm:$0xff] }
 0xd22   : > { %v17545_v6 = vpop.f32.mrb[182].mxu0  ;;  %20343 = vmatprep.subr.bf16.mxu1 %v20342_v53  ;;  %20435 = vmatprep.subr.bf16.mxu0 %v20434_v3 }
 0xd23   : > { %v5604_v15 = vpop.f32.mrb[183].mxu0  ;;  %20345 = vmatpush3.bf16.msra.mxu1 %v20342_v53  ;;  %20437 = vmatpush3.bf16.msra.mxu0 %v20434_v3  ;;  %v13914_v53 = vld [vmem:[%s26650_s4 + $0x1a8] sm:$0xff]  ;;  %v13951_v3 = vld [vmem:[%s26648_s2 + $0x390] sm:$0xff] }
 0xd24   : > { %v20346_v16 = vpack.c.bf16 %v17545_v6, %v5604_v15  ;;  %v20438_v6 = vpack.c.bf16 %v13914_v53, %v13913_v5  ;;  %v13915_v15 = vld [vmem:[%s26650_s4 + $0x1b0] sm:$0xff] }
 0xd26   : > { %v17548_v20 = vpop.f32.mrb[184].mxu0  ;;  %20347 = vmatprep.subr.bf16.mxu1 %v20346_v16  ;;  %20439 = vmatprep.subr.bf16.mxu0 %v20438_v6 }
 0xd27   : > { %v5614_v22 = vpop.f32.mrb[185].mxu0  ;;  %20349 = vmatpush3.bf16.msra.mxu1 %v20346_v16  ;;  %20441 = vmatpush3.bf16.msra.mxu0 %v20438_v6  ;;  %v13916_v16 = vld [vmem:[%s26650_s4 + $0x1b8] sm:$0xff] }
 0xd28   : > { %v20350_v23 = vpack.c.bf16 %v17548_v20, %v5614_v22  ;;  %v20442_v20 = vpack.c.bf16 %v13916_v16, %v13915_v15  ;;  %v13949_v22 = vld [vmem:[%s26648_s2 + $0x380] sm:$0xff] }
 0xd2a   : > { %v17551_v25 = vpop.f32.mrb[186].mxu0  ;;  %20351 = vmatprep.subr.bf16.mxu1 %v20350_v23  ;;  %20443 = vmatprep.subr.bf16.mxu0 %v20442_v20 }
 0xd2b   : > { %v5624_v27 = vpop.f32.mrb[187].mxu0  ;;  %20353 = vmatpush3.bf16.msra.mxu1 %v20350_v23  ;;  %20445 = vmatpush3.bf16.msra.mxu0 %v20442_v20  ;;  %v13950_v23 = vld [vmem:[%s26648_s2 + $0x388] sm:$0xff] }
 0xd2c   : > { %v20354_v8 = vpack.c.bf16 %v17551_v25, %v5624_v27  ;;  %v24060_v25 = vpack.c.bf16 %v13950_v23, %v13949_v22  ;;  %v13953_v23 = vld [vmem:[%s26648_s2 + $0x3a0] sm:$0xff] }
 0xd2e   : > { %v17554_v47 = vpop.f32.mrb[188].mxu0  ;;  %20355 = vmatprep.subr.bf16.mxu1 %v20354_v8  ;;  %20479 = vmatprep.subr.bf16.mxu0 %v24060_v25 }
 0xd2f   : > { %v5634_v52 = vpop.f32.mrb[189].mxu0  ;;  %20357 = vmatpush3.bf16.msra.mxu1 %v20354_v8 }
 0xd30   : > { %v20358_v54 = vpack.c.bf16 %v17554_v47, %v5634_v52 }
 0xd32   : > { %v17557_v59 = vpop.f32.mrb[190].mxu0  ;;  %20359 = vmatprep.subr.bf16.mxu1 %v20358_v54 }
 0xd33   : > { %v5644_v0 = vpop.f32.mrb[191].mxu0  ;;  %20361 = vmatpush3.bf16.msra.mxu1 %v20358_v54 }
 0xd34   : > { %v20362_v2 = vpack.c.bf16 %v17557_v59, %v5644_v0 }
 0xd36   : > { %20363 = vmatprep.subr.bf16.mxu1 %v20362_v2  ;;  %v17648_v7 = vpop.f32.mrb[192].mxu0 }
 0xd37   : > { %20365 = vmatpush3.bf16.msra.mxu1 %v20362_v2  ;;  %v5979_v17 = vpop.f32.mrb[193].mxu0 }
 0xd38   : > { %v20398_v18 = vpack.c.bf16 %v17648_v7, %v5979_v17 }
 0xd3a   : > { %17591 = vmatmul.mubr.f32.vlgmr.msra.gmra.mrb[176].mxu1 %v23921_v10  ;;  %v17651_v12 = vpop.f32.mrb[194].mxu0  ;;  %20399 = vmatprep.subr.bf16.mxu1 %v20398_v18 }
 0xd3b   : > { %v5989_v28 = vpop.f32.mrb[195].mxu0  ;;  %20401 = vmatpush3.bf16.msra.mxu1 %v20398_v18  ;;  %17593 = vmatprep.mubr.f32.mxu1 %v23927_v32 }
 0xd3c   : > { %v20402_v35 = vpack.c.bf16 %v17651_v12, %v5989_v28 }
 0xd3e   : > { %17594 = vmatmul.mubr.f32.gmra.mrb[178].mxu1 %v23933_v36  ;;  %v17654_v37 = vpop.f32.mrb[196].mxu0  ;;  %20403 = vmatprep.subr.bf16.mxu1 %v20402_v35 }
 0xd3f   : > { %v5999_v38 = vpop.f32.mrb[197].mxu0  ;;  %20405 = vmatpush3.bf16.msra.mxu1 %v20402_v35  ;;  %17596 = vmatprep.mubr.f32.mxu1 %v23939_v39 }
 0xd40   : > { %v20406_v41 = vpack.c.bf16 %v17654_v37, %v5999_v38 }
 0xd42   : > { %17597 = vmatmul.mubr.f32.gmra.mrb[180].mxu1 %v23945_v9  ;;  %v17657_v42 = vpop.f32.mrb[198].mxu0  ;;  %20407 = vmatprep.subr.bf16.mxu1 %v20406_v41 }
 0xd43   : > { %v6009_v30 = vpop.f32.mrb[199].mxu0  ;;  %20409 = vmatpush3.bf16.msra.mxu1 %v20406_v41  ;;  %17599 = vmatprep.mubr.f32.mxu1 %v23951_v13 }
 0xd44   : > { %v20410_v40 = vpack.c.bf16 %v17657_v42, %v6009_v30 }
 0xd46   : > { %17600 = vmatmul.mubr.f32.gmra.mrb[182].mxu1 %v23957_v21  ;;  %v17660_v24 = vpop.f32.mrb[200].mxu0  ;;  %20411 = vmatprep.subr.bf16.mxu1 %v20410_v40 }
 0xd47   : > { %v6019_v26 = vpop.f32.mrb[201].mxu0  ;;  %20413 = vmatpush3.bf16.msra.mxu1 %v20410_v40  ;;  %17602 = vmatprep.mubr.f32.mxu1 %v23963_v44 }
 0xd48   : > { %v20414_v49 = vpack.c.bf16 %v17660_v24, %v6019_v26 }
 0xd4a   : > { %17603 = vmatmul.mubr.f32.gmra.mrb[184].mxu1 %v23969_v57  ;;  %v17663_v62 = vpop.f32.mrb[202].mxu0  ;;  %20415 = vmatprep.subr.bf16.mxu1 %v20414_v49 }
 0xd4b   : > { %v6029_v4 = vpop.f32.mrb[203].mxu0  ;;  %20417 = vmatpush3.bf16.msra.mxu1 %v20414_v49  ;;  %17605 = vmatprep.mubr.f32.mxu1 %v23975_v14 }
 0xd4c   : > { %v20418_v19 = vpack.c.bf16 %v17663_v62, %v6029_v4 }
 0xd4e   : > { %17606 = vmatmul.mubr.f32.gmra.mrb[186].mxu1 %v23981_v11  ;;  %v17666_v29 = vpop.f32.mrb[204].mxu0  ;;  %20419 = vmatprep.subr.bf16.mxu1 %v20418_v19 }
 0xd4f   : > { %v6039_v33 = vpop.f32.mrb[205].mxu0  ;;  %20421 = vmatpush3.bf16.msra.mxu1 %v20418_v19  ;;  %17608 = vmatprep.mubr.f32.mxu1 %v23987_v34 }
 0xd50   : > { %v20422_v45 = vpack.c.bf16 %v17666_v29, %v6039_v33 }
 0xd52   : > { %17609 = vmatmul.mubr.f32.gmra.mrb[188].mxu1 %v23993_v46  ;;  %v17669_v48 = vpop.f32.mrb[206].mxu0  ;;  %20423 = vmatprep.subr.bf16.mxu1 %v20422_v45 }
 0xd53   : > { %v6049_v50 = vpop.f32.mrb[207].mxu0  ;;  %20425 = vmatpush3.bf16.msra.mxu1 %v20422_v45  ;;  %17611 = vmatprep.mubr.f32.mxu1 %v23999_v51 }
 0xd54   : > { %v20426_v55 = vpack.c.bf16 %v17669_v48, %v6049_v50 }
 0xd56   : > { %17612 = vmatmul.mubr.f32.gmra.mrb[190].mxu1 %v24005_v56  ;;  %20427 = vmatprep.subr.bf16.mxu1 %v20426_v55 }
 0xd57   : > { %20429 = vmatpush3.bf16.msra.mxu1 %v20426_v55  ;;  %17702 = vmatprep.mubr.f32.mxu1 %v24011_v58 }
 0xd5a   : > { %17703 = vmatmul.mubr.f32.vlgmr.msra.gmra.mrb[192].mxu1 %v23921_v10 }
 0xd5b   : > { %17705 = vmatprep.mubr.f32.mxu1 %v23927_v32 }
 0xd5e   : > { %17706 = vmatmul.mubr.f32.gmra.mrb[194].mxu1 %v23933_v36 }
 0xd5f   : > { %17708 = vmatprep.mubr.f32.mxu1 %v23939_v39 }
 0xd62   : > { %17709 = vmatmul.mubr.f32.gmra.mrb[196].mxu1 %v23945_v9 }
 0xd63   : > { %17711 = vmatprep.mubr.f32.mxu1 %v23951_v13 }
 0xd66   : > { %17712 = vmatmul.mubr.f32.gmra.mrb[198].mxu1 %v23957_v21 }
 0xd67   : > { %17714 = vmatprep.mubr.f32.mxu1 %v23963_v44 }
 0xd6a   : > { %17715 = vmatmul.mubr.f32.gmra.mrb[200].mxu1 %v23969_v57 }
 0xd6b   : > { %17717 = vmatprep.mubr.f32.mxu1 %v23975_v14 }
 0xd6e   : > { %17718 = vmatmul.mubr.f32.gmra.mrb[202].mxu1 %v23981_v11 }
 0xd6f   : > { %17720 = vmatprep.mubr.f32.mxu1 %v23987_v34 }
 0xd72   : > { %17721 = vmatmul.mubr.f32.gmra.mrb[204].mxu1 %v23993_v46 }
 0xd73   : > { %17723 = vmatprep.mubr.f32.mxu1 %v23999_v51 }
 0xd76   : > { %17724 = vmatmul.mubr.f32.gmra.mrb[206].mxu1 %v24005_v56 }
 0xd77   : > { %17798 = vmatprep.mubr.f32.mxu1 %v24011_v58 }
 0xe0d   : > { %v17592_v27 = vpop.f32.mrb[176].mxu1 }
 0xe0e   : > { %v5725_v8 = vadd.f32 %v23761_v43, %v17592_v27  ;;  %v5719_v47 = vpop.f32.mrb[177].mxu1  ;;  %v13954_v27 = vld [vmem:[%s26648_s2 + $0x3a8] sm:$0xff] }
 0xe0f   : > { %v5720_v52 = vadd.f32 %v23761_v43, %v5719_v47 }
 0xe10   : > { %5816 = vrot.lane.b32.xlu1 %v5725_v8, %s21742_s16 }
 0xe11   : > { %v17595_v54 = vpop.f32.mrb[178].mxu1  ;;  %5814 = vrot.lane.b32.xlu0 %v5720_v52, %s21742_s16 }
 0xe12   : > { %v5735_v59 = vadd.f32 %v23761_v43, %v17595_v54  ;;  %v5729_v0 = vpop.f32.mrb[179].mxu1 }
 0xe13   : > { %v5730_v2 = vadd.f32 %v23761_v43, %v5729_v0  ;;  %v20486_v0 = vpack.c.bf16 %v13954_v27, %v13953_v23 }
 0xe14   : > { %5820 = vrot.lane.b32.xlu1 %v5735_v59, %s21742_s16 }
 0xe15   : > { %v17598_v7 = vpop.f32.mrb[180].mxu1  ;;  %5818 = vrot.lane.b32.xlu0 %v5730_v2, %s21742_s16 }
 0xe16   : > { %v5745_v17 = vadd.f32 %v23761_v43, %v17598_v7  ;;  %v5739_v18 = vpop.f32.mrb[181].mxu1  ;;  %v13955_v7 = vld [vmem:[%s26648_s2 + $0x3b0] sm:$0xff] }
 0xe17   : > { %v5740_v12 = vadd.f32 %v23761_v43, %v5739_v18 }
 0xe18   : > { %5824 = vrot.lane.b32.xlu1 %v5745_v17, %s21742_s16  ;;  %v13956_v17 = vld [vmem:[%s26648_s2 + $0x3b8] sm:$0xff] }
 0xe19   : > { %v17601_v28 = vpop.f32.mrb[182].mxu1  ;;  %5822 = vrot.lane.b32.xlu0 %v5740_v12, %s21742_s16 }
 0xe1a   : > { %v5755_v35 = vadd.f32 %v23761_v43, %v17601_v28  ;;  %v5749_v37 = vpop.f32.mrb[183].mxu1 }
 0xe1b   : > { %v5750_v38 = vadd.f32 %v23761_v43, %v5749_v37  ;;  %v20490_v37 = vpack.c.bf16 %v13956_v17, %v13955_v7  ;;  %v13933_v7 = vld [vmem:[%s22376_s15 + $0x380] sm:$0xff]  ;;  %v13934_v17 = vld [vmem:[%s22376_s15 + $0x388] sm:$0xff] }
 0xe1c   : > { %5828 = vrot.lane.b32.xlu1 %v5755_v35, %s21742_s16 }
 0xe1d   : > { %v17604_v41 = vpop.f32.mrb[184].mxu1  ;;  %5826 = vrot.lane.b32.xlu0 %v5750_v38, %s21742_s16 }
 0xe1e   : > { %v5765_v42 = vadd.f32 %v23761_v43, %v17604_v41  ;;  %v5759_v30 = vpop.f32.mrb[185].mxu1  ;;  %v13957_v41 = vld [vmem:[%s26648_s2 + $0x3c0] sm:$0xff] }
 0xe1f   : > { %v5760_v40 = vadd.f32 %v23761_v43, %v5759_v30 }
 0xe20   : > { %5832 = vrot.lane.b32.xlu1 %v5765_v42, %s21742_s16  ;;  %v13958_v42 = vld [vmem:[%s26648_s2 + $0x3c8] sm:$0xff] }
 0xe21   : > { %v17607_v24 = vpop.f32.mrb[186].mxu1  ;;  %5830 = vrot.lane.b32.xlu0 %v5760_v40, %s21742_s16 }
 0xe22   : > { %v5775_v26 = vadd.f32 %v23761_v43, %v17607_v24  ;;  %v5769_v49 = vpop.f32.mrb[187].mxu1 }
 0xe23   : > { %v5770_v62 = vadd.f32 %v23761_v43, %v5769_v49 }
 0xe24   : > { %5836 = vrot.lane.b32.xlu1 %v5775_v26, %s21742_s16 }
 0xe25   : > { %v17610_v4 = vpop.f32.mrb[188].mxu1  ;;  %5834 = vrot.lane.b32.xlu0 %v5770_v62, %s21742_s16  ;;  %v20494_v62 = vpack.c.bf16 %v13958_v42, %v13957_v41  ;;  %v13942_v41 = vld [vmem:[%s22376_s15 + $0x3c8] sm:$0xff]  ;;  %v13943_v42 = vld [vmem:[%s22376_s15 + $0x3d0] sm:$0xff] }
 0xe26   : > { %v5785_v19 = vadd.f32 %v23761_v43, %v17610_v4  ;;  %v5779_v29 = vpop.f32.mrb[189].mxu1 }
 0xe27   : > { %v5780_v33 = vadd.f32 %v23761_v43, %v5779_v29  ;;  %v13960_v29 = vld [vmem:[%s26648_s2 + $0x3d8] sm:$0xff] }
 0xe28   : > { %5840 = vrot.lane.b32.xlu1 %v5785_v19, %s21742_s16  ;;  %v13959_v19 = vld [vmem:[%s26648_s2 + $0x3d0] sm:$0xff] }
 0xe29   : > { %v17613_v45 = vpop.f32.mrb[190].mxu1  ;;  %5838 = vrot.lane.b32.xlu0 %v5780_v33, %s21742_s16 }
 0xe2a   : > { %v5795_v48 = vadd.f32 %v23761_v43, %v17613_v45  ;;  %v5789_v50 = vpop.f32.mrb[191].mxu1 }
 0xe2b   : > { %v5790_v55 = vadd.f32 %v23761_v43, %v5789_v50  ;;  %v13952_v43 = vld [vmem:[%s26648_s2 + $0x398] sm:$0xff] }
 0xe2c   : > { %5844 = vrot.lane.b32.xlu1 %v5795_v48, %s21742_s16  ;;  %v20482_v20 = vpack.c.bf16 %v13952_v43, %v13951_v3 }
 0xe2d   : > { %v17704_v60 = vpop.f32.mrb[192].mxu1  ;;  %5842 = vrot.lane.b32.xlu0 %v5790_v55, %s21742_s16 }
 0xe2e   : > { %v6130_v63 = vadd.f32 %v24098_v61, %v17704_v60  ;;  %v6124_v31 = vpop.f32.mrb[193].mxu1  ;;  %v20498_v60 = vpack.c.bf16 %v13960_v29, %v13959_v19 }
 0xe2f   : > { %v6125_v1 = vadd.f32 %v24098_v61, %v6124_v31  ;;  %v13961_v31 = vld [vmem:[%s26648_s2 + $0x3e0] sm:$0xff] }
 0xe30   : > { %v6204_v6 = vmax.f32 %v6130_v63, 0.0 }
 0xe31   : > { %v6203_v5 = vmax.f32 %v6125_v1, 0.0  ;;  %v17707_v53 = vpop.f32.mrb[194].mxu1  ;;  %v13962_v1 = vld [vmem:[%s26648_s2 + $0x3e8] sm:$0xff] }
 0xe32   : > { %v6140_v15 = vadd.f32 %v24098_v61, %v17707_v53  ;;  %v6134_v16 = vpop.f32.mrb[195].mxu1 }
 0xe33   : > { %v6135_v22 = vadd.f32 %v24098_v61, %v6134_v16  ;;  %17742 = vmatprep.mubr.msk.f32.mxu0 %vm1677_vm0, %v6203_v5 }
 0xe34   : > { %17743 = vmatmul.mubr.msk.f32.vlgmr.msra.gmra.mrb[208].mxu0 %vm1677_vm0, %v6204_v6  ;;  %v6206_v52 = vmax.f32 %v6140_v15, 0.0  ;;  %v20502_v15 = vpack.c.bf16 %v13962_v1, %v13961_v31 }
 0xe35   : > { %v6205_v8 = vmax.f32 %v6135_v22, 0.0  ;;  %v17710_v47 = vpop.f32.mrb[196].mxu1  ;;  %20481 = vmatpush3.bf16.msra.mxu0 %v24060_v25  ;;  %v13964_v22 = vld [vmem:[%s26648_s2 + $0x3f8] sm:$0xff] }
 0xe36   : > { %v6150_v54 = vadd.f32 %v24098_v61, %v17710_v47  ;;  %v6144_v59 = vpop.f32.mrb[197].mxu1  ;;  %20483 = vmatprep.subr.bf16.mxu0 %v20482_v20 }
 0xe37   : > { %v6145_v2 = vadd.f32 %v24098_v61, %v6144_v59  ;;  %17745 = vmatprep.mubr.msk.f32.mxu0 %vm1677_vm0, %v6205_v8 }
 0xe38   : > { %17746 = vmatmul.mubr.msk.f32.gmra.mrb[210].mxu0 %vm1677_vm0, %v6206_v52  ;;  %v6208_v12 = vmax.f32 %v6150_v54, 0.0 }
 0xe39   : > { %v6207_v25 = vmax.f32 %v6145_v2, 0.0  ;;  %v17713_v18 = vpop.f32.mrb[198].mxu1  ;;  %20485 = vmatpush3.bf16.msra.mxu0 %v20482_v20  ;;  %v13963_v20 = vld [vmem:[%s26648_s2 + $0x3f0] sm:$0xff] }
 0xe3a   : > { %v6160_v28 = vadd.f32 %v24098_v61, %v17713_v18  ;;  %v6154_v35 = vpop.f32.mrb[199].mxu1  ;;  %20487 = vmatprep.subr.bf16.mxu0 %v20486_v0  ;;  %v20506_v54 = vpack.c.bf16 %v13964_v22, %v13963_v20  ;;  %v13936_v18 = vld [vmem:[%s22376_s15 + $0x398] sm:$0xff] }
 0xe3b   : > { %v6155_v38 = vadd.f32 %v24098_v61, %v6154_v35  ;;  %17748 = vmatprep.mubr.msk.f32.mxu0 %vm1677_vm0, %v6207_v25  ;;  %v13935_v25 = vld [vmem:[%s22376_s15 + $0x390] sm:$0xff] }
 0xe3c   : > { %17749 = vmatmul.mubr.msk.f32.gmra.mrb[212].mxu0 %vm1677_vm0, %v6208_v12  ;;  %v6210_v24 = vmax.f32 %v6160_v28, 0.0  ;;  %v13937_v12 = vld [vmem:[%s22376_s15 + $0x3a0] sm:$0xff]  ;;  %v13938_v28 = vld [vmem:[%s22376_s15 + $0x3a8] sm:$0xff]  ;;  %v13939_v35 = vld [vmem:[%s22376_s15 + $0x3b0] sm:$0xff] }
 0xe3d   : > { %v6209_v30 = vmax.f32 %v6155_v38, 0.0  ;;  %v17716_v40 = vpop.f32.mrb[200].mxu1  ;;  %20489 = vmatpush3.bf16.msra.mxu0 %v20486_v0  ;;  %v13941_v38 = vld [vmem:[%s22376_s15 + $0x3c0] sm:$0xff] }
 0xe3e   : > { %v6170_v26 = vadd.f32 %v24098_v61, %v17716_v40  ;;  %v6164_v49 = vpop.f32.mrb[201].mxu1  ;;  %20491 = vmatprep.subr.bf16.mxu0 %v20490_v37  ;;  %v13945_v40 = vld [vmem:[%s22376_s15 + $0x3e0] sm:$0xff] }
 0xe3f   : > { %v6165_v4 = vadd.f32 %v24098_v61, %v6164_v49  ;;  %17751 = vmatprep.mubr.msk.f32.mxu0 %vm1677_vm0, %v6209_v30  ;;  %v13944_v30 = vld [vmem:[%s22376_s15 + $0x3d8] sm:$0xff] }
 0xe40   : > { %17752 = vmatmul.mubr.msk.f32.gmra.mrb[214].mxu0 %vm1677_vm0, %v6210_v24  ;;  %v6212_v48 = vmax.f32 %v6170_v26, 0.0  ;;  %v13946_v24 = vld [vmem:[%s22376_s15 + $0x3e8] sm:$0xff]  ;;  %v13947_v26 = vld [vmem:[%s22376_s15 + $0x3f0] sm:$0xff]  ;;  %v13948_v49 = vld [vmem:[%s22376_s15 + $0x3f8] sm:$0xff] }
 0xe41   : > { %v6211_v33 = vmax.f32 %v6165_v4, 0.0  ;;  %v17719_v45 = vpop.f32.mrb[202].mxu1  ;;  %20493 = vmatpush3.bf16.msra.mxu0 %v20490_v37  ;;  %v13940_v37 = vld [vmem:[%s22376_s15 + $0x3b8] sm:$0xff] }
 0xe42   : > { %v6180_v50 = vadd.f32 %v24098_v61, %v17719_v45  ;;  %v6174_v55 = vpop.f32.mrb[203].mxu1  ;;  %20495 = vmatprep.subr.bf16.mxu0 %v20494_v62 }
 0xe43   : > { %v6175_v63 = vadd.f32 %v24098_v61, %v6174_v55  ;;  %17754 = vmatprep.mubr.msk.f32.mxu0 %vm1677_vm0, %v6211_v33 }
 0xe44   : > { %17755 = vmatmul.mubr.msk.f32.gmra.mrb[216].mxu0 %vm1677_vm0, %v6212_v48  ;;  %v6214_v5 = vmax.f32 %v6180_v50, 0.0 }
 0xe45   : > { %v6213_v3 = vmax.f32 %v6175_v63, 0.0  ;;  %v17722_v43 = vpop.f32.mrb[204].mxu1  ;;  %20497 = vmatpush3.bf16.msra.mxu0 %v20494_v62 }
 0xe46   : > { %v6190_v53 = vadd.f32 %v24098_v61, %v17722_v43  ;;  %v6184_v6 = vpop.f32.mrb[205].mxu1  ;;  %20499 = vmatprep.subr.bf16.mxu0 %v20498_v60 }
 0xe47   : > { %v6185_v16 = vadd.f32 %v24098_v61, %v6184_v6  ;;  %17757 = vmatprep.mubr.msk.f32.mxu0 %vm1677_vm0, %v6213_v3 }
 0xe48   : > { %17758 = vmatmul.mubr.msk.f32.gmra.mrb[218].mxu0 %vm1677_vm0, %v6214_v5  ;;  %v6216_v8 = vmax.f32 %v6190_v53, 0.0 }
 0xe49   : > { %v6215_v23 = vmax.f32 %v6185_v16, 0.0  ;;  %v17725_v27 = vpop.f32.mrb[206].mxu1  ;;  %20501 = vmatpush3.bf16.msra.mxu0 %v20498_v60 }
 0xe4a   : > { %v6200_v47 = vadd.f32 %v24098_v61, %v17725_v27  ;;  %v6194_v52 = vpop.f32.mrb[207].mxu1  ;;  %20503 = vmatprep.subr.bf16.mxu0 %v20502_v15 }
 0xe4b   : > { %v6195_v59 = vadd.f32 %v24098_v61, %v6194_v52  ;;  %17760 = vmatprep.mubr.msk.f32.mxu0 %vm1677_vm0, %v6215_v23 }
 0xe4c   : > { %17761 = vmatmul.mubr.msk.f32.gmra.mrb[220].mxu0 %vm1677_vm0, %v6216_v8  ;;  %v6218_v2 = vmax.f32 %v6200_v47, 0.0 }
 0xe4d   : > { %v6217_v0 = vmax.f32 %v6195_v59, 0.0  ;;  %20505 = vmatpush3.bf16.msra.mxu0 %v20502_v15 }
 0xe4e   : > { %20507 = vmatprep.subr.bf16.mxu0 %v20506_v54 }
 0xe4f   : > { %17763 = vmatprep.mubr.msk.f32.mxu0 %vm1677_vm0, %v6217_v0 }
 0xe50   : > { %17764 = vmatmul.mubr.msk.f32.gmra.mrb[222].mxu0 %vm1677_vm0, %v6218_v2 }
 0xe51   : > { %20509 = vmatpush3.bf16.msra.mxu0 %v20506_v54  ;;  %17854 = vmatprep.mubr.f32.mxu0 %v13933_v7 }
 0xe54   : > { %17855 = vmatmul.mubr.f32.vlgmr.msra.gmra.mrb[224].mxu0 %v13934_v17 }
 0xe55   : > { %17857 = vmatprep.mubr.f32.mxu0 %v13935_v25 }
 0xe58   : > { %17858 = vmatmul.mubr.f32.gmra.mrb[226].mxu0 %v13936_v18 }
 0xe59   : > { %17860 = vmatprep.mubr.f32.mxu0 %v13937_v12 }
 0xe5c   : > { %17861 = vmatmul.mubr.f32.gmra.mrb[228].mxu0 %v13938_v28 }
 0xe5d   : > { %17863 = vmatprep.mubr.f32.mxu0 %v13939_v35 }
 0xe60   : > { %17864 = vmatmul.mubr.f32.gmra.mrb[230].mxu0 %v13940_v37 }
 0xe61   : > { %17866 = vmatprep.mubr.f32.mxu0 %v13941_v38 }
 0xe64   : > { %17867 = vmatmul.mubr.f32.gmra.mrb[232].mxu0 %v13942_v41 }
 0xe65   : > { %17869 = vmatprep.mubr.f32.mxu0 %v13943_v42 }
 0xe68   : > { %17870 = vmatmul.mubr.f32.gmra.mrb[234].mxu0 %v13944_v30 }
 0xe69   : > { %17872 = vmatprep.mubr.f32.mxu0 %v13945_v40 }
 0xe6c   : > { %17873 = vmatmul.mubr.f32.gmra.mrb[236].mxu0 %v13946_v24 }
 0xe6d   : > { %17875 = vmatprep.mubr.f32.mxu0 %v13947_v26 }
 0xe70   : > { %17876 = vmatmul.mubr.f32.gmra.mrb[238].mxu0 %v13948_v49 }
 0xe82   : > { %v5817_v62 = vpop.permute.xlu1 %5816 }
 0xe83   : > { %5864 = vst.msk [vmem:[%s22719_s10 + $0x10] sm:$0xff] %vm5862_vm6, %v5817_v62  ;;  %v5815_v4 = vpop.permute.xlu0 %5814 }
 0xe84   : > { %5863 = vst.msk [vmem:[%s22719_s10] sm:$0xff] %vm5862_vm6, %v5815_v4 }
 0xe86   : > { %v5821_v19 = vpop.permute.xlu1 %5820 }
 0xe87   : > { %5866 = vst.msk [vmem:[%s22719_s10 + $0x30] sm:$0xff] %vm5862_vm6, %v5821_v19  ;;  %v5819_v29 = vpop.permute.xlu0 %5818 }
 0xe88   : > { %5865 = vst.msk [vmem:[%s22719_s10 + $0x20] sm:$0xff] %vm5862_vm6, %v5819_v29 }
 0xe8a   : > { %v5825_v33 = vpop.permute.xlu1 %5824 }
 0xe8b   : > { %5868 = vst.msk [vmem:[%s22719_s10 + $0x50] sm:$0xff] %vm5862_vm6, %v5825_v33  ;;  %v5823_v45 = vpop.permute.xlu0 %5822 }
 0xe8c   : > { %5867 = vst.msk [vmem:[%s22719_s10 + $0x40] sm:$0xff] %vm5862_vm6, %v5823_v45 }
 0xe8e   : > { %v5829_v48 = vpop.permute.xlu1 %5828 }
 0xe8f   : > { %5870 = vst.msk [vmem:[%s22719_s10 + $0x70] sm:$0xff] %vm5862_vm6, %v5829_v48  ;;  %v5827_v50 = vpop.permute.xlu0 %5826 }
 0xe90   : > { %5869 = vst.msk [vmem:[%s22719_s10 + $0x60] sm:$0xff] %vm5862_vm6, %v5827_v50 }
 0xe92   : > { %v5833_v55 = vpop.permute.xlu1 %5832 }
 0xe93   : > { %5872 = vst.msk [vmem:[%s22719_s10 + $0x90] sm:$0xff] %vm5862_vm6, %v5833_v55  ;;  %v5831_v60 = vpop.permute.xlu0 %5830 }
 0xe94   : > { %5871 = vst.msk [vmem:[%s22719_s10 + $0x80] sm:$0xff] %vm5862_vm6, %v5831_v60 }
 0xe96   : > { %v5837_v63 = vpop.permute.xlu1 %5836 }
 0xe97   : > { %5874 = vst.msk [vmem:[%s22719_s10 + $0xb0] sm:$0xff] %vm5862_vm6, %v5837_v63  ;;  %v5835_v31 = vpop.permute.xlu0 %5834 }
 0xe98   : > { %5873 = vst.msk [vmem:[%s22719_s10 + $0xa0] sm:$0xff] %vm5862_vm6, %v5835_v31 }
 0xe9a   : > { %v5841_v1 = vpop.permute.xlu1 %5840 }
 0xe9b   : > { %5876 = vst.msk [vmem:[%s22719_s10 + $0xd0] sm:$0xff] %vm5862_vm6, %v5841_v1  ;;  %v5839_v3 = vpop.permute.xlu0 %5838 }
 0xe9c   : > { %5875 = vst.msk [vmem:[%s22719_s10 + $0xc0] sm:$0xff] %vm5862_vm6, %v5839_v3 }
 0xe9e   : > { %v5845_v43 = vpop.permute.xlu1 %5844 }
 0xe9f   : > { %5878 = vst.msk [vmem:[%s22719_s10 + $0xf0] sm:$0xff] %vm5862_vm6, %v5845_v43  ;;  %v5843_v5 = vpop.permute.xlu0 %5842 }
 0xea0   : > { %5877 = vst.msk [vmem:[%s22719_s10 + $0xe0] sm:$0xff] %vm5862_vm6, %v5843_v5 }
 0xf07   : > { %v17744_v53 = vpop.f32.mrb[208].mxu0 }
 0xf08   : > { %v6342_v6 = vpop.f32.mrb[209].mxu0 }
 0xf09   : > { %v20446_v15 = vpack.c.bf16 %v17744_v53, %v6342_v6  ;;  %v24291_v6 = vld [vmem:[%s26651_s5] ss:$0 sm:$0xff] }
 0xf0b   : > { %v17747_v16 = vpop.f32.mrb[210].mxu0  ;;  %20447 = vmatprep.subr.bf16.mxu1 %v20446_v15 }
 0xf0c   : > { %v6352_v20 = vpop.f32.mrb[211].mxu0  ;;  %20449 = vmatpush3.bf16.msra.mxu1 %v20446_v15 }
 0xf0d   : > { %v20450_v22 = vpack.c.bf16 %v17747_v16, %v6352_v20 }
 0xf0f   : > { %v17750_v23 = vpop.f32.mrb[212].mxu0  ;;  %20451 = vmatprep.subr.bf16.mxu1 %v20450_v22 }
 0xf10   : > { %v6362_v27 = vpop.f32.mrb[213].mxu0  ;;  %20453 = vmatpush3.bf16.msra.mxu1 %v20450_v22 }
 0xf11   : > { %v20454_v8 = vpack.c.bf16 %v17750_v23, %v6362_v27 }
 0xf13   : > { %v17753_v47 = vpop.f32.mrb[214].mxu0  ;;  %20455 = vmatprep.subr.bf16.mxu1 %v20454_v8 }
 0xf14   : > { %v6372_v52 = vpop.f32.mrb[215].mxu0  ;;  %20457 = vmatpush3.bf16.msra.mxu1 %v20454_v8 }
 0xf15   : > { %v20458_v54 = vpack.c.bf16 %v17753_v47, %v6372_v52 }
 0xf17   : > { %v17756_v59 = vpop.f32.mrb[216].mxu0  ;;  %20459 = vmatprep.subr.bf16.mxu1 %v20458_v54 }
 0xf18   : > { %v6382_v0 = vpop.f32.mrb[217].mxu0  ;;  %20461 = vmatpush3.bf16.msra.mxu1 %v20458_v54 }
 0xf19   : > { %v20462_v2 = vpack.c.bf16 %v17756_v59, %v6382_v0 }
 0xf1b   : > { %v17759_v7 = vpop.f32.mrb[218].mxu0  ;;  %20463 = vmatprep.subr.bf16.mxu1 %v20462_v2 }
 0xf1c   : > { %v6392_v17 = vpop.f32.mrb[219].mxu0  ;;  %20465 = vmatpush3.bf16.msra.mxu1 %v20462_v2 }
 0xf1d   : > { %v20466_v25 = vpack.c.bf16 %v17759_v7, %v6392_v17 }
 0xf1f   : > { %v17762_v18 = vpop.f32.mrb[220].mxu0  ;;  %20467 = vmatprep.subr.bf16.mxu1 %v20466_v25 }
 0xf20   : > { %v6402_v12 = vpop.f32.mrb[221].mxu0  ;;  %20469 = vmatpush3.bf16.msra.mxu1 %v20466_v25 }
 0xf21   : > { %v20470_v28 = vpack.c.bf16 %v17762_v18, %v6402_v12 }
 0xf23   : > { %v17765_v35 = vpop.f32.mrb[222].mxu0  ;;  %20471 = vmatprep.subr.bf16.mxu1 %v20470_v28 }
 0xf24   : > { %v6412_v37 = vpop.f32.mrb[223].mxu0  ;;  %20473 = vmatpush3.bf16.msra.mxu1 %v20470_v28 }
 0xf25   : > { %v20474_v38 = vpack.c.bf16 %v17765_v35, %v6412_v37 }
 0xf27   : > { %20475 = vmatprep.subr.bf16.mxu1 %v20474_v38  ;;  %v17856_v41 = vpop.f32.mrb[224].mxu0 }
 0xf28   : > { %20477 = vmatpush3.bf16.msra.mxu1 %v20474_v38  ;;  %v6747_v42 = vpop.f32.mrb[225].mxu0 }
 0xf29   : > { %v20510_v30 = vpack.c.bf16 %v17856_v41, %v6747_v42 }
 0xf2b   : > { %17799 = vmatmul.mubr.f32.vlgmr.msra.gmra.mrb[208].mxu1 %v23921_v10  ;;  %v17859_v40 = vpop.f32.mrb[226].mxu0  ;;  %20511 = vmatprep.subr.bf16.mxu1 %v20510_v30 }
 0xf2c   : > { %v6757_v24 = vpop.f32.mrb[227].mxu0  ;;  %20513 = vmatpush3.bf16.msra.mxu1 %v20510_v30  ;;  %17801 = vmatprep.mubr.f32.mxu1 %v23927_v32 }
 0xf2d   : > { %v20514_v26 = vpack.c.bf16 %v17859_v40, %v6757_v24 }
 0xf2f   : > { %17802 = vmatmul.mubr.f32.gmra.mrb[210].mxu1 %v23933_v36  ;;  %v17862_v49 = vpop.f32.mrb[228].mxu0  ;;  %20515 = vmatprep.subr.bf16.mxu1 %v20514_v26 }
 0xf30   : > { %v6767_v62 = vpop.f32.mrb[229].mxu0  ;;  %20517 = vmatpush3.bf16.msra.mxu1 %v20514_v26  ;;  %17804 = vmatprep.mubr.f32.mxu1 %v23939_v39 }
 0xf31   : > { %v20518_v4 = vpack.c.bf16 %v17862_v49, %v6767_v62 }
 0xf33   : > { %17805 = vmatmul.mubr.f32.gmra.mrb[212].mxu1 %v23945_v9  ;;  %v17865_v19 = vpop.f32.mrb[230].mxu0  ;;  %20519 = vmatprep.subr.bf16.mxu1 %v20518_v4 }
 0xf34   : > { %v6777_v29 = vpop.f32.mrb[231].mxu0  ;;  %20521 = vmatpush3.bf16.msra.mxu1 %v20518_v4  ;;  %17807 = vmatprep.mubr.f32.mxu1 %v23951_v13 }
 0xf35   : > { %v20522_v33 = vpack.c.bf16 %v17865_v19, %v6777_v29 }
 0xf37   : > { %17808 = vmatmul.mubr.f32.gmra.mrb[214].mxu1 %v23957_v21  ;;  %v17868_v45 = vpop.f32.mrb[232].mxu0  ;;  %20523 = vmatprep.subr.bf16.mxu1 %v20522_v33 }
 0xf38   : > { %v6787_v48 = vpop.f32.mrb[233].mxu0  ;;  %20525 = vmatpush3.bf16.msra.mxu1 %v20522_v33  ;;  %17810 = vmatprep.mubr.f32.mxu1 %v23963_v44 }
 0xf39   : > { %v20526_v50 = vpack.c.bf16 %v17868_v45, %v6787_v48  ;;  %v14007_v48 = vld [vmem:[%s26648_s2 + $0x410] sm:$0xff] }
 0xf3b   : > { %17811 = vmatmul.mubr.f32.gmra.mrb[216].mxu1 %v23969_v57  ;;  %v17871_v55 = vpop.f32.mrb[234].mxu0  ;;  %20527 = vmatprep.subr.bf16.mxu1 %v20526_v50 }
 0xf3c   : > { %v6797_v60 = vpop.f32.mrb[235].mxu0  ;;  %20529 = vmatpush3.bf16.msra.mxu1 %v20526_v50  ;;  %17813 = vmatprep.mubr.f32.mxu1 %v23975_v14  ;;  %v14008_v50 = vld [vmem:[%s26648_s2 + $0x418] sm:$0xff] }
 0xf3d   : > { %v20530_v63 = vpack.c.bf16 %v17871_v55, %v6797_v60 }
 0xf3f   : > { %17814 = vmatmul.mubr.f32.gmra.mrb[218].mxu1 %v23981_v11  ;;  %v17874_v31 = vpop.f32.mrb[236].mxu0  ;;  %20531 = vmatprep.subr.bf16.mxu1 %v20530_v63 }
 0xf40   : > { %v6807_v1 = vpop.f32.mrb[237].mxu0  ;;  %20533 = vmatpush3.bf16.msra.mxu1 %v20530_v63  ;;  %17816 = vmatprep.mubr.f32.mxu1 %v23987_v34 }
 0xf41   : > { %v20534_v3 = vpack.c.bf16 %v17874_v31, %v6807_v1 }
 0xf43   : > { %17817 = vmatmul.mubr.f32.gmra.mrb[220].mxu1 %v23993_v46  ;;  %v17877_v43 = vpop.f32.mrb[238].mxu0  ;;  %20535 = vmatprep.subr.bf16.mxu1 %v20534_v3 }
 0xf44   : > { %v6817_v5 = vpop.f32.mrb[239].mxu0  ;;  %20537 = vmatpush3.bf16.msra.mxu1 %v20534_v3  ;;  %17819 = vmatprep.mubr.f32.mxu1 %v23999_v51  ;;  %v20594_v3 = vpack.c.bf16 %v14008_v50, %v14007_v48 }
 0xf45   : > { %v20538_v53 = vpack.c.bf16 %v17877_v43, %v6817_v5  ;;  %v14009_v5 = vld [vmem:[%s26648_s2 + $0x420] sm:$0xff] }
 0xf47   : > { %17820 = vmatmul.mubr.f32.gmra.mrb[222].mxu1 %v24005_v56  ;;  %20539 = vmatprep.subr.bf16.mxu1 %v20538_v53 }
 0xf48   : > { %20541 = vmatpush3.bf16.msra.mxu1 %v20538_v53  ;;  %17910 = vmatprep.mubr.f32.mxu1 %v24011_v58  ;;  %v14010_v53 = vld [vmem:[%s26648_s2 + $0x428] sm:$0xff] }
 0xf4b   : > { %17911 = vmatmul.mubr.f32.vlgmr.msra.gmra.mrb[224].mxu1 %v23921_v10  ;;  %v13965_v10 = vld [vmem:[%s26650_s4 + $0x1c0] sm:$0xff] }
 0xf4c   : > { %17913 = vmatprep.mubr.f32.mxu1 %v23927_v32  ;;  %v13966_v32 = vld [vmem:[%s26650_s4 + $0x1c8] sm:$0xff] }
 0xf4f   : > { %17914 = vmatmul.mubr.f32.gmra.mrb[226].mxu1 %v23933_v36  ;;  %v20542_v36 = vpack.c.bf16 %v13966_v32, %v13965_v10 }
 0xf50   : > { %17916 = vmatprep.mubr.f32.mxu1 %v23939_v39  ;;  %v13967_v39 = vld [vmem:[%s26650_s4 + $0x1d0] sm:$0xff] }
 0xf51   : > { %20543 = vmatprep.subr.bf16.mxu0 %v20542_v36 }
 0xf52   : > { %20545 = vmatpush3.bf16.msra.mxu0 %v20542_v36 }
 0xf53   : > { %17917 = vmatmul.mubr.f32.gmra.mrb[228].mxu1 %v23945_v9  ;;  %v13968_v9 = vld [vmem:[%s26650_s4 + $0x1d8] sm:$0xff] }
 0xf54   : > { %17919 = vmatprep.mubr.f32.mxu1 %v23951_v13  ;;  %v20546_v13 = vpack.c.bf16 %v13968_v9, %v13967_v39 }
 0xf56   : > { %20547 = vmatprep.subr.bf16.mxu0 %v20546_v13 }
 0xf57   : > { %17920 = vmatmul.mubr.f32.gmra.mrb[230].mxu1 %v23957_v21  ;;  %20549 = vmatpush3.bf16.msra.mxu0 %v20546_v13  ;;  %v13969_v21 = vld [vmem:[%s26650_s4 + $0x1e0] sm:$0xff]  ;;  %v20598_v13 = vpack.c.bf16 %v14010_v53, %v14009_v5  ;;  %v13996_v5 = vld [vmem:[%s22376_s15 + $0x438] sm:$0xff] }
 0xf58   : > { %17922 = vmatprep.mubr.f32.mxu1 %v23963_v44  ;;  %v13970_v44 = vld [vmem:[%s26650_s4 + $0x1e8] sm:$0xff]  ;;  %v13997_v53 = vld [vmem:[%s22376_s15 + $0x440] sm:$0xff] }
 0xf5b   : > { %17923 = vmatmul.mubr.f32.gmra.mrb[232].mxu1 %v23969_v57  ;;  %v20550_v57 = vpack.c.bf16 %v13970_v44, %v13969_v21  ;;  %v14011_v44 = vld [vmem:[%s26648_s2 + $0x430] sm:$0xff] }
 0xf5c   : > { %17925 = vmatprep.mubr.f32.mxu1 %v23975_v14  ;;  %v13971_v14 = vld [vmem:[%s26650_s4 + $0x1f0] sm:$0xff] }
 0xf5d   : > { %20551 = vmatprep.subr.bf16.mxu0 %v20550_v57 }
 0xf5e   : > { %20553 = vmatpush3.bf16.msra.mxu0 %v20550_v57  ;;  %v14012_v57 = vld [vmem:[%s26648_s2 + $0x438] sm:$0xff] }
 0xf5f   : > { %17926 = vmatmul.mubr.f32.gmra.mrb[234].mxu1 %v23981_v11  ;;  %v13972_v11 = vld [vmem:[%s26650_s4 + $0x1f8] sm:$0xff] }
 0xf60   : > { %17928 = vmatprep.mubr.f32.mxu1 %v23987_v34  ;;  %v20554_v34 = vpack.c.bf16 %v13972_v11, %v13971_v14 }
 0xf62   : > { %20555 = vmatprep.subr.bf16.mxu0 %v20554_v34 }
 0xf63   : > { %17929 = vmatmul.mubr.f32.gmra.mrb[236].mxu1 %v23993_v46  ;;  %20557 = vmatpush3.bf16.msra.mxu0 %v20554_v34  ;;  %v14005_v46 = vld [vmem:[%s26648_s2 + $0x400] sm:$0xff] }
 0xf64   : > { %17931 = vmatprep.mubr.f32.mxu1 %v23999_v51  ;;  %v14006_v51 = vld [vmem:[%s26648_s2 + $0x408] sm:$0xff] }
 0xf67   : > { %17932 = vmatmul.mubr.f32.gmra.mrb[238].mxu1 %v24005_v56  ;;  %v24285_v56 = vpack.c.bf16 %v14006_v51, %v14005_v46 }
 0xf68   : > { %18006 = vmatprep.mubr.f32.mxu1 %v24011_v58 }
 0xf69   : > { %20591 = vmatprep.subr.bf16.mxu0 %v24285_v56 }
 0xffe   : > { %v17800_v58 = vpop.f32.mrb[208].mxu1 }
 0xfff   : > { %v6493_v15 = vadd.f32 %v24291_v6, %v17800_v58  ;;  %v6487_v16 = vpop.f32.mrb[209].mxu1 }
0x1000   : > { %v6488_v20 = vadd.f32 %v24291_v6, %v6487_v16  ;;  %v14014_v16 = vld [vmem:[%s26648_s2 + $0x448] sm:$0xff] }
0x1001   : > { %6584 = vrot.lane.b32.xlu1 %v6493_v15, %s26654_s25  ;;  %v14013_v15 = vld [vmem:[%s26648_s2 + $0x440] sm:$0xff] }
0x1002   : > { %v17803_v22 = vpop.f32.mrb[210].mxu1  ;;  %6582 = vrot.lane.b32.xlu0 %v6488_v20, %s26654_s25 }
0x1003   : > { %v6503_v23 = vadd.f32 %v24291_v6, %v17803_v22  ;;  %v6497_v27 = vpop.f32.mrb[211].mxu1 }
0x1004   : > { %v6498_v8 = vadd.f32 %v24291_v6, %v6497_v27 }
0x1005   : > { %6588 = vrot.lane.b32.xlu1 %v6503_v23, %s26654_s25 }
0x1006   : > { %v17806_v47 = vpop.f32.mrb[212].mxu1  ;;  %6586 = vrot.lane.b32.xlu0 %v6498_v8, %s26654_s25 }
0x1007   : > { %v6513_v52 = vadd.f32 %v24291_v6, %v17806_v47  ;;  %v6507_v54 = vpop.f32.mrb[213].mxu1  ;;  %v20606_v47 = vpack.c.bf16 %v14014_v16, %v14013_v15 }
0x1008   : > { %v6508_v59 = vadd.f32 %v24291_v6, %v6507_v54  ;;  %v14015_v54 = vld [vmem:[%s26648_s2 + $0x450] sm:$0xff] }
0x1009   : > { %6592 = vrot.lane.b32.xlu1 %v6513_v52, %s26654_s25 }
0x100a   : > { %v17809_v0 = vpop.f32.mrb[214].mxu1  ;;  %6590 = vrot.lane.b32.xlu0 %v6508_v59, %s26654_s25  ;;  %v14016_v59 = vld [vmem:[%s26648_s2 + $0x458] sm:$0xff] }
0x100b   : > { %v6523_v2 = vadd.f32 %v24291_v6, %v17809_v0  ;;  %v6517_v7 = vpop.f32.mrb[215].mxu1 }
0x100c   : > { %v6518_v17 = vadd.f32 %v24291_v6, %v6517_v7 }
0x100d   : > { %6596 = vrot.lane.b32.xlu1 %v6523_v2, %s26654_s25 }
0x100e   : > { %v17812_v25 = vpop.f32.mrb[216].mxu1  ;;  %6594 = vrot.lane.b32.xlu0 %v6518_v17, %s26654_s25 }
0x100f   : > { %v6533_v18 = vadd.f32 %v24291_v6, %v17812_v25  ;;  %v6527_v12 = vpop.f32.mrb[217].mxu1 }
0x1010   : > { %v6528_v28 = vadd.f32 %v24291_v6, %v6527_v12 }
0x1011   : > { %6600 = vrot.lane.b32.xlu1 %v6533_v18, %s26654_s25  ;;  %v20610_v18 = vpack.c.bf16 %v14016_v59, %v14015_v54 }
0x1012   : > { %v17815_v35 = vpop.f32.mrb[218].mxu1  ;;  %6598 = vrot.lane.b32.xlu0 %v6528_v28, %s26654_s25  ;;  %v14017_v28 = vld [vmem:[%s26648_s2 + $0x460] sm:$0xff] }
0x1013   : > { %v6543_v37 = vadd.f32 %v24291_v6, %v17815_v35  ;;  %v6537_v38 = vpop.f32.mrb[219].mxu1  ;;  %v14018_v35 = vld [vmem:[%s26648_s2 + $0x468] sm:$0xff] }
0x1014   : > { %v6538_v41 = vadd.f32 %v24291_v6, %v6537_v38 }
0x1015   : > { %6604 = vrot.lane.b32.xlu1 %v6543_v37, %s26654_s25 }
0x1016   : > { %v17818_v42 = vpop.f32.mrb[220].mxu1  ;;  %6602 = vrot.lane.b32.xlu0 %v6538_v41, %s26654_s25 }
0x1017   : > { %v6553_v30 = vadd.f32 %v24291_v6, %v17818_v42  ;;  %v6547_v40 = vpop.f32.mrb[221].mxu1 }
0x1018   : > { %v6548_v24 = vadd.f32 %v24291_v6, %v6547_v40  ;;  %v20614_v40 = vpack.c.bf16 %v14018_v35, %v14017_v28 }
0x1019   : > { %6608 = vrot.lane.b32.xlu1 %v6553_v30, %s26654_s25 }
0x101a   : > { %v17821_v26 = vpop.f32.mrb[222].mxu1  ;;  %6606 = vrot.lane.b32.xlu0 %v6548_v24, %s26654_s25 }
0x101b   : > { %v6563_v49 = vadd.f32 %v24291_v6, %v17821_v26  ;;  %v6557_v62 = vpop.f32.mrb[223].mxu1  ;;  %v14019_v26 = vld [vmem:[%s26648_s2 + $0x470] sm:$0xff] }
0x101c   : > { %v6558_v4 = vadd.f32 %v24291_v6, %v6557_v62 }
0x101d   : > { %6612 = vrot.lane.b32.xlu1 %v6563_v49, %s26654_s25  ;;  %v14020_v49 = vld [vmem:[%s26648_s2 + $0x478] sm:$0xff] }
0x101e   : > { %v17912_v19 = vpop.f32.mrb[224].mxu1  ;;  %6610 = vrot.lane.b32.xlu0 %v6558_v4, %s26654_s25  ;;  %s26662_s25 = sadd.s32 4294967295, %s21736_s24  }
0x101f   : > { %v6898_v29 = vadd.f32 %v24098_v61, %v17912_v19  ;;  %v6892_v33 = vpop.f32.mrb[225].mxu1  ;;  %s14445_s11 = sshll.u32 %s26662_s25, 12 }
0x1020   : > { %v6893_v45 = vadd.f32 %v24098_v61, %v6892_v33  ;;  %s26595_s13 = scalar_lea.hbm %s26652_s6, %s14445_s11 }
0x1021   : > { %v6972_v63 = vmax.f32 %v6898_v29, 0.0 }
0x1022   : > { %v6971_v55 = vmax.f32 %v6893_v45, 0.0  ;;  %v17915_v60 = vpop.f32.mrb[226].mxu1  ;;  %v20618_v45 = vpack.c.bf16 %v14020_v49, %v14019_v26 }
0x1023   : > { %v6908_v31 = vadd.f32 %v24098_v61, %v17915_v60  ;;  %v6902_v1 = vpop.f32.mrb[227].mxu1  ;;  %v13989_v60 = vld [vmem:[%s22376_s15 + $0x400] sm:$0xff] }
0x1024   : > { %v6903_v43 = vadd.f32 %v24098_v61, %v6902_v1  ;;  %17950 = vmatprep.mubr.msk.f32.mxu0 %vm1677_vm0, %v6971_v55  ;;  %v13993_v1 = vld [vmem:[%s22376_s15 + $0x420] sm:$0xff] }
0x1025   : > { %17951 = vmatmul.mubr.msk.f32.vlgmr.msra.gmra.mrb[240].mxu0 %vm1677_vm0, %v6972_v63  ;;  %v6974_v36 = vmax.f32 %v6908_v31, 0.0  ;;  %v13991_v63 = vld [vmem:[%s22376_s15 + $0x410] sm:$0xff]  ;;  %v13992_v31 = vld [vmem:[%s22376_s15 + $0x418] sm:$0xff] }
0x1026   : > { %v6973_v10 = vmax.f32 %v6903_v43, 0.0  ;;  %v17918_v32 = vpop.f32.mrb[228].mxu1  ;;  %20593 = vmatpush3.bf16.msra.mxu0 %v24285_v56  ;;  %v20602_v56 = vpack.c.bf16 %v14012_v57, %v14011_v44  ;;  %v13995_v43 = vld [vmem:[%s22376_s15 + $0x430] sm:$0xff] }
0x1027   : > { %v6918_v39 = vadd.f32 %v24098_v61, %v17918_v32  ;;  %v6912_v9 = vpop.f32.mrb[229].mxu1  ;;  %20595 = vmatprep.subr.bf16.mxu0 %v20594_v3  ;;  %v13999_v32 = vld [vmem:[%s22376_s15 + $0x450] sm:$0xff] }
0x1028   : > { %v6913_v21 = vadd.f32 %v24098_v61, %v6912_v9  ;;  %17953 = vmatprep.mubr.msk.f32.mxu0 %vm1677_vm0, %v6973_v10  ;;  %v13998_v10 = vld [vmem:[%s22376_s15 + $0x448] sm:$0xff] }
0x1029   : > { %17954 = vmatmul.mubr.msk.f32.gmra.mrb[242].mxu0 %vm1677_vm0, %v6974_v36  ;;  %v6976_v34 = vmax.f32 %v6918_v39, 0.0  ;;  %v14000_v36 = vld [vmem:[%s22376_s15 + $0x458] sm:$0xff]  ;;  %v14001_v39 = vld [vmem:[%s22376_s15 + $0x460] sm:$0xff]  ;;  %v14002_v9 = vld [vmem:[%s22376_s15 + $0x468] sm:$0xff] }
0x102a   : > { %v6975_v14 = vmax.f32 %v6913_v21, 0.0  ;;  %v17921_v11 = vpop.f32.mrb[230].mxu1  ;;  %20597 = vmatpush3.bf16.msra.mxu0 %v20594_v3  ;;  %v13994_v3 = vld [vmem:[%s22376_s15 + $0x428] sm:$0xff]  ;;  %v14004_v21 = vld [vmem:[%s22376_s15 + $0x478] sm:$0xff] }
0x102b   : > { %v6928_v46 = vadd.f32 %v24098_v61, %v17921_v11  ;;  %v6922_v51 = vpop.f32.mrb[231].mxu1  ;;  %20599 = vmatprep.subr.bf16.mxu0 %v20598_v13 }
0x102c   : > { %v6923_v58 = vadd.f32 %v24098_v61, %v6922_v51  ;;  %17956 = vmatprep.mubr.msk.f32.mxu0 %vm1677_vm0, %v6975_v14 }
0x102d   : > { %17957 = vmatmul.mubr.msk.f32.gmra.mrb[244].mxu0 %vm1677_vm0, %v6976_v34  ;;  %v6978_v23 = vmax.f32 %v6928_v46, 0.0 }
0x102e   : > { %v6977_v20 = vmax.f32 %v6923_v58, 0.0  ;;  %v17924_v22 = vpop.f32.mrb[232].mxu1  ;;  %20601 = vmatpush3.bf16.msra.mxu0 %v20598_v13  ;;  %v14003_v13 = vld [vmem:[%s22376_s15 + $0x470] sm:$0xff] }
0x102f   : > { %v6938_v27 = vadd.f32 %v24098_v61, %v17924_v22  ;;  %v6932_v8 = vpop.f32.mrb[233].mxu1  ;;  %20603 = vmatprep.subr.bf16.mxu0 %v20602_v56 }
0x1030   : > { %v6933_v52 = vadd.f32 %v24098_v61, %v6932_v8  ;;  %17959 = vmatprep.mubr.msk.f32.mxu0 %vm1677_vm0, %v6977_v20 }
0x1031   : > { %17960 = vmatmul.mubr.msk.f32.gmra.mrb[246].mxu0 %vm1677_vm0, %v6978_v23  ;;  %v6980_v7 = vmax.f32 %v6938_v27, 0.0 }
0x1032   : > { %v6979_v0 = vmax.f32 %v6933_v52, 0.0  ;;  %v17927_v2 = vpop.f32.mrb[234].mxu1  ;;  %20605 = vmatpush3.bf16.msra.mxu0 %v20602_v56 }
0x1033   : > { %v6948_v17 = vadd.f32 %v24098_v61, %v17927_v2  ;;  %v6942_v25 = vpop.f32.mrb[235].mxu1  ;;  %20607 = vmatprep.subr.bf16.mxu0 %v20606_v47 }
0x1034   : > { %v6943_v12 = vadd.f32 %v24098_v61, %v6942_v25  ;;  %17962 = vmatprep.mubr.msk.f32.mxu0 %vm1677_vm0, %v6979_v0 }
0x1035   : > { %17963 = vmatmul.mubr.msk.f32.gmra.mrb[248].mxu0 %vm1677_vm0, %v6980_v7  ;;  %v6982_v41 = vmax.f32 %v6948_v17, 0.0 }
0x1036   : > { %v6981_v37 = vmax.f32 %v6943_v12, 0.0  ;;  %v17930_v38 = vpop.f32.mrb[236].mxu1  ;;  %20609 = vmatpush3.bf16.msra.mxu0 %v20606_v47 }
0x1037   : > { %v6958_v42 = vadd.f32 %v24098_v61, %v17930_v38  ;;  %v6952_v30 = vpop.f32.mrb[237].mxu1  ;;  %20611 = vmatprep.subr.bf16.mxu0 %v20610_v18 }
0x1038   : > { %v6953_v24 = vadd.f32 %v24098_v61, %v6952_v30  ;;  %17965 = vmatprep.mubr.msk.f32.mxu0 %vm1677_vm0, %v6981_v37 }
0x1039   : > { %17966 = vmatmul.mubr.msk.f32.gmra.mrb[250].mxu0 %vm1677_vm0, %v6982_v41  ;;  %v6984_v19 = vmax.f32 %v6958_v42, 0.0 }
0x103a   : > { %v6983_v62 = vmax.f32 %v6953_v24, 0.0  ;;  %v17933_v4 = vpop.f32.mrb[238].mxu1  ;;  %20613 = vmatpush3.bf16.msra.mxu0 %v20610_v18 }
0x103b   : > { %v6968_v29 = vadd.f32 %v24098_v61, %v17933_v4  ;;  %v6962_v33 = vpop.f32.mrb[239].mxu1  ;;  %20615 = vmatprep.subr.bf16.mxu0 %v20614_v40 }
0x103c   : > { %v6963_v48 = vadd.f32 %v24098_v61, %v6962_v33  ;;  %17968 = vmatprep.mubr.msk.f32.mxu0 %vm1677_vm0, %v6983_v62  ;;  %v13990_v61 = vld [vmem:[%s22376_s15 + $0x408] sm:$0xff] }
0x103d   : > { %17969 = vmatmul.mubr.msk.f32.gmra.mrb[252].mxu0 %vm1677_vm0, %v6984_v19  ;;  %v6986_v55 = vmax.f32 %v6968_v29, 0.0 }
0x103e   : > { %v6985_v50 = vmax.f32 %v6963_v48, 0.0  ;;  %20617 = vmatpush3.bf16.msra.mxu0 %v20614_v40 }
0x103f   : > { %20619 = vmatprep.subr.bf16.mxu0 %v20618_v45 }
0x1040   : > { %17971 = vmatprep.mubr.msk.f32.mxu0 %vm1677_vm0, %v6985_v50 }
0x1041   : > { %17972 = vmatmul.mubr.msk.f32.gmra.mrb[254].mxu0 %vm1677_vm0, %v6986_v55  ;;  %v24457_v55 = vld [vmem:[%s26647_s1 + $0x10] sm:$0xff] }
0x1042   : > { %20621 = vmatpush3.bf16.msra.mxu0 %v20618_v45  ;;  %18062 = vmatprep.mubr.f32.mxu0 %v13989_v60  ;;  %v24451_v45 = vld [vmem:[%s26647_s1 + $0x8] sm:$0xff] }
0x1045   : > { %18063 = vmatmul.mubr.f32.vlgmr.msra.gmra.mrb[0].mxu0 %v13990_v61  ;;  %v24463_v61 = vld [vmem:[%s26647_s1 + $0x18] sm:$0xff] }
0x1046   : > { %18065 = vmatprep.mubr.f32.mxu0 %v13991_v63 }
0x1049   : > { %18066 = vmatmul.mubr.f32.gmra.mrb[2].mxu0 %v13992_v31 }
0x104a   : > { %18068 = vmatprep.mubr.f32.mxu0 %v13993_v1  ;;  %v24469_v1 = vld [vmem:[%s26647_s1 + $0x20] sm:$0xff] }
0x104d   : > { %18069 = vmatmul.mubr.f32.gmra.mrb[4].mxu0 %v13994_v3 }
0x104e   : > { %18071 = vmatprep.mubr.f32.mxu0 %v13995_v43  ;;  %v24475_v43 = vld [vmem:[%s26647_s1 + $0x28] sm:$0xff] }
0x1051   : > { %18072 = vmatmul.mubr.f32.gmra.mrb[6].mxu0 %v13996_v5 }
0x1052   : > { %18074 = vmatprep.mubr.f32.mxu0 %v13997_v53 }
0x1055   : > { %18075 = vmatmul.mubr.f32.gmra.mrb[8].mxu0 %v13998_v10  ;;  %v24481_v10 = vld [vmem:[%s26647_s1 + $0x30] sm:$0xff] }
0x1056   : > { %18077 = vmatprep.mubr.f32.mxu0 %v13999_v32 }
0x1059   : > { %18078 = vmatmul.mubr.f32.gmra.mrb[10].mxu0 %v14000_v36  ;;  %v24487_v36 = vld [vmem:[%s26647_s1 + $0x38] sm:$0xff] }
0x105a   : > { %18080 = vmatprep.mubr.f32.mxu0 %v14001_v39 }
0x105d   : > { %18081 = vmatmul.mubr.f32.gmra.mrb[12].mxu0 %v14002_v9 }
0x105e   : > { %18083 = vmatprep.mubr.f32.mxu0 %v14003_v13  ;;  %v24493_v13 = vld [vmem:[%s26647_s1 + $0x40] sm:$0xff] }
0x1061   : > { %18084 = vmatmul.mubr.f32.gmra.mrb[14].mxu0 %v14004_v21 }
0x1073   : > { %v6585_v44 = vpop.permute.xlu1 %6584 }
0x1074   : > { %6632 = vst.msk [vmem:[%s22719_s10 + $0x10] sm:$0xff] %vm6630_vm7, %v6585_v44  ;;  %v6583_v57 = vpop.permute.xlu0 %6582  ;;  %v24499_v44 = vld [vmem:[%s26647_s1 + $0x48] sm:$0xff] }
0x1075   : > { %6631 = vst.msk [vmem:[%s22719_s10] sm:$0xff] %vm6630_vm7, %v6583_v57 }
0x1077   : > { %v6589_v14 = vpop.permute.xlu1 %6588 }
0x1078   : > { %6634 = vst.msk [vmem:[%s22719_s10 + $0x30] sm:$0xff] %vm6630_vm7, %v6589_v14  ;;  %v6587_v11 = vpop.permute.xlu0 %6586 }
0x1079   : > { %6633 = vst.msk [vmem:[%s22719_s10 + $0x20] sm:$0xff] %vm6630_vm7, %v6587_v11  ;;  %v24505_v11 = vld [vmem:[%s26647_s1 + $0x50] sm:$0xff] }
0x107b   : > { %v6593_v34 = vpop.permute.xlu1 %6592 }
0x107c   : > { %6636 = vst.msk [vmem:[%s22719_s10 + $0x50] sm:$0xff] %vm6630_vm7, %v6593_v34  ;;  %v6591_v46 = vpop.permute.xlu0 %6590 }
0x107d   : > { %6635 = vst.msk [vmem:[%s22719_s10 + $0x40] sm:$0xff] %vm6630_vm7, %v6591_v46  ;;  %v24511_v46 = vld [vmem:[%s26647_s1 + $0x58] sm:$0xff] }
0x107f   : > { %v6597_v51 = vpop.permute.xlu1 %6596 }
0x1080   : > { %6638 = vst.msk [vmem:[%s22719_s10 + $0x70] sm:$0xff] %vm6630_vm7, %v6597_v51  ;;  %v6595_v56 = vpop.permute.xlu0 %6594 }
0x1081   : > { %6637 = vst.msk [vmem:[%s22719_s10 + $0x60] sm:$0xff] %vm6630_vm7, %v6595_v56 }
0x1083   : > { %v6601_v58 = vpop.permute.xlu1 %6600 }
0x1084   : > { %6640 = vst.msk [vmem:[%s22719_s10 + $0x90] sm:$0xff] %vm6630_vm7, %v6601_v58  ;;  %v6599_v15 = vpop.permute.xlu0 %6598  ;;  %v24517_v58 = vld [vmem:[%s26647_s1 + $0x60] sm:$0xff] }
0x1085   : > { %6639 = vst.msk [vmem:[%s22719_s10 + $0x80] sm:$0xff] %vm6630_vm7, %v6599_v15 }
0x1087   : > { %v6605_v16 = vpop.permute.xlu1 %6604 }
0x1088   : > { %6642 = vst.msk [vmem:[%s22719_s10 + $0xb0] sm:$0xff] %vm6630_vm7, %v6605_v16  ;;  %v6603_v20 = vpop.permute.xlu0 %6602  ;;  %v24523_v16 = vld [vmem:[%s26647_s1 + $0x68] sm:$0xff] }
0x1089   : > { %6641 = vst.msk [vmem:[%s22719_s10 + $0xa0] sm:$0xff] %vm6630_vm7, %v6603_v20 }
0x108b   : > { %v6609_v22 = vpop.permute.xlu1 %6608 }
0x108c   : > { %6644 = vst.msk [vmem:[%s22719_s10 + $0xd0] sm:$0xff] %vm6630_vm7, %v6609_v22  ;;  %v6607_v23 = vpop.permute.xlu0 %6606 }
0x108d   : > { %6643 = vst.msk [vmem:[%s22719_s10 + $0xc0] sm:$0xff] %vm6630_vm7, %v6607_v23  ;;  %v24529_v23 = vld [vmem:[%s26647_s1 + $0x70] sm:$0xff] }
0x108f   : > { %v6613_v27 = vpop.permute.xlu1 %6612 }
0x1090   : > { %6646 = vst.msk [vmem:[%s22719_s10 + $0xf0] sm:$0xff] %vm6630_vm7, %v6613_v27  ;;  %v6611_v8 = vpop.permute.xlu0 %6610 }
0x1091   : > { %6645 = vst.msk [vmem:[%s22719_s10 + $0xe0] sm:$0xff] %vm6630_vm7, %v6611_v8  ;;  %v24535_v8 = vld [vmem:[%s26647_s1 + $0x78] sm:$0xff] }
0x10f8   : > { %v17952_v47 = vpop.f32.mrb[240].mxu0 }
0x10f9   : > { %v7110_v52 = vpop.f32.mrb[241].mxu0 }
0x10fa   : > { %v20558_v54 = vpack.c.bf16 %v17952_v47, %v7110_v52  ;;  %v24541_v47 = vld [vmem:[%s26647_s1] sm:$0xff] }
0x10fb   : > { %v14021_v52 = vld [vmem:[%s26650_s4 + $0x200] sm:$0xff] }
0x10fc   : > { %v17955_v59 = vpop.f32.mrb[242].mxu0  ;;  %20559 = vmatprep.subr.bf16.mxu1 %v20558_v54 }
0x10fd   : > { %v7120_v0 = vpop.f32.mrb[243].mxu0  ;;  %20561 = vmatpush3.bf16.msra.mxu1 %v20558_v54  ;;  %v14022_v54 = vld [vmem:[%s26650_s4 + $0x208] sm:$0xff] }
0x10fe   : > { %v20562_v2 = vpack.c.bf16 %v17955_v59, %v7120_v0  ;;  %v20654_v59 = vpack.c.bf16 %v14022_v54, %v14021_v52  ;;  %v14023_v0 = vld [vmem:[%s26650_s4 + $0x210] sm:$0xff]  ;;  %v24628_v54 = vld [vmem:[%s26649_s3] ss:$0 sm:$0xff] }
0x1100   : > { %v17958_v7 = vpop.f32.mrb[244].mxu0  ;;  %20563 = vmatprep.subr.bf16.mxu1 %v20562_v2  ;;  %20655 = vmatprep.subr.bf16.mxu0 %v20654_v59 }
0x1101   : > { %v7130_v17 = vpop.f32.mrb[245].mxu0  ;;  %20565 = vmatpush3.bf16.msra.mxu1 %v20562_v2  ;;  %20657 = vmatpush3.bf16.msra.mxu0 %v20654_v59  ;;  %v14024_v2 = vld [vmem:[%s26650_s4 + $0x218] sm:$0xff] }
0x1102   : > { %v20566_v25 = vpack.c.bf16 %v17958_v7, %v7130_v17  ;;  %v20658_v7 = vpack.c.bf16 %v14024_v2, %v14023_v0  ;;  %v14025_v17 = vld [vmem:[%s26650_s4 + $0x220] sm:$0xff] }
0x1104   : > { %v17961_v18 = vpop.f32.mrb[246].mxu0  ;;  %20567 = vmatprep.subr.bf16.mxu1 %v20566_v25  ;;  %20659 = vmatprep.subr.bf16.mxu0 %v20658_v7 }
0x1105   : > { %v7140_v12 = vpop.f32.mrb[247].mxu0  ;;  %20569 = vmatpush3.bf16.msra.mxu1 %v20566_v25  ;;  %20661 = vmatpush3.bf16.msra.mxu0 %v20658_v7  ;;  %v14026_v25 = vld [vmem:[%s26650_s4 + $0x228] sm:$0xff]  ;;  %v14063_v7 = vld [vmem:[%s26648_s2 + $0x490] sm:$0xff] }
0x1106   : > { %v20570_v28 = vpack.c.bf16 %v17961_v18, %v7140_v12  ;;  %v20662_v18 = vpack.c.bf16 %v14026_v25, %v14025_v17  ;;  %v14027_v12 = vld [vmem:[%s26650_s4 + $0x230] sm:$0xff] }
0x1108   : > { %v17964_v35 = vpop.f32.mrb[248].mxu0  ;;  %20571 = vmatprep.subr.bf16.mxu1 %v20570_v28  ;;  %20663 = vmatprep.subr.bf16.mxu0 %v20662_v18 }
0x1109   : > { %v7150_v37 = vpop.f32.mrb[249].mxu0  ;;  %20573 = vmatpush3.bf16.msra.mxu1 %v20570_v28  ;;  %20665 = vmatpush3.bf16.msra.mxu0 %v20662_v18  ;;  %v14028_v28 = vld [vmem:[%s26650_s4 + $0x238] sm:$0xff] }
0x110a   : > { %v20574_v38 = vpack.c.bf16 %v17964_v35, %v7150_v37  ;;  %v20666_v35 = vpack.c.bf16 %v14028_v28, %v14027_v12  ;;  %v14061_v37 = vld [vmem:[%s26648_s2 + $0x480] sm:$0xff] }
0x110c   : > { %v17967_v41 = vpop.f32.mrb[250].mxu0  ;;  %20575 = vmatprep.subr.bf16.mxu1 %v20574_v38  ;;  %20667 = vmatprep.subr.bf16.mxu0 %v20666_v35 }
0x110d   : > { %v7160_v42 = vpop.f32.mrb[251].mxu0  ;;  %20577 = vmatpush3.bf16.msra.mxu1 %v20574_v38  ;;  %20669 = vmatpush3.bf16.msra.mxu0 %v20666_v35  ;;  %v14062_v38 = vld [vmem:[%s26648_s2 + $0x488] sm:$0xff] }
0x110e   : > { %v20578_v30 = vpack.c.bf16 %v17967_v41, %v7160_v42  ;;  %v24590_v41 = vpack.c.bf16 %v14062_v38, %v14061_v37  ;;  %v14065_v38 = vld [vmem:[%s26648_s2 + $0x4a0] sm:$0xff] }
0x1110   : > { %v17970_v40 = vpop.f32.mrb[252].mxu0  ;;  %20579 = vmatprep.subr.bf16.mxu1 %v20578_v30  ;;  %20703 = vmatprep.subr.bf16.mxu0 %v24590_v41 }
0x1111   : > { %v7170_v24 = vpop.f32.mrb[253].mxu0  ;;  %20581 = vmatpush3.bf16.msra.mxu1 %v20578_v30 }
0x1112   : > { %v20582_v26 = vpack.c.bf16 %v17970_v40, %v7170_v24 }
0x1114   : > { %v17973_v49 = vpop.f32.mrb[254].mxu0  ;;  %20583 = vmatprep.subr.bf16.mxu1 %v20582_v26 }
0x1115   : > { %v7180_v62 = vpop.f32.mrb[255].mxu0  ;;  %20585 = vmatpush3.bf16.msra.mxu1 %v20582_v26 }
0x1116   : > { %v20586_v4 = vpack.c.bf16 %v17973_v49, %v7180_v62 }
0x1118   : > { %20587 = vmatprep.subr.bf16.mxu1 %v20586_v4  ;;  %v18064_v19 = vpop.f32.mrb[0].mxu0 }
0x1119   : > { %20589 = vmatpush3.bf16.msra.mxu1 %v20586_v4  ;;  %v7515_v29 = vpop.f32.mrb[1].mxu0 }
0x111a   : > { %v20622_v33 = vpack.c.bf16 %v18064_v19, %v7515_v29 }
0x111c   : > { %18007 = vmatmul.mubr.f32.vlgmr.msra.gmra.mrb[240].mxu1 %v24451_v45  ;;  %v18067_v48 = vpop.f32.mrb[2].mxu0  ;;  %20623 = vmatprep.subr.bf16.mxu1 %v20622_v33 }
0x111d   : > { %v7525_v50 = vpop.f32.mrb[3].mxu0  ;;  %20625 = vmatpush3.bf16.msra.mxu1 %v20622_v33  ;;  %18009 = vmatprep.mubr.f32.mxu1 %v24457_v55 }
0x111e   : > { %v20626_v60 = vpack.c.bf16 %v18067_v48, %v7525_v50 }
0x1120   : > { %18010 = vmatmul.mubr.f32.gmra.mrb[242].mxu1 %v24463_v61  ;;  %v18070_v63 = vpop.f32.mrb[4].mxu0  ;;  %20627 = vmatprep.subr.bf16.mxu1 %v20626_v60 }
0x1121   : > { %v7535_v31 = vpop.f32.mrb[5].mxu0  ;;  %20629 = vmatpush3.bf16.msra.mxu1 %v20626_v60  ;;  %18012 = vmatprep.mubr.f32.mxu1 %v24469_v1 }
0x1122   : > { %v20630_v3 = vpack.c.bf16 %v18070_v63, %v7535_v31 }
0x1124   : > { %18013 = vmatmul.mubr.f32.gmra.mrb[244].mxu1 %v24475_v43  ;;  %v18073_v5 = vpop.f32.mrb[6].mxu0  ;;  %20631 = vmatprep.subr.bf16.mxu1 %v20630_v3 }
0x1125   : > { %v7545_v53 = vpop.f32.mrb[7].mxu0  ;;  %20633 = vmatpush3.bf16.msra.mxu1 %v20630_v3  ;;  %18015 = vmatprep.mubr.f32.mxu1 %v24481_v10 }
0x1126   : > { %v20634_v32 = vpack.c.bf16 %v18073_v5, %v7545_v53 }
0x1128   : > { %18016 = vmatmul.mubr.f32.gmra.mrb[246].mxu1 %v24487_v36  ;;  %v18076_v39 = vpop.f32.mrb[8].mxu0  ;;  %20635 = vmatprep.subr.bf16.mxu1 %v20634_v32 }
0x1129   : > { %v7555_v9 = vpop.f32.mrb[9].mxu0  ;;  %20637 = vmatpush3.bf16.msra.mxu1 %v20634_v32  ;;  %18018 = vmatprep.mubr.f32.mxu1 %v24493_v13 }
0x112a   : > { %v20638_v21 = vpack.c.bf16 %v18076_v39, %v7555_v9 }
0x112c   : > { %18019 = vmatmul.mubr.f32.gmra.mrb[248].mxu1 %v24499_v44  ;;  %v18079_v57 = vpop.f32.mrb[10].mxu0  ;;  %20639 = vmatprep.subr.bf16.mxu1 %v20638_v21 }
0x112d   : > { %v7565_v14 = vpop.f32.mrb[11].mxu0  ;;  %20641 = vmatpush3.bf16.msra.mxu1 %v20638_v21  ;;  %18021 = vmatprep.mubr.f32.mxu1 %v24505_v11 }
0x112e   : > { %v20642_v34 = vpack.c.bf16 %v18079_v57, %v7565_v14 }
0x1130   : > { %18022 = vmatmul.mubr.f32.gmra.mrb[250].mxu1 %v24511_v46  ;;  %v18082_v51 = vpop.f32.mrb[12].mxu0  ;;  %20643 = vmatprep.subr.bf16.mxu1 %v20642_v34 }
0x1131   : > { %v7575_v56 = vpop.f32.mrb[13].mxu0  ;;  %20645 = vmatpush3.bf16.msra.mxu1 %v20642_v34  ;;  %18024 = vmatprep.mubr.f32.mxu1 %v24517_v58 }
0x1132   : > { %v20646_v15 = vpack.c.bf16 %v18082_v51, %v7575_v56 }
0x1134   : > { %18025 = vmatmul.mubr.f32.gmra.mrb[252].mxu1 %v24523_v16  ;;  %v18085_v20 = vpop.f32.mrb[14].mxu0  ;;  %20647 = vmatprep.subr.bf16.mxu1 %v20646_v15 }
0x1135   : > { %v7585_v22 = vpop.f32.mrb[15].mxu0  ;;  %20649 = vmatpush3.bf16.msra.mxu1 %v20646_v15  ;;  %18027 = vmatprep.mubr.f32.mxu1 %v24529_v23 }
0x1136   : > { %v20650_v27 = vpack.c.bf16 %v18085_v20, %v7585_v22 }
0x1138   : > { %18028 = vmatmul.mubr.f32.gmra.mrb[254].mxu1 %v24535_v8  ;;  %20651 = vmatprep.subr.bf16.mxu1 %v20650_v27 }
0x1139   : > { %20653 = vmatpush3.bf16.msra.mxu1 %v20650_v27  ;;  %18118 = vmatprep.mubr.f32.mxu1 %v24541_v47 }
0x113c   : > { %18119 = vmatmul.mubr.f32.vlgmr.msra.gmra.mrb[0].mxu1 %v24451_v45 }
0x113d   : > { %18121 = vmatprep.mubr.f32.mxu1 %v24457_v55 }
0x1140   : > { %18122 = vmatmul.mubr.f32.gmra.mrb[2].mxu1 %v24463_v61 }
0x1141   : > { %18124 = vmatprep.mubr.f32.mxu1 %v24469_v1 }
0x1144   : > { %18125 = vmatmul.mubr.f32.gmra.mrb[4].mxu1 %v24475_v43 }
0x1145   : > { %18127 = vmatprep.mubr.f32.mxu1 %v24481_v10 }
0x1148   : > { %18128 = vmatmul.mubr.f32.gmra.mrb[6].mxu1 %v24487_v36 }
0x1149   : > { %18130 = vmatprep.mubr.f32.mxu1 %v24493_v13 }
0x114c   : > { %18131 = vmatmul.mubr.f32.gmra.mrb[8].mxu1 %v24499_v44 }
0x114d   : > { %18133 = vmatprep.mubr.f32.mxu1 %v24505_v11 }
0x1150   : > { %18134 = vmatmul.mubr.f32.gmra.mrb[10].mxu1 %v24511_v46 }
0x1151   : > { %18136 = vmatprep.mubr.f32.mxu1 %v24517_v58 }
0x1154   : > { %18137 = vmatmul.mubr.f32.gmra.mrb[12].mxu1 %v24523_v16 }
0x1155   : > { %18139 = vmatprep.mubr.f32.mxu1 %v24529_v23 }
0x1158   : > { %18140 = vmatmul.mubr.f32.gmra.mrb[14].mxu1 %v24535_v8 }
0x1159   : > { %18214 = vmatprep.mubr.f32.mxu1 %v24541_v47 }
0x11ef   : > { %v18008_v42 = vpop.f32.mrb[240].mxu1 }
0x11f0   : > { %v7261_v30 = vadd.f32 %v24291_v6, %v18008_v42  ;;  %v7255_v40 = vpop.f32.mrb[241].mxu1  ;;  %v14066_v42 = vld [vmem:[%s26648_s2 + $0x4a8] sm:$0xff] }
0x11f1   : > { %v7256_v24 = vadd.f32 %v24291_v6, %v7255_v40 }
0x11f2   : > { %7352 = vrot.lane.b32.xlu1 %v7261_v30, %s26656_s29 }
0x11f3   : > { %v18011_v26 = vpop.f32.mrb[242].mxu1  ;;  %7350 = vrot.lane.b32.xlu0 %v7256_v24, %s26656_s29 }
0x11f4   : > { %v7271_v49 = vadd.f32 %v24291_v6, %v18011_v26  ;;  %v7265_v62 = vpop.f32.mrb[243].mxu1 }
0x11f5   : > { %v7266_v4 = vadd.f32 %v24291_v6, %v7265_v62  ;;  %v20710_v62 = vpack.c.bf16 %v14066_v42, %v14065_v38 }
0x11f6   : > { %7356 = vrot.lane.b32.xlu1 %v7271_v49, %s26656_s29 }
0x11f7   : > { %v18014_v19 = vpop.f32.mrb[244].mxu1  ;;  %7354 = vrot.lane.b32.xlu0 %v7266_v4, %s26656_s29 }
0x11f8   : > { %v7281_v29 = vadd.f32 %v24291_v6, %v18014_v19  ;;  %v7275_v33 = vpop.f32.mrb[245].mxu1  ;;  %v14067_v19 = vld [vmem:[%s26648_s2 + $0x4b0] sm:$0xff] }
0x11f9   : > { %v7276_v48 = vadd.f32 %v24291_v6, %v7275_v33 }
0x11fa   : > { %7360 = vrot.lane.b32.xlu1 %v7281_v29, %s26656_s29  ;;  %v14068_v29 = vld [vmem:[%s26648_s2 + $0x4b8] sm:$0xff] }
0x11fb   : > { %v18017_v50 = vpop.f32.mrb[246].mxu1  ;;  %7358 = vrot.lane.b32.xlu0 %v7276_v48, %s26656_s29 }
0x11fc   : > { %v7291_v60 = vadd.f32 %v24291_v6, %v18017_v50  ;;  %v7285_v63 = vpop.f32.mrb[247].mxu1 }
0x11fd   : > { %v7286_v31 = vadd.f32 %v24291_v6, %v7285_v63  ;;  %v20714_v63 = vpack.c.bf16 %v14068_v29, %v14067_v19  ;;  %v14045_v19 = vld [vmem:[%s22376_s15 + $0x480] sm:$0xff]  ;;  %v14046_v29 = vld [vmem:[%s22376_s15 + $0x488] sm:$0xff] }
0x11fe   : > { %7364 = vrot.lane.b32.xlu1 %v7291_v60, %s26656_s29 }
0x11ff   : > { %v18020_v3 = vpop.f32.mrb[248].mxu1  ;;  %7362 = vrot.lane.b32.xlu0 %v7286_v31, %s26656_s29 }
0x1200   : > { %v7301_v5 = vadd.f32 %v24291_v6, %v18020_v3  ;;  %v7295_v53 = vpop.f32.mrb[249].mxu1  ;;  %v14069_v3 = vld [vmem:[%s26648_s2 + $0x4c0] sm:$0xff] }
0x1201   : > { %v7296_v32 = vadd.f32 %v24291_v6, %v7295_v53 }
0x1202   : > { %7368 = vrot.lane.b32.xlu1 %v7301_v5, %s26656_s29  ;;  %v14070_v5 = vld [vmem:[%s26648_s2 + $0x4c8] sm:$0xff] }
0x1203   : > { %v18023_v39 = vpop.f32.mrb[250].mxu1  ;;  %7366 = vrot.lane.b32.xlu0 %v7296_v32, %s26656_s29 }
0x1204   : > { %v7311_v9 = vadd.f32 %v24291_v6, %v18023_v39  ;;  %v7305_v21 = vpop.f32.mrb[251].mxu1 }
0x1205   : > { %v7306_v57 = vadd.f32 %v24291_v6, %v7305_v21 }
0x1206   : > { %7372 = vrot.lane.b32.xlu1 %v7311_v9, %s26656_s29 }
0x1207   : > { %v18026_v14 = vpop.f32.mrb[252].mxu1  ;;  %7370 = vrot.lane.b32.xlu0 %v7306_v57, %s26656_s29  ;;  %v20718_v57 = vpack.c.bf16 %v14070_v5, %v14069_v3  ;;  %v14054_v3 = vld [vmem:[%s22376_s15 + $0x4c8] sm:$0xff]  ;;  %v14055_v5 = vld [vmem:[%s22376_s15 + $0x4d0] sm:$0xff] }
0x1208   : > { %v7321_v34 = vadd.f32 %v24291_v6, %v18026_v14  ;;  %v7315_v51 = vpop.f32.mrb[253].mxu1 }
0x1209   : > { %v7316_v56 = vadd.f32 %v24291_v6, %v7315_v51  ;;  %v14072_v51 = vld [vmem:[%s26648_s2 + $0x4d8] sm:$0xff] }
0x120a   : > { %7376 = vrot.lane.b32.xlu1 %v7321_v34, %s26656_s29  ;;  %v14071_v34 = vld [vmem:[%s26648_s2 + $0x4d0] sm:$0xff] }
0x120b   : > { %v18029_v15 = vpop.f32.mrb[254].mxu1  ;;  %7374 = vrot.lane.b32.xlu0 %v7316_v56, %s26656_s29 }
0x120c   : > { %v7331_v20 = vadd.f32 %v24291_v6, %v18029_v15  ;;  %v7325_v22 = vpop.f32.mrb[255].mxu1 }
0x120d   : > { %v7326_v27 = vadd.f32 %v24291_v6, %v7325_v22  ;;  %v14064_v6 = vld [vmem:[%s26648_s2 + $0x498] sm:$0xff] }
0x120e   : > { %7380 = vrot.lane.b32.xlu1 %v7331_v20, %s26656_s29  ;;  %v20706_v35 = vpack.c.bf16 %v14064_v6, %v14063_v7 }
0x120f   : > { %v18120_v52 = vpop.f32.mrb[0].mxu1  ;;  %7378 = vrot.lane.b32.xlu0 %v7326_v27, %s26656_s29  ;;  %s26661_s29 = smov 112  }
0x1210   : > { %v7666_v59 = vadd.f32 %v24628_v54, %v18120_v52  ;;  %v7660_v0 = vpop.f32.mrb[1].mxu1  ;;  %v20722_v52 = vpack.c.bf16 %v14072_v51, %v14071_v34 }
0x1211   : > { %v7661_v2 = vadd.f32 %v24628_v54, %v7660_v0  ;;  %v14073_v0 = vld [vmem:[%s26648_s2 + $0x4e0] sm:$0xff] }
0x1212   : > { %v7740_v18 = vmax.f32 %v7666_v59, 0.0 }
0x1213   : > { %v7739_v17 = vmax.f32 %v7661_v2, 0.0  ;;  %v18123_v25 = vpop.f32.mrb[2].mxu1  ;;  %v14074_v2 = vld [vmem:[%s26648_s2 + $0x4e8] sm:$0xff] }
0x1214   : > { %v7676_v12 = vadd.f32 %v24628_v54, %v18123_v25  ;;  %v7670_v28 = vpop.f32.mrb[3].mxu1 }
0x1215   : > { %v7671_v37 = vadd.f32 %v24628_v54, %v7670_v28  ;;  %18158 = vmatprep.mubr.msk.f32.mxu0 %vm1677_vm0, %v7739_v17 }
0x1216   : > { %18159 = vmatmul.mubr.msk.f32.vlgmr.msra.gmra.mrb[16].mxu0 %vm1677_vm0, %v7740_v18  ;;  %v7742_v24 = vmax.f32 %v7676_v12, 0.0  ;;  %v20726_v12 = vpack.c.bf16 %v14074_v2, %v14073_v0 }
0x1217   : > { %v7741_v30 = vmax.f32 %v7671_v37, 0.0  ;;  %v18126_v40 = vpop.f32.mrb[4].mxu1  ;;  %20705 = vmatpush3.bf16.msra.mxu0 %v24590_v41  ;;  %v14076_v37 = vld [vmem:[%s26648_s2 + $0x4f8] sm:$0xff] }
0x1218   : > { %v7686_v26 = vadd.f32 %v24628_v54, %v18126_v40  ;;  %v7680_v49 = vpop.f32.mrb[5].mxu1  ;;  %20707 = vmatprep.subr.bf16.mxu0 %v20706_v35 }
0x1219   : > { %v7681_v4 = vadd.f32 %v24628_v54, %v7680_v49  ;;  %18161 = vmatprep.mubr.msk.f32.mxu0 %vm1677_vm0, %v7741_v30 }
0x121a   : > { %18162 = vmatmul.mubr.msk.f32.gmra.mrb[18].mxu0 %vm1677_vm0, %v7742_v24  ;;  %v7744_v48 = vmax.f32 %v7686_v26, 0.0 }
0x121b   : > { %v7743_v41 = vmax.f32 %v7681_v4, 0.0  ;;  %v18129_v33 = vpop.f32.mrb[6].mxu1  ;;  %20709 = vmatpush3.bf16.msra.mxu0 %v20706_v35  ;;  %v14075_v35 = vld [vmem:[%s26648_s2 + $0x4f0] sm:$0xff] }
0x121c   : > { %v7696_v50 = vadd.f32 %v24628_v54, %v18129_v33  ;;  %v7690_v60 = vpop.f32.mrb[7].mxu1  ;;  %20711 = vmatprep.subr.bf16.mxu0 %v20710_v62  ;;  %v20730_v26 = vpack.c.bf16 %v14076_v37, %v14075_v35  ;;  %v14048_v33 = vld [vmem:[%s22376_s15 + $0x498] sm:$0xff] }
0x121d   : > { %v7691_v31 = vadd.f32 %v24628_v54, %v7690_v60  ;;  %18164 = vmatprep.mubr.msk.f32.mxu0 %vm1677_vm0, %v7743_v41  ;;  %v14047_v41 = vld [vmem:[%s22376_s15 + $0x490] sm:$0xff] }
0x121e   : > { %18165 = vmatmul.mubr.msk.f32.gmra.mrb[20].mxu0 %vm1677_vm0, %v7744_v48  ;;  %v7746_v39 = vmax.f32 %v7696_v50, 0.0  ;;  %v14049_v48 = vld [vmem:[%s22376_s15 + $0x4a0] sm:$0xff]  ;;  %v14050_v50 = vld [vmem:[%s22376_s15 + $0x4a8] sm:$0xff]  ;;  %v14051_v60 = vld [vmem:[%s22376_s15 + $0x4b0] sm:$0xff] }
0x121f   : > { %v7745_v53 = vmax.f32 %v7691_v31, 0.0  ;;  %v18132_v32 = vpop.f32.mrb[8].mxu1  ;;  %20713 = vmatpush3.bf16.msra.mxu0 %v20710_v62  ;;  %v14053_v31 = vld [vmem:[%s22376_s15 + $0x4c0] sm:$0xff] }
0x1220   : > { %v7706_v9 = vadd.f32 %v24628_v54, %v18132_v32  ;;  %v7700_v21 = vpop.f32.mrb[9].mxu1  ;;  %20715 = vmatprep.subr.bf16.mxu0 %v20714_v63  ;;  %v14057_v32 = vld [vmem:[%s22376_s15 + $0x4e0] sm:$0xff] }
0x1221   : > { %v7701_v14 = vadd.f32 %v24628_v54, %v7700_v21  ;;  %18167 = vmatprep.mubr.msk.f32.mxu0 %vm1677_vm0, %v7745_v53  ;;  %v14056_v53 = vld [vmem:[%s22376_s15 + $0x4d8] sm:$0xff] }
0x1222   : > { %18168 = vmatmul.mubr.msk.f32.gmra.mrb[22].mxu0 %vm1677_vm0, %v7746_v39  ;;  %v7748_v20 = vmax.f32 %v7706_v9, 0.0  ;;  %v14058_v39 = vld [vmem:[%s22376_s15 + $0x4e8] sm:$0xff]  ;;  %v14059_v9 = vld [vmem:[%s22376_s15 + $0x4f0] sm:$0xff]  ;;  %v14060_v21 = vld [vmem:[%s22376_s15 + $0x4f8] sm:$0xff] }
0x1223   : > { %v7747_v56 = vmax.f32 %v7701_v14, 0.0  ;;  %v18135_v15 = vpop.f32.mrb[10].mxu1  ;;  %20717 = vmatpush3.bf16.msra.mxu0 %v20714_v63  ;;  %v14052_v63 = vld [vmem:[%s22376_s15 + $0x4b8] sm:$0xff] }
0x1224   : > { %v7716_v22 = vadd.f32 %v24628_v54, %v18135_v15  ;;  %v7710_v27 = vpop.f32.mrb[11].mxu1  ;;  %20719 = vmatprep.subr.bf16.mxu0 %v20718_v57 }
0x1225   : > { %v7711_v59 = vadd.f32 %v24628_v54, %v7710_v27  ;;  %18170 = vmatprep.mubr.msk.f32.mxu0 %vm1677_vm0, %v7747_v56 }
0x1226   : > { %18171 = vmatmul.mubr.msk.f32.gmra.mrb[24].mxu0 %vm1677_vm0, %v7748_v20  ;;  %v7750_v17 = vmax.f32 %v7716_v22, 0.0 }
0x1227   : > { %v7749_v7 = vmax.f32 %v7711_v59, 0.0  ;;  %v18138_v6 = vpop.f32.mrb[12].mxu1  ;;  %20721 = vmatpush3.bf16.msra.mxu0 %v20718_v57 }
0x1228   : > { %v7726_v25 = vadd.f32 %v24628_v54, %v18138_v6  ;;  %v7720_v18 = vpop.f32.mrb[13].mxu1  ;;  %20723 = vmatprep.subr.bf16.mxu0 %v20722_v52 }
0x1229   : > { %v7721_v28 = vadd.f32 %v24628_v54, %v7720_v18  ;;  %18173 = vmatprep.mubr.msk.f32.mxu0 %vm1677_vm0, %v7749_v7 }
0x122a   : > { %18174 = vmatmul.mubr.msk.f32.gmra.mrb[26].mxu0 %vm1677_vm0, %v7750_v17  ;;  %v7752_v30 = vmax.f32 %v7726_v25, 0.0 }
0x122b   : > { %v7751_v38 = vmax.f32 %v7721_v28, 0.0  ;;  %v18141_v42 = vpop.f32.mrb[14].mxu1  ;;  %20725 = vmatpush3.bf16.msra.mxu0 %v20722_v52 }
0x122c   : > { %v7736_v40 = vadd.f32 %v24628_v54, %v18141_v42  ;;  %v7730_v24 = vpop.f32.mrb[15].mxu1  ;;  %20727 = vmatprep.subr.bf16.mxu0 %v20726_v12 }
0x122d   : > { %v7731_v49 = vadd.f32 %v24628_v54, %v7730_v24  ;;  %18176 = vmatprep.mubr.msk.f32.mxu0 %vm1677_vm0, %v7751_v38 }
0x122e   : > { %18177 = vmatmul.mubr.msk.f32.gmra.mrb[28].mxu0 %vm1677_vm0, %v7752_v30  ;;  %v7754_v4 = vmax.f32 %v7736_v40, 0.0 }
0x122f   : > { %v7753_v62 = vmax.f32 %v7731_v49, 0.0  ;;  %20729 = vmatpush3.bf16.msra.mxu0 %v20726_v12 }
0x1230   : > { %20731 = vmatprep.subr.bf16.mxu0 %v20730_v26 }
0x1231   : > { %18179 = vmatprep.mubr.msk.f32.mxu0 %vm1677_vm0, %v7753_v62 }
0x1232   : > { %18180 = vmatmul.mubr.msk.f32.gmra.mrb[30].mxu0 %vm1677_vm0, %v7754_v4 }
0x1233   : > { %20733 = vmatpush3.bf16.msra.mxu0 %v20730_v26  ;;  %18270 = vmatprep.mubr.f32.mxu0 %v14045_v19 }
0x1236   : > { %18271 = vmatmul.mubr.f32.vlgmr.msra.gmra.mrb[32].mxu0 %v14046_v29 }
0x1237   : > { %18273 = vmatprep.mubr.f32.mxu0 %v14047_v41 }
0x123a   : > { %18274 = vmatmul.mubr.f32.gmra.mrb[34].mxu0 %v14048_v33 }
0x123b   : > { %18276 = vmatprep.mubr.f32.mxu0 %v14049_v48 }
0x123e   : > { %18277 = vmatmul.mubr.f32.gmra.mrb[36].mxu0 %v14050_v50 }
0x123f   : > { %18279 = vmatprep.mubr.f32.mxu0 %v14051_v60 }
0x1242   : > { %18280 = vmatmul.mubr.f32.gmra.mrb[38].mxu0 %v14052_v63 }
0x1243   : > { %18282 = vmatprep.mubr.f32.mxu0 %v14053_v31 }
0x1246   : > { %18283 = vmatmul.mubr.f32.gmra.mrb[40].mxu0 %v14054_v3 }
0x1247   : > { %18285 = vmatprep.mubr.f32.mxu0 %v14055_v5 }
0x124a   : > { %18286 = vmatmul.mubr.f32.gmra.mrb[42].mxu0 %v14056_v53 }
0x124b   : > { %18288 = vmatprep.mubr.f32.mxu0 %v14057_v32 }
0x124e   : > { %18289 = vmatmul.mubr.f32.gmra.mrb[44].mxu0 %v14058_v39 }
0x124f   : > { %18291 = vmatprep.mubr.f32.mxu0 %v14059_v9 }
0x1252   : > { %18292 = vmatmul.mubr.f32.gmra.mrb[46].mxu0 %v14060_v21 }
0x1264   : > { %v7353_v57 = vpop.permute.xlu1 %7352 }
0x1265   : > { %7400 = vst.msk [vmem:[%s22719_s10 + $0x10] sm:$0xff] %vm7398_vm8, %v7353_v57  ;;  %v7351_v14 = vpop.permute.xlu0 %7350 }
0x1266   : > { %7399 = vst.msk [vmem:[%s22719_s10] sm:$0xff] %vm7398_vm8, %v7351_v14 }
0x1268   : > { %v7357_v34 = vpop.permute.xlu1 %7356 }
0x1269   : > { %7402 = vst.msk [vmem:[%s22719_s10 + $0x30] sm:$0xff] %vm7398_vm8, %v7357_v34  ;;  %v7355_v51 = vpop.permute.xlu0 %7354 }
0x126a   : > { %7401 = vst.msk [vmem:[%s22719_s10 + $0x20] sm:$0xff] %vm7398_vm8, %v7355_v51 }
0x126c   : > { %v7361_v56 = vpop.permute.xlu1 %7360 }
0x126d   : > { %7404 = vst.msk [vmem:[%s22719_s10 + $0x50] sm:$0xff] %vm7398_vm8, %v7361_v56  ;;  %v7359_v15 = vpop.permute.xlu0 %7358 }
0x126e   : > { %7403 = vst.msk [vmem:[%s22719_s10 + $0x40] sm:$0xff] %vm7398_vm8, %v7359_v15 }
0x1270   : > { %v7365_v20 = vpop.permute.xlu1 %7364 }
0x1271   : > { %7406 = vst.msk [vmem:[%s22719_s10 + $0x70] sm:$0xff] %vm7398_vm8, %v7365_v20  ;;  %v7363_v22 = vpop.permute.xlu0 %7362 }
0x1272   : > { %7405 = vst.msk [vmem:[%s22719_s10 + $0x60] sm:$0xff] %vm7398_vm8, %v7363_v22 }
0x1274   : > { %v7369_v27 = vpop.permute.xlu1 %7368 }
0x1275   : > { %7408 = vst.msk [vmem:[%s22719_s10 + $0x90] sm:$0xff] %vm7398_vm8, %v7369_v27  ;;  %v7367_v52 = vpop.permute.xlu0 %7366 }
0x1276   : > { %7407 = vst.msk [vmem:[%s22719_s10 + $0x80] sm:$0xff] %vm7398_vm8, %v7367_v52 }
0x1278   : > { %v7373_v59 = vpop.permute.xlu1 %7372 }
0x1279   : > { %7410 = vst.msk [vmem:[%s22719_s10 + $0xb0] sm:$0xff] %vm7398_vm8, %v7373_v59  ;;  %v7371_v0 = vpop.permute.xlu0 %7370 }
0x127a   : > { %7409 = vst.msk [vmem:[%s22719_s10 + $0xa0] sm:$0xff] %vm7398_vm8, %v7371_v0 }
0x127c   : > { %v7377_v2 = vpop.permute.xlu1 %7376 }
0x127d   : > { %7412 = vst.msk [vmem:[%s22719_s10 + $0xd0] sm:$0xff] %vm7398_vm8, %v7377_v2  ;;  %v7375_v7 = vpop.permute.xlu0 %7374 }
0x127e   : > { %7411 = vst.msk [vmem:[%s22719_s10 + $0xc0] sm:$0xff] %vm7398_vm8, %v7375_v7 }
0x1280   : > { %v7381_v6 = vpop.permute.xlu1 %7380 }
0x1281   : > { %7414 = vst.msk [vmem:[%s22719_s10 + $0xf0] sm:$0xff] %vm7398_vm8, %v7381_v6  ;;  %v7379_v17 = vpop.permute.xlu0 %7378 }
0x1282   : > { %7413 = vst.msk [vmem:[%s22719_s10 + $0xe0] sm:$0xff] %vm7398_vm8, %v7379_v17 }
0x12e9   : > { %v18160_v25 = vpop.f32.mrb[16].mxu0 }
0x12ea   : > { %v7878_v18 = vpop.f32.mrb[17].mxu0 }
0x12eb   : > { %v20670_v12 = vpack.c.bf16 %v18160_v25, %v7878_v18  ;;  %v24821_v18 = vld [vmem:[%s26651_s5] ss:$0 sm:$0xff] }
0x12ed   : > { %v18163_v28 = vpop.f32.mrb[18].mxu0  ;;  %20671 = vmatprep.subr.bf16.mxu1 %v20670_v12 }
0x12ee   : > { %v7888_v35 = vpop.f32.mrb[19].mxu0  ;;  %20673 = vmatpush3.bf16.msra.mxu1 %v20670_v12 }
0x12ef   : > { %v20674_v37 = vpack.c.bf16 %v18163_v28, %v7888_v35 }
0x12f1   : > { %v18166_v38 = vpop.f32.mrb[20].mxu0  ;;  %20675 = vmatprep.subr.bf16.mxu1 %v20674_v37 }
0x12f2   : > { %v7898_v42 = vpop.f32.mrb[21].mxu0  ;;  %20677 = vmatpush3.bf16.msra.mxu1 %v20674_v37 }
0x12f3   : > { %v20678_v30 = vpack.c.bf16 %v18166_v38, %v7898_v42 }
0x12f5   : > { %v18169_v40 = vpop.f32.mrb[22].mxu0  ;;  %20679 = vmatprep.subr.bf16.mxu1 %v20678_v30 }
0x12f6   : > { %v7908_v24 = vpop.f32.mrb[23].mxu0  ;;  %20681 = vmatpush3.bf16.msra.mxu1 %v20678_v30 }
0x12f7   : > { %v20682_v26 = vpack.c.bf16 %v18169_v40, %v7908_v24 }
0x12f9   : > { %v18172_v49 = vpop.f32.mrb[24].mxu0  ;;  %20683 = vmatprep.subr.bf16.mxu1 %v20682_v26 }
0x12fa   : > { %v7918_v62 = vpop.f32.mrb[25].mxu0  ;;  %20685 = vmatpush3.bf16.msra.mxu1 %v20682_v26 }
0x12fb   : > { %v20686_v4 = vpack.c.bf16 %v18172_v49, %v7918_v62 }
0x12fd   : > { %v18175_v19 = vpop.f32.mrb[26].mxu0  ;;  %20687 = vmatprep.subr.bf16.mxu1 %v20686_v4 }
0x12fe   : > { %v7928_v29 = vpop.f32.mrb[27].mxu0  ;;  %20689 = vmatpush3.bf16.msra.mxu1 %v20686_v4 }
0x12ff   : > { %v20690_v41 = vpack.c.bf16 %v18175_v19, %v7928_v29 }
0x1301   : > { %v18178_v33 = vpop.f32.mrb[28].mxu0  ;;  %20691 = vmatprep.subr.bf16.mxu1 %v20690_v41 }
0x1302   : > { %v7938_v48 = vpop.f32.mrb[29].mxu0  ;;  %20693 = vmatpush3.bf16.msra.mxu1 %v20690_v41 }
0x1303   : > { %v20694_v50 = vpack.c.bf16 %v18178_v33, %v7938_v48 }
0x1305   : > { %v18181_v60 = vpop.f32.mrb[30].mxu0  ;;  %20695 = vmatprep.subr.bf16.mxu1 %v20694_v50 }
0x1306   : > { %v7948_v63 = vpop.f32.mrb[31].mxu0  ;;  %20697 = vmatpush3.bf16.msra.mxu1 %v20694_v50 }
0x1307   : > { %v20698_v31 = vpack.c.bf16 %v18181_v60, %v7948_v63 }
0x1309   : > { %20699 = vmatprep.subr.bf16.mxu1 %v20698_v31  ;;  %v18272_v3 = vpop.f32.mrb[32].mxu0 }
0x130a   : > { %20701 = vmatpush3.bf16.msra.mxu1 %v20698_v31  ;;  %v8218_v5 = vpop.f32.mrb[33].mxu0 }
0x130b   : > { %v20734_v53 = vpack.c.bf16 %v18272_v3, %v8218_v5 }
0x130d   : > { %18215 = vmatmul.mubr.f32.vlgmr.msra.gmra.mrb[16].mxu1 %v24451_v45  ;;  %v18275_v32 = vpop.f32.mrb[34].mxu0  ;;  %20735 = vmatprep.subr.bf16.mxu1 %v20734_v53 }
0x130e   : > { %v8228_v39 = vpop.f32.mrb[35].mxu0  ;;  %20737 = vmatpush3.bf16.msra.mxu1 %v20734_v53  ;;  %18217 = vmatprep.mubr.f32.mxu1 %v24457_v55 }
0x130f   : > { %v20738_v9 = vpack.c.bf16 %v18275_v32, %v8228_v39 }
0x1311   : > { %18218 = vmatmul.mubr.f32.gmra.mrb[18].mxu1 %v24463_v61  ;;  %v18278_v21 = vpop.f32.mrb[36].mxu0  ;;  %20739 = vmatprep.subr.bf16.mxu1 %v20738_v9 }
0x1312   : > { %v8238_v57 = vpop.f32.mrb[37].mxu0  ;;  %20741 = vmatpush3.bf16.msra.mxu1 %v20738_v9  ;;  %18220 = vmatprep.mubr.f32.mxu1 %v24469_v1 }
0x1313   : > { %v20742_v14 = vpack.c.bf16 %v18278_v21, %v8238_v57 }
0x1315   : > { %18221 = vmatmul.mubr.f32.gmra.mrb[20].mxu1 %v24475_v43  ;;  %v18281_v34 = vpop.f32.mrb[38].mxu0  ;;  %20743 = vmatprep.subr.bf16.mxu1 %v20742_v14 }
0x1316   : > { %v8248_v51 = vpop.f32.mrb[39].mxu0  ;;  %20745 = vmatpush3.bf16.msra.mxu1 %v20742_v14  ;;  %18223 = vmatprep.mubr.f32.mxu1 %v24481_v10 }
0x1317   : > { %v20746_v56 = vpack.c.bf16 %v18281_v34, %v8248_v51 }
0x1319   : > { %18224 = vmatmul.mubr.f32.gmra.mrb[22].mxu1 %v24487_v36  ;;  %v18284_v15 = vpop.f32.mrb[40].mxu0  ;;  %20747 = vmatprep.subr.bf16.mxu1 %v20746_v56 }
0x131a   : > { %v8258_v20 = vpop.f32.mrb[41].mxu0  ;;  %20749 = vmatpush3.bf16.msra.mxu1 %v20746_v56  ;;  %18226 = vmatprep.mubr.f32.mxu1 %v24493_v13 }
0x131b   : > { %v20750_v22 = vpack.c.bf16 %v18284_v15, %v8258_v20  ;;  %v14119_v20 = vld [vmem:[%s26648_s2 + $0x510] sm:$0xff] }
0x131d   : > { %18227 = vmatmul.mubr.f32.gmra.mrb[24].mxu1 %v24499_v44  ;;  %v18287_v27 = vpop.f32.mrb[42].mxu0  ;;  %20751 = vmatprep.subr.bf16.mxu1 %v20750_v22 }
0x131e   : > { %v8268_v52 = vpop.f32.mrb[43].mxu0  ;;  %20753 = vmatpush3.bf16.msra.mxu1 %v20750_v22  ;;  %18229 = vmatprep.mubr.f32.mxu1 %v24505_v11  ;;  %v14120_v22 = vld [vmem:[%s26648_s2 + $0x518] sm:$0xff] }
0x131f   : > { %v20754_v59 = vpack.c.bf16 %v18287_v27, %v8268_v52 }
0x1321   : > { %18230 = vmatmul.mubr.f32.gmra.mrb[26].mxu1 %v24511_v46  ;;  %v18290_v0 = vpop.f32.mrb[44].mxu0  ;;  %20755 = vmatprep.subr.bf16.mxu1 %v20754_v59 }
0x1322   : > { %v8278_v2 = vpop.f32.mrb[45].mxu0  ;;  %20757 = vmatpush3.bf16.msra.mxu1 %v20754_v59  ;;  %18232 = vmatprep.mubr.f32.mxu1 %v24517_v58 }
0x1323   : > { %v20758_v7 = vpack.c.bf16 %v18290_v0, %v8278_v2 }
0x1325   : > { %18233 = vmatmul.mubr.f32.gmra.mrb[28].mxu1 %v24523_v16  ;;  %v18293_v6 = vpop.f32.mrb[46].mxu0  ;;  %20759 = vmatprep.subr.bf16.mxu1 %v20758_v7 }
0x1326   : > { %v8288_v17 = vpop.f32.mrb[47].mxu0  ;;  %20761 = vmatpush3.bf16.msra.mxu1 %v20758_v7  ;;  %18235 = vmatprep.mubr.f32.mxu1 %v24529_v23  ;;  %v20818_v7 = vpack.c.bf16 %v14120_v22, %v14119_v20 }
0x1327   : > { %v20762_v25 = vpack.c.bf16 %v18293_v6, %v8288_v17  ;;  %v14121_v17 = vld [vmem:[%s26648_s2 + $0x520] sm:$0xff] }
0x1329   : > { %18236 = vmatmul.mubr.f32.gmra.mrb[30].mxu1 %v24535_v8  ;;  %20763 = vmatprep.subr.bf16.mxu1 %v20762_v25 }
0x132a   : > { %20765 = vmatpush3.bf16.msra.mxu1 %v20762_v25  ;;  %18326 = vmatprep.mubr.f32.mxu1 %v24541_v47  ;;  %v14122_v25 = vld [vmem:[%s26648_s2 + $0x528] sm:$0xff] }
0x132d   : > { %18327 = vmatmul.mubr.f32.vlgmr.msra.gmra.mrb[32].mxu1 %v24451_v45  ;;  %v14077_v45 = vld [vmem:[%s26650_s4 + $0x240] sm:$0xff] }
0x132e   : > { %18329 = vmatprep.mubr.f32.mxu1 %v24457_v55  ;;  %v14078_v55 = vld [vmem:[%s26650_s4 + $0x248] sm:$0xff] }
0x1331   : > { %18330 = vmatmul.mubr.f32.gmra.mrb[34].mxu1 %v24463_v61  ;;  %v20766_v61 = vpack.c.bf16 %v14078_v55, %v14077_v45 }
0x1332   : > { %18332 = vmatprep.mubr.f32.mxu1 %v24469_v1  ;;  %v14079_v1 = vld [vmem:[%s26650_s4 + $0x250] sm:$0xff] }
0x1333   : > { %20767 = vmatprep.subr.bf16.mxu0 %v20766_v61 }
0x1334   : > { %20769 = vmatpush3.bf16.msra.mxu0 %v20766_v61 }
0x1335   : > { %18333 = vmatmul.mubr.f32.gmra.mrb[36].mxu1 %v24475_v43  ;;  %v14080_v43 = vld [vmem:[%s26650_s4 + $0x258] sm:$0xff] }
0x1336   : > { %18335 = vmatprep.mubr.f32.mxu1 %v24481_v10  ;;  %v20770_v10 = vpack.c.bf16 %v14080_v43, %v14079_v1 }
0x1338   : > { %20771 = vmatprep.subr.bf16.mxu0 %v20770_v10 }
0x1339   : > { %18336 = vmatmul.mubr.f32.gmra.mrb[38].mxu1 %v24487_v36  ;;  %20773 = vmatpush3.bf16.msra.mxu0 %v20770_v10  ;;  %v14081_v36 = vld [vmem:[%s26650_s4 + $0x260] sm:$0xff]  ;;  %v20822_v10 = vpack.c.bf16 %v14122_v25, %v14121_v17  ;;  %v14108_v17 = vld [vmem:[%s22376_s15 + $0x538] sm:$0xff] }
0x133a   : > { %18338 = vmatprep.mubr.f32.mxu1 %v24493_v13  ;;  %v14082_v13 = vld [vmem:[%s26650_s4 + $0x268] sm:$0xff]  ;;  %v14109_v25 = vld [vmem:[%s22376_s15 + $0x540] sm:$0xff] }
0x133d   : > { %18339 = vmatmul.mubr.f32.gmra.mrb[40].mxu1 %v24499_v44  ;;  %v20774_v44 = vpack.c.bf16 %v14082_v13, %v14081_v36  ;;  %v14123_v13 = vld [vmem:[%s26648_s2 + $0x530] sm:$0xff] }
0x133e   : > { %18341 = vmatprep.mubr.f32.mxu1 %v24505_v11  ;;  %v14083_v11 = vld [vmem:[%s26650_s4 + $0x270] sm:$0xff] }
0x133f   : > { %20775 = vmatprep.subr.bf16.mxu0 %v20774_v44 }
0x1340   : > { %20777 = vmatpush3.bf16.msra.mxu0 %v20774_v44  ;;  %v14124_v44 = vld [vmem:[%s26648_s2 + $0x538] sm:$0xff] }
0x1341   : > { %18342 = vmatmul.mubr.f32.gmra.mrb[42].mxu1 %v24511_v46  ;;  %v14084_v46 = vld [vmem:[%s26650_s4 + $0x278] sm:$0xff] }
0x1342   : > { %18344 = vmatprep.mubr.f32.mxu1 %v24517_v58  ;;  %v20778_v58 = vpack.c.bf16 %v14084_v46, %v14083_v11 }
0x1344   : > { %20779 = vmatprep.subr.bf16.mxu0 %v20778_v58 }
0x1345   : > { %18345 = vmatmul.mubr.f32.gmra.mrb[44].mxu1 %v24523_v16  ;;  %20781 = vmatpush3.bf16.msra.mxu0 %v20778_v58  ;;  %v14117_v16 = vld [vmem:[%s26648_s2 + $0x500] sm:$0xff] }
0x1346   : > { %18347 = vmatprep.mubr.f32.mxu1 %v24529_v23  ;;  %v14118_v23 = vld [vmem:[%s26648_s2 + $0x508] sm:$0xff] }
0x1349   : > { %18348 = vmatmul.mubr.f32.gmra.mrb[46].mxu1 %v24535_v8  ;;  %v24815_v8 = vpack.c.bf16 %v14118_v23, %v14117_v16 }
0x134a   : > { %18422 = vmatprep.mubr.f32.mxu1 %v24541_v47 }
0x134b   : > { %20815 = vmatprep.subr.bf16.mxu0 %v24815_v8 }
0x13e0   : > { %v18216_v47 = vpop.f32.mrb[16].mxu1 }
0x13e1   : > { %v8029_v12 = vadd.f32 %v24821_v18, %v18216_v47  ;;  %v8023_v28 = vpop.f32.mrb[17].mxu1 }
0x13e2   : > { %v8024_v35 = vadd.f32 %v24821_v18, %v8023_v28  ;;  %v14126_v28 = vld [vmem:[%s26648_s2 + $0x548] sm:$0xff] }
0x13e3   : > { %8103 = vst.msk [vmem:[%s22719_s10 + $0x18] sm:$0xff] %vm2022_vm1, %v8029_v12  ;;  %v14125_v12 = vld [vmem:[%s26648_s2 + $0x540] sm:$0xff] }
0x13e4   : > { %8102 = vst.msk [vmem:[%s22719_s10 + $0x8] sm:$0xff] %vm2022_vm1, %v8024_v35  ;;  %v18219_v37 = vpop.f32.mrb[18].mxu1 }
0x13e5   : > { %v8039_v38 = vadd.f32 %v24821_v18, %v18219_v37  ;;  %v8033_v42 = vpop.f32.mrb[19].mxu1 }
0x13e6   : > { %v8034_v30 = vadd.f32 %v24821_v18, %v8033_v42 }
0x13e7   : > { %8105 = vst.msk [vmem:[%s22719_s10 + $0x38] sm:$0xff] %vm2022_vm1, %v8039_v38 }
0x13e8   : > { %8104 = vst.msk [vmem:[%s22719_s10 + $0x28] sm:$0xff] %vm2022_vm1, %v8034_v30  ;;  %v18222_v40 = vpop.f32.mrb[20].mxu1 }
0x13e9   : > { %v8049_v24 = vadd.f32 %v24821_v18, %v18222_v40  ;;  %v8043_v26 = vpop.f32.mrb[21].mxu1  ;;  %v20830_v40 = vpack.c.bf16 %v14126_v28, %v14125_v12 }
0x13ea   : > { %v8044_v49 = vadd.f32 %v24821_v18, %v8043_v26  ;;  %v14127_v26 = vld [vmem:[%s26648_s2 + $0x550] sm:$0xff] }
0x13eb   : > { %8107 = vst.msk [vmem:[%s22719_s10 + $0x58] sm:$0xff] %vm2022_vm1, %v8049_v24 }
0x13ec   : > { %8106 = vst.msk [vmem:[%s22719_s10 + $0x48] sm:$0xff] %vm2022_vm1, %v8044_v49  ;;  %v18225_v62 = vpop.f32.mrb[22].mxu1  ;;  %v14128_v49 = vld [vmem:[%s26648_s2 + $0x558] sm:$0xff] }
0x13ed   : > { %v8059_v4 = vadd.f32 %v24821_v18, %v18225_v62  ;;  %v8053_v19 = vpop.f32.mrb[23].mxu1 }
0x13ee   : > { %v8054_v29 = vadd.f32 %v24821_v18, %v8053_v19 }
0x13ef   : > { %8109 = vst.msk [vmem:[%s22719_s10 + $0x78] sm:$0xff] %vm2022_vm1, %v8059_v4 }
0x13f0   : > { %8108 = vst.msk [vmem:[%s22719_s10 + $0x68] sm:$0xff] %vm2022_vm1, %v8054_v29  ;;  %v18228_v41 = vpop.f32.mrb[24].mxu1 }
0x13f1   : > { %v8069_v33 = vadd.f32 %v24821_v18, %v18228_v41  ;;  %v8063_v48 = vpop.f32.mrb[25].mxu1 }
0x13f2   : > { %v8064_v50 = vadd.f32 %v24821_v18, %v8063_v48 }
0x13f3   : > { %8111 = vst.msk [vmem:[%s22719_s10 + $0x98] sm:$0xff] %vm2022_vm1, %v8069_v33  ;;  %v20834_v33 = vpack.c.bf16 %v14128_v49, %v14127_v26 }
0x13f4   : > { %8110 = vst.msk [vmem:[%s22719_s10 + $0x88] sm:$0xff] %vm2022_vm1, %v8064_v50  ;;  %v18231_v60 = vpop.f32.mrb[26].mxu1  ;;  %v14129_v50 = vld [vmem:[%s26648_s2 + $0x560] sm:$0xff] }
0x13f5   : > { %v8079_v63 = vadd.f32 %v24821_v18, %v18231_v60  ;;  %v8073_v31 = vpop.f32.mrb[27].mxu1  ;;  %v14130_v60 = vld [vmem:[%s26648_s2 + $0x568] sm:$0xff] }
0x13f6   : > { %v8074_v3 = vadd.f32 %v24821_v18, %v8073_v31 }
0x13f7   : > { %8113 = vst.msk [vmem:[%s22719_s10 + $0xb8] sm:$0xff] %vm2022_vm1, %v8079_v63 }
0x13f8   : > { %8112 = vst.msk [vmem:[%s22719_s10 + $0xa8] sm:$0xff] %vm2022_vm1, %v8074_v3  ;;  %v18234_v5 = vpop.f32.mrb[28].mxu1 }
0x13f9   : > { %v8089_v53 = vadd.f32 %v24821_v18, %v18234_v5  ;;  %v8083_v32 = vpop.f32.mrb[29].mxu1 }
0x13fa   : > { %v8084_v39 = vadd.f32 %v24821_v18, %v8083_v32  ;;  %v20838_v32 = vpack.c.bf16 %v14130_v60, %v14129_v50  ;;  %v24965_v50 = vld [vmem:[%s26647_s1 + $0x8] sm:$0xff] }
0x13fb   : > { %8115 = vst.msk [vmem:[%s22719_s10 + $0xd8] sm:$0xff] %vm2022_vm1, %v8089_v53 }
0x13fc   : > { %8114 = vst.msk [vmem:[%s22719_s10 + $0xc8] sm:$0xff] %vm2022_vm1, %v8084_v39  ;;  %v18237_v9 = vpop.f32.mrb[30].mxu1 }
0x13fd   : > { %v8099_v21 = vadd.f32 %v24821_v18, %v18237_v9  ;;  %v8093_v57 = vpop.f32.mrb[31].mxu1  ;;  %v14131_v9 = vld [vmem:[%s26648_s2 + $0x570] sm:$0xff] }
0x13fe   : > { %v8094_v14 = vadd.f32 %v24821_v18, %v8093_v57 }
0x13ff   : > { %8117 = vst.msk [vmem:[%s22719_s10 + $0xf8] sm:$0xff] %vm2022_vm1, %v8099_v21  ;;  %v14132_v21 = vld [vmem:[%s26648_s2 + $0x578] sm:$0xff] }
0x1400   : > { %8116 = vst.msk [vmem:[%s22719_s10 + $0xe8] sm:$0xff] %vm2022_vm1, %v8094_v14  ;;  %v18328_v34 = vpop.f32.mrb[32].mxu1 }
0x1401   : > { %v8369_v51 = vadd.f32 %v24628_v54, %v18328_v34  ;;  %v8363_v56 = vpop.f32.mrb[33].mxu1 }
0x1402   : > { %v8364_v15 = vadd.f32 %v24628_v54, %v8363_v56 }
0x1403   : > { %v8443_v59 = vmax.f32 %v8369_v51, 0.0 }
0x1404   : > { %v8442_v27 = vmax.f32 %v8364_v15, 0.0  ;;  %v18331_v52 = vpop.f32.mrb[34].mxu1  ;;  %v20842_v15 = vpack.c.bf16 %v14132_v21, %v14131_v9  ;;  %v24989_v21 = vld [vmem:[%s26647_s1 + $0x28] sm:$0xff] }
0x1405   : > { %v8379_v0 = vadd.f32 %v24628_v54, %v18331_v52  ;;  %v8373_v2 = vpop.f32.mrb[35].mxu1  ;;  %v14101_v52 = vld [vmem:[%s22376_s15 + $0x500] sm:$0xff] }
0x1406   : > { %v8374_v6 = vadd.f32 %v24628_v54, %v8373_v2  ;;  %18366 = vmatprep.mubr.msk.f32.mxu0 %vm1677_vm0, %v8442_v27  ;;  %v14105_v2 = vld [vmem:[%s22376_s15 + $0x520] sm:$0xff] }
0x1407   : > { %18367 = vmatmul.mubr.msk.f32.vlgmr.msra.gmra.mrb[48].mxu0 %vm1677_vm0, %v8443_v59  ;;  %v8445_v61 = vmax.f32 %v8379_v0, 0.0  ;;  %v14103_v59 = vld [vmem:[%s22376_s15 + $0x510] sm:$0xff]  ;;  %v14104_v0 = vld [vmem:[%s22376_s15 + $0x518] sm:$0xff] }
0x1408   : > { %v8444_v45 = vmax.f32 %v8374_v6, 0.0  ;;  %v18334_v55 = vpop.f32.mrb[36].mxu1  ;;  %20817 = vmatpush3.bf16.msra.mxu0 %v24815_v8  ;;  %v20826_v8 = vpack.c.bf16 %v14124_v44, %v14123_v13  ;;  %v14107_v6 = vld [vmem:[%s22376_s15 + $0x530] sm:$0xff] }
0x1409   : > { %v8389_v1 = vadd.f32 %v24628_v54, %v18334_v55  ;;  %v8383_v43 = vpop.f32.mrb[37].mxu1  ;;  %20819 = vmatprep.subr.bf16.mxu0 %v20818_v7  ;;  %v14111_v55 = vld [vmem:[%s22376_s15 + $0x550] sm:$0xff] }
0x140a   : > { %v8384_v36 = vadd.f32 %v24628_v54, %v8383_v43  ;;  %18369 = vmatprep.mubr.msk.f32.mxu0 %vm1677_vm0, %v8444_v45  ;;  %v14110_v45 = vld [vmem:[%s22376_s15 + $0x548] sm:$0xff] }
0x140b   : > { %18370 = vmatmul.mubr.msk.f32.gmra.mrb[50].mxu0 %vm1677_vm0, %v8445_v61  ;;  %v8447_v58 = vmax.f32 %v8389_v1, 0.0  ;;  %v14112_v61 = vld [vmem:[%s22376_s15 + $0x558] sm:$0xff]  ;;  %v14113_v1 = vld [vmem:[%s22376_s15 + $0x560] sm:$0xff]  ;;  %v14114_v43 = vld [vmem:[%s22376_s15 + $0x568] sm:$0xff] }
0x140c   : > { %v8446_v11 = vmax.f32 %v8384_v36, 0.0  ;;  %v18337_v46 = vpop.f32.mrb[38].mxu1  ;;  %20821 = vmatpush3.bf16.msra.mxu0 %v20818_v7  ;;  %v14106_v7 = vld [vmem:[%s22376_s15 + $0x528] sm:$0xff]  ;;  %v14116_v36 = vld [vmem:[%s22376_s15 + $0x578] sm:$0xff] }
0x140d   : > { %v8399_v16 = vadd.f32 %v24628_v54, %v18337_v46  ;;  %v8393_v23 = vpop.f32.mrb[39].mxu1  ;;  %20823 = vmatprep.subr.bf16.mxu0 %v20822_v10 }
0x140e   : > { %v8394_v47 = vadd.f32 %v24628_v54, %v8393_v23  ;;  %18372 = vmatprep.mubr.msk.f32.mxu0 %vm1677_vm0, %v8446_v11 }
0x140f   : > { %18373 = vmatmul.mubr.msk.f32.gmra.mrb[52].mxu0 %vm1677_vm0, %v8447_v58  ;;  %v8449_v38 = vmax.f32 %v8399_v16, 0.0 }
0x1410   : > { %v8448_v35 = vmax.f32 %v8394_v47, 0.0  ;;  %v18340_v37 = vpop.f32.mrb[40].mxu1  ;;  %20825 = vmatpush3.bf16.msra.mxu0 %v20822_v10  ;;  %v14115_v10 = vld [vmem:[%s22376_s15 + $0x570] sm:$0xff] }
0x1411   : > { %v8409_v42 = vadd.f32 %v24628_v54, %v18340_v37  ;;  %v8403_v30 = vpop.f32.mrb[41].mxu1  ;;  %20827 = vmatprep.subr.bf16.mxu0 %v20826_v8 }
0x1412   : > { %v8404_v24 = vadd.f32 %v24628_v54, %v8403_v30  ;;  %18375 = vmatprep.mubr.msk.f32.mxu0 %vm1677_vm0, %v8448_v35 }
0x1413   : > { %18376 = vmatmul.mubr.msk.f32.gmra.mrb[54].mxu0 %vm1677_vm0, %v8449_v38  ;;  %v8451_v19 = vmax.f32 %v8409_v42, 0.0 }
0x1414   : > { %v8450_v62 = vmax.f32 %v8404_v24, 0.0  ;;  %v18343_v4 = vpop.f32.mrb[42].mxu1  ;;  %20829 = vmatpush3.bf16.msra.mxu0 %v20826_v8 }
0x1415   : > { %v8419_v29 = vadd.f32 %v24628_v54, %v18343_v4  ;;  %v8413_v41 = vpop.f32.mrb[43].mxu1  ;;  %20831 = vmatprep.subr.bf16.mxu0 %v20830_v40 }
0x1416   : > { %v8414_v48 = vadd.f32 %v24628_v54, %v8413_v41  ;;  %18378 = vmatprep.mubr.msk.f32.mxu0 %vm1677_vm0, %v8450_v62 }
0x1417   : > { %18379 = vmatmul.mubr.msk.f32.gmra.mrb[56].mxu0 %vm1677_vm0, %v8451_v19  ;;  %v8453_v3 = vmax.f32 %v8419_v29, 0.0 }
0x1418   : > { %v8452_v63 = vmax.f32 %v8414_v48, 0.0  ;;  %v18346_v31 = vpop.f32.mrb[44].mxu1  ;;  %20833 = vmatpush3.bf16.msra.mxu0 %v20830_v40 }
0x1419   : > { %v8429_v5 = vadd.f32 %v24628_v54, %v18346_v31  ;;  %v8423_v53 = vpop.f32.mrb[45].mxu1  ;;  %20835 = vmatprep.subr.bf16.mxu0 %v20834_v33  ;;  %v24971_v31 = vld [vmem:[%s26647_s1 + $0x10] sm:$0xff] }
0x141a   : > { %v8424_v39 = vadd.f32 %v24628_v54, %v8423_v53  ;;  %18381 = vmatprep.mubr.msk.f32.mxu0 %vm1677_vm0, %v8452_v63 }
0x141b   : > { %18382 = vmatmul.mubr.msk.f32.gmra.mrb[58].mxu0 %vm1677_vm0, %v8453_v3  ;;  %v8455_v34 = vmax.f32 %v8429_v5, 0.0  ;;  %v24977_v5 = vld [vmem:[%s26647_s1 + $0x18] sm:$0xff] }
0x141c   : > { %v8454_v57 = vmax.f32 %v8424_v39, 0.0  ;;  %v18349_v14 = vpop.f32.mrb[46].mxu1  ;;  %20837 = vmatpush3.bf16.msra.mxu0 %v20834_v33  ;;  %v24983_v39 = vld [vmem:[%s26647_s1 + $0x20] sm:$0xff] }
0x141d   : > { %v8439_v51 = vadd.f32 %v24628_v54, %v18349_v14  ;;  %v8433_v56 = vpop.f32.mrb[47].mxu1  ;;  %20839 = vmatprep.subr.bf16.mxu0 %v20838_v32 }
0x141e   : > { %v8434_v20 = vadd.f32 %v24628_v54, %v8433_v56  ;;  %18384 = vmatprep.mubr.msk.f32.mxu0 %vm1677_vm0, %v8454_v57  ;;  %v14102_v54 = vld [vmem:[%s22376_s15 + $0x508] sm:$0xff]  ;;  %v25001_v56 = vld [vmem:[%s26647_s1 + $0x38] sm:$0xff] }
0x141f   : > { %18385 = vmatmul.mubr.msk.f32.gmra.mrb[60].mxu0 %vm1677_vm0, %v8455_v34  ;;  %v8457_v27 = vmax.f32 %v8439_v51, 0.0  ;;  %v24995_v34 = vld [vmem:[%s26647_s1 + $0x30] sm:$0xff] }
0x1420   : > { %v8456_v22 = vmax.f32 %v8434_v20, 0.0  ;;  %20841 = vmatpush3.bf16.msra.mxu0 %v20838_v32 }
0x1421   : > { %20843 = vmatprep.subr.bf16.mxu0 %v20842_v15 }
0x1422   : > { %18387 = vmatprep.mubr.msk.f32.mxu0 %vm1677_vm0, %v8456_v22  ;;  %v25007_v22 = vld [vmem:[%s26647_s1 + $0x40] sm:$0xff] }
0x1423   : > { %18388 = vmatmul.mubr.msk.f32.gmra.mrb[62].mxu0 %vm1677_vm0, %v8457_v27 }
0x1424   : > { %20845 = vmatpush3.bf16.msra.mxu0 %v20842_v15  ;;  %18478 = vmatprep.mubr.f32.mxu0 %v14101_v52  ;;  %v25013_v52 = vld [vmem:[%s26647_s1 + $0x48] sm:$0xff] }
0x1427   : > { %18479 = vmatmul.mubr.f32.vlgmr.msra.gmra.mrb[64].mxu0 %v14102_v54 }
0x1428   : > { %18481 = vmatprep.mubr.f32.mxu0 %v14103_v59 }
0x142b   : > { %18482 = vmatmul.mubr.f32.gmra.mrb[66].mxu0 %v14104_v0  ;;  %v25019_v0 = vld [vmem:[%s26647_s1 + $0x50] sm:$0xff] }
0x142c   : > { %18484 = vmatprep.mubr.f32.mxu0 %v14105_v2 }
0x142f   : > { %18485 = vmatmul.mubr.f32.gmra.mrb[68].mxu0 %v14106_v7  ;;  %v25025_v7 = vld [vmem:[%s26647_s1 + $0x58] sm:$0xff] }
0x1430   : > { %18487 = vmatprep.mubr.f32.mxu0 %v14107_v6 }
0x1433   : > { %18488 = vmatmul.mubr.f32.gmra.mrb[70].mxu0 %v14108_v17 }
0x1434   : > { %18490 = vmatprep.mubr.f32.mxu0 %v14109_v25  ;;  %v25031_v25 = vld [vmem:[%s26647_s1 + $0x60] sm:$0xff] }
0x1437   : > { %18491 = vmatmul.mubr.f32.gmra.mrb[72].mxu0 %v14110_v45 }
0x1438   : > { %18493 = vmatprep.mubr.f32.mxu0 %v14111_v55  ;;  %v25037_v55 = vld [vmem:[%s26647_s1 + $0x68] sm:$0xff] }
0x143b   : > { %18494 = vmatmul.mubr.f32.gmra.mrb[74].mxu0 %v14112_v61 }
0x143c   : > { %18496 = vmatprep.mubr.f32.mxu0 %v14113_v1 }
0x143f   : > { %18497 = vmatmul.mubr.f32.gmra.mrb[76].mxu0 %v14114_v43  ;;  %v25043_v43 = vld [vmem:[%s26647_s1 + $0x70] sm:$0xff] }
0x1440   : > { %18499 = vmatprep.mubr.f32.mxu0 %v14115_v10 }
0x1443   : > { %18500 = vmatmul.mubr.f32.gmra.mrb[78].mxu0 %v14116_v36  ;;  %v25049_v36 = vld [vmem:[%s26647_s1 + $0x78] sm:$0xff] }
0x14da   : > { %v18368_v13 = vpop.f32.mrb[48].mxu0 }
0x14db   : > { %v8581_v44 = vpop.f32.mrb[49].mxu0 }
0x14dc   : > { %v20782_v11 = vpack.c.bf16 %v18368_v13, %v8581_v44  ;;  %v25055_v13 = vld [vmem:[%s26647_s1] sm:$0xff] }
0x14dd   : > { %v14133_v44 = vld [vmem:[%s26650_s4 + $0x280] sm:$0xff] }
0x14de   : > { %v18371_v46 = vpop.f32.mrb[50].mxu0  ;;  %20783 = vmatprep.subr.bf16.mxu1 %v20782_v11 }
0x14df   : > { %v8591_v58 = vpop.f32.mrb[51].mxu0  ;;  %20785 = vmatpush3.bf16.msra.mxu1 %v20782_v11  ;;  %v14134_v11 = vld [vmem:[%s26650_s4 + $0x288] sm:$0xff] }
0x14e0   : > { %v20786_v16 = vpack.c.bf16 %v18371_v46, %v8591_v58  ;;  %v20878_v46 = vpack.c.bf16 %v14134_v11, %v14133_v44  ;;  %v14135_v58 = vld [vmem:[%s26650_s4 + $0x290] sm:$0xff]  ;;  %v25142_v11 = vld [vmem:[%s26649_s3] ss:$0 sm:$0xff] }
0x14e2   : > { %v18374_v23 = vpop.f32.mrb[52].mxu0  ;;  %20787 = vmatprep.subr.bf16.mxu1 %v20786_v16  ;;  %20879 = vmatprep.subr.bf16.mxu0 %v20878_v46 }
0x14e3   : > { %v8601_v8 = vpop.f32.mrb[53].mxu0  ;;  %20789 = vmatpush3.bf16.msra.mxu1 %v20786_v16  ;;  %20881 = vmatpush3.bf16.msra.mxu0 %v20878_v46  ;;  %v14136_v16 = vld [vmem:[%s26650_s4 + $0x298] sm:$0xff] }
0x14e4   : > { %v20790_v47 = vpack.c.bf16 %v18374_v23, %v8601_v8  ;;  %v20882_v23 = vpack.c.bf16 %v14136_v16, %v14135_v58  ;;  %v14137_v8 = vld [vmem:[%s26650_s4 + $0x2a0] sm:$0xff] }
0x14e6   : > { %v18377_v12 = vpop.f32.mrb[54].mxu0  ;;  %20791 = vmatprep.subr.bf16.mxu1 %v20790_v47  ;;  %20883 = vmatprep.subr.bf16.mxu0 %v20882_v23 }
0x14e7   : > { %v8611_v28 = vpop.f32.mrb[55].mxu0  ;;  %20793 = vmatpush3.bf16.msra.mxu1 %v20790_v47  ;;  %20885 = vmatpush3.bf16.msra.mxu0 %v20882_v23  ;;  %v14138_v47 = vld [vmem:[%s26650_s4 + $0x2a8] sm:$0xff]  ;;  %v14175_v23 = vld [vmem:[%s26648_s2 + $0x590] sm:$0xff] }
0x14e8   : > { %v20794_v35 = vpack.c.bf16 %v18377_v12, %v8611_v28  ;;  %v20886_v12 = vpack.c.bf16 %v14138_v47, %v14137_v8  ;;  %v14139_v28 = vld [vmem:[%s26650_s4 + $0x2b0] sm:$0xff] }
0x14ea   : > { %v18380_v37 = vpop.f32.mrb[56].mxu0  ;;  %20795 = vmatprep.subr.bf16.mxu1 %v20794_v35  ;;  %20887 = vmatprep.subr.bf16.mxu0 %v20886_v12 }
0x14eb   : > { %v8621_v38 = vpop.f32.mrb[57].mxu0  ;;  %20797 = vmatpush3.bf16.msra.mxu1 %v20794_v35  ;;  %20889 = vmatpush3.bf16.msra.mxu0 %v20886_v12  ;;  %v14140_v35 = vld [vmem:[%s26650_s4 + $0x2b8] sm:$0xff] }
0x14ec   : > { %v20798_v42 = vpack.c.bf16 %v18380_v37, %v8621_v38  ;;  %v20890_v37 = vpack.c.bf16 %v14140_v35, %v14139_v28  ;;  %v14173_v38 = vld [vmem:[%s26648_s2 + $0x580] sm:$0xff] }
0x14ee   : > { %v18383_v30 = vpop.f32.mrb[58].mxu0  ;;  %20799 = vmatprep.subr.bf16.mxu1 %v20798_v42  ;;  %20891 = vmatprep.subr.bf16.mxu0 %v20890_v37 }
0x14ef   : > { %v8631_v40 = vpop.f32.mrb[59].mxu0  ;;  %20801 = vmatpush3.bf16.msra.mxu1 %v20798_v42  ;;  %20893 = vmatpush3.bf16.msra.mxu0 %v20890_v37  ;;  %v14174_v42 = vld [vmem:[%s26648_s2 + $0x588] sm:$0xff] }
0x14f0   : > { %v20802_v24 = vpack.c.bf16 %v18383_v30, %v8631_v40  ;;  %v25104_v30 = vpack.c.bf16 %v14174_v42, %v14173_v38  ;;  %v14177_v42 = vld [vmem:[%s26648_s2 + $0x5a0] sm:$0xff] }
0x14f2   : > { %v18386_v26 = vpop.f32.mrb[60].mxu0  ;;  %20803 = vmatprep.subr.bf16.mxu1 %v20802_v24  ;;  %20927 = vmatprep.subr.bf16.mxu0 %v25104_v30 }
0x14f3   : > { %v8641_v49 = vpop.f32.mrb[61].mxu0  ;;  %20805 = vmatpush3.bf16.msra.mxu1 %v20802_v24 }
0x14f4   : > { %v20806_v62 = vpack.c.bf16 %v18386_v26, %v8641_v49 }
0x14f6   : > { %v18389_v4 = vpop.f32.mrb[62].mxu0  ;;  %20807 = vmatprep.subr.bf16.mxu1 %v20806_v62 }
0x14f7   : > { %v8651_v19 = vpop.f32.mrb[63].mxu0  ;;  %20809 = vmatpush3.bf16.msra.mxu1 %v20806_v62 }
0x14f8   : > { %v20810_v29 = vpack.c.bf16 %v18389_v4, %v8651_v19 }
0x14fa   : > { %20811 = vmatprep.subr.bf16.mxu1 %v20810_v29  ;;  %v18480_v41 = vpop.f32.mrb[64].mxu0 }
0x14fb   : > { %20813 = vmatpush3.bf16.msra.mxu1 %v20810_v29  ;;  %v8985_v33 = vpop.f32.mrb[65].mxu0 }
0x14fc   : > { %v20846_v48 = vpack.c.bf16 %v18480_v41, %v8985_v33 }
0x14fe   : > { %18423 = vmatmul.mubr.f32.vlgmr.msra.gmra.mrb[48].mxu1 %v24965_v50  ;;  %v18483_v60 = vpop.f32.mrb[66].mxu0  ;;  %20847 = vmatprep.subr.bf16.mxu1 %v20846_v48 }
0x14ff   : > { %v8995_v63 = vpop.f32.mrb[67].mxu0  ;;  %20849 = vmatpush3.bf16.msra.mxu1 %v20846_v48  ;;  %18425 = vmatprep.mubr.f32.mxu1 %v24971_v31 }
0x1500   : > { %v20850_v3 = vpack.c.bf16 %v18483_v60, %v8995_v63 }
0x1502   : > { %18426 = vmatmul.mubr.f32.gmra.mrb[50].mxu1 %v24977_v5  ;;  %v18486_v53 = vpop.f32.mrb[68].mxu0  ;;  %20851 = vmatprep.subr.bf16.mxu1 %v20850_v3 }
0x1503   : > { %v9005_v32 = vpop.f32.mrb[69].mxu0  ;;  %20853 = vmatpush3.bf16.msra.mxu1 %v20850_v3  ;;  %18428 = vmatprep.mubr.f32.mxu1 %v24983_v39 }
0x1504   : > { %v20854_v9 = vpack.c.bf16 %v18486_v53, %v9005_v32 }
0x1506   : > { %18429 = vmatmul.mubr.f32.gmra.mrb[52].mxu1 %v24989_v21  ;;  %v18489_v57 = vpop.f32.mrb[70].mxu0  ;;  %20855 = vmatprep.subr.bf16.mxu1 %v20854_v9 }
0x1507   : > { %v9015_v14 = vpop.f32.mrb[71].mxu0  ;;  %20857 = vmatpush3.bf16.msra.mxu1 %v20854_v9  ;;  %18431 = vmatprep.mubr.f32.mxu1 %v24995_v34 }
0x1508   : > { %v20858_v51 = vpack.c.bf16 %v18489_v57, %v9015_v14 }
0x150a   : > { %18432 = vmatmul.mubr.f32.gmra.mrb[54].mxu1 %v25001_v56  ;;  %v18492_v15 = vpop.f32.mrb[72].mxu0  ;;  %20859 = vmatprep.subr.bf16.mxu1 %v20858_v51 }
0x150b   : > { %v9025_v20 = vpop.f32.mrb[73].mxu0  ;;  %20861 = vmatpush3.bf16.msra.mxu1 %v20858_v51  ;;  %18434 = vmatprep.mubr.f32.mxu1 %v25007_v22 }
0x150c   : > { %v20862_v27 = vpack.c.bf16 %v18492_v15, %v9025_v20 }
0x150e   : > { %18435 = vmatmul.mubr.f32.gmra.mrb[56].mxu1 %v25013_v52  ;;  %v18495_v54 = vpop.f32.mrb[74].mxu0  ;;  %20863 = vmatprep.subr.bf16.mxu1 %v20862_v27 }
0x150f   : > { %v9035_v59 = vpop.f32.mrb[75].mxu0  ;;  %20865 = vmatpush3.bf16.msra.mxu1 %v20862_v27  ;;  %18437 = vmatprep.mubr.f32.mxu1 %v25019_v0 }
0x1510   : > { %v20866_v2 = vpack.c.bf16 %v18495_v54, %v9035_v59 }
0x1512   : > { %18438 = vmatmul.mubr.f32.gmra.mrb[58].mxu1 %v25025_v7  ;;  %v18498_v6 = vpop.f32.mrb[76].mxu0  ;;  %20867 = vmatprep.subr.bf16.mxu1 %v20866_v2 }
0x1513   : > { %v9045_v17 = vpop.f32.mrb[77].mxu0  ;;  %20869 = vmatpush3.bf16.msra.mxu1 %v20866_v2  ;;  %18440 = vmatprep.mubr.f32.mxu1 %v25031_v25 }
0x1514   : > { %v20870_v45 = vpack.c.bf16 %v18498_v6, %v9045_v17 }
0x1516   : > { %18441 = vmatmul.mubr.f32.gmra.mrb[60].mxu1 %v25037_v55  ;;  %v18501_v61 = vpop.f32.mrb[78].mxu0  ;;  %20871 = vmatprep.subr.bf16.mxu1 %v20870_v45 }
0x1517   : > { %v9055_v1 = vpop.f32.mrb[79].mxu0  ;;  %20873 = vmatpush3.bf16.msra.mxu1 %v20870_v45  ;;  %18443 = vmatprep.mubr.f32.mxu1 %v25043_v43 }
0x1518   : > { %v20874_v10 = vpack.c.bf16 %v18501_v61, %v9055_v1 }
0x151a   : > { %18444 = vmatmul.mubr.f32.gmra.mrb[62].mxu1 %v25049_v36  ;;  %20875 = vmatprep.subr.bf16.mxu1 %v20874_v10 }
0x151b   : > { %20877 = vmatpush3.bf16.msra.mxu1 %v20874_v10  ;;  %18534 = vmatprep.mubr.f32.mxu1 %v25055_v13 }
0x151e   : > { %18535 = vmatmul.mubr.f32.vlgmr.msra.gmra.mrb[64].mxu1 %v24965_v50 }
0x151f   : > { %18537 = vmatprep.mubr.f32.mxu1 %v24971_v31 }
0x1522   : > { %18538 = vmatmul.mubr.f32.gmra.mrb[66].mxu1 %v24977_v5 }
0x1523   : > { %18540 = vmatprep.mubr.f32.mxu1 %v24983_v39 }
0x1526   : > { %18541 = vmatmul.mubr.f32.gmra.mrb[68].mxu1 %v24989_v21 }
0x1527   : > { %18543 = vmatprep.mubr.f32.mxu1 %v24995_v34 }
0x152a   : > { %18544 = vmatmul.mubr.f32.gmra.mrb[70].mxu1 %v25001_v56 }
0x152b   : > { %18546 = vmatprep.mubr.f32.mxu1 %v25007_v22 }
0x152e   : > { %18547 = vmatmul.mubr.f32.gmra.mrb[72].mxu1 %v25013_v52 }
0x152f   : > { %18549 = vmatprep.mubr.f32.mxu1 %v25019_v0 }
0x1532   : > { %18550 = vmatmul.mubr.f32.gmra.mrb[74].mxu1 %v25025_v7 }
0x1533   : > { %18552 = vmatprep.mubr.f32.mxu1 %v25031_v25 }
0x1536   : > { %18553 = vmatmul.mubr.f32.gmra.mrb[76].mxu1 %v25037_v55 }
0x1537   : > { %18555 = vmatprep.mubr.f32.mxu1 %v25043_v43 }
0x153a   : > { %18556 = vmatmul.mubr.f32.gmra.mrb[78].mxu1 %v25049_v36 }
0x153b   : > { %18630 = vmatprep.mubr.f32.mxu1 %v25055_v13 }
0x15d1   : > { %v18424_v40 = vpop.f32.mrb[48].mxu1 }
0x15d2   : > { %v8732_v24 = vadd.f32 %v24821_v18, %v18424_v40  ;;  %v8726_v26 = vpop.f32.mrb[49].mxu1  ;;  %v14178_v40 = vld [vmem:[%s26648_s2 + $0x5a8] sm:$0xff] }
0x15d3   : > { %v8727_v49 = vadd.f32 %v24821_v18, %v8726_v26 }
0x15d4   : > { %8823 = vrot.lane.b32.xlu1 %v8732_v24, %s21738_s20 }
0x15d5   : > { %v18427_v62 = vpop.f32.mrb[50].mxu1  ;;  %8821 = vrot.lane.b32.xlu0 %v8727_v49, %s21738_s20 }
0x15d6   : > { %v8742_v4 = vadd.f32 %v24821_v18, %v18427_v62  ;;  %v8736_v19 = vpop.f32.mrb[51].mxu1 }
0x15d7   : > { %v8737_v29 = vadd.f32 %v24821_v18, %v8736_v19  ;;  %v20934_v19 = vpack.c.bf16 %v14178_v40, %v14177_v42 }
0x15d8   : > { %8827 = vrot.lane.b32.xlu1 %v8742_v4, %s21738_s20 }
0x15d9   : > { %v18430_v41 = vpop.f32.mrb[52].mxu1  ;;  %8825 = vrot.lane.b32.xlu0 %v8737_v29, %s21738_s20 }
0x15da   : > { %v8752_v33 = vadd.f32 %v24821_v18, %v18430_v41  ;;  %v8746_v48 = vpop.f32.mrb[53].mxu1  ;;  %v14179_v41 = vld [vmem:[%s26648_s2 + $0x5b0] sm:$0xff] }
0x15db   : > { %v8747_v60 = vadd.f32 %v24821_v18, %v8746_v48 }
0x15dc   : > { %8831 = vrot.lane.b32.xlu1 %v8752_v33, %s21738_s20  ;;  %v14180_v33 = vld [vmem:[%s26648_s2 + $0x5b8] sm:$0xff] }
0x15dd   : > { %v18433_v63 = vpop.f32.mrb[54].mxu1  ;;  %8829 = vrot.lane.b32.xlu0 %v8747_v60, %s21738_s20 }
0x15de   : > { %v8762_v3 = vadd.f32 %v24821_v18, %v18433_v63  ;;  %v8756_v53 = vpop.f32.mrb[55].mxu1 }
0x15df   : > { %v8757_v32 = vadd.f32 %v24821_v18, %v8756_v53  ;;  %v20938_v53 = vpack.c.bf16 %v14180_v33, %v14179_v41  ;;  %v14157_v41 = vld [vmem:[%s22376_s15 + $0x580] sm:$0xff]  ;;  %v14158_v33 = vld [vmem:[%s22376_s15 + $0x588] sm:$0xff] }
0x15e0   : > { %8835 = vrot.lane.b32.xlu1 %v8762_v3, %s21738_s20 }
0x15e1   : > { %v18436_v9 = vpop.f32.mrb[56].mxu1  ;;  %8833 = vrot.lane.b32.xlu0 %v8757_v32, %s21738_s20 }
0x15e2   : > { %v8772_v57 = vadd.f32 %v24821_v18, %v18436_v9  ;;  %v8766_v14 = vpop.f32.mrb[57].mxu1  ;;  %v14181_v9 = vld [vmem:[%s26648_s2 + $0x5c0] sm:$0xff] }
0x15e3   : > { %v8767_v51 = vadd.f32 %v24821_v18, %v8766_v14 }
0x15e4   : > { %8839 = vrot.lane.b32.xlu1 %v8772_v57, %s21738_s20  ;;  %v14182_v57 = vld [vmem:[%s26648_s2 + $0x5c8] sm:$0xff] }
0x15e5   : > { %v18439_v15 = vpop.f32.mrb[58].mxu1  ;;  %8837 = vrot.lane.b32.xlu0 %v8767_v51, %s21738_s20 }
0x15e6   : > { %v8782_v20 = vadd.f32 %v24821_v18, %v18439_v15  ;;  %v8776_v27 = vpop.f32.mrb[59].mxu1 }
0x15e7   : > { %v8777_v54 = vadd.f32 %v24821_v18, %v8776_v27 }
0x15e8   : > { %8843 = vrot.lane.b32.xlu1 %v8782_v20, %s21738_s20 }
0x15e9   : > { %v18442_v59 = vpop.f32.mrb[60].mxu1  ;;  %8841 = vrot.lane.b32.xlu0 %v8777_v54, %s21738_s20  ;;  %v20942_v54 = vpack.c.bf16 %v14182_v57, %v14181_v9  ;;  %v14166_v9 = vld [vmem:[%s22376_s15 + $0x5c8] sm:$0xff]  ;;  %v14167_v57 = vld [vmem:[%s22376_s15 + $0x5d0] sm:$0xff] }
0x15ea   : > { %v8792_v2 = vadd.f32 %v24821_v18, %v18442_v59  ;;  %v8786_v6 = vpop.f32.mrb[61].mxu1 }
0x15eb   : > { %v8787_v17 = vadd.f32 %v24821_v18, %v8786_v6  ;;  %v14184_v6 = vld [vmem:[%s26648_s2 + $0x5d8] sm:$0xff] }
0x15ec   : > { %8847 = vrot.lane.b32.xlu1 %v8792_v2, %s21738_s20  ;;  %v14183_v2 = vld [vmem:[%s26648_s2 + $0x5d0] sm:$0xff] }
0x15ed   : > { %v18445_v45 = vpop.f32.mrb[62].mxu1  ;;  %8845 = vrot.lane.b32.xlu0 %v8787_v17, %s21738_s20 }
0x15ee   : > { %v8802_v61 = vadd.f32 %v24821_v18, %v18445_v45  ;;  %v8796_v1 = vpop.f32.mrb[63].mxu1 }
0x15ef   : > { %v8797_v10 = vadd.f32 %v24821_v18, %v8796_v1  ;;  %v14176_v18 = vld [vmem:[%s26648_s2 + $0x598] sm:$0xff] }
0x15f0   : > { %8851 = vrot.lane.b32.xlu1 %v8802_v61, %s21738_s20  ;;  %v20930_v37 = vpack.c.bf16 %v14176_v18, %v14175_v23 }
0x15f1   : > { %v18536_v44 = vpop.f32.mrb[64].mxu1  ;;  %8849 = vrot.lane.b32.xlu0 %v8797_v10, %s21738_s20 }
0x15f2   : > { %v9136_v46 = vadd.f32 %v25142_v11, %v18536_v44  ;;  %v9130_v58 = vpop.f32.mrb[65].mxu1  ;;  %v20946_v44 = vpack.c.bf16 %v14184_v6, %v14183_v2 }
0x15f3   : > { %v9131_v16 = vadd.f32 %v25142_v11, %v9130_v58  ;;  %v14185_v58 = vld [vmem:[%s26648_s2 + $0x5e0] sm:$0xff] }
0x15f4   : > { %v9210_v12 = vmax.f32 %v9136_v46, 0.0 }
0x15f5   : > { %v9209_v8 = vmax.f32 %v9131_v16, 0.0  ;;  %v18539_v47 = vpop.f32.mrb[66].mxu1  ;;  %v14186_v16 = vld [vmem:[%s26648_s2 + $0x5e8] sm:$0xff] }
0x15f6   : > { %v9146_v28 = vadd.f32 %v25142_v11, %v18539_v47  ;;  %v9140_v35 = vpop.f32.mrb[67].mxu1 }
0x15f7   : > { %v9141_v38 = vadd.f32 %v25142_v11, %v9140_v35  ;;  %18574 = vmatprep.mubr.msk.f32.mxu0 %vm1677_vm0, %v9209_v8 }
0x15f8   : > { %18575 = vmatmul.mubr.msk.f32.vlgmr.msra.gmra.mrb[80].mxu0 %vm1677_vm0, %v9210_v12  ;;  %v9212_v49 = vmax.f32 %v9146_v28, 0.0  ;;  %v20950_v28 = vpack.c.bf16 %v14186_v16, %v14185_v58 }
0x15f9   : > { %v9211_v24 = vmax.f32 %v9141_v38, 0.0  ;;  %v18542_v26 = vpop.f32.mrb[68].mxu1  ;;  %20929 = vmatpush3.bf16.msra.mxu0 %v25104_v30  ;;  %v14188_v38 = vld [vmem:[%s26648_s2 + $0x5f8] sm:$0xff] }
0x15fa   : > { %v9156_v62 = vadd.f32 %v25142_v11, %v18542_v26  ;;  %v9150_v4 = vpop.f32.mrb[69].mxu1  ;;  %20931 = vmatprep.subr.bf16.mxu0 %v20930_v37 }
0x15fb   : > { %v9151_v29 = vadd.f32 %v25142_v11, %v9150_v4  ;;  %18577 = vmatprep.mubr.msk.f32.mxu0 %vm1677_vm0, %v9211_v24 }
0x15fc   : > { %18578 = vmatmul.mubr.msk.f32.gmra.mrb[82].mxu0 %vm1677_vm0, %v9212_v49  ;;  %v9214_v60 = vmax.f32 %v9156_v62, 0.0 }
0x15fd   : > { %v9213_v30 = vmax.f32 %v9151_v29, 0.0  ;;  %v18545_v48 = vpop.f32.mrb[70].mxu1  ;;  %20933 = vmatpush3.bf16.msra.mxu0 %v20930_v37  ;;  %v14187_v37 = vld [vmem:[%s26648_s2 + $0x5f0] sm:$0xff] }
0x15fe   : > { %v9166_v63 = vadd.f32 %v25142_v11, %v18545_v48  ;;  %v9160_v3 = vpop.f32.mrb[71].mxu1  ;;  %20935 = vmatprep.subr.bf16.mxu0 %v20934_v19  ;;  %v20954_v62 = vpack.c.bf16 %v14188_v38, %v14187_v37  ;;  %v14160_v48 = vld [vmem:[%s22376_s15 + $0x598] sm:$0xff] }
0x15ff   : > { %v9161_v32 = vadd.f32 %v25142_v11, %v9160_v3  ;;  %18580 = vmatprep.mubr.msk.f32.mxu0 %vm1677_vm0, %v9213_v30  ;;  %v14159_v30 = vld [vmem:[%s22376_s15 + $0x590] sm:$0xff] }
0x1600   : > { %18581 = vmatmul.mubr.msk.f32.gmra.mrb[84].mxu0 %vm1677_vm0, %v9214_v60  ;;  %v9216_v15 = vmax.f32 %v9166_v63, 0.0  ;;  %v14161_v60 = vld [vmem:[%s22376_s15 + $0x5a0] sm:$0xff]  ;;  %v14162_v63 = vld [vmem:[%s22376_s15 + $0x5a8] sm:$0xff]  ;;  %v14163_v3 = vld [vmem:[%s22376_s15 + $0x5b0] sm:$0xff] }
0x1601   : > { %v9215_v14 = vmax.f32 %v9161_v32, 0.0  ;;  %v18548_v51 = vpop.f32.mrb[72].mxu1  ;;  %20937 = vmatpush3.bf16.msra.mxu0 %v20934_v19  ;;  %v14165_v32 = vld [vmem:[%s22376_s15 + $0x5c0] sm:$0xff] }
0x1602   : > { %v9176_v20 = vadd.f32 %v25142_v11, %v18548_v51  ;;  %v9170_v27 = vpop.f32.mrb[73].mxu1  ;;  %20939 = vmatprep.subr.bf16.mxu0 %v20938_v53  ;;  %v14169_v51 = vld [vmem:[%s22376_s15 + $0x5e0] sm:$0xff] }
0x1603   : > { %v9171_v59 = vadd.f32 %v25142_v11, %v9170_v27  ;;  %18583 = vmatprep.mubr.msk.f32.mxu0 %vm1677_vm0, %v9215_v14  ;;  %v14168_v14 = vld [vmem:[%s22376_s15 + $0x5d8] sm:$0xff] }
0x1604   : > { %18584 = vmatmul.mubr.msk.f32.gmra.mrb[86].mxu0 %vm1677_vm0, %v9216_v15  ;;  %v9218_v61 = vmax.f32 %v9176_v20, 0.0  ;;  %v14170_v15 = vld [vmem:[%s22376_s15 + $0x5e8] sm:$0xff]  ;;  %v14171_v20 = vld [vmem:[%s22376_s15 + $0x5f0] sm:$0xff]  ;;  %v14172_v27 = vld [vmem:[%s22376_s15 + $0x5f8] sm:$0xff] }
0x1605   : > { %v9217_v17 = vmax.f32 %v9171_v59, 0.0  ;;  %v18551_v45 = vpop.f32.mrb[74].mxu1  ;;  %20941 = vmatpush3.bf16.msra.mxu0 %v20938_v53  ;;  %v14164_v53 = vld [vmem:[%s22376_s15 + $0x5b8] sm:$0xff] }
0x1606   : > { %v9186_v1 = vadd.f32 %v25142_v11, %v18551_v45  ;;  %v9180_v10 = vpop.f32.mrb[75].mxu1  ;;  %20943 = vmatprep.subr.bf16.mxu0 %v20942_v54 }
0x1607   : > { %v9181_v46 = vadd.f32 %v25142_v11, %v9180_v10  ;;  %18586 = vmatprep.mubr.msk.f32.mxu0 %vm1677_vm0, %v9217_v17 }
0x1608   : > { %18587 = vmatmul.mubr.msk.f32.gmra.mrb[88].mxu0 %vm1677_vm0, %v9218_v61  ;;  %v9220_v8 = vmax.f32 %v9186_v1, 0.0 }
0x1609   : > { %v9219_v23 = vmax.f32 %v9181_v46, 0.0  ;;  %v18554_v18 = vpop.f32.mrb[76].mxu1  ;;  %20945 = vmatpush3.bf16.msra.mxu0 %v20942_v54 }
0x160a   : > { %v9196_v47 = vadd.f32 %v25142_v11, %v18554_v18  ;;  %v9190_v12 = vpop.f32.mrb[77].mxu1  ;;  %20947 = vmatprep.subr.bf16.mxu0 %v20946_v44 }
0x160b   : > { %v9191_v35 = vadd.f32 %v25142_v11, %v9190_v12  ;;  %18589 = vmatprep.mubr.msk.f32.mxu0 %vm1677_vm0, %v9219_v23 }
0x160c   : > { %18590 = vmatmul.mubr.msk.f32.gmra.mrb[90].mxu0 %vm1677_vm0, %v9220_v8  ;;  %v9222_v24 = vmax.f32 %v9196_v47, 0.0 }
0x160d   : > { %v9221_v42 = vmax.f32 %v9191_v35, 0.0  ;;  %v18557_v40 = vpop.f32.mrb[78].mxu1  ;;  %20949 = vmatpush3.bf16.msra.mxu0 %v20946_v44 }
0x160e   : > { %v9206_v26 = vadd.f32 %v25142_v11, %v18557_v40  ;;  %v9200_v49 = vpop.f32.mrb[79].mxu1  ;;  %20951 = vmatprep.subr.bf16.mxu0 %v20950_v28 }
0x160f   : > { %v9201_v4 = vadd.f32 %v25142_v11, %v9200_v49  ;;  %18592 = vmatprep.mubr.msk.f32.mxu0 %vm1677_vm0, %v9221_v42 }
0x1610   : > { %18593 = vmatmul.mubr.msk.f32.gmra.mrb[92].mxu0 %vm1677_vm0, %v9222_v24  ;;  %v9224_v29 = vmax.f32 %v9206_v26, 0.0 }
0x1611   : > { %v9223_v19 = vmax.f32 %v9201_v4, 0.0  ;;  %20953 = vmatpush3.bf16.msra.mxu0 %v20950_v28 }
0x1612   : > { %20955 = vmatprep.subr.bf16.mxu0 %v20954_v62 }
0x1613   : > { %18595 = vmatprep.mubr.msk.f32.mxu0 %vm1677_vm0, %v9223_v19 }
0x1614   : > { %18596 = vmatmul.mubr.msk.f32.gmra.mrb[94].mxu0 %vm1677_vm0, %v9224_v29 }
0x1615   : > { %20957 = vmatpush3.bf16.msra.mxu0 %v20954_v62  ;;  %18686 = vmatprep.mubr.f32.mxu0 %v14157_v41 }
0x1618   : > { %18687 = vmatmul.mubr.f32.vlgmr.msra.gmra.mrb[96].mxu0 %v14158_v33 }
0x1619   : > { %18689 = vmatprep.mubr.f32.mxu0 %v14159_v30 }
0x161c   : > { %18690 = vmatmul.mubr.f32.gmra.mrb[98].mxu0 %v14160_v48 }
0x161d   : > { %18692 = vmatprep.mubr.f32.mxu0 %v14161_v60 }
0x1620   : > { %18693 = vmatmul.mubr.f32.gmra.mrb[100].mxu0 %v14162_v63 }
0x1621   : > { %18695 = vmatprep.mubr.f32.mxu0 %v14163_v3 }
0x1624   : > { %18696 = vmatmul.mubr.f32.gmra.mrb[102].mxu0 %v14164_v53 }
0x1625   : > { %18698 = vmatprep.mubr.f32.mxu0 %v14165_v32 }
0x1628   : > { %18699 = vmatmul.mubr.f32.gmra.mrb[104].mxu0 %v14166_v9 }
0x1629   : > { %18701 = vmatprep.mubr.f32.mxu0 %v14167_v57 }
0x162c   : > { %18702 = vmatmul.mubr.f32.gmra.mrb[106].mxu0 %v14168_v14 }
0x162d   : > { %18704 = vmatprep.mubr.f32.mxu0 %v14169_v51 }
0x1630   : > { %18705 = vmatmul.mubr.f32.gmra.mrb[108].mxu0 %v14170_v15 }
0x1631   : > { %18707 = vmatprep.mubr.f32.mxu0 %v14171_v20 }
0x1634   : > { %18708 = vmatmul.mubr.f32.gmra.mrb[110].mxu0 %v14172_v27 }
0x1646   : > { %v8824_v54 = vpop.permute.xlu1 %8823 }
0x1647   : > { %8870 = vst.msk [vmem:[%s22719_s10 + $0x18] sm:$0xff] %vm2790_vm2, %v8824_v54  ;;  %v8822_v59 = vpop.permute.xlu0 %8821 }
0x1648   : > { %8869 = vst.msk [vmem:[%s22719_s10 + $0x8] sm:$0xff] %vm2790_vm2, %v8822_v59 }
0x164a   : > { %v8828_v2 = vpop.permute.xlu1 %8827 }
0x164b   : > { %8872 = vst.msk [vmem:[%s22719_s10 + $0x38] sm:$0xff] %vm2790_vm2, %v8828_v2  ;;  %v8826_v6 = vpop.permute.xlu0 %8825 }
0x164c   : > { %8871 = vst.msk [vmem:[%s22719_s10 + $0x28] sm:$0xff] %vm2790_vm2, %v8826_v6 }
0x164e   : > { %v8832_v17 = vpop.permute.xlu1 %8831 }
0x164f   : > { %8874 = vst.msk [vmem:[%s22719_s10 + $0x58] sm:$0xff] %vm2790_vm2, %v8832_v17  ;;  %v8830_v45 = vpop.permute.xlu0 %8829 }
0x1650   : > { %8873 = vst.msk [vmem:[%s22719_s10 + $0x48] sm:$0xff] %vm2790_vm2, %v8830_v45 }
0x1652   : > { %v8836_v61 = vpop.permute.xlu1 %8835 }
0x1653   : > { %8876 = vst.msk [vmem:[%s22719_s10 + $0x78] sm:$0xff] %vm2790_vm2, %v8836_v61  ;;  %v8834_v1 = vpop.permute.xlu0 %8833 }
0x1654   : > { %8875 = vst.msk [vmem:[%s22719_s10 + $0x68] sm:$0xff] %vm2790_vm2, %v8834_v1 }
0x1656   : > { %v8840_v10 = vpop.permute.xlu1 %8839 }
0x1657   : > { %8878 = vst.msk [vmem:[%s22719_s10 + $0x98] sm:$0xff] %vm2790_vm2, %v8840_v10  ;;  %v8838_v44 = vpop.permute.xlu0 %8837 }
0x1658   : > { %8877 = vst.msk [vmem:[%s22719_s10 + $0x88] sm:$0xff] %vm2790_vm2, %v8838_v44 }
0x165a   : > { %v8844_v46 = vpop.permute.xlu1 %8843 }
0x165b   : > { %8880 = vst.msk [vmem:[%s22719_s10 + $0xb8] sm:$0xff] %vm2790_vm2, %v8844_v46  ;;  %v8842_v58 = vpop.permute.xlu0 %8841 }
0x165c   : > { %8879 = vst.msk [vmem:[%s22719_s10 + $0xa8] sm:$0xff] %vm2790_vm2, %v8842_v58 }
0x165e   : > { %v8848_v16 = vpop.permute.xlu1 %8847 }
0x165f   : > { %8882 = vst.msk [vmem:[%s22719_s10 + $0xd8] sm:$0xff] %vm2790_vm2, %v8848_v16  ;;  %v8846_v23 = vpop.permute.xlu0 %8845 }
0x1660   : > { %8881 = vst.msk [vmem:[%s22719_s10 + $0xc8] sm:$0xff] %vm2790_vm2, %v8846_v23 }
0x1662   : > { %v8852_v18 = vpop.permute.xlu1 %8851 }
0x1663   : > { %8884 = vst.msk [vmem:[%s22719_s10 + $0xf8] sm:$0xff] %vm2790_vm2, %v8852_v18  ;;  %v8850_v8 = vpop.permute.xlu0 %8849 }
0x1664   : > { %8883 = vst.msk [vmem:[%s22719_s10 + $0xe8] sm:$0xff] %vm2790_vm2, %v8850_v8 }
0x16cb   : > { %v18576_v47 = vpop.f32.mrb[80].mxu0 }
0x16cc   : > { %v9348_v12 = vpop.f32.mrb[81].mxu0 }
0x16cd   : > { %v20894_v28 = vpack.c.bf16 %v18576_v47, %v9348_v12  ;;  %v25335_v12 = vld [vmem:[%s26651_s5] ss:$0 sm:$0xff] }
0x16cf   : > { %v18579_v35 = vpop.f32.mrb[82].mxu0  ;;  %20895 = vmatprep.subr.bf16.mxu1 %v20894_v28 }
0x16d0   : > { %v9358_v37 = vpop.f32.mrb[83].mxu0  ;;  %20897 = vmatpush3.bf16.msra.mxu1 %v20894_v28 }
0x16d1   : > { %v20898_v38 = vpack.c.bf16 %v18579_v35, %v9358_v37 }
0x16d3   : > { %v18582_v42 = vpop.f32.mrb[84].mxu0  ;;  %20899 = vmatprep.subr.bf16.mxu1 %v20898_v38 }
0x16d4   : > { %v9368_v40 = vpop.f32.mrb[85].mxu0  ;;  %20901 = vmatpush3.bf16.msra.mxu1 %v20898_v38 }
0x16d5   : > { %v20902_v24 = vpack.c.bf16 %v18582_v42, %v9368_v40 }
0x16d7   : > { %v18585_v26 = vpop.f32.mrb[86].mxu0  ;;  %20903 = vmatprep.subr.bf16.mxu1 %v20902_v24 }
0x16d8   : > { %v9378_v49 = vpop.f32.mrb[87].mxu0  ;;  %20905 = vmatpush3.bf16.msra.mxu1 %v20902_v24 }
0x16d9   : > { %v20906_v62 = vpack.c.bf16 %v18585_v26, %v9378_v49 }
0x16db   : > { %v18588_v4 = vpop.f32.mrb[88].mxu0  ;;  %20907 = vmatprep.subr.bf16.mxu1 %v20906_v62 }
0x16dc   : > { %v9388_v19 = vpop.f32.mrb[89].mxu0  ;;  %20909 = vmatpush3.bf16.msra.mxu1 %v20906_v62 }
0x16dd   : > { %v20910_v29 = vpack.c.bf16 %v18588_v4, %v9388_v19 }
0x16df   : > { %v18591_v41 = vpop.f32.mrb[90].mxu0  ;;  %20911 = vmatprep.subr.bf16.mxu1 %v20910_v29 }
0x16e0   : > { %v9398_v33 = vpop.f32.mrb[91].mxu0  ;;  %20913 = vmatpush3.bf16.msra.mxu1 %v20910_v29 }
0x16e1   : > { %v20914_v30 = vpack.c.bf16 %v18591_v41, %v9398_v33 }
0x16e3   : > { %v18594_v48 = vpop.f32.mrb[92].mxu0  ;;  %20915 = vmatprep.subr.bf16.mxu1 %v20914_v30 }
0x16e4   : > { %v9408_v60 = vpop.f32.mrb[93].mxu0  ;;  %20917 = vmatpush3.bf16.msra.mxu1 %v20914_v30 }
0x16e5   : > { %v20918_v63 = vpack.c.bf16 %v18594_v48, %v9408_v60 }
0x16e7   : > { %v18597_v3 = vpop.f32.mrb[94].mxu0  ;;  %20919 = vmatprep.subr.bf16.mxu1 %v20918_v63 }
0x16e8   : > { %v9418_v53 = vpop.f32.mrb[95].mxu0  ;;  %20921 = vmatpush3.bf16.msra.mxu1 %v20918_v63 }
0x16e9   : > { %v20922_v32 = vpack.c.bf16 %v18597_v3, %v9418_v53 }
0x16eb   : > { %20923 = vmatprep.subr.bf16.mxu1 %v20922_v32  ;;  %v18688_v9 = vpop.f32.mrb[96].mxu0 }
0x16ec   : > { %20925 = vmatpush3.bf16.msra.mxu1 %v20922_v32  ;;  %v9752_v57 = vpop.f32.mrb[97].mxu0 }
0x16ed   : > { %v20958_v14 = vpack.c.bf16 %v18688_v9, %v9752_v57 }
0x16ef   : > { %18631 = vmatmul.mubr.f32.vlgmr.msra.gmra.mrb[80].mxu1 %v24965_v50  ;;  %v18691_v51 = vpop.f32.mrb[98].mxu0  ;;  %20959 = vmatprep.subr.bf16.mxu1 %v20958_v14 }
0x16f0   : > { %v9762_v15 = vpop.f32.mrb[99].mxu0  ;;  %20961 = vmatpush3.bf16.msra.mxu1 %v20958_v14  ;;  %18633 = vmatprep.mubr.f32.mxu1 %v24971_v31 }
0x16f1   : > { %v20962_v20 = vpack.c.bf16 %v18691_v51, %v9762_v15 }
0x16f3   : > { %18634 = vmatmul.mubr.f32.gmra.mrb[82].mxu1 %v24977_v5  ;;  %v18694_v27 = vpop.f32.mrb[100].mxu0  ;;  %20963 = vmatprep.subr.bf16.mxu1 %v20962_v20 }
0x16f4   : > { %v9772_v54 = vpop.f32.mrb[101].mxu0  ;;  %20965 = vmatpush3.bf16.msra.mxu1 %v20962_v20  ;;  %18636 = vmatprep.mubr.f32.mxu1 %v24983_v39 }
0x16f5   : > { %v20966_v59 = vpack.c.bf16 %v18694_v27, %v9772_v54 }
0x16f7   : > { %18637 = vmatmul.mubr.f32.gmra.mrb[84].mxu1 %v24989_v21  ;;  %v18697_v2 = vpop.f32.mrb[102].mxu0  ;;  %20967 = vmatprep.subr.bf16.mxu1 %v20966_v59 }
0x16f8   : > { %v9782_v6 = vpop.f32.mrb[103].mxu0  ;;  %20969 = vmatpush3.bf16.msra.mxu1 %v20966_v59  ;;  %18639 = vmatprep.mubr.f32.mxu1 %v24995_v34 }
0x16f9   : > { %v20970_v17 = vpack.c.bf16 %v18697_v2, %v9782_v6 }
0x16fb   : > { %18640 = vmatmul.mubr.f32.gmra.mrb[86].mxu1 %v25001_v56  ;;  %v18700_v45 = vpop.f32.mrb[104].mxu0  ;;  %20971 = vmatprep.subr.bf16.mxu1 %v20970_v17 }
0x16fc   : > { %v9792_v61 = vpop.f32.mrb[105].mxu0  ;;  %20973 = vmatpush3.bf16.msra.mxu1 %v20970_v17  ;;  %18642 = vmatprep.mubr.f32.mxu1 %v25007_v22 }
0x16fd   : > { %v20974_v1 = vpack.c.bf16 %v18700_v45, %v9792_v61  ;;  %v14231_v61 = vld [vmem:[%s26648_s2 + $0x610] sm:$0xff] }
0x16ff   : > { %18643 = vmatmul.mubr.f32.gmra.mrb[88].mxu1 %v25013_v52  ;;  %v18703_v10 = vpop.f32.mrb[106].mxu0  ;;  %20975 = vmatprep.subr.bf16.mxu1 %v20974_v1 }
0x1700   : > { %v9802_v44 = vpop.f32.mrb[107].mxu0  ;;  %20977 = vmatpush3.bf16.msra.mxu1 %v20974_v1  ;;  %18645 = vmatprep.mubr.f32.mxu1 %v25019_v0  ;;  %v14232_v1 = vld [vmem:[%s26648_s2 + $0x618] sm:$0xff] }
0x1701   : > { %v20978_v46 = vpack.c.bf16 %v18703_v10, %v9802_v44 }
0x1703   : > { %18646 = vmatmul.mubr.f32.gmra.mrb[90].mxu1 %v25025_v7  ;;  %v18706_v58 = vpop.f32.mrb[108].mxu0  ;;  %20979 = vmatprep.subr.bf16.mxu1 %v20978_v46 }
0x1704   : > { %v9812_v16 = vpop.f32.mrb[109].mxu0  ;;  %20981 = vmatpush3.bf16.msra.mxu1 %v20978_v46  ;;  %18648 = vmatprep.mubr.f32.mxu1 %v25031_v25 }
0x1705   : > { %v20982_v23 = vpack.c.bf16 %v18706_v58, %v9812_v16 }
0x1707   : > { %18649 = vmatmul.mubr.f32.gmra.mrb[92].mxu1 %v25037_v55  ;;  %v18709_v18 = vpop.f32.mrb[110].mxu0  ;;  %20983 = vmatprep.subr.bf16.mxu1 %v20982_v23 }
0x1708   : > { %v9822_v8 = vpop.f32.mrb[111].mxu0  ;;  %20985 = vmatpush3.bf16.msra.mxu1 %v20982_v23  ;;  %18651 = vmatprep.mubr.f32.mxu1 %v25043_v43  ;;  %v21042_v23 = vpack.c.bf16 %v14232_v1, %v14231_v61 }
0x1709   : > { %v20986_v47 = vpack.c.bf16 %v18709_v18, %v9822_v8  ;;  %v14233_v8 = vld [vmem:[%s26648_s2 + $0x620] sm:$0xff] }
0x170b   : > { %18652 = vmatmul.mubr.f32.gmra.mrb[94].mxu1 %v25049_v36  ;;  %20987 = vmatprep.subr.bf16.mxu1 %v20986_v47 }
0x170c   : > { %20989 = vmatpush3.bf16.msra.mxu1 %v20986_v47  ;;  %18742 = vmatprep.mubr.f32.mxu1 %v25055_v13  ;;  %v14234_v47 = vld [vmem:[%s26648_s2 + $0x628] sm:$0xff] }
0x170f   : > { %18743 = vmatmul.mubr.f32.vlgmr.msra.gmra.mrb[96].mxu1 %v24965_v50  ;;  %v14189_v50 = vld [vmem:[%s26650_s4 + $0x2c0] sm:$0xff] }
0x1710   : > { %18745 = vmatprep.mubr.f32.mxu1 %v24971_v31  ;;  %v14190_v31 = vld [vmem:[%s26650_s4 + $0x2c8] sm:$0xff] }
0x1713   : > { %18746 = vmatmul.mubr.f32.gmra.mrb[98].mxu1 %v24977_v5  ;;  %v20990_v5 = vpack.c.bf16 %v14190_v31, %v14189_v50 }
0x1714   : > { %18748 = vmatprep.mubr.f32.mxu1 %v24983_v39  ;;  %v14191_v39 = vld [vmem:[%s26650_s4 + $0x2d0] sm:$0xff] }
0x1715   : > { %20991 = vmatprep.subr.bf16.mxu0 %v20990_v5 }
0x1716   : > { %20993 = vmatpush3.bf16.msra.mxu0 %v20990_v5 }
0x1717   : > { %18749 = vmatmul.mubr.f32.gmra.mrb[100].mxu1 %v24989_v21  ;;  %v14192_v21 = vld [vmem:[%s26650_s4 + $0x2d8] sm:$0xff] }
0x1718   : > { %18751 = vmatprep.mubr.f32.mxu1 %v24995_v34  ;;  %v20994_v34 = vpack.c.bf16 %v14192_v21, %v14191_v39 }
0x171a   : > { %20995 = vmatprep.subr.bf16.mxu0 %v20994_v34 }
0x171b   : > { %18752 = vmatmul.mubr.f32.gmra.mrb[102].mxu1 %v25001_v56  ;;  %20997 = vmatpush3.bf16.msra.mxu0 %v20994_v34  ;;  %v14193_v56 = vld [vmem:[%s26650_s4 + $0x2e0] sm:$0xff]  ;;  %v21046_v34 = vpack.c.bf16 %v14234_v47, %v14233_v8  ;;  %v14220_v8 = vld [vmem:[%s22376_s15 + $0x638] sm:$0xff] }
0x171c   : > { %18754 = vmatprep.mubr.f32.mxu1 %v25007_v22  ;;  %v14194_v22 = vld [vmem:[%s26650_s4 + $0x2e8] sm:$0xff]  ;;  %v14221_v47 = vld [vmem:[%s22376_s15 + $0x640] sm:$0xff] }
0x171f   : > { %18755 = vmatmul.mubr.f32.gmra.mrb[104].mxu1 %v25013_v52  ;;  %v20998_v52 = vpack.c.bf16 %v14194_v22, %v14193_v56  ;;  %v14235_v22 = vld [vmem:[%s26648_s2 + $0x630] sm:$0xff] }
0x1720   : > { %18757 = vmatprep.mubr.f32.mxu1 %v25019_v0  ;;  %v14195_v0 = vld [vmem:[%s26650_s4 + $0x2f0] sm:$0xff] }
0x1721   : > { %20999 = vmatprep.subr.bf16.mxu0 %v20998_v52 }
0x1722   : > { %21001 = vmatpush3.bf16.msra.mxu0 %v20998_v52  ;;  %v14236_v52 = vld [vmem:[%s26648_s2 + $0x638] sm:$0xff] }
0x1723   : > { %18758 = vmatmul.mubr.f32.gmra.mrb[106].mxu1 %v25025_v7  ;;  %v14196_v7 = vld [vmem:[%s26650_s4 + $0x2f8] sm:$0xff] }
0x1724   : > { %18760 = vmatprep.mubr.f32.mxu1 %v25031_v25  ;;  %v21002_v25 = vpack.c.bf16 %v14196_v7, %v14195_v0 }
0x1726   : > { %21003 = vmatprep.subr.bf16.mxu0 %v21002_v25 }
0x1727   : > { %18761 = vmatmul.mubr.f32.gmra.mrb[108].mxu1 %v25037_v55  ;;  %21005 = vmatpush3.bf16.msra.mxu0 %v21002_v25  ;;  %v14229_v55 = vld [vmem:[%s26648_s2 + $0x600] sm:$0xff] }
0x1728   : > { %18763 = vmatprep.mubr.f32.mxu1 %v25043_v43  ;;  %v14230_v43 = vld [vmem:[%s26648_s2 + $0x608] sm:$0xff] }
0x172b   : > { %18764 = vmatmul.mubr.f32.gmra.mrb[110].mxu1 %v25049_v36  ;;  %v25329_v36 = vpack.c.bf16 %v14230_v43, %v14229_v55 }
0x172c   : > { %18838 = vmatprep.mubr.f32.mxu1 %v25055_v13 }
0x172d   : > { %21039 = vmatprep.subr.bf16.mxu0 %v25329_v36 }
0x17c2   : > { %v18632_v13 = vpop.f32.mrb[80].mxu1 }
0x17c3   : > { %v9499_v28 = vadd.f32 %v25335_v12, %v18632_v13  ;;  %v9493_v35 = vpop.f32.mrb[81].mxu1 }
0x17c4   : > { %v9494_v37 = vadd.f32 %v25335_v12, %v9493_v35  ;;  %v14238_v35 = vld [vmem:[%s26648_s2 + $0x648] sm:$0xff] }
0x17c5   : > { %9590 = vrot.lane.b32.xlu1 %v9499_v28, %s21739_s17  ;;  %v14237_v28 = vld [vmem:[%s26648_s2 + $0x640] sm:$0xff] }
0x17c6   : > { %v18635_v38 = vpop.f32.mrb[82].mxu1  ;;  %9588 = vrot.lane.b32.xlu0 %v9494_v37, %s21739_s17 }
0x17c7   : > { %v9509_v42 = vadd.f32 %v25335_v12, %v18635_v38  ;;  %v9503_v40 = vpop.f32.mrb[83].mxu1 }
0x17c8   : > { %v9504_v24 = vadd.f32 %v25335_v12, %v9503_v40 }
0x17c9   : > { %9594 = vrot.lane.b32.xlu1 %v9509_v42, %s21739_s17 }
0x17ca   : > { %v18638_v26 = vpop.f32.mrb[84].mxu1  ;;  %9592 = vrot.lane.b32.xlu0 %v9504_v24, %s21739_s17 }
0x17cb   : > { %v9519_v49 = vadd.f32 %v25335_v12, %v18638_v26  ;;  %v9513_v62 = vpop.f32.mrb[85].mxu1  ;;  %v21054_v26 = vpack.c.bf16 %v14238_v35, %v14237_v28 }
0x17cc   : > { %v9514_v4 = vadd.f32 %v25335_v12, %v9513_v62  ;;  %v14239_v62 = vld [vmem:[%s26648_s2 + $0x650] sm:$0xff] }
0x17cd   : > { %9598 = vrot.lane.b32.xlu1 %v9519_v49, %s21739_s17 }
0x17ce   : > { %v18641_v19 = vpop.f32.mrb[86].mxu1  ;;  %9596 = vrot.lane.b32.xlu0 %v9514_v4, %s21739_s17  ;;  %v14240_v4 = vld [vmem:[%s26648_s2 + $0x658] sm:$0xff] }
0x17cf   : > { %v9529_v29 = vadd.f32 %v25335_v12, %v18641_v19  ;;  %v9523_v41 = vpop.f32.mrb[87].mxu1 }
0x17d0   : > { %v9524_v33 = vadd.f32 %v25335_v12, %v9523_v41 }
0x17d1   : > { %9602 = vrot.lane.b32.xlu1 %v9529_v29, %s21739_s17 }
0x17d2   : > { %v18644_v30 = vpop.f32.mrb[88].mxu1  ;;  %9600 = vrot.lane.b32.xlu0 %v9524_v33, %s21739_s17 }
0x17d3   : > { %v9539_v48 = vadd.f32 %v25335_v12, %v18644_v30  ;;  %v9533_v60 = vpop.f32.mrb[89].mxu1 }
0x17d4   : > { %v9534_v63 = vadd.f32 %v25335_v12, %v9533_v60 }
0x17d5   : > { %9606 = vrot.lane.b32.xlu1 %v9539_v48, %s21739_s17  ;;  %v21058_v48 = vpack.c.bf16 %v14240_v4, %v14239_v62 }
0x17d6   : > { %v18647_v3 = vpop.f32.mrb[90].mxu1  ;;  %9604 = vrot.lane.b32.xlu0 %v9534_v63, %s21739_s17  ;;  %v14241_v63 = vld [vmem:[%s26648_s2 + $0x660] sm:$0xff] }
0x17d7   : > { %v9549_v53 = vadd.f32 %v25335_v12, %v18647_v3  ;;  %v9543_v32 = vpop.f32.mrb[91].mxu1  ;;  %v14242_v3 = vld [vmem:[%s26648_s2 + $0x668] sm:$0xff] }
0x17d8   : > { %v9544_v9 = vadd.f32 %v25335_v12, %v9543_v32 }
0x17d9   : > { %9610 = vrot.lane.b32.xlu1 %v9549_v53, %s21739_s17 }
0x17da   : > { %v18650_v57 = vpop.f32.mrb[92].mxu1  ;;  %9608 = vrot.lane.b32.xlu0 %v9544_v9, %s21739_s17 }
0x17db   : > { %v9559_v14 = vadd.f32 %v25335_v12, %v18650_v57  ;;  %v9553_v51 = vpop.f32.mrb[93].mxu1 }
0x17dc   : > { %v9554_v15 = vadd.f32 %v25335_v12, %v9553_v51  ;;  %v21062_v51 = vpack.c.bf16 %v14242_v3, %v14241_v63 }
0x17dd   : > { %9614 = vrot.lane.b32.xlu1 %v9559_v14, %s21739_s17 }
0x17de   : > { %v18653_v20 = vpop.f32.mrb[94].mxu1  ;;  %9612 = vrot.lane.b32.xlu0 %v9554_v15, %s21739_s17 }
0x17df   : > { %v9569_v27 = vadd.f32 %v25335_v12, %v18653_v20  ;;  %v9563_v54 = vpop.f32.mrb[95].mxu1  ;;  %v14243_v20 = vld [vmem:[%s26648_s2 + $0x670] sm:$0xff] }
0x17e0   : > { %v9564_v59 = vadd.f32 %v25335_v12, %v9563_v54 }
0x17e1   : > { %9618 = vrot.lane.b32.xlu1 %v9569_v27, %s21739_s17  ;;  %v14244_v27 = vld [vmem:[%s26648_s2 + $0x678] sm:$0xff] }
0x17e2   : > { %v18744_v2 = vpop.f32.mrb[96].mxu1  ;;  %9616 = vrot.lane.b32.xlu0 %v9564_v59, %s21739_s17  ;;  %s21678_s17 = sshll.u32 %s21745_s9, 4  ;;  %s21679_s17 = int_to_ptr.vmem [resolvable:$false] %s21678_s17 }
0x17e3   : > { %v9903_v6 = vadd.f32 %v25142_v11, %v18744_v2  ;;  %v9897_v17 = vpop.f32.mrb[97].mxu1 }
0x17e4   : > { %v9898_v45 = vadd.f32 %v25142_v11, %v9897_v17 }
0x17e5   : > { %v9977_v46 = vmax.f32 %v9903_v6, 0.0 }
0x17e6   : > { %v9976_v10 = vmax.f32 %v9898_v45, 0.0  ;;  %v18747_v44 = vpop.f32.mrb[98].mxu1  ;;  %v21066_v45 = vpack.c.bf16 %v14244_v27, %v14243_v20 }
0x17e7   : > { %v9913_v58 = vadd.f32 %v25142_v11, %v18747_v44  ;;  %v9907_v16 = vpop.f32.mrb[99].mxu1  ;;  %v14213_v44 = vld [vmem:[%s22376_s15 + $0x600] sm:$0xff] }
0x17e8   : > { %v9908_v18 = vadd.f32 %v25142_v11, %v9907_v16  ;;  %18782 = vmatprep.mubr.msk.f32.mxu0 %vm1677_vm0, %v9976_v10  ;;  %v14217_v16 = vld [vmem:[%s22376_s15 + $0x620] sm:$0xff] }
0x17e9   : > { %18783 = vmatmul.mubr.msk.f32.vlgmr.msra.gmra.mrb[112].mxu0 %vm1677_vm0, %v9977_v46  ;;  %v9979_v5 = vmax.f32 %v9913_v58, 0.0  ;;  %v14215_v46 = vld [vmem:[%s22376_s15 + $0x610] sm:$0xff]  ;;  %v14216_v58 = vld [vmem:[%s22376_s15 + $0x618] sm:$0xff] }
0x17ea   : > { %v9978_v50 = vmax.f32 %v9908_v18, 0.0  ;;  %v18750_v31 = vpop.f32.mrb[100].mxu1  ;;  %21041 = vmatpush3.bf16.msra.mxu0 %v25329_v36  ;;  %v21050_v36 = vpack.c.bf16 %v14236_v52, %v14235_v22  ;;  %v14219_v18 = vld [vmem:[%s22376_s15 + $0x630] sm:$0xff] }
0x17eb   : > { %v9923_v39 = vadd.f32 %v25142_v11, %v18750_v31  ;;  %v9917_v21 = vpop.f32.mrb[101].mxu1  ;;  %21043 = vmatprep.subr.bf16.mxu0 %v21042_v23  ;;  %v14223_v31 = vld [vmem:[%s22376_s15 + $0x650] sm:$0xff] }
0x17ec   : > { %v9918_v56 = vadd.f32 %v25142_v11, %v9917_v21  ;;  %18785 = vmatprep.mubr.msk.f32.mxu0 %vm1677_vm0, %v9978_v50  ;;  %v14222_v50 = vld [vmem:[%s22376_s15 + $0x648] sm:$0xff] }
0x17ed   : > { %18786 = vmatmul.mubr.msk.f32.gmra.mrb[114].mxu0 %vm1677_vm0, %v9979_v5  ;;  %v9981_v25 = vmax.f32 %v9923_v39, 0.0  ;;  %v14224_v5 = vld [vmem:[%s22376_s15 + $0x658] sm:$0xff]  ;;  %v14225_v39 = vld [vmem:[%s22376_s15 + $0x660] sm:$0xff]  ;;  %v14226_v21 = vld [vmem:[%s22376_s15 + $0x668] sm:$0xff] }
0x17ee   : > { %v9980_v0 = vmax.f32 %v9918_v56, 0.0  ;;  %v18753_v7 = vpop.f32.mrb[102].mxu1  ;;  %21045 = vmatpush3.bf16.msra.mxu0 %v21042_v23  ;;  %v14218_v23 = vld [vmem:[%s22376_s15 + $0x628] sm:$0xff]  ;;  %v14228_v56 = vld [vmem:[%s22376_s15 + $0x678] sm:$0xff] }
0x17ef   : > { %v9933_v55 = vadd.f32 %v25142_v11, %v18753_v7  ;;  %v9927_v43 = vpop.f32.mrb[103].mxu1  ;;  %21047 = vmatprep.subr.bf16.mxu0 %v21046_v34 }
0x17f0   : > { %v9928_v13 = vadd.f32 %v25142_v11, %v9927_v43  ;;  %18788 = vmatprep.mubr.msk.f32.mxu0 %vm1677_vm0, %v9980_v0 }
0x17f1   : > { %18789 = vmatmul.mubr.msk.f32.gmra.mrb[116].mxu0 %vm1677_vm0, %v9981_v25  ;;  %v9983_v42 = vmax.f32 %v9933_v55, 0.0 }
0x17f2   : > { %v9982_v37 = vmax.f32 %v9928_v13, 0.0  ;;  %v18756_v38 = vpop.f32.mrb[104].mxu1  ;;  %21049 = vmatpush3.bf16.msra.mxu0 %v21046_v34  ;;  %v14227_v34 = vld [vmem:[%s22376_s15 + $0x670] sm:$0xff] }
0x17f3   : > { %v9943_v40 = vadd.f32 %v25142_v11, %v18756_v38  ;;  %v9937_v24 = vpop.f32.mrb[105].mxu1  ;;  %21051 = vmatprep.subr.bf16.mxu0 %v21050_v36 }
0x17f4   : > { %v9938_v49 = vadd.f32 %v25142_v11, %v9937_v24  ;;  %18791 = vmatprep.mubr.msk.f32.mxu0 %vm1677_vm0, %v9982_v37 }
0x17f5   : > { %18792 = vmatmul.mubr.msk.f32.gmra.mrb[118].mxu0 %vm1677_vm0, %v9983_v42  ;;  %v9985_v41 = vmax.f32 %v9943_v40, 0.0 }
0x17f6   : > { %v9984_v19 = vmax.f32 %v9938_v49, 0.0  ;;  %v18759_v29 = vpop.f32.mrb[106].mxu1  ;;  %21053 = vmatpush3.bf16.msra.mxu0 %v21050_v36 }
0x17f7   : > { %v9953_v33 = vadd.f32 %v25142_v11, %v18759_v29  ;;  %v9947_v30 = vpop.f32.mrb[107].mxu1  ;;  %21055 = vmatprep.subr.bf16.mxu0 %v21054_v26 }
0x17f8   : > { %v9948_v60 = vadd.f32 %v25142_v11, %v9947_v30  ;;  %18794 = vmatprep.mubr.msk.f32.mxu0 %vm1677_vm0, %v9984_v19 }
0x17f9   : > { %18795 = vmatmul.mubr.msk.f32.gmra.mrb[120].mxu0 %vm1677_vm0, %v9985_v41  ;;  %v9987_v9 = vmax.f32 %v9953_v33, 0.0 }
0x17fa   : > { %v9986_v53 = vmax.f32 %v9948_v60, 0.0  ;;  %v18762_v32 = vpop.f32.mrb[108].mxu1  ;;  %21057 = vmatpush3.bf16.msra.mxu0 %v21054_v26 }
0x17fb   : > { %v9963_v57 = vadd.f32 %v25142_v11, %v18762_v32  ;;  %v9957_v14 = vpop.f32.mrb[109].mxu1  ;;  %21059 = vmatprep.subr.bf16.mxu0 %v21058_v48 }
0x17fc   : > { %v9958_v15 = vadd.f32 %v25142_v11, %v9957_v14  ;;  %18797 = vmatprep.mubr.msk.f32.mxu0 %vm1677_vm0, %v9986_v53 }
0x17fd   : > { %18798 = vmatmul.mubr.msk.f32.gmra.mrb[122].mxu0 %vm1677_vm0, %v9987_v9  ;;  %v9989_v2 = vmax.f32 %v9963_v57, 0.0 }
0x17fe   : > { %v9988_v54 = vmax.f32 %v9958_v15, 0.0  ;;  %v18765_v59 = vpop.f32.mrb[110].mxu1  ;;  %21061 = vmatpush3.bf16.msra.mxu0 %v21058_v48 }
0x17ff   : > { %v9973_v6 = vadd.f32 %v25142_v11, %v18765_v59  ;;  %v9967_v17 = vpop.f32.mrb[111].mxu1  ;;  %21063 = vmatprep.subr.bf16.mxu0 %v21062_v51 }
0x1800   : > { %v9968_v61 = vadd.f32 %v25142_v11, %v9967_v17  ;;  %18800 = vmatprep.mubr.msk.f32.mxu0 %vm1677_vm0, %v9988_v54  ;;  %v14214_v11 = vld [vmem:[%s22376_s15 + $0x608] sm:$0xff] }
0x1801   : > { %18801 = vmatmul.mubr.msk.f32.gmra.mrb[124].mxu0 %vm1677_vm0, %v9989_v2  ;;  %v9991_v10 = vmax.f32 %v9973_v6, 0.0 }
0x1802   : > { %v9990_v1 = vmax.f32 %v9968_v61, 0.0  ;;  %21065 = vmatpush3.bf16.msra.mxu0 %v21062_v51 }
0x1803   : > { %21067 = vmatprep.subr.bf16.mxu0 %v21066_v45 }
0x1804   : > { %18803 = vmatprep.mubr.msk.f32.mxu0 %vm1677_vm0, %v9990_v1 }
0x1805   : > { %18804 = vmatmul.mubr.msk.f32.gmra.mrb[126].mxu0 %vm1677_vm0, %v9991_v10  ;;  %v25501_v10 = vld [vmem:[%s26647_s1 + $0x10] sm:$0xff] }
0x1806   : > { %21069 = vmatpush3.bf16.msra.mxu0 %v21066_v45  ;;  %18894 = vmatprep.mubr.f32.mxu0 %v14213_v44  ;;  %v25495_v45 = vld [vmem:[%s26647_s1 + $0x8] sm:$0xff] }
0x1809   : > { %18895 = vmatmul.mubr.f32.vlgmr.msra.gmra.mrb[128].mxu0 %v14214_v11  ;;  %v25507_v11 = vld [vmem:[%s26647_s1 + $0x18] sm:$0xff] }
0x180a   : > { %18897 = vmatprep.mubr.f32.mxu0 %v14215_v46 }
0x180d   : > { %18898 = vmatmul.mubr.f32.gmra.mrb[130].mxu0 %v14216_v58 }
0x180e   : > { %18900 = vmatprep.mubr.f32.mxu0 %v14217_v16  ;;  %v25513_v16 = vld [vmem:[%s26647_s1 + $0x20] sm:$0xff] }
0x1811   : > { %18901 = vmatmul.mubr.f32.gmra.mrb[132].mxu0 %v14218_v23 }
0x1812   : > { %18903 = vmatprep.mubr.f32.mxu0 %v14219_v18  ;;  %v25519_v18 = vld [vmem:[%s26647_s1 + $0x28] sm:$0xff] }
0x1815   : > { %18904 = vmatmul.mubr.f32.gmra.mrb[134].mxu0 %v14220_v8 }
0x1816   : > { %18906 = vmatprep.mubr.f32.mxu0 %v14221_v47 }
0x1819   : > { %18907 = vmatmul.mubr.f32.gmra.mrb[136].mxu0 %v14222_v50  ;;  %v25525_v50 = vld [vmem:[%s26647_s1 + $0x30] sm:$0xff] }
0x181a   : > { %18909 = vmatprep.mubr.f32.mxu0 %v14223_v31 }
0x181d   : > { %18910 = vmatmul.mubr.f32.gmra.mrb[138].mxu0 %v14224_v5  ;;  %v25531_v5 = vld [vmem:[%s26647_s1 + $0x38] sm:$0xff] }
0x181e   : > { %18912 = vmatprep.mubr.f32.mxu0 %v14225_v39 }
0x1821   : > { %18913 = vmatmul.mubr.f32.gmra.mrb[140].mxu0 %v14226_v21 }
0x1822   : > { %18915 = vmatprep.mubr.f32.mxu0 %v14227_v34  ;;  %v25537_v34 = vld [vmem:[%s26647_s1 + $0x40] sm:$0xff] }
0x1825   : > { %18916 = vmatmul.mubr.f32.gmra.mrb[142].mxu0 %v14228_v56 }
0x1837   : > { %v9591_v22 = vpop.permute.xlu1 %9590 }
0x1838   : > { %9637 = vst.msk [vmem:[%s22719_s10 + $0x18] sm:$0xff] %vm3558_vm3, %v9591_v22  ;;  %v9589_v52 = vpop.permute.xlu0 %9588  ;;  %v25543_v22 = vld [vmem:[%s26647_s1 + $0x48] sm:$0xff] }
0x1839   : > { %9636 = vst.msk [vmem:[%s22719_s10 + $0x8] sm:$0xff] %vm3558_vm3, %v9589_v52 }
0x183b   : > { %v9595_v0 = vpop.permute.xlu1 %9594 }
0x183c   : > { %9639 = vst.msk [vmem:[%s22719_s10 + $0x38] sm:$0xff] %vm3558_vm3, %v9595_v0  ;;  %v9593_v7 = vpop.permute.xlu0 %9592 }
0x183d   : > { %9638 = vst.msk [vmem:[%s22719_s10 + $0x28] sm:$0xff] %vm3558_vm3, %v9593_v7  ;;  %v25549_v7 = vld [vmem:[%s26647_s1 + $0x50] sm:$0xff] }
0x183f   : > { %v9599_v25 = vpop.permute.xlu1 %9598 }
0x1840   : > { %9641 = vst.msk [vmem:[%s22719_s10 + $0x58] sm:$0xff] %vm3558_vm3, %v9599_v25  ;;  %v9597_v55 = vpop.permute.xlu0 %9596 }
0x1841   : > { %9640 = vst.msk [vmem:[%s22719_s10 + $0x48] sm:$0xff] %vm3558_vm3, %v9597_v55  ;;  %v25555_v55 = vld [vmem:[%s26647_s1 + $0x58] sm:$0xff] }
0x1843   : > { %v9603_v43 = vpop.permute.xlu1 %9602 }
0x1844   : > { %9643 = vst.msk [vmem:[%s22719_s10 + $0x78] sm:$0xff] %vm3558_vm3, %v9603_v43  ;;  %v9601_v36 = vpop.permute.xlu0 %9600 }
0x1845   : > { %9642 = vst.msk [vmem:[%s22719_s10 + $0x68] sm:$0xff] %vm3558_vm3, %v9601_v36 }
0x1847   : > { %v9607_v13 = vpop.permute.xlu1 %9606 }
0x1848   : > { %9645 = vst.msk [vmem:[%s22719_s10 + $0x98] sm:$0xff] %vm3558_vm3, %v9607_v13  ;;  %v9605_v28 = vpop.permute.xlu0 %9604  ;;  %v25561_v13 = vld [vmem:[%s26647_s1 + $0x60] sm:$0xff] }
0x1849   : > { %9644 = vst.msk [vmem:[%s22719_s10 + $0x88] sm:$0xff] %vm3558_vm3, %v9605_v28 }
0x184b   : > { %v9611_v35 = vpop.permute.xlu1 %9610 }
0x184c   : > { %9647 = vst.msk [vmem:[%s22719_s10 + $0xb8] sm:$0xff] %vm3558_vm3, %v9611_v35  ;;  %v9609_v37 = vpop.permute.xlu0 %9608  ;;  %v25567_v35 = vld [vmem:[%s26647_s1 + $0x68] sm:$0xff] }
0x184d   : > { %9646 = vst.msk [vmem:[%s22719_s10 + $0xa8] sm:$0xff] %vm3558_vm3, %v9609_v37 }
0x184f   : > { %v9615_v38 = vpop.permute.xlu1 %9614 }
0x1850   : > { %9649 = vst.msk [vmem:[%s22719_s10 + $0xd8] sm:$0xff] %vm3558_vm3, %v9615_v38  ;;  %v9613_v42 = vpop.permute.xlu0 %9612 }
0x1851   : > { %9648 = vst.msk [vmem:[%s22719_s10 + $0xc8] sm:$0xff] %vm3558_vm3, %v9613_v42  ;;  %v25573_v42 = vld [vmem:[%s26647_s1 + $0x70] sm:$0xff] }
0x1853   : > { %v9619_v40 = vpop.permute.xlu1 %9618 }
0x1854   : > { %9651 = vst.msk [vmem:[%s22719_s10 + $0xf8] sm:$0xff] %vm3558_vm3, %v9619_v40  ;;  %v9617_v24 = vpop.permute.xlu0 %9616 }
0x1855   : > { %9650 = vst.msk [vmem:[%s22719_s10 + $0xe8] sm:$0xff] %vm3558_vm3, %v9617_v24  ;;  %v25579_v24 = vld [vmem:[%s26647_s1 + $0x78] sm:$0xff] }
0x18bc   : > { %v18784_v26 = vpop.f32.mrb[112].mxu0 }
0x18bd   : > { %v10115_v49 = vpop.f32.mrb[113].mxu0 }
0x18be   : > { %v21006_v62 = vpack.c.bf16 %v18784_v26, %v10115_v49  ;;  %v25585_v26 = vld [vmem:[%s26647_s1] sm:$0xff] }
0x18bf   : > { %v14245_v49 = vld [vmem:[%s26650_s4 + $0x300] sm:$0xff] }
0x18c0   : > { %v18787_v4 = vpop.f32.mrb[114].mxu0  ;;  %21007 = vmatprep.subr.bf16.mxu1 %v21006_v62 }
0x18c1   : > { %v10125_v19 = vpop.f32.mrb[115].mxu0  ;;  %21009 = vmatpush3.bf16.msra.mxu1 %v21006_v62  ;;  %v14246_v62 = vld [vmem:[%s26650_s4 + $0x308] sm:$0xff] }
0x18c2   : > { %v21010_v29 = vpack.c.bf16 %v18787_v4, %v10125_v19  ;;  %v21102_v4 = vpack.c.bf16 %v14246_v62, %v14245_v49  ;;  %v14247_v19 = vld [vmem:[%s26650_s4 + $0x310] sm:$0xff]  ;;  %v25672_v62 = vld [vmem:[%s26649_s3] ss:$0 sm:$0xff] }
0x18c4   : > { %v18790_v41 = vpop.f32.mrb[116].mxu0  ;;  %21011 = vmatprep.subr.bf16.mxu1 %v21010_v29  ;;  %21103 = vmatprep.subr.bf16.mxu0 %v21102_v4 }
0x18c5   : > { %v10135_v33 = vpop.f32.mrb[117].mxu0  ;;  %21013 = vmatpush3.bf16.msra.mxu1 %v21010_v29  ;;  %21105 = vmatpush3.bf16.msra.mxu0 %v21102_v4  ;;  %v14248_v29 = vld [vmem:[%s26650_s4 + $0x318] sm:$0xff] }
0x18c6   : > { %v21014_v30 = vpack.c.bf16 %v18790_v41, %v10135_v33  ;;  %v21106_v41 = vpack.c.bf16 %v14248_v29, %v14247_v19  ;;  %v14249_v33 = vld [vmem:[%s26650_s4 + $0x320] sm:$0xff] }
0x18c8   : > { %v18793_v48 = vpop.f32.mrb[118].mxu0  ;;  %21015 = vmatprep.subr.bf16.mxu1 %v21014_v30  ;;  %21107 = vmatprep.subr.bf16.mxu0 %v21106_v41 }
0x18c9   : > { %v10145_v60 = vpop.f32.mrb[119].mxu0  ;;  %21017 = vmatpush3.bf16.msra.mxu1 %v21014_v30  ;;  %21109 = vmatpush3.bf16.msra.mxu0 %v21106_v41  ;;  %v14250_v30 = vld [vmem:[%s26650_s4 + $0x328] sm:$0xff]  ;;  %v14287_v41 = vld [vmem:[%s26648_s2 + $0x690] sm:$0xff] }
0x18ca   : > { %v21018_v63 = vpack.c.bf16 %v18793_v48, %v10145_v60  ;;  %v21110_v48 = vpack.c.bf16 %v14250_v30, %v14249_v33  ;;  %v14251_v60 = vld [vmem:[%s26650_s4 + $0x330] sm:$0xff] }
0x18cc   : > { %v18796_v3 = vpop.f32.mrb[120].mxu0  ;;  %21019 = vmatprep.subr.bf16.mxu1 %v21018_v63  ;;  %21111 = vmatprep.subr.bf16.mxu0 %v21110_v48 }
0x18cd   : > { %v10155_v53 = vpop.f32.mrb[121].mxu0  ;;  %21021 = vmatpush3.bf16.msra.mxu1 %v21018_v63  ;;  %21113 = vmatpush3.bf16.msra.mxu0 %v21110_v48  ;;  %v14252_v63 = vld [vmem:[%s26650_s4 + $0x338] sm:$0xff] }
0x18ce   : > { %v21022_v32 = vpack.c.bf16 %v18796_v3, %v10155_v53  ;;  %v21114_v3 = vpack.c.bf16 %v14252_v63, %v14251_v60  ;;  %v14285_v53 = vld [vmem:[%s26648_s2 + $0x680] sm:$0xff] }
0x18d0   : > { %v18799_v9 = vpop.f32.mrb[122].mxu0  ;;  %21023 = vmatprep.subr.bf16.mxu1 %v21022_v32  ;;  %21115 = vmatprep.subr.bf16.mxu0 %v21114_v3 }
0x18d1   : > { %v10165_v57 = vpop.f32.mrb[123].mxu0  ;;  %21025 = vmatpush3.bf16.msra.mxu1 %v21022_v32  ;;  %21117 = vmatpush3.bf16.msra.mxu0 %v21114_v3  ;;  %v14286_v32 = vld [vmem:[%s26648_s2 + $0x688] sm:$0xff] }
0x18d2   : > { %v21026_v14 = vpack.c.bf16 %v18799_v9, %v10165_v57  ;;  %v25634_v9 = vpack.c.bf16 %v14286_v32, %v14285_v53  ;;  %v14289_v32 = vld [vmem:[%s26648_s2 + $0x6a0] sm:$0xff] }
0x18d4   : > { %v18802_v51 = vpop.f32.mrb[124].mxu0  ;;  %21027 = vmatprep.subr.bf16.mxu1 %v21026_v14  ;;  %21151 = vmatprep.subr.bf16.mxu0 %v25634_v9 }
0x18d5   : > { %v10175_v15 = vpop.f32.mrb[125].mxu0  ;;  %21029 = vmatpush3.bf16.msra.mxu1 %v21026_v14 }
0x18d6   : > { %v21030_v20 = vpack.c.bf16 %v18802_v51, %v10175_v15 }
0x18d8   : > { %v18805_v27 = vpop.f32.mrb[126].mxu0  ;;  %21031 = vmatprep.subr.bf16.mxu1 %v21030_v20 }
0x18d9   : > { %v10185_v54 = vpop.f32.mrb[127].mxu0  ;;  %21033 = vmatpush3.bf16.msra.mxu1 %v21030_v20 }
0x18da   : > { %v21034_v59 = vpack.c.bf16 %v18805_v27, %v10185_v54 }
0x18dc   : > { %21035 = vmatprep.subr.bf16.mxu1 %v21034_v59  ;;  %v18896_v2 = vpop.f32.mrb[128].mxu0 }
0x18dd   : > { %21037 = vmatpush3.bf16.msra.mxu1 %v21034_v59  ;;  %v10519_v6 = vpop.f32.mrb[129].mxu0 }
0x18de   : > { %v21070_v17 = vpack.c.bf16 %v18896_v2, %v10519_v6 }
0x18e0   : > { %18839 = vmatmul.mubr.f32.vlgmr.msra.gmra.mrb[112].mxu1 %v25495_v45  ;;  %v18899_v61 = vpop.f32.mrb[130].mxu0  ;;  %21071 = vmatprep.subr.bf16.mxu1 %v21070_v17 }
0x18e1   : > { %v10529_v1 = vpop.f32.mrb[131].mxu0  ;;  %21073 = vmatpush3.bf16.msra.mxu1 %v21070_v17  ;;  %18841 = vmatprep.mubr.f32.mxu1 %v25501_v10 }
0x18e2   : > { %v21074_v44 = vpack.c.bf16 %v18899_v61, %v10529_v1 }
0x18e4   : > { %18842 = vmatmul.mubr.f32.gmra.mrb[114].mxu1 %v25507_v11  ;;  %v18902_v46 = vpop.f32.mrb[132].mxu0  ;;  %21075 = vmatprep.subr.bf16.mxu1 %v21074_v44 }
0x18e5   : > { %v10539_v58 = vpop.f32.mrb[133].mxu0  ;;  %21077 = vmatpush3.bf16.msra.mxu1 %v21074_v44  ;;  %18844 = vmatprep.mubr.f32.mxu1 %v25513_v16 }
0x18e6   : > { %v21078_v23 = vpack.c.bf16 %v18902_v46, %v10539_v58 }
0x18e8   : > { %18845 = vmatmul.mubr.f32.gmra.mrb[116].mxu1 %v25519_v18  ;;  %v18905_v8 = vpop.f32.mrb[134].mxu0  ;;  %21079 = vmatprep.subr.bf16.mxu1 %v21078_v23 }
0x18e9   : > { %v10549_v47 = vpop.f32.mrb[135].mxu0  ;;  %21081 = vmatpush3.bf16.msra.mxu1 %v21078_v23  ;;  %18847 = vmatprep.mubr.f32.mxu1 %v25525_v50 }
0x18ea   : > { %v21082_v31 = vpack.c.bf16 %v18905_v8, %v10549_v47 }
0x18ec   : > { %18848 = vmatmul.mubr.f32.gmra.mrb[118].mxu1 %v25531_v5  ;;  %v18908_v39 = vpop.f32.mrb[136].mxu0  ;;  %21083 = vmatprep.subr.bf16.mxu1 %v21082_v31 }
0x18ed   : > { %v10559_v21 = vpop.f32.mrb[137].mxu0  ;;  %21085 = vmatpush3.bf16.msra.mxu1 %v21082_v31  ;;  %18850 = vmatprep.mubr.f32.mxu1 %v25537_v34 }
0x18ee   : > { %v21086_v56 = vpack.c.bf16 %v18908_v39, %v10559_v21 }
0x18f0   : > { %18851 = vmatmul.mubr.f32.gmra.mrb[120].mxu1 %v25543_v22  ;;  %v18911_v52 = vpop.f32.mrb[138].mxu0  ;;  %21087 = vmatprep.subr.bf16.mxu1 %v21086_v56 }
0x18f1   : > { %v10569_v0 = vpop.f32.mrb[139].mxu0  ;;  %21089 = vmatpush3.bf16.msra.mxu1 %v21086_v56  ;;  %18853 = vmatprep.mubr.f32.mxu1 %v25549_v7 }
0x18f2   : > { %v21090_v25 = vpack.c.bf16 %v18911_v52, %v10569_v0 }
0x18f4   : > { %18854 = vmatmul.mubr.f32.gmra.mrb[122].mxu1 %v25555_v55  ;;  %v18914_v43 = vpop.f32.mrb[140].mxu0  ;;  %21091 = vmatprep.subr.bf16.mxu1 %v21090_v25 }
0x18f5   : > { %v10579_v36 = vpop.f32.mrb[141].mxu0  ;;  %21093 = vmatpush3.bf16.msra.mxu1 %v21090_v25  ;;  %18856 = vmatprep.mubr.f32.mxu1 %v25561_v13 }
0x18f6   : > { %v21094_v28 = vpack.c.bf16 %v18914_v43, %v10579_v36 }
0x18f8   : > { %18857 = vmatmul.mubr.f32.gmra.mrb[124].mxu1 %v25567_v35  ;;  %v18917_v37 = vpop.f32.mrb[142].mxu0  ;;  %21095 = vmatprep.subr.bf16.mxu1 %v21094_v28 }
0x18f9   : > { %v10589_v38 = vpop.f32.mrb[143].mxu0  ;;  %21097 = vmatpush3.bf16.msra.mxu1 %v21094_v28  ;;  %18859 = vmatprep.mubr.f32.mxu1 %v25573_v42 }
0x18fa   : > { %v21098_v40 = vpack.c.bf16 %v18917_v37, %v10589_v38 }
0x18fc   : > { %18860 = vmatmul.mubr.f32.gmra.mrb[126].mxu1 %v25579_v24  ;;  %21099 = vmatprep.subr.bf16.mxu1 %v21098_v40 }
0x18fd   : > { %21101 = vmatpush3.bf16.msra.mxu1 %v21098_v40  ;;  %18950 = vmatprep.mubr.f32.mxu1 %v25585_v26 }
0x1900   : > { %18951 = vmatmul.mubr.f32.vlgmr.msra.gmra.mrb[128].mxu1 %v25495_v45 }
0x1901   : > { %18953 = vmatprep.mubr.f32.mxu1 %v25501_v10 }
0x1904   : > { %18954 = vmatmul.mubr.f32.gmra.mrb[130].mxu1 %v25507_v11 }
0x1905   : > { %18956 = vmatprep.mubr.f32.mxu1 %v25513_v16 }
0x1908   : > { %18957 = vmatmul.mubr.f32.gmra.mrb[132].mxu1 %v25519_v18 }
0x1909   : > { %18959 = vmatprep.mubr.f32.mxu1 %v25525_v50 }
0x190c   : > { %18960 = vmatmul.mubr.f32.gmra.mrb[134].mxu1 %v25531_v5 }
0x190d   : > { %18962 = vmatprep.mubr.f32.mxu1 %v25537_v34 }
0x1910   : > { %18963 = vmatmul.mubr.f32.gmra.mrb[136].mxu1 %v25543_v22 }
0x1911   : > { %18965 = vmatprep.mubr.f32.mxu1 %v25549_v7 }
0x1914   : > { %18966 = vmatmul.mubr.f32.gmra.mrb[138].mxu1 %v25555_v55 }
0x1915   : > { %18968 = vmatprep.mubr.f32.mxu1 %v25561_v13 }
0x1918   : > { %18969 = vmatmul.mubr.f32.gmra.mrb[140].mxu1 %v25567_v35 }
0x1919   : > { %18971 = vmatprep.mubr.f32.mxu1 %v25573_v42 }
0x191c   : > { %18972 = vmatmul.mubr.f32.gmra.mrb[142].mxu1 %v25579_v24 }
0x191d   : > { %19046 = vmatprep.mubr.f32.mxu1 %v25585_v26 }
0x19b3   : > { %v18840_v57 = vpop.f32.mrb[112].mxu1 }
0x19b4   : > { %v10266_v14 = vadd.f32 %v25335_v12, %v18840_v57  ;;  %v10260_v51 = vpop.f32.mrb[113].mxu1  ;;  %v14290_v57 = vld [vmem:[%s26648_s2 + $0x6a8] sm:$0xff] }
0x19b5   : > { %v10261_v15 = vadd.f32 %v25335_v12, %v10260_v51 }
0x19b6   : > { %10357 = vrot.lane.b32.xlu1 %v10266_v14, %s21740_s18 }
0x19b7   : > { %v18843_v20 = vpop.f32.mrb[114].mxu1  ;;  %10355 = vrot.lane.b32.xlu0 %v10261_v15, %s21740_s18 }
0x19b8   : > { %v10276_v27 = vadd.f32 %v25335_v12, %v18843_v20  ;;  %v10270_v54 = vpop.f32.mrb[115].mxu1 }
0x19b9   : > { %v10271_v59 = vadd.f32 %v25335_v12, %v10270_v54  ;;  %v21158_v54 = vpack.c.bf16 %v14290_v57, %v14289_v32 }
0x19ba   : > { %10361 = vrot.lane.b32.xlu1 %v10276_v27, %s21740_s18 }
0x19bb   : > { %v18846_v2 = vpop.f32.mrb[116].mxu1  ;;  %10359 = vrot.lane.b32.xlu0 %v10271_v59, %s21740_s18 }
0x19bc   : > { %v10286_v6 = vadd.f32 %v25335_v12, %v18846_v2  ;;  %v10280_v17 = vpop.f32.mrb[117].mxu1  ;;  %v14291_v2 = vld [vmem:[%s26648_s2 + $0x6b0] sm:$0xff] }
0x19bd   : > { %v10281_v61 = vadd.f32 %v25335_v12, %v10280_v17 }
0x19be   : > { %10365 = vrot.lane.b32.xlu1 %v10286_v6, %s21740_s18  ;;  %v14292_v6 = vld [vmem:[%s26648_s2 + $0x6b8] sm:$0xff] }
0x19bf   : > { %v18849_v1 = vpop.f32.mrb[118].mxu1  ;;  %10363 = vrot.lane.b32.xlu0 %v10281_v61, %s21740_s18 }
0x19c0   : > { %v10296_v44 = vadd.f32 %v25335_v12, %v18849_v1  ;;  %v10290_v46 = vpop.f32.mrb[119].mxu1 }
0x19c1   : > { %v10291_v58 = vadd.f32 %v25335_v12, %v10290_v46  ;;  %v21162_v46 = vpack.c.bf16 %v14292_v6, %v14291_v2  ;;  %v14269_v2 = vld [vmem:[%s22376_s15 + $0x680] sm:$0xff]  ;;  %v14270_v6 = vld [vmem:[%s22376_s15 + $0x688] sm:$0xff] }
0x19c2   : > { %10369 = vrot.lane.b32.xlu1 %v10296_v44, %s21740_s18 }
0x19c3   : > { %v18852_v23 = vpop.f32.mrb[120].mxu1  ;;  %10367 = vrot.lane.b32.xlu0 %v10291_v58, %s21740_s18 }
0x19c4   : > { %v10306_v8 = vadd.f32 %v25335_v12, %v18852_v23  ;;  %v10300_v47 = vpop.f32.mrb[121].mxu1  ;;  %v14293_v23 = vld [vmem:[%s26648_s2 + $0x6c0] sm:$0xff] }
0x19c5   : > { %v10301_v31 = vadd.f32 %v25335_v12, %v10300_v47 }
0x19c6   : > { %10373 = vrot.lane.b32.xlu1 %v10306_v8, %s21740_s18  ;;  %v14294_v8 = vld [vmem:[%s26648_s2 + $0x6c8] sm:$0xff] }
0x19c7   : > { %v18855_v39 = vpop.f32.mrb[122].mxu1  ;;  %10371 = vrot.lane.b32.xlu0 %v10301_v31, %s21740_s18 }
0x19c8   : > { %v10316_v21 = vadd.f32 %v25335_v12, %v18855_v39  ;;  %v10310_v56 = vpop.f32.mrb[123].mxu1 }
0x19c9   : > { %v10311_v52 = vadd.f32 %v25335_v12, %v10310_v56 }
0x19ca   : > { %10377 = vrot.lane.b32.xlu1 %v10316_v21, %s21740_s18 }
0x19cb   : > { %v18858_v0 = vpop.f32.mrb[124].mxu1  ;;  %10375 = vrot.lane.b32.xlu0 %v10311_v52, %s21740_s18  ;;  %v21166_v52 = vpack.c.bf16 %v14294_v8, %v14293_v23  ;;  %v14278_v23 = vld [vmem:[%s22376_s15 + $0x6c8] sm:$0xff]  ;;  %v14279_v8 = vld [vmem:[%s22376_s15 + $0x6d0] sm:$0xff] }
0x19cc   : > { %v10326_v25 = vadd.f32 %v25335_v12, %v18858_v0  ;;  %v10320_v43 = vpop.f32.mrb[125].mxu1 }
0x19cd   : > { %v10321_v36 = vadd.f32 %v25335_v12, %v10320_v43  ;;  %v14296_v43 = vld [vmem:[%s26648_s2 + $0x6d8] sm:$0xff] }
0x19ce   : > { %10381 = vrot.lane.b32.xlu1 %v10326_v25, %s21740_s18  ;;  %v14295_v25 = vld [vmem:[%s26648_s2 + $0x6d0] sm:$0xff] }
0x19cf   : > { %v18861_v28 = vpop.f32.mrb[126].mxu1  ;;  %10379 = vrot.lane.b32.xlu0 %v10321_v36, %s21740_s18 }
0x19d0   : > { %v10336_v37 = vadd.f32 %v25335_v12, %v18861_v28  ;;  %v10330_v38 = vpop.f32.mrb[127].mxu1 }
0x19d1   : > { %v10331_v40 = vadd.f32 %v25335_v12, %v10330_v38  ;;  %v14288_v12 = vld [vmem:[%s26648_s2 + $0x698] sm:$0xff] }
0x19d2   : > { %10385 = vrot.lane.b32.xlu1 %v10336_v37, %s21740_s18  ;;  %v21154_v3 = vpack.c.bf16 %v14288_v12, %v14287_v41 }
0x19d3   : > { %v18952_v49 = vpop.f32.mrb[128].mxu1  ;;  %10383 = vrot.lane.b32.xlu0 %v10331_v40, %s21740_s18 }
0x19d4   : > { %v10670_v4 = vadd.f32 %v25672_v62, %v18952_v49  ;;  %v10664_v19 = vpop.f32.mrb[129].mxu1  ;;  %v21170_v49 = vpack.c.bf16 %v14296_v43, %v14295_v25 }
0x19d5   : > { %v10665_v29 = vadd.f32 %v25672_v62, %v10664_v19  ;;  %v14297_v19 = vld [vmem:[%s26648_s2 + $0x6e0] sm:$0xff] }
0x19d6   : > { %v10744_v48 = vmax.f32 %v10670_v4, 0.0 }
0x19d7   : > { %v10743_v33 = vmax.f32 %v10665_v29, 0.0  ;;  %v18955_v30 = vpop.f32.mrb[130].mxu1  ;;  %v14298_v29 = vld [vmem:[%s26648_s2 + $0x6e8] sm:$0xff] }
0x19d8   : > { %v10680_v60 = vadd.f32 %v25672_v62, %v18955_v30  ;;  %v10674_v63 = vpop.f32.mrb[131].mxu1 }
0x19d9   : > { %v10675_v53 = vadd.f32 %v25672_v62, %v10674_v63  ;;  %18990 = vmatprep.mubr.msk.f32.mxu0 %vm1677_vm0, %v10743_v33 }
0x19da   : > { %18991 = vmatmul.mubr.msk.f32.vlgmr.msra.gmra.mrb[144].mxu0 %vm1677_vm0, %v10744_v48  ;;  %v10746_v15 = vmax.f32 %v10680_v60, 0.0  ;;  %v21174_v60 = vpack.c.bf16 %v14298_v29, %v14297_v19 }
0x19db   : > { %v10745_v14 = vmax.f32 %v10675_v53, 0.0  ;;  %v18958_v51 = vpop.f32.mrb[132].mxu1  ;;  %21153 = vmatpush3.bf16.msra.mxu0 %v25634_v9  ;;  %v14300_v53 = vld [vmem:[%s26648_s2 + $0x6f8] sm:$0xff] }
0x19dc   : > { %v10690_v20 = vadd.f32 %v25672_v62, %v18958_v51  ;;  %v10684_v27 = vpop.f32.mrb[133].mxu1  ;;  %21155 = vmatprep.subr.bf16.mxu0 %v21154_v3 }
0x19dd   : > { %v10685_v59 = vadd.f32 %v25672_v62, %v10684_v27  ;;  %18993 = vmatprep.mubr.msk.f32.mxu0 %vm1677_vm0, %v10745_v14 }
0x19de   : > { %18994 = vmatmul.mubr.msk.f32.gmra.mrb[146].mxu0 %vm1677_vm0, %v10746_v15  ;;  %v10748_v61 = vmax.f32 %v10690_v20, 0.0 }
0x19df   : > { %v10747_v9 = vmax.f32 %v10685_v59, 0.0  ;;  %v18961_v17 = vpop.f32.mrb[134].mxu1  ;;  %21157 = vmatpush3.bf16.msra.mxu0 %v21154_v3  ;;  %v14299_v3 = vld [vmem:[%s26648_s2 + $0x6f0] sm:$0xff] }
0x19e0   : > { %v10700_v1 = vadd.f32 %v25672_v62, %v18961_v17  ;;  %v10694_v44 = vpop.f32.mrb[135].mxu1  ;;  %21159 = vmatprep.subr.bf16.mxu0 %v21158_v54  ;;  %v21178_v20 = vpack.c.bf16 %v14300_v53, %v14299_v3  ;;  %v14272_v17 = vld [vmem:[%s22376_s15 + $0x698] sm:$0xff] }
0x19e1   : > { %v10695_v58 = vadd.f32 %v25672_v62, %v10694_v44  ;;  %18996 = vmatprep.mubr.msk.f32.mxu0 %vm1677_vm0, %v10747_v9  ;;  %v14271_v9 = vld [vmem:[%s22376_s15 + $0x690] sm:$0xff] }
0x19e2   : > { %18997 = vmatmul.mubr.msk.f32.gmra.mrb[148].mxu0 %vm1677_vm0, %v10748_v61  ;;  %v10750_v39 = vmax.f32 %v10700_v1, 0.0  ;;  %v14273_v61 = vld [vmem:[%s22376_s15 + $0x6a0] sm:$0xff]  ;;  %v14274_v1 = vld [vmem:[%s22376_s15 + $0x6a8] sm:$0xff]  ;;  %v14275_v44 = vld [vmem:[%s22376_s15 + $0x6b0] sm:$0xff] }
0x19e3   : > { %v10749_v47 = vmax.f32 %v10695_v58, 0.0  ;;  %v18964_v31 = vpop.f32.mrb[136].mxu1  ;;  %21161 = vmatpush3.bf16.msra.mxu0 %v21158_v54  ;;  %v14277_v58 = vld [vmem:[%s22376_s15 + $0x6c0] sm:$0xff] }
0x19e4   : > { %v10710_v21 = vadd.f32 %v25672_v62, %v18964_v31  ;;  %v10704_v56 = vpop.f32.mrb[137].mxu1  ;;  %21163 = vmatprep.subr.bf16.mxu0 %v21162_v46  ;;  %v14281_v31 = vld [vmem:[%s22376_s15 + $0x6e0] sm:$0xff] }
0x19e5   : > { %v10705_v0 = vadd.f32 %v25672_v62, %v10704_v56  ;;  %18999 = vmatprep.mubr.msk.f32.mxu0 %vm1677_vm0, %v10749_v47  ;;  %v14280_v47 = vld [vmem:[%s22376_s15 + $0x6d8] sm:$0xff] }
0x19e6   : > { %19000 = vmatmul.mubr.msk.f32.gmra.mrb[150].mxu0 %vm1677_vm0, %v10750_v39  ;;  %v10752_v37 = vmax.f32 %v10710_v21, 0.0  ;;  %v14282_v39 = vld [vmem:[%s22376_s15 + $0x6e8] sm:$0xff]  ;;  %v14283_v21 = vld [vmem:[%s22376_s15 + $0x6f0] sm:$0xff]  ;;  %v14284_v56 = vld [vmem:[%s22376_s15 + $0x6f8] sm:$0xff] }
0x19e7   : > { %v10751_v36 = vmax.f32 %v10705_v0, 0.0  ;;  %v18967_v28 = vpop.f32.mrb[138].mxu1  ;;  %21165 = vmatpush3.bf16.msra.mxu0 %v21162_v46  ;;  %v14276_v46 = vld [vmem:[%s22376_s15 + $0x6b8] sm:$0xff] }
0x19e8   : > { %v10720_v38 = vadd.f32 %v25672_v62, %v18967_v28  ;;  %v10714_v40 = vpop.f32.mrb[139].mxu1  ;;  %21167 = vmatprep.subr.bf16.mxu0 %v21166_v52 }
0x19e9   : > { %v10715_v4 = vadd.f32 %v25672_v62, %v10714_v40  ;;  %19002 = vmatprep.mubr.msk.f32.mxu0 %vm1677_vm0, %v10751_v36 }
0x19ea   : > { %19003 = vmatmul.mubr.msk.f32.gmra.mrb[152].mxu0 %vm1677_vm0, %v10752_v37  ;;  %v10754_v33 = vmax.f32 %v10720_v38, 0.0 }
0x19eb   : > { %v10753_v41 = vmax.f32 %v10715_v4, 0.0  ;;  %v18970_v12 = vpop.f32.mrb[140].mxu1  ;;  %21169 = vmatpush3.bf16.msra.mxu0 %v21166_v52 }
0x19ec   : > { %v10730_v30 = vadd.f32 %v25672_v62, %v18970_v12  ;;  %v10724_v48 = vpop.f32.mrb[141].mxu1  ;;  %21171 = vmatprep.subr.bf16.mxu0 %v21170_v49 }
0x19ed   : > { %v10725_v63 = vadd.f32 %v25672_v62, %v10724_v48  ;;  %19005 = vmatprep.mubr.msk.f32.mxu0 %vm1677_vm0, %v10753_v41 }
0x19ee   : > { %19006 = vmatmul.mubr.msk.f32.gmra.mrb[154].mxu0 %vm1677_vm0, %v10754_v33  ;;  %v10756_v14 = vmax.f32 %v10730_v30, 0.0 }
0x19ef   : > { %v10755_v32 = vmax.f32 %v10725_v63, 0.0  ;;  %v18973_v57 = vpop.f32.mrb[142].mxu1  ;;  %21173 = vmatpush3.bf16.msra.mxu0 %v21170_v49 }
0x19f0   : > { %v10740_v51 = vadd.f32 %v25672_v62, %v18973_v57  ;;  %v10734_v15 = vpop.f32.mrb[143].mxu1  ;;  %21175 = vmatprep.subr.bf16.mxu0 %v21174_v60 }
0x19f1   : > { %v10735_v27 = vadd.f32 %v25672_v62, %v10734_v15  ;;  %19008 = vmatprep.mubr.msk.f32.mxu0 %vm1677_vm0, %v10755_v32 }
0x19f2   : > { %19009 = vmatmul.mubr.msk.f32.gmra.mrb[156].mxu0 %vm1677_vm0, %v10756_v14  ;;  %v10758_v59 = vmax.f32 %v10740_v51, 0.0 }
0x19f3   : > { %v10757_v54 = vmax.f32 %v10735_v27, 0.0  ;;  %21177 = vmatpush3.bf16.msra.mxu0 %v21174_v60 }
0x19f4   : > { %21179 = vmatprep.subr.bf16.mxu0 %v21178_v20 }
0x19f5   : > { %19011 = vmatprep.mubr.msk.f32.mxu0 %vm1677_vm0, %v10757_v54 }
0x19f6   : > { %19012 = vmatmul.mubr.msk.f32.gmra.mrb[158].mxu0 %vm1677_vm0, %v10758_v59 }
0x19f7   : > { %21181 = vmatpush3.bf16.msra.mxu0 %v21178_v20  ;;  %19102 = vmatprep.mubr.f32.mxu0 %v14269_v2 }
0x19fa   : > { %19103 = vmatmul.mubr.f32.vlgmr.msra.gmra.mrb[160].mxu0 %v14270_v6 }
0x19fb   : > { %19105 = vmatprep.mubr.f32.mxu0 %v14271_v9 }
0x19fe   : > { %19106 = vmatmul.mubr.f32.gmra.mrb[162].mxu0 %v14272_v17 }
0x19ff   : > { %19108 = vmatprep.mubr.f32.mxu0 %v14273_v61 }
0x1a02   : > { %19109 = vmatmul.mubr.f32.gmra.mrb[164].mxu0 %v14274_v1 }
0x1a03   : > { %19111 = vmatprep.mubr.f32.mxu0 %v14275_v44 }
0x1a06   : > { %19112 = vmatmul.mubr.f32.gmra.mrb[166].mxu0 %v14276_v46 }
0x1a07   : > { %19114 = vmatprep.mubr.f32.mxu0 %v14277_v58 }
0x1a0a   : > { %19115 = vmatmul.mubr.f32.gmra.mrb[168].mxu0 %v14278_v23 }
0x1a0b   : > { %19117 = vmatprep.mubr.f32.mxu0 %v14279_v8 }
0x1a0e   : > { %19118 = vmatmul.mubr.f32.gmra.mrb[170].mxu0 %v14280_v47 }
0x1a0f   : > { %19120 = vmatprep.mubr.f32.mxu0 %v14281_v31 }
0x1a12   : > { %19121 = vmatmul.mubr.f32.gmra.mrb[172].mxu0 %v14282_v39 }
0x1a13   : > { %19123 = vmatprep.mubr.f32.mxu0 %v14283_v21 }
0x1a16   : > { %19124 = vmatmul.mubr.f32.gmra.mrb[174].mxu0 %v14284_v56 }
0x1a28   : > { %v10358_v52 = vpop.permute.xlu1 %10357 }
0x1a29   : > { %10404 = vst.msk [vmem:[%s22719_s10 + $0x18] sm:$0xff] %vm4326_vm4, %v10358_v52  ;;  %v10356_v0 = vpop.permute.xlu0 %10355 }
0x1a2a   : > { %10403 = vst.msk [vmem:[%s22719_s10 + $0x8] sm:$0xff] %vm4326_vm4, %v10356_v0 }
0x1a2c   : > { %v10362_v25 = vpop.permute.xlu1 %10361 }
0x1a2d   : > { %10406 = vst.msk [vmem:[%s22719_s10 + $0x38] sm:$0xff] %vm4326_vm4, %v10362_v25  ;;  %v10360_v43 = vpop.permute.xlu0 %10359 }
0x1a2e   : > { %10405 = vst.msk [vmem:[%s22719_s10 + $0x28] sm:$0xff] %vm4326_vm4, %v10360_v43 }
0x1a30   : > { %v10366_v36 = vpop.permute.xlu1 %10365 }
0x1a31   : > { %10408 = vst.msk [vmem:[%s22719_s10 + $0x58] sm:$0xff] %vm4326_vm4, %v10366_v36  ;;  %v10364_v28 = vpop.permute.xlu0 %10363 }
0x1a32   : > { %10407 = vst.msk [vmem:[%s22719_s10 + $0x48] sm:$0xff] %vm4326_vm4, %v10364_v28 }
0x1a34   : > { %v10370_v37 = vpop.permute.xlu1 %10369 }
0x1a35   : > { %10410 = vst.msk [vmem:[%s22719_s10 + $0x78] sm:$0xff] %vm4326_vm4, %v10370_v37  ;;  %v10368_v38 = vpop.permute.xlu0 %10367 }
0x1a36   : > { %10409 = vst.msk [vmem:[%s22719_s10 + $0x68] sm:$0xff] %vm4326_vm4, %v10368_v38 }
0x1a38   : > { %v10374_v40 = vpop.permute.xlu1 %10373 }
0x1a39   : > { %10412 = vst.msk [vmem:[%s22719_s10 + $0x98] sm:$0xff] %vm4326_vm4, %v10374_v40  ;;  %v10372_v49 = vpop.permute.xlu0 %10371 }
0x1a3a   : > { %10411 = vst.msk [vmem:[%s22719_s10 + $0x88] sm:$0xff] %vm4326_vm4, %v10372_v49 }
0x1a3c   : > { %v10378_v4 = vpop.permute.xlu1 %10377 }
0x1a3d   : > { %10414 = vst.msk [vmem:[%s22719_s10 + $0xb8] sm:$0xff] %vm4326_vm4, %v10378_v4  ;;  %v10376_v19 = vpop.permute.xlu0 %10375 }
0x1a3e   : > { %10413 = vst.msk [vmem:[%s22719_s10 + $0xa8] sm:$0xff] %vm4326_vm4, %v10376_v19 }
0x1a40   : > { %v10382_v29 = vpop.permute.xlu1 %10381 }
0x1a41   : > { %10416 = vst.msk [vmem:[%s22719_s10 + $0xd8] sm:$0xff] %vm4326_vm4, %v10382_v29  ;;  %v10380_v41 = vpop.permute.xlu0 %10379 }
0x1a42   : > { %10415 = vst.msk [vmem:[%s22719_s10 + $0xc8] sm:$0xff] %vm4326_vm4, %v10380_v41 }
0x1a44   : > { %v10386_v12 = vpop.permute.xlu1 %10385 }
0x1a45   : > { %10418 = vst.msk [vmem:[%s22719_s10 + $0xf8] sm:$0xff] %vm4326_vm4, %v10386_v12  ;;  %v10384_v33 = vpop.permute.xlu0 %10383 }
0x1a46   : > { %10417 = vst.msk [vmem:[%s22719_s10 + $0xe8] sm:$0xff] %vm4326_vm4, %v10384_v33 }
0x1aad   : > { %v18992_v30 = vpop.f32.mrb[144].mxu0 }
0x1aae   : > { %v10882_v48 = vpop.f32.mrb[145].mxu0 }
0x1aaf   : > { %v21118_v60 = vpack.c.bf16 %v18992_v30, %v10882_v48  ;;  %v25865_v48 = vld [vmem:[%s26651_s5] ss:$0 sm:$0xff] }
0x1ab1   : > { %v18995_v63 = vpop.f32.mrb[146].mxu0  ;;  %21119 = vmatprep.subr.bf16.mxu1 %v21118_v60 }
0x1ab2   : > { %v10892_v3 = vpop.f32.mrb[147].mxu0  ;;  %21121 = vmatpush3.bf16.msra.mxu1 %v21118_v60 }
0x1ab3   : > { %v21122_v53 = vpack.c.bf16 %v18995_v63, %v10892_v3 }
0x1ab5   : > { %v18998_v32 = vpop.f32.mrb[148].mxu0  ;;  %21123 = vmatprep.subr.bf16.mxu1 %v21122_v53 }
0x1ab6   : > { %v10902_v57 = vpop.f32.mrb[149].mxu0  ;;  %21125 = vmatpush3.bf16.msra.mxu1 %v21122_v53 }
0x1ab7   : > { %v21126_v14 = vpack.c.bf16 %v18998_v32, %v10902_v57 }
0x1ab9   : > { %v19001_v51 = vpop.f32.mrb[150].mxu0  ;;  %21127 = vmatprep.subr.bf16.mxu1 %v21126_v14 }
0x1aba   : > { %v10912_v15 = vpop.f32.mrb[151].mxu0  ;;  %21129 = vmatpush3.bf16.msra.mxu1 %v21126_v14 }
0x1abb   : > { %v21130_v20 = vpack.c.bf16 %v19001_v51, %v10912_v15 }
0x1abd   : > { %v19004_v27 = vpop.f32.mrb[152].mxu0  ;;  %21131 = vmatprep.subr.bf16.mxu1 %v21130_v20 }
0x1abe   : > { %v10922_v54 = vpop.f32.mrb[153].mxu0  ;;  %21133 = vmatpush3.bf16.msra.mxu1 %v21130_v20 }
0x1abf   : > { %v21134_v59 = vpack.c.bf16 %v19004_v27, %v10922_v54 }
0x1ac1   : > { %v19007_v2 = vpop.f32.mrb[154].mxu0  ;;  %21135 = vmatprep.subr.bf16.mxu1 %v21134_v59 }
0x1ac2   : > { %v10932_v6 = vpop.f32.mrb[155].mxu0  ;;  %21137 = vmatpush3.bf16.msra.mxu1 %v21134_v59 }
0x1ac3   : > { %v21138_v9 = vpack.c.bf16 %v19007_v2, %v10932_v6 }
0x1ac5   : > { %v19010_v17 = vpop.f32.mrb[156].mxu0  ;;  %21139 = vmatprep.subr.bf16.mxu1 %v21138_v9 }
0x1ac6   : > { %v10942_v61 = vpop.f32.mrb[157].mxu0  ;;  %21141 = vmatpush3.bf16.msra.mxu1 %v21138_v9 }
0x1ac7   : > { %v21142_v1 = vpack.c.bf16 %v19010_v17, %v10942_v61 }
0x1ac9   : > { %v19013_v44 = vpop.f32.mrb[158].mxu0  ;;  %21143 = vmatprep.subr.bf16.mxu1 %v21142_v1 }
0x1aca   : > { %v10952_v46 = vpop.f32.mrb[159].mxu0  ;;  %21145 = vmatpush3.bf16.msra.mxu1 %v21142_v1 }
0x1acb   : > { %v21146_v58 = vpack.c.bf16 %v19013_v44, %v10952_v46 }
0x1acd   : > { %21147 = vmatprep.subr.bf16.mxu1 %v21146_v58  ;;  %v19104_v23 = vpop.f32.mrb[160].mxu0 }
0x1ace   : > { %21149 = vmatpush3.bf16.msra.mxu1 %v21146_v58  ;;  %v11286_v8 = vpop.f32.mrb[161].mxu0 }
0x1acf   : > { %v21182_v47 = vpack.c.bf16 %v19104_v23, %v11286_v8 }
0x1ad1   : > { %19047 = vmatmul.mubr.f32.vlgmr.msra.gmra.mrb[144].mxu1 %v25495_v45  ;;  %v19107_v31 = vpop.f32.mrb[162].mxu0  ;;  %21183 = vmatprep.subr.bf16.mxu1 %v21182_v47 }
0x1ad2   : > { %v11296_v39 = vpop.f32.mrb[163].mxu0  ;;  %21185 = vmatpush3.bf16.msra.mxu1 %v21182_v47  ;;  %19049 = vmatprep.mubr.f32.mxu1 %v25501_v10 }
0x1ad3   : > { %v21186_v21 = vpack.c.bf16 %v19107_v31, %v11296_v39 }
0x1ad5   : > { %19050 = vmatmul.mubr.f32.gmra.mrb[146].mxu1 %v25507_v11  ;;  %v19110_v56 = vpop.f32.mrb[164].mxu0  ;;  %21187 = vmatprep.subr.bf16.mxu1 %v21186_v21 }
0x1ad6   : > { %v11306_v52 = vpop.f32.mrb[165].mxu0  ;;  %21189 = vmatpush3.bf16.msra.mxu1 %v21186_v21  ;;  %19052 = vmatprep.mubr.f32.mxu1 %v25513_v16 }
0x1ad7   : > { %v21190_v0 = vpack.c.bf16 %v19110_v56, %v11306_v52 }
0x1ad9   : > { %19053 = vmatmul.mubr.f32.gmra.mrb[148].mxu1 %v25519_v18  ;;  %v19113_v25 = vpop.f32.mrb[166].mxu0  ;;  %21191 = vmatprep.subr.bf16.mxu1 %v21190_v0 }
0x1ada   : > { %v11316_v43 = vpop.f32.mrb[167].mxu0  ;;  %21193 = vmatpush3.bf16.msra.mxu1 %v21190_v0  ;;  %19055 = vmatprep.mubr.f32.mxu1 %v25525_v50 }
0x1adb   : > { %v21194_v36 = vpack.c.bf16 %v19113_v25, %v11316_v43 }
0x1add   : > { %19056 = vmatmul.mubr.f32.gmra.mrb[150].mxu1 %v25531_v5  ;;  %v19116_v28 = vpop.f32.mrb[168].mxu0  ;;  %21195 = vmatprep.subr.bf16.mxu1 %v21194_v36 }
0x1ade   : > { %v11326_v37 = vpop.f32.mrb[169].mxu0  ;;  %21197 = vmatpush3.bf16.msra.mxu1 %v21194_v36  ;;  %19058 = vmatprep.mubr.f32.mxu1 %v25537_v34 }
0x1adf   : > { %v21198_v38 = vpack.c.bf16 %v19116_v28, %v11326_v37  ;;  %v14343_v37 = vld [vmem:[%s26648_s2 + $0x710] sm:$0xff] }
0x1ae1   : > { %19059 = vmatmul.mubr.f32.gmra.mrb[152].mxu1 %v25543_v22  ;;  %v19119_v40 = vpop.f32.mrb[170].mxu0  ;;  %21199 = vmatprep.subr.bf16.mxu1 %v21198_v38 }
0x1ae2   : > { %v11336_v49 = vpop.f32.mrb[171].mxu0  ;;  %21201 = vmatpush3.bf16.msra.mxu1 %v21198_v38  ;;  %19061 = vmatprep.mubr.f32.mxu1 %v25549_v7  ;;  %v14344_v38 = vld [vmem:[%s26648_s2 + $0x718] sm:$0xff] }
0x1ae3   : > { %v21202_v4 = vpack.c.bf16 %v19119_v40, %v11336_v49 }
0x1ae5   : > { %19062 = vmatmul.mubr.f32.gmra.mrb[154].mxu1 %v25555_v55  ;;  %v19122_v19 = vpop.f32.mrb[172].mxu0  ;;  %21203 = vmatprep.subr.bf16.mxu1 %v21202_v4 }
0x1ae6   : > { %v11346_v29 = vpop.f32.mrb[173].mxu0  ;;  %21205 = vmatpush3.bf16.msra.mxu1 %v21202_v4  ;;  %19064 = vmatprep.mubr.f32.mxu1 %v25561_v13 }
0x1ae7   : > { %v21206_v41 = vpack.c.bf16 %v19122_v19, %v11346_v29 }
0x1ae9   : > { %19065 = vmatmul.mubr.f32.gmra.mrb[156].mxu1 %v25567_v35  ;;  %v19125_v12 = vpop.f32.mrb[174].mxu0  ;;  %21207 = vmatprep.subr.bf16.mxu1 %v21206_v41 }
0x1aea   : > { %v11356_v33 = vpop.f32.mrb[175].mxu0  ;;  %21209 = vmatpush3.bf16.msra.mxu1 %v21206_v41  ;;  %19067 = vmatprep.mubr.f32.mxu1 %v25573_v42  ;;  %v21266_v41 = vpack.c.bf16 %v14344_v38, %v14343_v37 }
0x1aeb   : > { %v21210_v30 = vpack.c.bf16 %v19125_v12, %v11356_v33  ;;  %v14345_v33 = vld [vmem:[%s26648_s2 + $0x720] sm:$0xff] }
0x1aed   : > { %19068 = vmatmul.mubr.f32.gmra.mrb[158].mxu1 %v25579_v24  ;;  %21211 = vmatprep.subr.bf16.mxu1 %v21210_v30 }
0x1aee   : > { %21213 = vmatpush3.bf16.msra.mxu1 %v21210_v30  ;;  %19158 = vmatprep.mubr.f32.mxu1 %v25585_v26  ;;  %v14346_v30 = vld [vmem:[%s26648_s2 + $0x728] sm:$0xff] }
0x1af1   : > { %19159 = vmatmul.mubr.f32.vlgmr.msra.gmra.mrb[160].mxu1 %v25495_v45  ;;  %v14301_v45 = vld [vmem:[%s26650_s4 + $0x340] sm:$0xff] }
0x1af2   : > { %19161 = vmatprep.mubr.f32.mxu1 %v25501_v10  ;;  %v14302_v10 = vld [vmem:[%s26650_s4 + $0x348] sm:$0xff] }
0x1af5   : > { %19162 = vmatmul.mubr.f32.gmra.mrb[162].mxu1 %v25507_v11  ;;  %v21214_v11 = vpack.c.bf16 %v14302_v10, %v14301_v45 }
0x1af6   : > { %19164 = vmatprep.mubr.f32.mxu1 %v25513_v16  ;;  %v14303_v16 = vld [vmem:[%s26650_s4 + $0x350] sm:$0xff] }
0x1af7   : > { %21215 = vmatprep.subr.bf16.mxu0 %v21214_v11 }
0x1af8   : > { %21217 = vmatpush3.bf16.msra.mxu0 %v21214_v11 }
0x1af9   : > { %19165 = vmatmul.mubr.f32.gmra.mrb[164].mxu1 %v25519_v18  ;;  %v14304_v18 = vld [vmem:[%s26650_s4 + $0x358] sm:$0xff] }
0x1afa   : > { %19167 = vmatprep.mubr.f32.mxu1 %v25525_v50  ;;  %v21218_v50 = vpack.c.bf16 %v14304_v18, %v14303_v16 }
0x1afc   : > { %21219 = vmatprep.subr.bf16.mxu0 %v21218_v50 }
0x1afd   : > { %19168 = vmatmul.mubr.f32.gmra.mrb[166].mxu1 %v25531_v5  ;;  %21221 = vmatpush3.bf16.msra.mxu0 %v21218_v50  ;;  %v14305_v5 = vld [vmem:[%s26650_s4 + $0x360] sm:$0xff]  ;;  %v21270_v50 = vpack.c.bf16 %v14346_v30, %v14345_v33  ;;  %v14332_v33 = vld [vmem:[%s22376_s15 + $0x738] sm:$0xff] }
0x1afe   : > { %19170 = vmatprep.mubr.f32.mxu1 %v25537_v34  ;;  %v14306_v34 = vld [vmem:[%s26650_s4 + $0x368] sm:$0xff]  ;;  %v14333_v30 = vld [vmem:[%s22376_s15 + $0x740] sm:$0xff] }
0x1b01   : > { %19171 = vmatmul.mubr.f32.gmra.mrb[168].mxu1 %v25543_v22  ;;  %v21222_v22 = vpack.c.bf16 %v14306_v34, %v14305_v5  ;;  %v14347_v34 = vld [vmem:[%s26648_s2 + $0x730] sm:$0xff] }
0x1b02   : > { %19173 = vmatprep.mubr.f32.mxu1 %v25549_v7  ;;  %v14307_v7 = vld [vmem:[%s26650_s4 + $0x370] sm:$0xff] }
0x1b03   : > { %21223 = vmatprep.subr.bf16.mxu0 %v21222_v22 }
0x1b04   : > { %21225 = vmatpush3.bf16.msra.mxu0 %v21222_v22  ;;  %v14348_v22 = vld [vmem:[%s26648_s2 + $0x738] sm:$0xff] }
0x1b05   : > { %19174 = vmatmul.mubr.f32.gmra.mrb[170].mxu1 %v25555_v55  ;;  %v14308_v55 = vld [vmem:[%s26650_s4 + $0x378] sm:$0xff] }
0x1b06   : > { %19176 = vmatprep.mubr.f32.mxu1 %v25561_v13  ;;  %v21226_v13 = vpack.c.bf16 %v14308_v55, %v14307_v7 }
0x1b08   : > { %21227 = vmatprep.subr.bf16.mxu0 %v21226_v13 }
0x1b09   : > { %19177 = vmatmul.mubr.f32.gmra.mrb[172].mxu1 %v25567_v35  ;;  %21229 = vmatpush3.bf16.msra.mxu0 %v21226_v13  ;;  %v14341_v35 = vld [vmem:[%s26648_s2 + $0x700] sm:$0xff] }
0x1b0a   : > { %19179 = vmatprep.mubr.f32.mxu1 %v25573_v42  ;;  %v14342_v42 = vld [vmem:[%s26648_s2 + $0x708] sm:$0xff] }
0x1b0d   : > { %19180 = vmatmul.mubr.f32.gmra.mrb[174].mxu1 %v25579_v24  ;;  %v25859_v24 = vpack.c.bf16 %v14342_v42, %v14341_v35 }
0x1b0e   : > { %19254 = vmatprep.mubr.f32.mxu1 %v25585_v26 }
0x1b0f   : > { %21263 = vmatprep.subr.bf16.mxu0 %v25859_v24 }
0x1ba4   : > { %v19048_v26 = vpop.f32.mrb[144].mxu1 }
0x1ba5   : > { %v11033_v60 = vadd.f32 %v25865_v48, %v19048_v26  ;;  %v11027_v63 = vpop.f32.mrb[145].mxu1 }
0x1ba6   : > { %v11028_v3 = vadd.f32 %v25865_v48, %v11027_v63  ;;  %v14350_v63 = vld [vmem:[%s26648_s2 + $0x748] sm:$0xff] }
0x1ba7   : > { %11124 = vrot.lane.b32.xlu1 %v11033_v60, %s21741_s14  ;;  %v14349_v60 = vld [vmem:[%s26648_s2 + $0x740] sm:$0xff] }
0x1ba8   : > { %v19051_v53 = vpop.f32.mrb[146].mxu1  ;;  %11122 = vrot.lane.b32.xlu0 %v11028_v3, %s21741_s14 }
0x1ba9   : > { %v11043_v32 = vadd.f32 %v25865_v48, %v19051_v53  ;;  %v11037_v57 = vpop.f32.mrb[147].mxu1 }
0x1baa   : > { %v11038_v14 = vadd.f32 %v25865_v48, %v11037_v57 }
0x1bab   : > { %11128 = vrot.lane.b32.xlu1 %v11043_v32, %s21741_s14 }
0x1bac   : > { %v19054_v51 = vpop.f32.mrb[148].mxu1  ;;  %11126 = vrot.lane.b32.xlu0 %v11038_v14, %s21741_s14 }
0x1bad   : > { %v11053_v15 = vadd.f32 %v25865_v48, %v19054_v51  ;;  %v11047_v20 = vpop.f32.mrb[149].mxu1  ;;  %v21278_v51 = vpack.c.bf16 %v14350_v63, %v14349_v60 }
0x1bae   : > { %v11048_v27 = vadd.f32 %v25865_v48, %v11047_v20  ;;  %v14351_v20 = vld [vmem:[%s26648_s2 + $0x750] sm:$0xff] }
0x1baf   : > { %11132 = vrot.lane.b32.xlu1 %v11053_v15, %s21741_s14 }
0x1bb0   : > { %v19057_v54 = vpop.f32.mrb[150].mxu1  ;;  %11130 = vrot.lane.b32.xlu0 %v11048_v27, %s21741_s14  ;;  %v14352_v27 = vld [vmem:[%s26648_s2 + $0x758] sm:$0xff] }
0x1bb1   : > { %v11063_v59 = vadd.f32 %v25865_v48, %v19057_v54  ;;  %v11057_v2 = vpop.f32.mrb[151].mxu1 }
0x1bb2   : > { %v11058_v6 = vadd.f32 %v25865_v48, %v11057_v2 }
0x1bb3   : > { %11136 = vrot.lane.b32.xlu1 %v11063_v59, %s21741_s14 }
0x1bb4   : > { %v19060_v9 = vpop.f32.mrb[152].mxu1  ;;  %11134 = vrot.lane.b32.xlu0 %v11058_v6, %s21741_s14 }
0x1bb5   : > { %v11073_v17 = vadd.f32 %v25865_v48, %v19060_v9  ;;  %v11067_v61 = vpop.f32.mrb[153].mxu1 }
0x1bb6   : > { %v11068_v1 = vadd.f32 %v25865_v48, %v11067_v61 }
0x1bb7   : > { %11140 = vrot.lane.b32.xlu1 %v11073_v17, %s21741_s14  ;;  %v21282_v17 = vpack.c.bf16 %v14352_v27, %v14351_v20 }
0x1bb8   : > { %v19063_v44 = vpop.f32.mrb[154].mxu1  ;;  %11138 = vrot.lane.b32.xlu0 %v11068_v1, %s21741_s14  ;;  %v14353_v1 = vld [vmem:[%s26648_s2 + $0x760] sm:$0xff] }
0x1bb9   : > { %v11083_v46 = vadd.f32 %v25865_v48, %v19063_v44  ;;  %v11077_v58 = vpop.f32.mrb[155].mxu1  ;;  %v14354_v44 = vld [vmem:[%s26648_s2 + $0x768] sm:$0xff] }
0x1bba   : > { %v11078_v23 = vadd.f32 %v25865_v48, %v11077_v58 }
0x1bbb   : > { %11144 = vrot.lane.b32.xlu1 %v11083_v46, %s21741_s14 }
0x1bbc   : > { %v19066_v8 = vpop.f32.mrb[156].mxu1  ;;  %11142 = vrot.lane.b32.xlu0 %v11078_v23, %s21741_s14 }
0x1bbd   : > { %v11093_v47 = vadd.f32 %v25865_v48, %v19066_v8  ;;  %v11087_v31 = vpop.f32.mrb[157].mxu1 }
0x1bbe   : > { %v11088_v39 = vadd.f32 %v25865_v48, %v11087_v31  ;;  %v21286_v31 = vpack.c.bf16 %v14354_v44, %v14353_v1 }
0x1bbf   : > { %11148 = vrot.lane.b32.xlu1 %v11093_v47, %s21741_s14 }
0x1bc0   : > { %v19069_v21 = vpop.f32.mrb[158].mxu1  ;;  %11146 = vrot.lane.b32.xlu0 %v11088_v39, %s21741_s14 }
0x1bc1   : > { %v11103_v56 = vadd.f32 %v25865_v48, %v19069_v21  ;;  %v11097_v52 = vpop.f32.mrb[159].mxu1  ;;  %v14355_v21 = vld [vmem:[%s26648_s2 + $0x770] sm:$0xff] }
0x1bc2   : > { %v11098_v0 = vadd.f32 %v25865_v48, %v11097_v52 }
0x1bc3   : > { %11152 = vrot.lane.b32.xlu1 %v11103_v56, %s21741_s14  ;;  %v14356_v56 = vld [vmem:[%s26648_s2 + $0x778] sm:$0xff] }
0x1bc4   : > { %v19160_v25 = vpop.f32.mrb[160].mxu1  ;;  %11150 = vrot.lane.b32.xlu0 %v11098_v0, %s21741_s14  ;;  %s21680_s14 = scalar_lea.vmem %s21679_s17, 8192 }
0x1bc5   : > { %v11437_v43 = vadd.f32 %v25672_v62, %v19160_v25  ;;  %v11431_v36 = vpop.f32.mrb[161].mxu1 }
0x1bc6   : > { %v11432_v28 = vadd.f32 %v25672_v62, %v11431_v36 }
0x1bc7   : > { %v11511_v4 = vmax.f32 %v11437_v43, 0.0 }
0x1bc8   : > { %v11510_v40 = vmax.f32 %v11432_v28, 0.0  ;;  %v19163_v49 = vpop.f32.mrb[162].mxu1  ;;  %v21290_v28 = vpack.c.bf16 %v14356_v56, %v14355_v21 }
0x1bc9   : > { %v11447_v19 = vadd.f32 %v25672_v62, %v19163_v49  ;;  %v11441_v29 = vpop.f32.mrb[163].mxu1  ;;  %v14325_v49 = vld [vmem:[%s22376_s15 + $0x700] sm:$0xff] }
0x1bca   : > { %v11442_v12 = vadd.f32 %v25672_v62, %v11441_v29  ;;  %19198 = vmatprep.mubr.msk.f32.mxu0 %vm1677_vm0, %v11510_v40  ;;  %v14329_v29 = vld [vmem:[%s22376_s15 + $0x720] sm:$0xff] }
0x1bcb   : > { %19199 = vmatmul.mubr.msk.f32.vlgmr.msra.gmra.mrb[176].mxu0 %vm1677_vm0, %v11511_v4  ;;  %v11513_v11 = vmax.f32 %v11447_v19, 0.0  ;;  %v14327_v4 = vld [vmem:[%s22376_s15 + $0x710] sm:$0xff]  ;;  %v14328_v19 = vld [vmem:[%s22376_s15 + $0x718] sm:$0xff] }
0x1bcc   : > { %v11512_v45 = vmax.f32 %v11442_v12, 0.0  ;;  %v19166_v10 = vpop.f32.mrb[164].mxu1  ;;  %21265 = vmatpush3.bf16.msra.mxu0 %v25859_v24  ;;  %v21274_v24 = vpack.c.bf16 %v14348_v22, %v14347_v34  ;;  %v14331_v12 = vld [vmem:[%s22376_s15 + $0x730] sm:$0xff] }
0x1bcd   : > { %v11457_v16 = vadd.f32 %v25672_v62, %v19166_v10  ;;  %v11451_v18 = vpop.f32.mrb[165].mxu1  ;;  %21267 = vmatprep.subr.bf16.mxu0 %v21266_v41  ;;  %v14335_v10 = vld [vmem:[%s22376_s15 + $0x750] sm:$0xff] }
0x1bce   : > { %v11452_v5 = vadd.f32 %v25672_v62, %v11451_v18  ;;  %19201 = vmatprep.mubr.msk.f32.mxu0 %vm1677_vm0, %v11512_v45  ;;  %v14334_v45 = vld [vmem:[%s22376_s15 + $0x748] sm:$0xff] }
0x1bcf   : > { %19202 = vmatmul.mubr.msk.f32.gmra.mrb[178].mxu0 %vm1677_vm0, %v11513_v11  ;;  %v11515_v13 = vmax.f32 %v11457_v16, 0.0  ;;  %v14336_v11 = vld [vmem:[%s22376_s15 + $0x758] sm:$0xff]  ;;  %v14337_v16 = vld [vmem:[%s22376_s15 + $0x760] sm:$0xff]  ;;  %v14338_v18 = vld [vmem:[%s22376_s15 + $0x768] sm:$0xff] }
0x1bd0   : > { %v11514_v7 = vmax.f32 %v11452_v5, 0.0  ;;  %v19169_v55 = vpop.f32.mrb[166].mxu1  ;;  %21269 = vmatpush3.bf16.msra.mxu0 %v21266_v41  ;;  %v14330_v41 = vld [vmem:[%s22376_s15 + $0x728] sm:$0xff]  ;;  %v14340_v5 = vld [vmem:[%s22376_s15 + $0x778] sm:$0xff] }
0x1bd1   : > { %v11467_v35 = vadd.f32 %v25672_v62, %v19169_v55  ;;  %v11461_v42 = vpop.f32.mrb[167].mxu1  ;;  %21271 = vmatprep.subr.bf16.mxu0 %v21270_v50 }
0x1bd2   : > { %v11462_v26 = vadd.f32 %v25672_v62, %v11461_v42  ;;  %19204 = vmatprep.mubr.msk.f32.mxu0 %vm1677_vm0, %v11514_v7 }
0x1bd3   : > { %19205 = vmatmul.mubr.msk.f32.gmra.mrb[180].mxu0 %vm1677_vm0, %v11515_v13  ;;  %v11517_v32 = vmax.f32 %v11467_v35, 0.0 }
0x1bd4   : > { %v11516_v3 = vmax.f32 %v11462_v26, 0.0  ;;  %v19172_v53 = vpop.f32.mrb[168].mxu1  ;;  %21273 = vmatpush3.bf16.msra.mxu0 %v21270_v50  ;;  %v14339_v50 = vld [vmem:[%s22376_s15 + $0x770] sm:$0xff] }
0x1bd5   : > { %v11477_v57 = vadd.f32 %v25672_v62, %v19172_v53  ;;  %v11471_v14 = vpop.f32.mrb[169].mxu1  ;;  %21275 = vmatprep.subr.bf16.mxu0 %v21274_v24 }
0x1bd6   : > { %v11472_v15 = vadd.f32 %v25672_v62, %v11471_v14  ;;  %19207 = vmatprep.mubr.msk.f32.mxu0 %vm1677_vm0, %v11516_v3 }
0x1bd7   : > { %19208 = vmatmul.mubr.msk.f32.gmra.mrb[182].mxu0 %vm1677_vm0, %v11517_v32  ;;  %v11519_v2 = vmax.f32 %v11477_v57, 0.0 }
0x1bd8   : > { %v11518_v54 = vmax.f32 %v11472_v15, 0.0  ;;  %v19175_v59 = vpop.f32.mrb[170].mxu1  ;;  %21277 = vmatpush3.bf16.msra.mxu0 %v21274_v24 }
0x1bd9   : > { %v11487_v6 = vadd.f32 %v25672_v62, %v19175_v59  ;;  %v11481_v9 = vpop.f32.mrb[171].mxu1  ;;  %21279 = vmatprep.subr.bf16.mxu0 %v21278_v51 }
0x1bda   : > { %v11482_v61 = vadd.f32 %v25672_v62, %v11481_v9  ;;  %19210 = vmatprep.mubr.msk.f32.mxu0 %vm1677_vm0, %v11518_v54 }
0x1bdb   : > { %19211 = vmatmul.mubr.msk.f32.gmra.mrb[184].mxu0 %vm1677_vm0, %v11519_v2  ;;  %v11521_v23 = vmax.f32 %v11487_v6, 0.0 }
0x1bdc   : > { %v11520_v46 = vmax.f32 %v11482_v61, 0.0  ;;  %v19178_v58 = vpop.f32.mrb[172].mxu1  ;;  %21281 = vmatpush3.bf16.msra.mxu0 %v21278_v51 }
0x1bdd   : > { %v11497_v8 = vadd.f32 %v25672_v62, %v19178_v58  ;;  %v11491_v47 = vpop.f32.mrb[173].mxu1  ;;  %21283 = vmatprep.subr.bf16.mxu0 %v21282_v17 }
0x1bde   : > { %v11492_v39 = vadd.f32 %v25672_v62, %v11491_v47  ;;  %19213 = vmatprep.mubr.msk.f32.mxu0 %vm1677_vm0, %v11520_v46 }
0x1bdf   : > { %19214 = vmatmul.mubr.msk.f32.gmra.mrb[186].mxu0 %vm1677_vm0, %v11521_v23  ;;  %v11523_v25 = vmax.f32 %v11497_v8, 0.0 }
0x1be0   : > { %v11522_v52 = vmax.f32 %v11492_v39, 0.0  ;;  %v19181_v0 = vpop.f32.mrb[174].mxu1  ;;  %21285 = vmatpush3.bf16.msra.mxu0 %v21282_v17 }
0x1be1   : > { %v11507_v43 = vadd.f32 %v25672_v62, %v19181_v0  ;;  %v11501_v36 = vpop.f32.mrb[175].mxu1  ;;  %21287 = vmatprep.subr.bf16.mxu0 %v21286_v31 }
0x1be2   : > { %v11502_v37 = vadd.f32 %v25672_v62, %v11501_v36  ;;  %19216 = vmatprep.mubr.msk.f32.mxu0 %vm1677_vm0, %v11522_v52  ;;  %v14326_v62 = vld [vmem:[%s22376_s15 + $0x708] sm:$0xff] }
0x1be3   : > { %19217 = vmatmul.mubr.msk.f32.gmra.mrb[188].mxu0 %vm1677_vm0, %v11523_v25  ;;  %v11525_v40 = vmax.f32 %v11507_v43, 0.0 }
0x1be4   : > { %v11524_v38 = vmax.f32 %v11502_v37, 0.0  ;;  %21289 = vmatpush3.bf16.msra.mxu0 %v21286_v31 }
0x1be5   : > { %21291 = vmatprep.subr.bf16.mxu0 %v21290_v28 }
0x1be6   : > { %19219 = vmatprep.mubr.msk.f32.mxu0 %vm1677_vm0, %v11524_v38 }
0x1be7   : > { %19220 = vmatmul.mubr.msk.f32.gmra.mrb[190].mxu0 %vm1677_vm0, %v11525_v40  ;;  %v26031_v40 = vld [vmem:[%s26647_s1 + $0x10] sm:$0xff] }
0x1be8   : > { %21293 = vmatpush3.bf16.msra.mxu0 %v21290_v28  ;;  %19310 = vmatprep.mubr.f32.mxu0 %v14325_v49  ;;  %v26025_v28 = vld [vmem:[%s26647_s1 + $0x8] sm:$0xff] }
0x1beb   : > { %19311 = vmatmul.mubr.f32.vlgmr.msra.gmra.mrb[192].mxu0 %v14326_v62  ;;  %v26037_v62 = vld [vmem:[%s26647_s1 + $0x18] sm:$0xff] }
0x1bec   : > { %19313 = vmatprep.mubr.f32.mxu0 %v14327_v4 }
0x1bef   : > { %19314 = vmatmul.mubr.f32.gmra.mrb[194].mxu0 %v14328_v19 }
0x1bf0   : > { %19316 = vmatprep.mubr.f32.mxu0 %v14329_v29  ;;  %v26043_v29 = vld [vmem:[%s26647_s1 + $0x20] sm:$0xff] }
0x1bf3   : > { %19317 = vmatmul.mubr.f32.gmra.mrb[196].mxu0 %v14330_v41 }
0x1bf4   : > { %19319 = vmatprep.mubr.f32.mxu0 %v14331_v12  ;;  %v26049_v12 = vld [vmem:[%s26647_s1 + $0x28] sm:$0xff] }
0x1bf7   : > { %19320 = vmatmul.mubr.f32.gmra.mrb[198].mxu0 %v14332_v33 }
0x1bf8   : > { %19322 = vmatprep.mubr.f32.mxu0 %v14333_v30 }
0x1bfb   : > { %19323 = vmatmul.mubr.f32.gmra.mrb[200].mxu0 %v14334_v45  ;;  %v26055_v45 = vld [vmem:[%s26647_s1 + $0x30] sm:$0xff] }
0x1bfc   : > { %19325 = vmatprep.mubr.f32.mxu0 %v14335_v10 }
0x1bff   : > { %19326 = vmatmul.mubr.f32.gmra.mrb[202].mxu0 %v14336_v11  ;;  %v26061_v11 = vld [vmem:[%s26647_s1 + $0x38] sm:$0xff] }
0x1c00   : > { %19328 = vmatprep.mubr.f32.mxu0 %v14337_v16 }
0x1c03   : > { %19329 = vmatmul.mubr.f32.gmra.mrb[204].mxu0 %v14338_v18 }
0x1c04   : > { %19331 = vmatprep.mubr.f32.mxu0 %v14339_v50  ;;  %v26067_v50 = vld [vmem:[%s26647_s1 + $0x40] sm:$0xff] }
0x1c07   : > { %19332 = vmatmul.mubr.f32.gmra.mrb[206].mxu0 %v14340_v5 }
0x1c19   : > { %v11125_v34 = vpop.permute.xlu1 %11124 }
0x1c1a   : > { %11171 = vst.msk [vmem:[%s22719_s10 + $0x18] sm:$0xff] %vm5094_vm5, %v11125_v34  ;;  %v11123_v22 = vpop.permute.xlu0 %11122  ;;  %v26073_v34 = vld [vmem:[%s26647_s1 + $0x48] sm:$0xff] }
0x1c1b   : > { %11170 = vst.msk [vmem:[%s22719_s10 + $0x8] sm:$0xff] %vm5094_vm5, %v11123_v22 }
0x1c1d   : > { %v11129_v7 = vpop.permute.xlu1 %11128 }
0x1c1e   : > { %11173 = vst.msk [vmem:[%s22719_s10 + $0x38] sm:$0xff] %vm5094_vm5, %v11129_v7  ;;  %v11127_v55 = vpop.permute.xlu0 %11126 }
0x1c1f   : > { %11172 = vst.msk [vmem:[%s22719_s10 + $0x28] sm:$0xff] %vm5094_vm5, %v11127_v55  ;;  %v26079_v55 = vld [vmem:[%s26647_s1 + $0x50] sm:$0xff] }
0x1c21   : > { %v11133_v13 = vpop.permute.xlu1 %11132 }
0x1c22   : > { %11175 = vst.msk [vmem:[%s22719_s10 + $0x58] sm:$0xff] %vm5094_vm5, %v11133_v13  ;;  %v11131_v35 = vpop.permute.xlu0 %11130 }
0x1c23   : > { %11174 = vst.msk [vmem:[%s22719_s10 + $0x48] sm:$0xff] %vm5094_vm5, %v11131_v35  ;;  %v26085_v35 = vld [vmem:[%s26647_s1 + $0x58] sm:$0xff] }
0x1c25   : > { %v11137_v42 = vpop.permute.xlu1 %11136 }
0x1c26   : > { %11177 = vst.msk [vmem:[%s22719_s10 + $0x78] sm:$0xff] %vm5094_vm5, %v11137_v42  ;;  %v11135_v24 = vpop.permute.xlu0 %11134 }
0x1c27   : > { %11176 = vst.msk [vmem:[%s22719_s10 + $0x68] sm:$0xff] %vm5094_vm5, %v11135_v24 }
0x1c29   : > { %v11141_v26 = vpop.permute.xlu1 %11140 }
0x1c2a   : > { %11179 = vst.msk [vmem:[%s22719_s10 + $0x98] sm:$0xff] %vm5094_vm5, %v11141_v26  ;;  %v11139_v60 = vpop.permute.xlu0 %11138  ;;  %v26091_v26 = vld [vmem:[%s26647_s1 + $0x60] sm:$0xff] }
0x1c2b   : > { %11178 = vst.msk [vmem:[%s22719_s10 + $0x88] sm:$0xff] %vm5094_vm5, %v11139_v60 }
0x1c2d   : > { %v11145_v63 = vpop.permute.xlu1 %11144 }
0x1c2e   : > { %11181 = vst.msk [vmem:[%s22719_s10 + $0xb8] sm:$0xff] %vm5094_vm5, %v11145_v63  ;;  %v11143_v3 = vpop.permute.xlu0 %11142  ;;  %v26097_v63 = vld [vmem:[%s26647_s1 + $0x68] sm:$0xff] }
0x1c2f   : > { %11180 = vst.msk [vmem:[%s22719_s10 + $0xa8] sm:$0xff] %vm5094_vm5, %v11143_v3 }
0x1c31   : > { %v11149_v53 = vpop.permute.xlu1 %11148 }
0x1c32   : > { %11183 = vst.msk [vmem:[%s22719_s10 + $0xd8] sm:$0xff] %vm5094_vm5, %v11149_v53  ;;  %v11147_v32 = vpop.permute.xlu0 %11146 }
0x1c33   : > { %11182 = vst.msk [vmem:[%s22719_s10 + $0xc8] sm:$0xff] %vm5094_vm5, %v11147_v32  ;;  %v26103_v32 = vld [vmem:[%s26647_s1 + $0x70] sm:$0xff] }
0x1c35   : > { %v11153_v57 = vpop.permute.xlu1 %11152 }
0x1c36   : > { %11185 = vst.msk [vmem:[%s22719_s10 + $0xf8] sm:$0xff] %vm5094_vm5, %v11153_v57  ;;  %v11151_v14 = vpop.permute.xlu0 %11150 }
0x1c37   : > { %11184 = vst.msk [vmem:[%s22719_s10 + $0xe8] sm:$0xff] %vm5094_vm5, %v11151_v14  ;;  %v26109_v14 = vld [vmem:[%s26647_s1 + $0x78] sm:$0xff] }
0x1c9e   : > { %v19200_v51 = vpop.f32.mrb[176].mxu0 }
0x1c9f   : > { %v11649_v15 = vpop.f32.mrb[177].mxu0 }
0x1ca0   : > { %v21230_v20 = vpack.c.bf16 %v19200_v51, %v11649_v15  ;;  %v26115_v51 = vld [vmem:[%s26647_s1] sm:$0xff] }
0x1ca1   : > { %v14357_v15 = vld [vmem:[%s26650_s4 + $0x380] sm:$0xff] }
0x1ca2   : > { %v19203_v27 = vpop.f32.mrb[178].mxu0  ;;  %21231 = vmatprep.subr.bf16.mxu1 %v21230_v20 }
0x1ca3   : > { %v11659_v54 = vpop.f32.mrb[179].mxu0  ;;  %21233 = vmatpush3.bf16.msra.mxu1 %v21230_v20  ;;  %v14358_v20 = vld [vmem:[%s26650_s4 + $0x388] sm:$0xff] }
0x1ca4   : > { %v21234_v59 = vpack.c.bf16 %v19203_v27, %v11659_v54  ;;  %v21326_v27 = vpack.c.bf16 %v14358_v20, %v14357_v15  ;;  %v14359_v54 = vld [vmem:[%s26650_s4 + $0x390] sm:$0xff]  ;;  %v26202_v20 = vld [vmem:[%s26649_s3] ss:$0 sm:$0xff] }
0x1ca6   : > { %v19206_v2 = vpop.f32.mrb[180].mxu0  ;;  %21235 = vmatprep.subr.bf16.mxu1 %v21234_v59  ;;  %21327 = vmatprep.subr.bf16.mxu0 %v21326_v27 }
0x1ca7   : > { %v11669_v6 = vpop.f32.mrb[181].mxu0  ;;  %21237 = vmatpush3.bf16.msra.mxu1 %v21234_v59  ;;  %21329 = vmatpush3.bf16.msra.mxu0 %v21326_v27  ;;  %v14360_v59 = vld [vmem:[%s26650_s4 + $0x398] sm:$0xff] }
0x1ca8   : > { %v21238_v9 = vpack.c.bf16 %v19206_v2, %v11669_v6  ;;  %v21330_v2 = vpack.c.bf16 %v14360_v59, %v14359_v54  ;;  %v14361_v6 = vld [vmem:[%s26650_s4 + $0x3a0] sm:$0xff] }
0x1caa   : > { %v19209_v17 = vpop.f32.mrb[182].mxu0  ;;  %21239 = vmatprep.subr.bf16.mxu1 %v21238_v9  ;;  %21331 = vmatprep.subr.bf16.mxu0 %v21330_v2 }
0x1cab   : > { %v11679_v61 = vpop.f32.mrb[183].mxu0  ;;  %21241 = vmatpush3.bf16.msra.mxu1 %v21238_v9  ;;  %21333 = vmatpush3.bf16.msra.mxu0 %v21330_v2  ;;  %v14362_v9 = vld [vmem:[%s26650_s4 + $0x3a8] sm:$0xff]  ;;  %v14399_v2 = vld [vmem:[%s26648_s2 + $0x790] sm:$0xff] }
0x1cac   : > { %v21242_v1 = vpack.c.bf16 %v19209_v17, %v11679_v61  ;;  %v21334_v17 = vpack.c.bf16 %v14362_v9, %v14361_v6  ;;  %v14363_v61 = vld [vmem:[%s26650_s4 + $0x3b0] sm:$0xff] }
0x1cae   : > { %v19212_v44 = vpop.f32.mrb[184].mxu0  ;;  %21243 = vmatprep.subr.bf16.mxu1 %v21242_v1  ;;  %21335 = vmatprep.subr.bf16.mxu0 %v21334_v17 }
0x1caf   : > { %v11689_v46 = vpop.f32.mrb[185].mxu0  ;;  %21245 = vmatpush3.bf16.msra.mxu1 %v21242_v1  ;;  %21337 = vmatpush3.bf16.msra.mxu0 %v21334_v17  ;;  %v14364_v1 = vld [vmem:[%s26650_s4 + $0x3b8] sm:$0xff] }
0x1cb0   : > { %v21246_v58 = vpack.c.bf16 %v19212_v44, %v11689_v46  ;;  %v21338_v44 = vpack.c.bf16 %v14364_v1, %v14363_v61  ;;  %v14397_v46 = vld [vmem:[%s26648_s2 + $0x780] sm:$0xff] }
0x1cb2   : > { %v19215_v23 = vpop.f32.mrb[186].mxu0  ;;  %21247 = vmatprep.subr.bf16.mxu1 %v21246_v58  ;;  %21339 = vmatprep.subr.bf16.mxu0 %v21338_v44 }
0x1cb3   : > { %v11699_v8 = vpop.f32.mrb[187].mxu0  ;;  %21249 = vmatpush3.bf16.msra.mxu1 %v21246_v58  ;;  %21341 = vmatpush3.bf16.msra.mxu0 %v21338_v44  ;;  %v14398_v58 = vld [vmem:[%s26648_s2 + $0x788] sm:$0xff] }
0x1cb4   : > { %v21250_v47 = vpack.c.bf16 %v19215_v23, %v11699_v8  ;;  %v26164_v23 = vpack.c.bf16 %v14398_v58, %v14397_v46  ;;  %v14401_v58 = vld [vmem:[%s26648_s2 + $0x7a0] sm:$0xff] }
0x1cb6   : > { %v19218_v31 = vpop.f32.mrb[188].mxu0  ;;  %21251 = vmatprep.subr.bf16.mxu1 %v21250_v47  ;;  %21375 = vmatprep.subr.bf16.mxu0 %v26164_v23 }
0x1cb7   : > { %v11709_v39 = vpop.f32.mrb[189].mxu0  ;;  %21253 = vmatpush3.bf16.msra.mxu1 %v21250_v47 }
0x1cb8   : > { %v21254_v21 = vpack.c.bf16 %v19218_v31, %v11709_v39 }
0x1cba   : > { %v19221_v56 = vpop.f32.mrb[190].mxu0  ;;  %21255 = vmatprep.subr.bf16.mxu1 %v21254_v21 }
0x1cbb   : > { %v11719_v52 = vpop.f32.mrb[191].mxu0  ;;  %21257 = vmatpush3.bf16.msra.mxu1 %v21254_v21 }
0x1cbc   : > { %v21258_v0 = vpack.c.bf16 %v19221_v56, %v11719_v52 }
0x1cbe   : > { %21259 = vmatprep.subr.bf16.mxu1 %v21258_v0  ;;  %v19312_v25 = vpop.f32.mrb[192].mxu0 }
0x1cbf   : > { %21261 = vmatpush3.bf16.msra.mxu1 %v21258_v0  ;;  %v12053_v43 = vpop.f32.mrb[193].mxu0 }
0x1cc0   : > { %v21294_v36 = vpack.c.bf16 %v19312_v25, %v12053_v43 }
0x1cc2   : > { %19255 = vmatmul.mubr.f32.vlgmr.msra.gmra.mrb[176].mxu1 %v26025_v28  ;;  %v19315_v37 = vpop.f32.mrb[194].mxu0  ;;  %21295 = vmatprep.subr.bf16.mxu1 %v21294_v36 }
0x1cc3   : > { %v12063_v38 = vpop.f32.mrb[195].mxu0  ;;  %21297 = vmatpush3.bf16.msra.mxu1 %v21294_v36  ;;  %19257 = vmatprep.mubr.f32.mxu1 %v26031_v40 }
0x1cc4   : > { %v21298_v49 = vpack.c.bf16 %v19315_v37, %v12063_v38 }
0x1cc6   : > { %19258 = vmatmul.mubr.f32.gmra.mrb[178].mxu1 %v26037_v62  ;;  %v19318_v4 = vpop.f32.mrb[196].mxu0  ;;  %21299 = vmatprep.subr.bf16.mxu1 %v21298_v49 }
0x1cc7   : > { %v12073_v19 = vpop.f32.mrb[197].mxu0  ;;  %21301 = vmatpush3.bf16.msra.mxu1 %v21298_v49  ;;  %19260 = vmatprep.mubr.f32.mxu1 %v26043_v29 }
0x1cc8   : > { %v21302_v41 = vpack.c.bf16 %v19318_v4, %v12073_v19 }
0x1cca   : > { %19261 = vmatmul.mubr.f32.gmra.mrb[180].mxu1 %v26049_v12  ;;  %v19321_v33 = vpop.f32.mrb[198].mxu0  ;;  %21303 = vmatprep.subr.bf16.mxu1 %v21302_v41 }
0x1ccb   : > { %v12083_v30 = vpop.f32.mrb[199].mxu0  ;;  %21305 = vmatpush3.bf16.msra.mxu1 %v21302_v41  ;;  %19263 = vmatprep.mubr.f32.mxu1 %v26055_v45 }
0x1ccc   : > { %v21306_v10 = vpack.c.bf16 %v19321_v33, %v12083_v30 }
0x1cce   : > { %19264 = vmatmul.mubr.f32.gmra.mrb[182].mxu1 %v26061_v11  ;;  %v19324_v16 = vpop.f32.mrb[200].mxu0  ;;  %21307 = vmatprep.subr.bf16.mxu1 %v21306_v10 }
0x1ccf   : > { %v12093_v18 = vpop.f32.mrb[201].mxu0  ;;  %21309 = vmatpush3.bf16.msra.mxu1 %v21306_v10  ;;  %19266 = vmatprep.mubr.f32.mxu1 %v26067_v50 }
0x1cd0   : > { %v21310_v5 = vpack.c.bf16 %v19324_v16, %v12093_v18 }
0x1cd2   : > { %19267 = vmatmul.mubr.f32.gmra.mrb[184].mxu1 %v26073_v34  ;;  %v19327_v22 = vpop.f32.mrb[202].mxu0  ;;  %21311 = vmatprep.subr.bf16.mxu1 %v21310_v5 }
0x1cd3   : > { %v12103_v7 = vpop.f32.mrb[203].mxu0  ;;  %21313 = vmatpush3.bf16.msra.mxu1 %v21310_v5  ;;  %19269 = vmatprep.mubr.f32.mxu1 %v26079_v55 }
0x1cd4   : > { %v21314_v13 = vpack.c.bf16 %v19327_v22, %v12103_v7 }
0x1cd6   : > { %19270 = vmatmul.mubr.f32.gmra.mrb[186].mxu1 %v26085_v35  ;;  %v19330_v42 = vpop.f32.mrb[204].mxu0  ;;  %21315 = vmatprep.subr.bf16.mxu1 %v21314_v13 }
0x1cd7   : > { %v12113_v24 = vpop.f32.mrb[205].mxu0  ;;  %21317 = vmatpush3.bf16.msra.mxu1 %v21314_v13  ;;  %19272 = vmatprep.mubr.f32.mxu1 %v26091_v26 }
0x1cd8   : > { %v21318_v60 = vpack.c.bf16 %v19330_v42, %v12113_v24 }
0x1cda   : > { %19273 = vmatmul.mubr.f32.gmra.mrb[188].mxu1 %v26097_v63  ;;  %v19333_v3 = vpop.f32.mrb[206].mxu0  ;;  %21319 = vmatprep.subr.bf16.mxu1 %v21318_v60 }
0x1cdb   : > { %v12123_v53 = vpop.f32.mrb[207].mxu0  ;;  %21321 = vmatpush3.bf16.msra.mxu1 %v21318_v60  ;;  %19275 = vmatprep.mubr.f32.mxu1 %v26103_v32 }
0x1cdc   : > { %v21322_v57 = vpack.c.bf16 %v19333_v3, %v12123_v53 }
0x1cde   : > { %19276 = vmatmul.mubr.f32.gmra.mrb[190].mxu1 %v26109_v14  ;;  %21323 = vmatprep.subr.bf16.mxu1 %v21322_v57 }
0x1cdf   : > { %21325 = vmatpush3.bf16.msra.mxu1 %v21322_v57  ;;  %19366 = vmatprep.mubr.f32.mxu1 %v26115_v51 }
0x1ce2   : > { %19367 = vmatmul.mubr.f32.vlgmr.msra.gmra.mrb[192].mxu1 %v26025_v28 }
0x1ce3   : > { %19369 = vmatprep.mubr.f32.mxu1 %v26031_v40 }
0x1ce6   : > { %19370 = vmatmul.mubr.f32.gmra.mrb[194].mxu1 %v26037_v62 }
0x1ce7   : > { %19372 = vmatprep.mubr.f32.mxu1 %v26043_v29 }
0x1cea   : > { %19373 = vmatmul.mubr.f32.gmra.mrb[196].mxu1 %v26049_v12 }
0x1ceb   : > { %19375 = vmatprep.mubr.f32.mxu1 %v26055_v45 }
0x1cee   : > { %19376 = vmatmul.mubr.f32.gmra.mrb[198].mxu1 %v26061_v11 }
0x1cef   : > { %19378 = vmatprep.mubr.f32.mxu1 %v26067_v50 }
0x1cf2   : > { %19379 = vmatmul.mubr.f32.gmra.mrb[200].mxu1 %v26073_v34 }
0x1cf3   : > { %19381 = vmatprep.mubr.f32.mxu1 %v26079_v55 }
0x1cf6   : > { %19382 = vmatmul.mubr.f32.gmra.mrb[202].mxu1 %v26085_v35 }
0x1cf7   : > { %19384 = vmatprep.mubr.f32.mxu1 %v26091_v26 }
0x1cfa   : > { %19385 = vmatmul.mubr.f32.gmra.mrb[204].mxu1 %v26097_v63 }
0x1cfb   : > { %19387 = vmatprep.mubr.f32.mxu1 %v26103_v32 }
0x1cfe   : > { %19388 = vmatmul.mubr.f32.gmra.mrb[206].mxu1 %v26109_v14 }
0x1cff   : > { %19462 = vmatprep.mubr.f32.mxu1 %v26115_v51 }
0x1d95   : > { %v19256_v8 = vpop.f32.mrb[176].mxu1 }
0x1d96   : > { %v11800_v47 = vadd.f32 %v25865_v48, %v19256_v8  ;;  %v11794_v31 = vpop.f32.mrb[177].mxu1  ;;  %v14402_v8 = vld [vmem:[%s26648_s2 + $0x7a8] sm:$0xff] }
0x1d97   : > { %v11795_v39 = vadd.f32 %v25865_v48, %v11794_v31 }
0x1d98   : > { %11891 = vrot.lane.b32.xlu1 %v11800_v47, %s21742_s16 }
0x1d99   : > { %v19259_v21 = vpop.f32.mrb[178].mxu1  ;;  %11889 = vrot.lane.b32.xlu0 %v11795_v39, %s21742_s16 }
0x1d9a   : > { %v11810_v56 = vadd.f32 %v25865_v48, %v19259_v21  ;;  %v11804_v52 = vpop.f32.mrb[179].mxu1 }
0x1d9b   : > { %v11805_v0 = vadd.f32 %v25865_v48, %v11804_v52  ;;  %v21382_v52 = vpack.c.bf16 %v14402_v8, %v14401_v58 }
0x1d9c   : > { %11895 = vrot.lane.b32.xlu1 %v11810_v56, %s21742_s16 }
0x1d9d   : > { %v19262_v25 = vpop.f32.mrb[180].mxu1  ;;  %11893 = vrot.lane.b32.xlu0 %v11805_v0, %s21742_s16 }
0x1d9e   : > { %v11820_v43 = vadd.f32 %v25865_v48, %v19262_v25  ;;  %v11814_v36 = vpop.f32.mrb[181].mxu1  ;;  %v14403_v25 = vld [vmem:[%s26648_s2 + $0x7b0] sm:$0xff] }
0x1d9f   : > { %v11815_v37 = vadd.f32 %v25865_v48, %v11814_v36 }
0x1da0   : > { %11899 = vrot.lane.b32.xlu1 %v11820_v43, %s21742_s16  ;;  %v14404_v43 = vld [vmem:[%s26648_s2 + $0x7b8] sm:$0xff] }
0x1da1   : > { %v19265_v38 = vpop.f32.mrb[182].mxu1  ;;  %11897 = vrot.lane.b32.xlu0 %v11815_v37, %s21742_s16 }
0x1da2   : > { %v11830_v49 = vadd.f32 %v25865_v48, %v19265_v38  ;;  %v11824_v4 = vpop.f32.mrb[183].mxu1 }
0x1da3   : > { %v11825_v19 = vadd.f32 %v25865_v48, %v11824_v4  ;;  %v21386_v4 = vpack.c.bf16 %v14404_v43, %v14403_v25  ;;  %v14381_v25 = vld [vmem:[%s22376_s15 + $0x780] sm:$0xff]  ;;  %v14382_v43 = vld [vmem:[%s22376_s15 + $0x788] sm:$0xff] }
0x1da4   : > { %11903 = vrot.lane.b32.xlu1 %v11830_v49, %s21742_s16 }
0x1da5   : > { %v19268_v41 = vpop.f32.mrb[184].mxu1  ;;  %11901 = vrot.lane.b32.xlu0 %v11825_v19, %s21742_s16 }
0x1da6   : > { %v11840_v33 = vadd.f32 %v25865_v48, %v19268_v41  ;;  %v11834_v30 = vpop.f32.mrb[185].mxu1  ;;  %v14405_v41 = vld [vmem:[%s26648_s2 + $0x7c0] sm:$0xff] }
0x1da7   : > { %v11835_v10 = vadd.f32 %v25865_v48, %v11834_v30 }
0x1da8   : > { %11907 = vrot.lane.b32.xlu1 %v11840_v33, %s21742_s16  ;;  %v14406_v33 = vld [vmem:[%s26648_s2 + $0x7c8] sm:$0xff] }
0x1da9   : > { %v19271_v16 = vpop.f32.mrb[186].mxu1  ;;  %11905 = vrot.lane.b32.xlu0 %v11835_v10, %s21742_s16 }
0x1daa   : > { %v11850_v18 = vadd.f32 %v25865_v48, %v19271_v16  ;;  %v11844_v5 = vpop.f32.mrb[187].mxu1 }
0x1dab   : > { %v11845_v22 = vadd.f32 %v25865_v48, %v11844_v5 }
0x1dac   : > { %11911 = vrot.lane.b32.xlu1 %v11850_v18, %s21742_s16 }
0x1dad   : > { %v19274_v7 = vpop.f32.mrb[188].mxu1  ;;  %11909 = vrot.lane.b32.xlu0 %v11845_v22, %s21742_s16  ;;  %v21390_v22 = vpack.c.bf16 %v14406_v33, %v14405_v41  ;;  %v14390_v41 = vld [vmem:[%s22376_s15 + $0x7c8] sm:$0xff]  ;;  %v14391_v33 = vld [vmem:[%s22376_s15 + $0x7d0] sm:$0xff] }
0x1dae   : > { %v11860_v13 = vadd.f32 %v25865_v48, %v19274_v7  ;;  %v11854_v42 = vpop.f32.mrb[189].mxu1 }
0x1daf   : > { %v11855_v24 = vadd.f32 %v25865_v48, %v11854_v42  ;;  %v14408_v42 = vld [vmem:[%s26648_s2 + $0x7d8] sm:$0xff] }
0x1db0   : > { %11915 = vrot.lane.b32.xlu1 %v11860_v13, %s21742_s16  ;;  %v14407_v13 = vld [vmem:[%s26648_s2 + $0x7d0] sm:$0xff] }
0x1db1   : > { %v19277_v60 = vpop.f32.mrb[190].mxu1  ;;  %11913 = vrot.lane.b32.xlu0 %v11855_v24, %s21742_s16 }
0x1db2   : > { %v11870_v3 = vadd.f32 %v25865_v48, %v19277_v60  ;;  %v11864_v53 = vpop.f32.mrb[191].mxu1 }
0x1db3   : > { %v11865_v57 = vadd.f32 %v25865_v48, %v11864_v53  ;;  %v14400_v48 = vld [vmem:[%s26648_s2 + $0x798] sm:$0xff] }
0x1db4   : > { %11919 = vrot.lane.b32.xlu1 %v11870_v3, %s21742_s16  ;;  %v21378_v44 = vpack.c.bf16 %v14400_v48, %v14399_v2 }
0x1db5   : > { %v19368_v15 = vpop.f32.mrb[192].mxu1  ;;  %11917 = vrot.lane.b32.xlu0 %v11865_v57, %s21742_s16 }
0x1db6   : > { %v12204_v27 = vadd.f32 %v26202_v20, %v19368_v15  ;;  %v12198_v54 = vpop.f32.mrb[193].mxu1  ;;  %v21394_v15 = vpack.c.bf16 %v14408_v42, %v14407_v13 }
0x1db7   : > { %v12199_v59 = vadd.f32 %v26202_v20, %v12198_v54  ;;  %v14409_v54 = vld [vmem:[%s26648_s2 + $0x7e0] sm:$0xff] }
0x1db8   : > { %v12278_v17 = vmax.f32 %v12204_v27, 0.0 }
0x1db9   : > { %v12277_v6 = vmax.f32 %v12199_v59, 0.0  ;;  %v19371_v9 = vpop.f32.mrb[194].mxu1  ;;  %v14410_v59 = vld [vmem:[%s26648_s2 + $0x7e8] sm:$0xff] }
0x1dba   : > { %v12214_v61 = vadd.f32 %v26202_v20, %v19371_v9  ;;  %v12208_v1 = vpop.f32.mrb[195].mxu1 }
0x1dbb   : > { %v12209_v46 = vadd.f32 %v26202_v20, %v12208_v1  ;;  %19406 = vmatprep.mubr.msk.f32.mxu0 %vm1677_vm0, %v12277_v6 }
0x1dbc   : > { %19407 = vmatmul.mubr.msk.f32.vlgmr.msra.gmra.mrb[208].mxu0 %vm1677_vm0, %v12278_v17  ;;  %v12280_v39 = vmax.f32 %v12214_v61, 0.0  ;;  %v21398_v61 = vpack.c.bf16 %v14410_v59, %v14409_v54 }
0x1dbd   : > { %v12279_v47 = vmax.f32 %v12209_v46, 0.0  ;;  %v19374_v31 = vpop.f32.mrb[196].mxu1  ;;  %21377 = vmatpush3.bf16.msra.mxu0 %v26164_v23  ;;  %v14412_v46 = vld [vmem:[%s26648_s2 + $0x7f8] sm:$0xff] }
0x1dbe   : > { %v12224_v21 = vadd.f32 %v26202_v20, %v19374_v31  ;;  %v12218_v56 = vpop.f32.mrb[197].mxu1  ;;  %21379 = vmatprep.subr.bf16.mxu0 %v21378_v44 }
0x1dbf   : > { %v12219_v0 = vadd.f32 %v26202_v20, %v12218_v56  ;;  %19409 = vmatprep.mubr.msk.f32.mxu0 %vm1677_vm0, %v12279_v47 }
0x1dc0   : > { %19410 = vmatmul.mubr.msk.f32.gmra.mrb[210].mxu0 %vm1677_vm0, %v12280_v39  ;;  %v12282_v37 = vmax.f32 %v12224_v21, 0.0 }
0x1dc1   : > { %v12281_v23 = vmax.f32 %v12219_v0, 0.0  ;;  %v19377_v36 = vpop.f32.mrb[198].mxu1  ;;  %21381 = vmatpush3.bf16.msra.mxu0 %v21378_v44  ;;  %v14411_v44 = vld [vmem:[%s26648_s2 + $0x7f0] sm:$0xff] }
0x1dc2   : > { %v12234_v38 = vadd.f32 %v26202_v20, %v19377_v36  ;;  %v12228_v49 = vpop.f32.mrb[199].mxu1  ;;  %21383 = vmatprep.subr.bf16.mxu0 %v21382_v52  ;;  %v21402_v21 = vpack.c.bf16 %v14412_v46, %v14411_v44  ;;  %v14384_v36 = vld [vmem:[%s22376_s15 + $0x798] sm:$0xff] }
0x1dc3   : > { %v12229_v19 = vadd.f32 %v26202_v20, %v12228_v49  ;;  %19412 = vmatprep.mubr.msk.f32.mxu0 %vm1677_vm0, %v12281_v23  ;;  %v14383_v23 = vld [vmem:[%s22376_s15 + $0x790] sm:$0xff] }
0x1dc4   : > { %19413 = vmatmul.mubr.msk.f32.gmra.mrb[212].mxu0 %vm1677_vm0, %v12282_v37  ;;  %v12284_v16 = vmax.f32 %v12234_v38, 0.0  ;;  %v14385_v37 = vld [vmem:[%s22376_s15 + $0x7a0] sm:$0xff]  ;;  %v14386_v38 = vld [vmem:[%s22376_s15 + $0x7a8] sm:$0xff]  ;;  %v14387_v49 = vld [vmem:[%s22376_s15 + $0x7b0] sm:$0xff] }
0x1dc5   : > { %v12283_v30 = vmax.f32 %v12229_v19, 0.0  ;;  %v19380_v10 = vpop.f32.mrb[200].mxu1  ;;  %21385 = vmatpush3.bf16.msra.mxu0 %v21382_v52  ;;  %v14389_v19 = vld [vmem:[%s22376_s15 + $0x7c0] sm:$0xff] }
0x1dc6   : > { %v12244_v18 = vadd.f32 %v26202_v20, %v19380_v10  ;;  %v12238_v5 = vpop.f32.mrb[201].mxu1  ;;  %21387 = vmatprep.subr.bf16.mxu0 %v21386_v4  ;;  %v14393_v10 = vld [vmem:[%s22376_s15 + $0x7e0] sm:$0xff] }
0x1dc7   : > { %v12239_v7 = vadd.f32 %v26202_v20, %v12238_v5  ;;  %19415 = vmatprep.mubr.msk.f32.mxu0 %vm1677_vm0, %v12283_v30  ;;  %v14392_v30 = vld [vmem:[%s22376_s15 + $0x7d8] sm:$0xff] }
0x1dc8   : > { %19416 = vmatmul.mubr.msk.f32.gmra.mrb[214].mxu0 %vm1677_vm0, %v12284_v16  ;;  %v12286_v3 = vmax.f32 %v12244_v18, 0.0  ;;  %v14394_v16 = vld [vmem:[%s22376_s15 + $0x7e8] sm:$0xff]  ;;  %v14395_v18 = vld [vmem:[%s22376_s15 + $0x7f0] sm:$0xff]  ;;  %v14396_v5 = vld [vmem:[%s22376_s15 + $0x7f8] sm:$0xff] }
0x1dc9   : > { %v12285_v24 = vmax.f32 %v12239_v7, 0.0  ;;  %v19383_v60 = vpop.f32.mrb[202].mxu1  ;;  %21389 = vmatpush3.bf16.msra.mxu0 %v21386_v4  ;;  %v14388_v4 = vld [vmem:[%s22376_s15 + $0x7b8] sm:$0xff]  ;;  %s13502_s15 = sshll.u32 %s22719_s10, 4  ;;  %s26597_s15 = int_to_ptr.vmem [resolvable:$true] %s13502_s15 }
0x1dca   : > { %v12254_v53 = vadd.f32 %v26202_v20, %v19383_v60  ;;  %v12248_v57 = vpop.f32.mrb[203].mxu1  ;;  %21391 = vmatprep.subr.bf16.mxu0 %v21390_v22  ;;  %p21681_p2 = scmp.lt.s32.totalorder %s26597_s15, %s21679_s17 }
0x1dcb   : > { %v12249_v27 = vadd.f32 %v26202_v20, %v12248_v57  ;;  %19418 = vmatprep.mubr.msk.f32.mxu0 %vm1677_vm0, %v12285_v24 }
0x1dcc   : > { %19419 = vmatmul.mubr.msk.f32.gmra.mrb[216].mxu0 %vm1677_vm0, %v12286_v3  ;;  %v12288_v6 = vmax.f32 %v12254_v53, 0.0 }
0x1dcd   : > { %v12287_v2 = vmax.f32 %v12249_v27, 0.0  ;;  %v19386_v48 = vpop.f32.mrb[204].mxu1  ;;  %21393 = vmatpush3.bf16.msra.mxu0 %v21390_v22 }
0x1dce   : > { %v12264_v9 = vadd.f32 %v26202_v20, %v19386_v48  ;;  %v12258_v17 = vpop.f32.mrb[205].mxu1  ;;  %21395 = vmatprep.subr.bf16.mxu0 %v21394_v15 }
0x1dcf   : > { %v12259_v1 = vadd.f32 %v26202_v20, %v12258_v17  ;;  %19421 = vmatprep.mubr.msk.f32.mxu0 %vm1677_vm0, %v12287_v2 }
0x1dd0   : > { %19422 = vmatmul.mubr.msk.f32.gmra.mrb[218].mxu0 %vm1677_vm0, %v12288_v6  ;;  %v12290_v47 = vmax.f32 %v12264_v9, 0.0 }
0x1dd1   : > { %v12289_v58 = vmax.f32 %v12259_v1, 0.0  ;;  %v19389_v8 = vpop.f32.mrb[206].mxu1  ;;  %21397 = vmatpush3.bf16.msra.mxu0 %v21394_v15 }
0x1dd2   : > { %v12274_v31 = vadd.f32 %v26202_v20, %v19389_v8  ;;  %v12268_v39 = vpop.f32.mrb[207].mxu1  ;;  %21399 = vmatprep.subr.bf16.mxu0 %v21398_v61 }
0x1dd3   : > { %v12269_v56 = vadd.f32 %v26202_v20, %v12268_v39  ;;  %19424 = vmatprep.mubr.msk.f32.mxu0 %vm1677_vm0, %v12289_v58 }
0x1dd4   : > { %19425 = vmatmul.mubr.msk.f32.gmra.mrb[220].mxu0 %vm1677_vm0, %v12290_v47  ;;  %v12292_v0 = vmax.f32 %v12274_v31, 0.0 }
0x1dd5   : > { %v12291_v52 = vmax.f32 %v12269_v56, 0.0  ;;  %21401 = vmatpush3.bf16.msra.mxu0 %v21398_v61 }
0x1dd6   : > { %21403 = vmatprep.subr.bf16.mxu0 %v21402_v21 }
0x1dd7   : > { %19427 = vmatprep.mubr.msk.f32.mxu0 %vm1677_vm0, %v12291_v52 }
0x1dd8   : > { %19428 = vmatmul.mubr.msk.f32.gmra.mrb[222].mxu0 %vm1677_vm0, %v12292_v0 }
0x1dd9   : > { %21405 = vmatpush3.bf16.msra.mxu0 %v21402_v21  ;;  %19518 = vmatprep.mubr.f32.mxu0 %v14381_v25 }
0x1ddc   : > { %19519 = vmatmul.mubr.f32.vlgmr.msra.gmra.mrb[224].mxu0 %v14382_v43 }
0x1ddd   : > { %19521 = vmatprep.mubr.f32.mxu0 %v14383_v23 }
0x1de0   : > { %19522 = vmatmul.mubr.f32.gmra.mrb[226].mxu0 %v14384_v36 }
0x1de1   : > { %19524 = vmatprep.mubr.f32.mxu0 %v14385_v37 }
0x1de4   : > { %19525 = vmatmul.mubr.f32.gmra.mrb[228].mxu0 %v14386_v38 }
0x1de5   : > { %19527 = vmatprep.mubr.f32.mxu0 %v14387_v49 }
0x1de8   : > { %19528 = vmatmul.mubr.f32.gmra.mrb[230].mxu0 %v14388_v4 }
0x1de9   : > { %19530 = vmatprep.mubr.f32.mxu0 %v14389_v19 }
0x1dec   : > { %19531 = vmatmul.mubr.f32.gmra.mrb[232].mxu0 %v14390_v41 }
0x1ded   : > { %19533 = vmatprep.mubr.f32.mxu0 %v14391_v33 }
0x1df0   : > { %19534 = vmatmul.mubr.f32.gmra.mrb[234].mxu0 %v14392_v30 }
0x1df1   : > { %19536 = vmatprep.mubr.f32.mxu0 %v14393_v10 }
0x1df4   : > { %19537 = vmatmul.mubr.f32.gmra.mrb[236].mxu0 %v14394_v16 }
0x1df5   : > { %19539 = vmatprep.mubr.f32.mxu0 %v14395_v18 }
0x1df8   : > { %19540 = vmatmul.mubr.f32.gmra.mrb[238].mxu0 %v14396_v5 }
0x1e0a   : > { %v11892_v22 = vpop.permute.xlu1 %11891 }
0x1e0b   : > { %11938 = vst.msk [vmem:[%s22719_s10 + $0x18] sm:$0xff] %vm5862_vm6, %v11892_v22  ;;  %v11890_v7 = vpop.permute.xlu0 %11889 }
0x1e0c   : > { %11937 = vst.msk [vmem:[%s22719_s10 + $0x8] sm:$0xff] %vm5862_vm6, %v11890_v7 }
0x1e0e   : > { %v11896_v13 = vpop.permute.xlu1 %11895 }
0x1e0f   : > { %11940 = vst.msk [vmem:[%s22719_s10 + $0x38] sm:$0xff] %vm5862_vm6, %v11896_v13  ;;  %v11894_v42 = vpop.permute.xlu0 %11893 }
0x1e10   : > { %11939 = vst.msk [vmem:[%s22719_s10 + $0x28] sm:$0xff] %vm5862_vm6, %v11894_v42 }
0x1e12   : > { %v11900_v24 = vpop.permute.xlu1 %11899 }
0x1e13   : > { %11942 = vst.msk [vmem:[%s22719_s10 + $0x58] sm:$0xff] %vm5862_vm6, %v11900_v24  ;;  %v11898_v60 = vpop.permute.xlu0 %11897 }
0x1e14   : > { %11941 = vst.msk [vmem:[%s22719_s10 + $0x48] sm:$0xff] %vm5862_vm6, %v11898_v60 }
0x1e16   : > { %v11904_v3 = vpop.permute.xlu1 %11903 }
0x1e17   : > { %11944 = vst.msk [vmem:[%s22719_s10 + $0x78] sm:$0xff] %vm5862_vm6, %v11904_v3  ;;  %v11902_v53 = vpop.permute.xlu0 %11901 }
0x1e18   : > { %11943 = vst.msk [vmem:[%s22719_s10 + $0x68] sm:$0xff] %vm5862_vm6, %v11902_v53 }
0x1e1a   : > { %v11908_v57 = vpop.permute.xlu1 %11907 }
0x1e1b   : > { %11946 = vst.msk [vmem:[%s22719_s10 + $0x98] sm:$0xff] %vm5862_vm6, %v11908_v57  ;;  %v11906_v15 = vpop.permute.xlu0 %11905 }
0x1e1c   : > { %11945 = vst.msk [vmem:[%s22719_s10 + $0x88] sm:$0xff] %vm5862_vm6, %v11906_v15 }
0x1e1e   : > { %v11912_v27 = vpop.permute.xlu1 %11911 }
0x1e1f   : > { %11948 = vst.msk [vmem:[%s22719_s10 + $0xb8] sm:$0xff] %vm5862_vm6, %v11912_v27  ;;  %v11910_v54 = vpop.permute.xlu0 %11909 }
0x1e20   : > { %11947 = vst.msk [vmem:[%s22719_s10 + $0xa8] sm:$0xff] %vm5862_vm6, %v11910_v54 }
0x1e22   : > { %v11916_v59 = vpop.permute.xlu1 %11915 }
0x1e23   : > { %11950 = vst.msk [vmem:[%s22719_s10 + $0xd8] sm:$0xff] %vm5862_vm6, %v11916_v59  ;;  %v11914_v2 = vpop.permute.xlu0 %11913 }
0x1e24   : > { %11949 = vst.msk [vmem:[%s22719_s10 + $0xc8] sm:$0xff] %vm5862_vm6, %v11914_v2 }
0x1e26   : > { %v11920_v48 = vpop.permute.xlu1 %11919 }
0x1e27   : > { %11952 = vst.msk [vmem:[%s22719_s10 + $0xf8] sm:$0xff] %vm5862_vm6, %v11920_v48  ;;  %v11918_v6 = vpop.permute.xlu0 %11917 }
0x1e28   : > { %11951 = vst.msk [vmem:[%s22719_s10 + $0xe8] sm:$0xff] %vm5862_vm6, %v11918_v6 }
0x1e8f   : > { %v19408_v9 = vpop.f32.mrb[208].mxu0 }
0x1e90   : > { %v12416_v17 = vpop.f32.mrb[209].mxu0 }
0x1e91   : > { %v21342_v61 = vpack.c.bf16 %v19408_v9, %v12416_v17 }
0x1e93   : > { %v19411_v1 = vpop.f32.mrb[210].mxu0  ;;  %21343 = vmatprep.subr.bf16.mxu1 %v21342_v61 }
0x1e94   : > { %v12426_v44 = vpop.f32.mrb[211].mxu0  ;;  %21345 = vmatpush3.bf16.msra.mxu1 %v21342_v61 }
0x1e95   : > { %v21346_v46 = vpack.c.bf16 %v19411_v1, %v12426_v44 }
0x1e97   : > { %v19414_v58 = vpop.f32.mrb[212].mxu0  ;;  %21347 = vmatprep.subr.bf16.mxu1 %v21346_v46 }
0x1e98   : > { %v12436_v8 = vpop.f32.mrb[213].mxu0  ;;  %21349 = vmatpush3.bf16.msra.mxu1 %v21346_v46 }
0x1e99   : > { %v21350_v47 = vpack.c.bf16 %v19414_v58, %v12436_v8 }
0x1e9b   : > { %v19417_v31 = vpop.f32.mrb[214].mxu0  ;;  %21351 = vmatprep.subr.bf16.mxu1 %v21350_v47 }
0x1e9c   : > { %v12446_v39 = vpop.f32.mrb[215].mxu0  ;;  %21353 = vmatpush3.bf16.msra.mxu1 %v21350_v47 }
0x1e9d   : > { %v21354_v21 = vpack.c.bf16 %v19417_v31, %v12446_v39 }
0x1e9f   : > { %v19420_v56 = vpop.f32.mrb[216].mxu0  ;;  %21355 = vmatprep.subr.bf16.mxu1 %v21354_v21 }
0x1ea0   : > { %v12456_v52 = vpop.f32.mrb[217].mxu0  ;;  %21357 = vmatpush3.bf16.msra.mxu1 %v21354_v21 }
0x1ea1   : > { %v21358_v0 = vpack.c.bf16 %v19420_v56, %v12456_v52 }
0x1ea3   : > { %v19423_v25 = vpop.f32.mrb[218].mxu0  ;;  %21359 = vmatprep.subr.bf16.mxu1 %v21358_v0 }
0x1ea4   : > { %v12466_v43 = vpop.f32.mrb[219].mxu0  ;;  %21361 = vmatpush3.bf16.msra.mxu1 %v21358_v0 }
0x1ea5   : > { %v21362_v23 = vpack.c.bf16 %v19423_v25, %v12466_v43 }
0x1ea7   : > { %v19426_v36 = vpop.f32.mrb[220].mxu0  ;;  %21363 = vmatprep.subr.bf16.mxu1 %v21362_v23 }
0x1ea8   : > { %v12476_v37 = vpop.f32.mrb[221].mxu0  ;;  %21365 = vmatpush3.bf16.msra.mxu1 %v21362_v23 }
0x1ea9   : > { %v21366_v38 = vpack.c.bf16 %v19426_v36, %v12476_v37 }
0x1eab   : > { %v19429_v49 = vpop.f32.mrb[222].mxu0  ;;  %21367 = vmatprep.subr.bf16.mxu1 %v21366_v38 }
0x1eac   : > { %v12486_v4 = vpop.f32.mrb[223].mxu0  ;;  %21369 = vmatpush3.bf16.msra.mxu1 %v21366_v38 }
0x1ead   : > { %v21370_v19 = vpack.c.bf16 %v19429_v49, %v12486_v4 }
0x1eaf   : > { %21371 = vmatprep.subr.bf16.mxu1 %v21370_v19  ;;  %v19520_v41 = vpop.f32.mrb[224].mxu0 }
0x1eb0   : > { %21373 = vmatpush3.bf16.msra.mxu1 %v21370_v19  ;;  %v12820_v33 = vpop.f32.mrb[225].mxu0 }
0x1eb1   : > { %v21406_v30 = vpack.c.bf16 %v19520_v41, %v12820_v33 }
0x1eb3   : > { %19463 = vmatmul.mubr.f32.vlgmr.msra.gmra.mrb[208].mxu1 %v26025_v28  ;;  %v19523_v10 = vpop.f32.mrb[226].mxu0  ;;  %21407 = vmatprep.subr.bf16.mxu1 %v21406_v30 }
0x1eb4   : > { %v12830_v16 = vpop.f32.mrb[227].mxu0  ;;  %21409 = vmatpush3.bf16.msra.mxu1 %v21406_v30  ;;  %19465 = vmatprep.mubr.f32.mxu1 %v26031_v40 }
0x1eb5   : > { %v21410_v18 = vpack.c.bf16 %v19523_v10, %v12830_v16 }
0x1eb7   : > { %19466 = vmatmul.mubr.f32.gmra.mrb[210].mxu1 %v26037_v62  ;;  %v19526_v5 = vpop.f32.mrb[228].mxu0  ;;  %21411 = vmatprep.subr.bf16.mxu1 %v21410_v18 }
0x1eb8   : > { %v12840_v22 = vpop.f32.mrb[229].mxu0  ;;  %21413 = vmatpush3.bf16.msra.mxu1 %v21410_v18  ;;  %19468 = vmatprep.mubr.f32.mxu1 %v26043_v29 }
0x1eb9   : > { %v21414_v7 = vpack.c.bf16 %v19526_v5, %v12840_v22 }
0x1ebb   : > { %19469 = vmatmul.mubr.f32.gmra.mrb[212].mxu1 %v26049_v12  ;;  %v19529_v13 = vpop.f32.mrb[230].mxu0  ;;  %21415 = vmatprep.subr.bf16.mxu1 %v21414_v7 }
0x1ebc   : > { %v12850_v42 = vpop.f32.mrb[231].mxu0  ;;  %21417 = vmatpush3.bf16.msra.mxu1 %v21414_v7  ;;  %19471 = vmatprep.mubr.f32.mxu1 %v26055_v45 }
0x1ebd   : > { %v21418_v24 = vpack.c.bf16 %v19529_v13, %v12850_v42 }
0x1ebf   : > { %19472 = vmatmul.mubr.f32.gmra.mrb[214].mxu1 %v26061_v11  ;;  %v19532_v60 = vpop.f32.mrb[232].mxu0  ;;  %21419 = vmatprep.subr.bf16.mxu1 %v21418_v24 }
0x1ec0   : > { %v12860_v3 = vpop.f32.mrb[233].mxu0  ;;  %21421 = vmatpush3.bf16.msra.mxu1 %v21418_v24  ;;  %19474 = vmatprep.mubr.f32.mxu1 %v26067_v50 }
0x1ec1   : > { %v21422_v53 = vpack.c.bf16 %v19532_v60, %v12860_v3 }
0x1ec3   : > { %19475 = vmatmul.mubr.f32.gmra.mrb[216].mxu1 %v26073_v34  ;;  %v19535_v57 = vpop.f32.mrb[234].mxu0  ;;  %21423 = vmatprep.subr.bf16.mxu1 %v21422_v53 }
0x1ec4   : > { %v12870_v15 = vpop.f32.mrb[235].mxu0  ;;  %21425 = vmatpush3.bf16.msra.mxu1 %v21422_v53  ;;  %19477 = vmatprep.mubr.f32.mxu1 %v26079_v55 }
0x1ec5   : > { %v21426_v27 = vpack.c.bf16 %v19535_v57, %v12870_v15 }
0x1ec7   : > { %19478 = vmatmul.mubr.f32.gmra.mrb[218].mxu1 %v26085_v35  ;;  %v19538_v54 = vpop.f32.mrb[236].mxu0  ;;  %21427 = vmatprep.subr.bf16.mxu1 %v21426_v27 }
0x1ec8   : > { %v12880_v59 = vpop.f32.mrb[237].mxu0  ;;  %21429 = vmatpush3.bf16.msra.mxu1 %v21426_v27  ;;  %19480 = vmatprep.mubr.f32.mxu1 %v26091_v26 }
0x1ec9   : > { %v21430_v2 = vpack.c.bf16 %v19538_v54, %v12880_v59 }
0x1ecb   : > { %19481 = vmatmul.mubr.f32.gmra.mrb[220].mxu1 %v26097_v63  ;;  %v19541_v48 = vpop.f32.mrb[238].mxu0  ;;  %21431 = vmatprep.subr.bf16.mxu1 %v21430_v2 }
0x1ecc   : > { %v12890_v6 = vpop.f32.mrb[239].mxu0  ;;  %21433 = vmatpush3.bf16.msra.mxu1 %v21430_v2  ;;  %19483 = vmatprep.mubr.f32.mxu1 %v26103_v32 }
0x1ecd   : > { %v21434_v9 = vpack.c.bf16 %v19541_v48, %v12890_v6 }
0x1ecf   : > { %19484 = vmatmul.mubr.f32.gmra.mrb[222].mxu1 %v26109_v14  ;;  %21435 = vmatprep.subr.bf16.mxu1 %v21434_v9 }
0x1ed0   : > { %21437 = vmatpush3.bf16.msra.mxu1 %v21434_v9  ;;  %19574 = vmatprep.mubr.f32.mxu1 %v26115_v51 }
0x1ed3   : > { %19575 = vmatmul.mubr.f32.vlgmr.msra.gmra.mrb[224].mxu1 %v26025_v28  ;;  %v14413_v28 = vld [vmem:[%s26650_s4 + $0x3c0] sm:$0xff] }
0x1ed4   : > { %19577 = vmatprep.mubr.f32.mxu1 %v26031_v40  ;;  %v14414_v40 = vld [vmem:[%s26650_s4 + $0x3c8] sm:$0xff] }
0x1ed7   : > { %19578 = vmatmul.mubr.f32.gmra.mrb[226].mxu1 %v26037_v62  ;;  %v21438_v62 = vpack.c.bf16 %v14414_v40, %v14413_v28 }
0x1ed8   : > { %19580 = vmatprep.mubr.f32.mxu1 %v26043_v29  ;;  %v14415_v29 = vld [vmem:[%s26650_s4 + $0x3d0] sm:$0xff] }
0x1ed9   : > { %21439 = vmatprep.subr.bf16.mxu0 %v21438_v62 }
0x1eda   : > { %21441 = vmatpush3.bf16.msra.mxu0 %v21438_v62 }
0x1edb   : > { %19581 = vmatmul.mubr.f32.gmra.mrb[228].mxu1 %v26049_v12  ;;  %v14416_v12 = vld [vmem:[%s26650_s4 + $0x3d8] sm:$0xff] }
0x1edc   : > { %19583 = vmatprep.mubr.f32.mxu1 %v26055_v45  ;;  %v21442_v45 = vpack.c.bf16 %v14416_v12, %v14415_v29 }
0x1ede   : > { %21443 = vmatprep.subr.bf16.mxu0 %v21442_v45 }
0x1edf   : > { %19584 = vmatmul.mubr.f32.gmra.mrb[230].mxu1 %v26061_v11  ;;  %21445 = vmatpush3.bf16.msra.mxu0 %v21442_v45  ;;  %v14417_v11 = vld [vmem:[%s26650_s4 + $0x3e0] sm:$0xff] }
0x1ee0   : > { %19586 = vmatprep.mubr.f32.mxu1 %v26067_v50  ;;  %v14418_v50 = vld [vmem:[%s26650_s4 + $0x3e8] sm:$0xff] }
0x1ee3   : > { %19587 = vmatmul.mubr.f32.gmra.mrb[232].mxu1 %v26073_v34  ;;  %v21446_v34 = vpack.c.bf16 %v14418_v50, %v14417_v11 }
0x1ee4   : > { %19589 = vmatprep.mubr.f32.mxu1 %v26079_v55  ;;  %v14419_v55 = vld [vmem:[%s26650_s4 + $0x3f0] sm:$0xff] }
0x1ee5   : > { %21447 = vmatprep.subr.bf16.mxu0 %v21446_v34 }
0x1ee6   : > { %21449 = vmatpush3.bf16.msra.mxu0 %v21446_v34 }
0x1ee7   : > { %19590 = vmatmul.mubr.f32.gmra.mrb[234].mxu1 %v26085_v35  ;;  %v14420_v35 = vld [vmem:[%s26650_s4 + $0x3f8] sm:$0xff] }
0x1ee8   : > { %19592 = vmatprep.mubr.f32.mxu1 %v26091_v26  ;;  %v21450_v26 = vpack.c.bf16 %v14420_v35, %v14419_v55 }
0x1eea   : > { %21451 = vmatprep.subr.bf16.mxu0 %v21450_v26 }
0x1eeb   : > { %19593 = vmatmul.mubr.f32.gmra.mrb[236].mxu1 %v26097_v63  ;;  %21453 = vmatpush3.bf16.msra.mxu0 %v21450_v26 }
0x1eec   : > { %19595 = vmatprep.mubr.f32.mxu1 %v26103_v32  ;;  %v26386_v32 = vld [vmem:[%s26651_s5] ss:$0 sm:$0xff] }
0x1eef   : > { %19596 = vmatmul.mubr.f32.gmra.mrb[238].mxu1 %v26109_v14 }
0x1ef0   : > { %19670 = vmatprep.mubr.f32.mxu1 %v26115_v51 }
0x1f86   : > { %v19464_v63 = vpop.f32.mrb[208].mxu1 }
0x1f87   : > { %v12567_v14 = vadd.f32 %v26386_v32, %v19464_v63  ;;  %v12561_v51 = vpop.f32.mrb[209].mxu1 }
0x1f88   : > { %v12562_v17 = vadd.f32 %v26386_v32, %v12561_v51 }
0x1f89   : > { %12658 = vrot.lane.b32.xlu1 %v12567_v14, %s26660_s26 }
0x1f8a   : > { %v19467_v61 = vpop.f32.mrb[210].mxu1  ;;  %12656 = vrot.lane.b32.xlu0 %v12562_v17, %s26660_s26 }
0x1f8b   : > { %v12577_v1 = vadd.f32 %v26386_v32, %v19467_v61  ;;  %v12571_v44 = vpop.f32.mrb[211].mxu1 }
0x1f8c   : > { %v12572_v46 = vadd.f32 %v26386_v32, %v12571_v44 }
0x1f8d   : > { %12662 = vrot.lane.b32.xlu1 %v12577_v1, %s26660_s26 }
0x1f8e   : > { %v19470_v58 = vpop.f32.mrb[212].mxu1  ;;  %12660 = vrot.lane.b32.xlu0 %v12572_v46, %s26660_s26 }
0x1f8f   : > { %v12587_v8 = vadd.f32 %v26386_v32, %v19470_v58  ;;  %v12581_v47 = vpop.f32.mrb[213].mxu1 }
0x1f90   : > { %v12582_v31 = vadd.f32 %v26386_v32, %v12581_v47 }
0x1f91   : > { %12666 = vrot.lane.b32.xlu1 %v12587_v8, %s26660_s26 }
0x1f92   : > { %v19473_v39 = vpop.f32.mrb[214].mxu1  ;;  %12664 = vrot.lane.b32.xlu0 %v12582_v31, %s26660_s26 }
0x1f93   : > { %v12597_v21 = vadd.f32 %v26386_v32, %v19473_v39  ;;  %v12591_v56 = vpop.f32.mrb[215].mxu1 }
0x1f94   : > { %v12592_v52 = vadd.f32 %v26386_v32, %v12591_v56 }
0x1f95   : > { %12670 = vrot.lane.b32.xlu1 %v12597_v21, %s26660_s26 }
0x1f96   : > { %v19476_v0 = vpop.f32.mrb[216].mxu1  ;;  %12668 = vrot.lane.b32.xlu0 %v12592_v52, %s26660_s26 }
0x1f97   : > { %v12607_v25 = vadd.f32 %v26386_v32, %v19476_v0  ;;  %v12601_v43 = vpop.f32.mrb[217].mxu1 }
0x1f98   : > { %v12602_v23 = vadd.f32 %v26386_v32, %v12601_v43 }
0x1f99   : > { %12674 = vrot.lane.b32.xlu1 %v12607_v25, %s26660_s26 }
0x1f9a   : > { %v19479_v36 = vpop.f32.mrb[218].mxu1  ;;  %12672 = vrot.lane.b32.xlu0 %v12602_v23, %s26660_s26 }
0x1f9b   : > { %v12617_v37 = vadd.f32 %v26386_v32, %v19479_v36  ;;  %v12611_v38 = vpop.f32.mrb[219].mxu1 }
0x1f9c   : > { %v12612_v49 = vadd.f32 %v26386_v32, %v12611_v38 }
0x1f9d   : > { %12678 = vrot.lane.b32.xlu1 %v12617_v37, %s26660_s26 }
0x1f9e   : > { %v19482_v4 = vpop.f32.mrb[220].mxu1  ;;  %12676 = vrot.lane.b32.xlu0 %v12612_v49, %s26660_s26 }
0x1f9f   : > { %v12627_v19 = vadd.f32 %v26386_v32, %v19482_v4  ;;  %v12621_v41 = vpop.f32.mrb[221].mxu1 }
0x1fa0   : > { %v12622_v33 = vadd.f32 %v26386_v32, %v12621_v41 }
0x1fa1   : > { %12682 = vrot.lane.b32.xlu1 %v12627_v19, %s26660_s26 }
0x1fa2   : > { %v19485_v30 = vpop.f32.mrb[222].mxu1  ;;  %12680 = vrot.lane.b32.xlu0 %v12622_v33, %s26660_s26 }
0x1fa3   : > { %v12637_v10 = vadd.f32 %v26386_v32, %v19485_v30  ;;  %v12631_v16 = vpop.f32.mrb[223].mxu1 }
0x1fa4   : > { %v12632_v18 = vadd.f32 %v26386_v32, %v12631_v16 }
0x1fa5   : > { %12686 = vrot.lane.b32.xlu1 %v12637_v10, %s26660_s26 }
0x1fa6   : > { %v19576_v5 = vpop.f32.mrb[224].mxu1  ;;  %12684 = vrot.lane.b32.xlu0 %v12632_v18, %s26660_s26  ;;  %s21674_s26 = scalar_lea.vmem %s26597_s15, 4096 }
0x1fa7   : > { %v12971_v22 = vadd.f32 %v26202_v20, %v19576_v5  ;;  %v12965_v7 = vpop.f32.mrb[225].mxu1  ;;  %p21675_p13 = scmp.ne.s32.totalorder %s26597_s15, %s21674_s26  ;;  %p21682_p3 = scmp.lt.s32.totalorder %s21680_s14, %s21674_s26 }
0x1fa8   : > { %v12966_v13 = vadd.f32 %v26202_v20, %v12965_v7 }
0x1fa9   : > { %v13045_v60 = vmax.f32 %v12971_v22, 0.0  ;;  %p21676_p0 = pnand %p21675_p13, %p21820_p6  ;;  %p21683_p4 = por %p21682_p3, %p21681_p2 }
0x1faa   : > { %v13044_v42 = vmax.f32 %v12966_v13, 0.0  ;;  %v19579_v24 = vpop.f32.mrb[226].mxu1 }
0x1fab   : > { %v12981_v3 = vadd.f32 %v26202_v20, %v19579_v24  ;;  %v12975_v53 = vpop.f32.mrb[227].mxu1  ;;  %p21677_p1 = pneg %p21676_p0 }
0x1fac   : > { %v12976_v57 = vadd.f32 %v26202_v20, %v12975_v53  ;;  %19614 = vmatprep.mubr.msk.f32.mxu0 %vm1677_vm0, %v13044_v42 }
0x1fad   : > { %19615 = vmatmul.mubr.msk.f32.vlgmr.msra.gmra.mrb[240].mxu0 %vm1677_vm0, %v13045_v60  ;;  %v13047_v54 = vmax.f32 %v12981_v3, 0.0  ;;  %p21684_p5 = pnand %p21683_p4, %p21677_p1 }
0x1fae   : > { %v13046_v15 = vmax.f32 %v12976_v57, 0.0  ;;  %v19582_v27 = vpop.f32.mrb[228].mxu1 }
0x1faf   : > { %v12991_v59 = vadd.f32 %v26202_v20, %v19582_v27  ;;  %v12985_v2 = vpop.f32.mrb[229].mxu1 }
0x1fb0   : > { %v12986_v48 = vadd.f32 %v26202_v20, %v12985_v2  ;;  %19617 = vmatprep.mubr.msk.f32.mxu0 %vm1677_vm0, %v13046_v15 }
0x1fb1   : > { %19618 = vmatmul.mubr.msk.f32.gmra.mrb[242].mxu0 %vm1677_vm0, %v13047_v54  ;;  %v13049_v28 = vmax.f32 %v12991_v59, 0.0 }
0x1fb2   : > { %v13048_v6 = vmax.f32 %v12986_v48, 0.0  ;;  %v19585_v9 = vpop.f32.mrb[230].mxu1 }
0x1fb3   : > { %v13001_v40 = vadd.f32 %v26202_v20, %v19585_v9  ;;  %v12995_v62 = vpop.f32.mrb[231].mxu1 }
0x1fb4   : > { %v12996_v29 = vadd.f32 %v26202_v20, %v12995_v62  ;;  %19620 = vmatprep.mubr.msk.f32.mxu0 %vm1677_vm0, %v13048_v6 }
0x1fb5   : > { %19621 = vmatmul.mubr.msk.f32.gmra.mrb[244].mxu0 %vm1677_vm0, %v13049_v28  ;;  %v13051_v11 = vmax.f32 %v13001_v40, 0.0 }
0x1fb6   : > { %v13050_v12 = vmax.f32 %v12996_v29, 0.0  ;;  %v19588_v45 = vpop.f32.mrb[232].mxu1 }
0x1fb7   : > { %v13011_v50 = vadd.f32 %v26202_v20, %v19588_v45  ;;  %v13005_v34 = vpop.f32.mrb[233].mxu1 }
0x1fb8   : > { %v13006_v55 = vadd.f32 %v26202_v20, %v13005_v34  ;;  %19623 = vmatprep.mubr.msk.f32.mxu0 %vm1677_vm0, %v13050_v12  ;;  %v21660_v34 = vld [vmem:[%s26647_s1 + $0x10] sm:$0xff] }
0x1fb9   : > { %19624 = vmatmul.mubr.msk.f32.gmra.mrb[246].mxu0 %vm1677_vm0, %v13051_v11  ;;  %v13053_v63 = vmax.f32 %v13011_v50, 0.0  ;;  %v21659_v50 = vld [vmem:[%s26647_s1 + $0x8] sm:$0xff] }
0x1fba   : > { %v13052_v35 = vmax.f32 %v13006_v55, 0.0  ;;  %v19591_v26 = vpop.f32.mrb[234].mxu1  ;;  %v21661_v55 = vld [vmem:[%s26647_s1 + $0x18] sm:$0xff] }
0x1fbb   : > { %v13021_v14 = vadd.f32 %v26202_v20, %v19591_v26  ;;  %v13015_v51 = vpop.f32.mrb[235].mxu1  ;;  %v21663_v26 = vld [vmem:[%s26647_s1 + $0x28] sm:$0xff] }
0x1fbc   : > { %v13016_v17 = vadd.f32 %v26202_v20, %v13015_v51  ;;  %19626 = vmatprep.mubr.msk.f32.mxu0 %vm1677_vm0, %v13052_v35  ;;  %v21662_v35 = vld [vmem:[%s26647_s1 + $0x20] sm:$0xff] }
0x1fbd   : > { %19627 = vmatmul.mubr.msk.f32.gmra.mrb[248].mxu0 %vm1677_vm0, %v13053_v63  ;;  %v13055_v44 = vmax.f32 %v13021_v14, 0.0  ;;  %v21664_v63 = vld [vmem:[%s26647_s1 + $0x30] sm:$0xff]  ;;  %v21665_v14 = vld [vmem:[%s26647_s1 + $0x38] sm:$0xff]  ;;  %v21666_v51 = vld [vmem:[%s26647_s1 + $0x40] sm:$0xff] }
0x1fbe   : > { %v13054_v61 = vmax.f32 %v13016_v17, 0.0  ;;  %v19594_v1 = vpop.f32.mrb[236].mxu1  ;;  %v21667_v17 = vld [vmem:[%s26647_s1 + $0x48] sm:$0xff] }
0x1fbf   : > { %v13031_v46 = vadd.f32 %v26202_v20, %v19594_v1  ;;  %v13025_v58 = vpop.f32.mrb[237].mxu1  ;;  %v21669_v1 = vld [vmem:[%s26647_s1 + $0x58] sm:$0xff] }
0x1fc0   : > { %v13026_v8 = vadd.f32 %v26202_v20, %v13025_v58  ;;  %19629 = vmatprep.mubr.msk.f32.mxu0 %vm1677_vm0, %v13054_v61  ;;  %v21668_v61 = vld [vmem:[%s26647_s1 + $0x50] sm:$0xff] }
0x1fc1   : > { %19630 = vmatmul.mubr.msk.f32.gmra.mrb[250].mxu0 %vm1677_vm0, %v13055_v44  ;;  %v13057_v39 = vmax.f32 %v13031_v46, 0.0  ;;  %v21670_v44 = vld [vmem:[%s26647_s1 + $0x60] sm:$0xff]  ;;  %v21671_v46 = vld [vmem:[%s26647_s1 + $0x68] sm:$0xff]  ;;  %v21672_v58 = vld [vmem:[%s26647_s1 + $0x70] sm:$0xff] }
0x1fc2   : > { %v13056_v47 = vmax.f32 %v13026_v8, 0.0  ;;  %v19597_v31 = vpop.f32.mrb[238].mxu1  ;;  %v21673_v8 = vld [vmem:[%s26647_s1 + $0x78] sm:$0xff] }
0x1fc3   : > { %v13041_v21 = vadd.f32 %v26202_v20, %v19597_v31  ;;  %v13035_v56 = vpop.f32.mrb[239].mxu1 }
0x1fc4   : > { %v13036_v52 = vadd.f32 %v26202_v20, %v13035_v56  ;;  %19632 = vmatprep.mubr.msk.f32.mxu0 %vm1677_vm0, %v13056_v47 }
0x1fc5   : > { %19633 = vmatmul.mubr.msk.f32.gmra.mrb[252].mxu0 %vm1677_vm0, %v13057_v39  ;;  %v13059_v25 = vmax.f32 %v13041_v21, 0.0 }
0x1fc6   : > { %v13058_v0 = vmax.f32 %v13036_v52, 0.0 }
0x1fc8   : > { %19635 = vmatprep.mubr.msk.f32.mxu0 %vm1677_vm0, %v13058_v0 }
0x1fc9   : > { %19636 = vmatmul.mubr.msk.f32.gmra.mrb[254].mxu0 %vm1677_vm0, %v13059_v25 }
0x1ffb   : > { %v12659_v43 = vpop.permute.xlu1 %12658 }
0x1ffc   : > { %12705 = vst.msk [vmem:[%s22719_s10 + $0x18] sm:$0xff] %vm6630_vm7, %v12659_v43  ;;  %v12657_v23 = vpop.permute.xlu0 %12656 }
0x1ffd   : > { %12704 = vst.msk [vmem:[%s22719_s10 + $0x8] sm:$0xff] %vm6630_vm7, %v12657_v23 }
0x1fff   : > { %v12663_v20 = vpop.permute.xlu1 %12662 }
0x2000   : > { %12707 = vst.msk [vmem:[%s22719_s10 + $0x38] sm:$0xff] %vm6630_vm7, %v12663_v20  ;;  %v12661_v36 = vpop.permute.xlu0 %12660 }
0x2001   : > { %12706 = vst.msk [vmem:[%s22719_s10 + $0x28] sm:$0xff] %vm6630_vm7, %v12661_v36 }
0x2003   : > { %v12667_v37 = vpop.permute.xlu1 %12666 }
0x2004   : > { %12709 = vst.msk [vmem:[%s22719_s10 + $0x58] sm:$0xff] %vm6630_vm7, %v12667_v37  ;;  %v12665_v38 = vpop.permute.xlu0 %12664 }
0x2005   : > { %12708 = vst.msk [vmem:[%s22719_s10 + $0x48] sm:$0xff] %vm6630_vm7, %v12665_v38 }
0x2007   : > { %v12671_v49 = vpop.permute.xlu1 %12670 }
0x2008   : > { %12711 = vst.msk [vmem:[%s22719_s10 + $0x78] sm:$0xff] %vm6630_vm7, %v12671_v49  ;;  %v12669_v4 = vpop.permute.xlu0 %12668 }
0x2009   : > { %12710 = vst.msk [vmem:[%s22719_s10 + $0x68] sm:$0xff] %vm6630_vm7, %v12669_v4 }
0x200b   : > { %v12675_v19 = vpop.permute.xlu1 %12674 }
0x200c   : > { %12713 = vst.msk [vmem:[%s22719_s10 + $0x98] sm:$0xff] %vm6630_vm7, %v12675_v19  ;;  %v12673_v41 = vpop.permute.xlu0 %12672 }
0x200d   : > { %12712 = vst.msk [vmem:[%s22719_s10 + $0x88] sm:$0xff] %vm6630_vm7, %v12673_v41 }
0x200f   : > { %v12679_v33 = vpop.permute.xlu1 %12678 }
0x2010   : > { %12715 = vst.msk [vmem:[%s22719_s10 + $0xb8] sm:$0xff] %vm6630_vm7, %v12679_v33  ;;  %v12677_v30 = vpop.permute.xlu0 %12676 }
0x2011   : > { %12714 = vst.msk [vmem:[%s22719_s10 + $0xa8] sm:$0xff] %vm6630_vm7, %v12677_v30 }
0x2013   : > { %v12683_v10 = vpop.permute.xlu1 %12682 }
0x2014   : > { %12717 = vst.msk [vmem:[%s22719_s10 + $0xd8] sm:$0xff] %vm6630_vm7, %v12683_v10  ;;  %v12681_v16 = vpop.permute.xlu0 %12680 }
0x2015   : > { %12716 = vst.msk [vmem:[%s22719_s10 + $0xc8] sm:$0xff] %vm6630_vm7, %v12681_v16 }
0x2017   : > { %v12687_v18 = vpop.permute.xlu1 %12686 }
0x2018   : > { %12719 = vst.msk [vmem:[%s22719_s10 + $0xf8] sm:$0xff] %vm6630_vm7, %v12687_v18  ;;  %v12685_v5 = vpop.permute.xlu0 %12684 }
0x2019   : > { %12718 = vst.msk [vmem:[%s22719_s10 + $0xe8] sm:$0xff] %vm6630_vm7, %v12685_v5 }
0x2080   : > { %v19616_v22 = vpop.f32.mrb[240].mxu0 }
0x2081   : > { %v13183_v7 = vpop.f32.mrb[241].mxu0 }
0x2082   : > { %v21454_v13 = vpack.c.bf16 %v19616_v22, %v13183_v7 }
0x2084   : > { %v19619_v42 = vpop.f32.mrb[242].mxu0  ;;  %21455 = vmatprep.subr.bf16.mxu1 %v21454_v13 }
0x2085   : > { %v13193_v24 = vpop.f32.mrb[243].mxu0  ;;  %21457 = vmatpush3.bf16.msra.mxu1 %v21454_v13 }
0x2086   : > { %v21458_v60 = vpack.c.bf16 %v19619_v42, %v13193_v24 }
0x2088   : > { %v19622_v3 = vpop.f32.mrb[244].mxu0  ;;  %21459 = vmatprep.subr.bf16.mxu1 %v21458_v60 }
0x2089   : > { %v13203_v53 = vpop.f32.mrb[245].mxu0  ;;  %21461 = vmatpush3.bf16.msra.mxu1 %v21458_v60 }
0x208a   : > { %v21462_v57 = vpack.c.bf16 %v19622_v3, %v13203_v53 }
0x208c   : > { %v19625_v15 = vpop.f32.mrb[246].mxu0  ;;  %21463 = vmatprep.subr.bf16.mxu1 %v21462_v57 }
0x208d   : > { %v13213_v27 = vpop.f32.mrb[247].mxu0  ;;  %21465 = vmatpush3.bf16.msra.mxu1 %v21462_v57 }
0x208e   : > { %v21466_v54 = vpack.c.bf16 %v19625_v15, %v13213_v27 }
0x2090   : > { %v19628_v59 = vpop.f32.mrb[248].mxu0  ;;  %21467 = vmatprep.subr.bf16.mxu1 %v21466_v54 }
0x2091   : > { %v13223_v2 = vpop.f32.mrb[249].mxu0  ;;  %21469 = vmatpush3.bf16.msra.mxu1 %v21466_v54 }
0x2092   : > { %v21470_v48 = vpack.c.bf16 %v19628_v59, %v13223_v2 }
0x2094   : > { %v19631_v6 = vpop.f32.mrb[250].mxu0  ;;  %21471 = vmatprep.subr.bf16.mxu1 %v21470_v48 }
0x2095   : > { %v13233_v9 = vpop.f32.mrb[251].mxu0  ;;  %21473 = vmatpush3.bf16.msra.mxu1 %v21470_v48 }
0x2096   : > { %v21474_v28 = vpack.c.bf16 %v19631_v6, %v13233_v9 }
0x2098   : > { %v19634_v40 = vpop.f32.mrb[252].mxu0  ;;  %21475 = vmatprep.subr.bf16.mxu1 %v21474_v28 }
0x2099   : > { %v13243_v62 = vpop.f32.mrb[253].mxu0  ;;  %21477 = vmatpush3.bf16.msra.mxu1 %v21474_v28 }
0x209a   : > { %v21478_v29 = vpack.c.bf16 %v19634_v40, %v13243_v62 }
0x209c   : > { %v19637_v12 = vpop.f32.mrb[254].mxu0  ;;  %21479 = vmatprep.subr.bf16.mxu1 %v21478_v29 }
0x209d   : > { %v13253_v45 = vpop.f32.mrb[255].mxu0  ;;  %21481 = vmatpush3.bf16.msra.mxu1 %v21478_v29 }
0x209e   : > { %v21482_v11 = vpack.c.bf16 %v19637_v12, %v13253_v45 }
0x20a0   : > { %21483 = vmatprep.subr.bf16.mxu1 %v21482_v11 }
0x20a1   : > { %21485 = vmatpush3.bf16.msra.mxu1 %v21482_v11 }
0x20a4   : > { %19671 = vmatmul.mubr.f32.vlgmr.msra.gmra.mrb[240].mxu1 %v21659_v50 }
0x20a5   : > { %19673 = vmatprep.mubr.f32.mxu1 %v21660_v34 }
0x20a8   : > { %19674 = vmatmul.mubr.f32.gmra.mrb[242].mxu1 %v21661_v55 }
0x20a9   : > { %19676 = vmatprep.mubr.f32.mxu1 %v21662_v35 }
0x20ac   : > { %19677 = vmatmul.mubr.f32.gmra.mrb[244].mxu1 %v21663_v26 }
0x20ad   : > { %19679 = vmatprep.mubr.f32.mxu1 %v21664_v63 }
0x20b0   : > { %19680 = vmatmul.mubr.f32.gmra.mrb[246].mxu1 %v21665_v14 }
0x20b1   : > { %19682 = vmatprep.mubr.f32.mxu1 %v21666_v51 }
0x20b4   : > { %19683 = vmatmul.mubr.f32.gmra.mrb[248].mxu1 %v21667_v17 }
0x20b5   : > { %19685 = vmatprep.mubr.f32.mxu1 %v21668_v61 }
0x20b8   : > { %19686 = vmatmul.mubr.f32.gmra.mrb[250].mxu1 %v21669_v1 }
0x20b9   : > { %19688 = vmatprep.mubr.f32.mxu1 %v21670_v44 }
0x20bc   : > { %19689 = vmatmul.mubr.f32.gmra.mrb[252].mxu1 %v21671_v46 }
0x20bd   : > { %19691 = vmatprep.mubr.f32.mxu1 %v21672_v58 }
0x20c0   : > { %19692 = vmatmul.mubr.f32.gmra.mrb[254].mxu1 %v21673_v8 }
0x2177   : > { %v19672_v47 = vpop.f32.mrb[240].mxu1 }
0x2178   : > { %v13334_v31 = vadd.f32 %v26386_v32, %v19672_v47  ;;  %v13328_v39 = vpop.f32.mrb[241].mxu1 }
0x2179   : > { %v13329_v21 = vadd.f32 %v26386_v32, %v13328_v39 }
0x217a   : > { %13425 = vrot.lane.b32.xlu1 %v13334_v31, %s26661_s29 }
0x217b   : > { %v19675_v56 = vpop.f32.mrb[242].mxu1  ;;  %13423 = vrot.lane.b32.xlu0 %v13329_v21, %s26661_s29 }
0x217c   : > { %v13344_v52 = vadd.f32 %v26386_v32, %v19675_v56  ;;  %v13338_v0 = vpop.f32.mrb[243].mxu1 }
0x217d   : > { %v13339_v25 = vadd.f32 %v26386_v32, %v13338_v0 }
0x217e   : > { %13429 = vrot.lane.b32.xlu1 %v13344_v52, %s26661_s29 }
0x217f   : > { %v19678_v43 = vpop.f32.mrb[244].mxu1  ;;  %13427 = vrot.lane.b32.xlu0 %v13339_v25, %s26661_s29 }
0x2180   : > { %v13354_v23 = vadd.f32 %v26386_v32, %v19678_v43  ;;  %v13348_v20 = vpop.f32.mrb[245].mxu1 }
0x2181   : > { %v13349_v36 = vadd.f32 %v26386_v32, %v13348_v20 }
0x2182   : > { %13433 = vrot.lane.b32.xlu1 %v13354_v23, %s26661_s29 }
0x2183   : > { %v19681_v37 = vpop.f32.mrb[246].mxu1  ;;  %13431 = vrot.lane.b32.xlu0 %v13349_v36, %s26661_s29 }
0x2184   : > { %v13364_v38 = vadd.f32 %v26386_v32, %v19681_v37  ;;  %v13358_v49 = vpop.f32.mrb[247].mxu1 }
0x2185   : > { %v13359_v4 = vadd.f32 %v26386_v32, %v13358_v49 }
0x2186   : > { %13437 = vrot.lane.b32.xlu1 %v13364_v38, %s26661_s29 }
0x2187   : > { %v19684_v19 = vpop.f32.mrb[248].mxu1  ;;  %13435 = vrot.lane.b32.xlu0 %v13359_v4, %s26661_s29 }
0x2188   : > { %v13374_v41 = vadd.f32 %v26386_v32, %v19684_v19  ;;  %v13368_v33 = vpop.f32.mrb[249].mxu1 }
0x2189   : > { %v13369_v30 = vadd.f32 %v26386_v32, %v13368_v33 }
0x218a   : > { %13441 = vrot.lane.b32.xlu1 %v13374_v41, %s26661_s29 }
0x218b   : > { %v19687_v10 = vpop.f32.mrb[250].mxu1  ;;  %13439 = vrot.lane.b32.xlu0 %v13369_v30, %s26661_s29 }
0x218c   : > { %v13384_v16 = vadd.f32 %v26386_v32, %v19687_v10  ;;  %v13378_v18 = vpop.f32.mrb[251].mxu1 }
0x218d   : > { %v13379_v5 = vadd.f32 %v26386_v32, %v13378_v18 }
0x218e   : > { %13445 = vrot.lane.b32.xlu1 %v13384_v16, %s26661_s29 }
0x218f   : > { %v19690_v22 = vpop.f32.mrb[252].mxu1  ;;  %13443 = vrot.lane.b32.xlu0 %v13379_v5, %s26661_s29 }
0x2190   : > { %v13394_v7 = vadd.f32 %v26386_v32, %v19690_v22  ;;  %v13388_v13 = vpop.f32.mrb[253].mxu1 }
0x2191   : > { %v13389_v42 = vadd.f32 %v26386_v32, %v13388_v13 }
0x2192   : > { %13449 = vrot.lane.b32.xlu1 %v13394_v7, %s26661_s29 }
0x2193   : > { %v19693_v24 = vpop.f32.mrb[254].mxu1  ;;  %13447 = vrot.lane.b32.xlu0 %v13389_v42, %s26661_s29 }
0x2194   : > { %v13404_v60 = vadd.f32 %v26386_v32, %v19693_v24  ;;  %v13398_v3 = vpop.f32.mrb[255].mxu1 }
0x2195   : > { %v13399_v53 = vadd.f32 %v26386_v32, %v13398_v3 }
0x2196   : > { %13453 = vrot.lane.b32.xlu1 %v13404_v60, %s26661_s29 }
0x2197   : > { %13451 = vrot.lane.b32.xlu0 %v13399_v53, %s26661_s29 }
0x21ec   : > { %v13426_v57 = vpop.permute.xlu1 %13425 }
0x21ed   : > { %13472 = vst.msk [vmem:[%s22719_s10 + $0x18] sm:$0xff] %vm7398_vm8, %v13426_v57  ;;  %v13424_v15 = vpop.permute.xlu0 %13423 }
0x21ee   : > { %13471 = vst.msk [vmem:[%s22719_s10 + $0x8] sm:$0xff] %vm7398_vm8, %v13424_v15 }
0x21f0   : > { %v13430_v27 = vpop.permute.xlu1 %13429 }
0x21f1   : > { %13474 = vst.msk [vmem:[%s22719_s10 + $0x38] sm:$0xff] %vm7398_vm8, %v13430_v27  ;;  %v13428_v54 = vpop.permute.xlu0 %13427 }
0x21f2   : > { %13473 = vst.msk [vmem:[%s22719_s10 + $0x28] sm:$0xff] %vm7398_vm8, %v13428_v54 }
0x21f4   : > { %v13434_v32 = vpop.permute.xlu1 %13433 }
0x21f5   : > { %13476 = vst.msk [vmem:[%s22719_s10 + $0x58] sm:$0xff] %vm7398_vm8, %v13434_v32  ;;  %v13432_v59 = vpop.permute.xlu0 %13431 }
0x21f6   : > { %13475 = vst.msk [vmem:[%s22719_s10 + $0x48] sm:$0xff] %vm7398_vm8, %v13432_v59 }
0x21f8   : > { %v13438_v2 = vpop.permute.xlu1 %13437 }
0x21f9   : > { %13478 = vst.msk [vmem:[%s22719_s10 + $0x78] sm:$0xff] %vm7398_vm8, %v13438_v2  ;;  %v13436_v48 = vpop.permute.xlu0 %13435 }
0x21fa   : > { %13477 = vst.msk [vmem:[%s22719_s10 + $0x68] sm:$0xff] %vm7398_vm8, %v13436_v48 }
0x21fc   : > { %v13442_v6 = vpop.permute.xlu1 %13441 }
0x21fd   : > { %13480 = vst.msk [vmem:[%s22719_s10 + $0x98] sm:$0xff] %vm7398_vm8, %v13442_v6  ;;  %v13440_v9 = vpop.permute.xlu0 %13439 }
0x21fe   : > { %13479 = vst.msk [vmem:[%s22719_s10 + $0x88] sm:$0xff] %vm7398_vm8, %v13440_v9 }
0x2200   : > { %v13446_v28 = vpop.permute.xlu1 %13445 }
0x2201   : > { %13482 = vst.msk [vmem:[%s22719_s10 + $0xb8] sm:$0xff] %vm7398_vm8, %v13446_v28  ;;  %v13444_v40 = vpop.permute.xlu0 %13443 }
0x2202   : > { %13481 = vst.msk [vmem:[%s22719_s10 + $0xa8] sm:$0xff] %vm7398_vm8, %v13444_v40 }
0x2204   : > { %v13450_v62 = vpop.permute.xlu1 %13449 }
0x2205   : > { %13484 = vst.msk [vmem:[%s22719_s10 + $0xd8] sm:$0xff] %vm7398_vm8, %v13450_v62  ;;  %v13448_v29 = vpop.permute.xlu0 %13447 }
0x2206   : > { %13483 = vst.msk [vmem:[%s22719_s10 + $0xc8] sm:$0xff] %vm7398_vm8, %v13448_v29 }
0x2208   : > { %v13454_v12 = vpop.permute.xlu1 %13453 }
0x2209   : > { %13486 = vst.msk [vmem:[%s22719_s10 + $0xf8] sm:$0xff] %vm7398_vm8, %v13454_v12  ;;  %v13452_v45 = vpop.permute.xlu0 %13451 }
0x220a   : > { %13485 = vst.msk [vmem:[%s22719_s10 + $0xe8] sm:$0xff] %vm7398_vm8, %v13452_v45 }
0x220b   : > { %21687 = shalt.err (!%p21684_p5)
}
0x220c   : > { %s21688_s10 = scalar_lea.hbm %s26595_s13, 4096  ;;  %s21692_s25 = scalar_lea.hbm %s26652_s6, 8192 }
0x220d   : > { %p21689_p7 = scmp.ne.s32.totalorder %s26595_s13, %s21688_s10  ;;  %p21693_p12 = scmp.lt.u32.totalorder %s26595_s13, %s26652_s6 }
0x220e   : > { %p21694_p13 = scmp.lt.u32.totalorder %s21692_s25, %s21688_s10  ;;  %p21696_p1 = scmp.lt.u32.totalorder %s21688_s10, %s26595_s13 }
0x220f   : > { %p21690_p10 = pnand %p21689_p7, %p21820_p6 }
0x2210   : > { %p21695_p0 = por %p21694_p13, %p21693_p12 }
0x2211   : > { %p21691_p11 = pneg %p21690_p10 }
0x2212   : > { %p21697_p2 = por %p21696_p1, %p21695_p0 }
0x2214   : > { %p21698_p3 = pnand %p21697_p2, %p21691_p11 }
0x2216   : > { %21701 = shalt.err (!%p21698_p3)
}
0x2217   : > { %s21746_s12 = smov 256  }
0x2218   : > { %21486 = dma.vmem_to_hbm [thread:$0]  (%p21820_p6), %s26597_s15, 4096, %s26595_s13, %s13488_s19, %s21746_s12, %s21746_s12, %s21738_s20  }
0x2219 PF: > { %s13517_s26 = sand.u32 1, %s21724_s21   ;;  %p21489_p4 = pnand %p13572_p9, %p21824_p8 }
0x221a   : > { %s13518_s9 = scalar_lea.sflag [#allocation4], %s13517_s26 }
0x221b   : > { %21719 = dma.done.wait (!%p21489_p4), %s13518_s9, 4096  }
0x221c   : > { %21721 = vsyncadd (!%p21489_p4), %s13518_s9, 4294963200  ;;  %p16_p5 = scmp.ge.s32.totalorder %s21805_s27, 4   ;;  %s26663_s21 = smov %s21728_s22 }
0x221d   : > { %s26664_s22 = smov %s21732_s23  ;;  %s26665_s23 = smov %s21818_s30 }
0x221e   : > { %s26666_s24 = smov %s21805_s27  ;;  %18 = sbr.rel (!%p16_p5) target bundleno = 3 (0x3), region = 167 }
0x2225   :  { %13523 = vsyncpa [#allocation4], 1 }
0x2226   :  { %13525 = vsyncpa [#allocation4 + $0x1], 1 }

</bundles_post_ra>
